<compile_context>
chip_gen: v7x
topology: tpu7x:2x2x1
jax: 0.10.0
libtpu: 0.0.40
codegen_flags: <defaults>
</compile_context>

<pallas_src>
import functools

import jax
import jax.numpy as jnp
from jax import lax
from jax.experimental import pallas as pl
from jax.experimental.pallas import tpu as pltpu


# ------------------------------ math helpers ---------------------------------

_SQRT_HALF = 0.7071067811865476


def _l2_normalize(x, eps=1e-12):
    # F.normalize(x, dim=-1): x / max(||x||, eps) == x * rsqrt(max(sumsq, eps^2))
    sumsq = jnp.sum(x * x, axis=-1, keepdims=True)
    return x * lax.rsqrt(jnp.maximum(sumsq, eps * eps))


def _erf_approx(x):
    # Abramowitz & Stegun 7.1.26 rational approximation, |error| <= 1.5e-7.
    a1, a2, a3, a4, a5 = 0.254829592, -0.284496736, 1.421413741, -1.453152027, 1.061405429
    p = 0.3275911
    ax = jnp.abs(x)
    t = 1.0 / (1.0 + p * ax)
    poly = t * (a1 + t * (a2 + t * (a3 + t * (a4 + t * a5))))
    y = 1.0 - poly * jnp.exp(-ax * ax)
    return jnp.where(x < 0.0, -y, y)


def _gelu_erf(x):
    # nn.GELU() default (exact erf form), to float32 precision.
    return 0.5 * x * (1.0 + _erf_approx(x * _SQRT_HALF))


# ------------------------------ kernel ----------------------------------------

def transformer_block_kernel(xq_ref, xkv_ref,
                             wq_ref, bq_ref, wk_ref, bk_ref, wv_ref, bv_ref,
                             wp_ref, bp_ref,
                             wfc1_ref, bfc1_ref, wfc2_ref, bfc2_ref,
                             o_ref,
                             q_scr, m_scr, l_scr, acc_scr,
                             *, num_heads, scale):
    """Grid = (batch, q_tile, kv_tile); kv_tile is the innermost reduction axis.

    xq_ref:  (1, tq, C)   query / residual rows of this batch element
    xkv_ref: (1, tk, C)   key/value rows for the current kv tile
    wq/wk/wv_ref: (heads, C, hd)   per-head W^T      bq/bk/bv_ref: (heads, 1, hd)
    wp_ref:  (heads, hd, C)  per-head rows of W_proj^T,  bp_ref: (1, C)
    wfc1_ref:(C, H)  bfc1_ref:(1, H)  wfc2_ref:(H, C)  bfc2_ref:(1, C)
    scratch: q_scr (heads, tq, hd), m_scr/l_scr (heads, tq, 1), acc_scr (heads, tq, hd)
    """
    kv = pl.program_id(2)
    nk = pl.num_programs(2)

    x_q = xq_ref[0].astype(jnp.float32)                      # (tq, C)
    xn_kv = _l2_normalize(xkv_ref[0].astype(jnp.float32))    # (tk, C), norm1 on K/V rows

    # ---- first kv step of every (batch, q-tile): init online-softmax state ----
    @pl.when(kv == 0)
    def _init():
        m_scr[...] = jnp.full(m_scr.shape, -jnp.inf, dtype=m_scr.dtype)
        l_scr[...] = jnp.zeros(l_scr.shape, dtype=l_scr.dtype)
        acc_scr[...] = jnp.zeros(acc_scr.shape, dtype=acc_scr.dtype)
        xn_q = _l2_normalize(x_q)                             # norm1 on query rows
        def q_body(h, carry):
            q_scr[h] = (jnp.dot(xn_q, wq_ref[h],
                                preferred_element_type=jnp.float32)
                        + bq_ref[h]) * scale
            return carry
        lax.fori_loop(0, num_heads, q_body, 0)

    # ---- online-softmax update for this kv tile, one head per iteration -------
    def kv_body(h, carry):
        k_h = jnp.dot(xn_kv, wk_ref[h], preferred_element_type=jnp.float32) + bk_ref[h]
        v_h = jnp.dot(xn_kv, wv_ref[h], preferred_element_type=jnp.float32) + bv_ref[h]
        s = lax.dot_general(q_scr[h], k_h,
                            dimension_numbers=(((1,), (1,)), ((), ())),
                            preferred_element_type=jnp.float32)            # (tq, tk)
        m_prev = m_scr[h]
        m_new = jnp.maximum(m_prev, jnp.max(s, axis=-1, keepdims=True))
        alpha = jnp.exp(m_prev - m_new)
        p = jnp.exp(s - m_new)
        l_scr[h] = alpha * l_scr[h] + jnp.sum(p, axis=-1, keepdims=True)
        acc_scr[h] = alpha * acc_scr[h] + jnp.dot(p, v_h,
                                                  preferred_element_type=jnp.float32)
        m_scr[h] = m_new
        return carry
    lax.fori_loop(0, num_heads, kv_body, 0)

    # ---- last kv step: finalize attention, residual, MLP, residual ------------
    @pl.when(kv == nk - 1)
    def _finalize():
        tq, ch = x_q.shape

        def proj_body(h, attn):
            # softmax denominator via approx reciprocal (EUP slot, see review)
            o_h = acc_scr[h] * pl.reciprocal(l_scr[h], approx=True)        # (tq, hd)
            return attn + jnp.dot(o_h, wp_ref[h],
                                  preferred_element_type=jnp.float32)      # (tq, C)

        attn = lax.fori_loop(0, num_heads, proj_body,
                             jnp.zeros((tq, ch), jnp.float32))
        w1 = x_q + attn + bp_ref[...]                                       # residual 1

        xn2 = _l2_normalize(w1)                                             # norm2
        hid = jnp.dot(xn2, wfc1_ref[...], preferred_element_type=jnp.float32) + bfc1_ref[...]
        hid = _gelu_erf(hid)
        mlp = jnp.dot(hid, wfc2_ref[...], preferred_element_type=jnp.float32) + bfc2_ref[...]

        o_ref[0] = (w1 + mlp).astype(o_ref.dtype)                           # residual 2


# ------------------------------ wrapper ----------------------------------------

def _pick_tile(n, target):
    """Largest tile <= target that is a multiple of 8 and divides n (else n)."""
    if n <= target:
        return n
    t = (target // 8) * 8
    while t >= 8:
        if n % t == 0:
            return t
        t -= 8
    return n


def _pick_vmem_limit():
    """Per-generation VMEM cap: ~96 MiB on v5e/v6e (128 MiB phys), ~48 MiB on v7x."""
    try:
        cap = pltpu.get_tpu_info().vmem_capacity_bytes
        return int(min(cap * 3 // 4, 110 * 1024 * 1024))
    except Exception:  # pragma: no cover - conservative fallback
        return 32 * 1024 * 1024


def transformer_block_forward(x, params, num_heads, *, q_tile=128, kv_tile=128):
    wqkv, bqkv, wproj, bproj, wfc1, bfc1, wfc2, bfc2 = params
    B, N, C = x.shape
    H = wfc1.shape[0]
    hd = C // num_heads
    scale = float(hd) ** -0.5
    f32 = jnp.float32

    # Head-major weight layouts prepared on the host (exact, no in-kernel relayouts).
    wq_t = wqkv[:C].reshape(num_heads, hd, C).transpose(0, 2, 1).astype(f32)        # (h, C, hd)
    wk_t = wqkv[C:2 * C].reshape(num_heads, hd, C).transpose(0, 2, 1).astype(f32)
    wv_t = wqkv[2 * C:].reshape(num_heads, hd, C).transpose(0, 2, 1).astype(f32)
    bq = bqkv[:C].reshape(num_heads, 1, hd).astype(f32)
    bk = bqkv[C:2 * C].reshape(num_heads, 1, hd).astype(f32)
    bv = bqkv[2 * C:].reshape(num_heads, 1, hd).astype(f32)
    wp_h = wproj.T.reshape(num_heads, hd, C).astype(f32)                             # (h, hd, C)
    bp = bproj.reshape(1, C).astype(f32)
    wfc1_t = wfc1.T.astype(f32)          # (C, H)
    bfc1_r = bfc1.reshape(1, H).astype(f32)
    wfc2_t = wfc2.T.astype(f32)          # (H, C)
    bfc2_r = bfc2.reshape(1, C).astype(f32)

    tq = _pick_tile(N, q_tile)
    tk = _pick_tile(N, kv_tile)
    nq, nk = N // tq, N // tk

    kernel = functools.partial(transformer_block_kernel,
                               num_heads=num_heads, scale=scale)

    def const_spec(shape, single_buffer):
        nd = len(shape)
        if single_buffer:
            # Constant block index -> single buffering halves resident-weight VMEM.
            return pl.BlockSpec(shape, lambda *_: (0,) * nd,
                                pipeline_mode=pl.Buffered(1))
        return pl.BlockSpec(shape, lambda *_: (0,) * nd)

    def build(single_buffer_weights):
        csp = lambda a: const_spec(a.shape, single_buffer_weights)
        return pl.pallas_call(
            kernel,
            out_shape=jax.ShapeDtypeStruct((B, N, C), x.dtype),
            grid_spec=pltpu.PrefetchScalarGridSpec(
                num_scalar_prefetch=0,
                grid=(B, nq, nk),
                in_specs=[
                    pl.BlockSpec((1, tq, C), lambda b, qi, kv: (b, qi, 0)),   # query rows
                    pl.BlockSpec((1, tk, C), lambda b, qi, kv: (b, kv, 0)),   # kv rows
                    csp(wq_t), csp(bq), csp(wk_t), csp(bk), csp(wv_t), csp(bv),
                    csp(wp_h), csp(bp),
                    csp(wfc1_t), csp(bfc1_r), csp(wfc2_t), csp(bfc2_r),
                ],
                out_specs=pl.BlockSpec((1, tq, C), lambda b, qi, kv: (b, qi, 0)),
                scratch_shapes=[
                    pltpu.VMEM((num_heads, tq, hd), f32),   # pre-scaled q per head
                    pltpu.VMEM((num_heads, tq, 1), f32),    # running max
                    pltpu.VMEM((num_heads, tq, 1), f32),    # running denominator
                    pltpu.VMEM((num_heads, tq, hd), f32),   # running p@v accumulator
                ],
            ),
            compiler_params=pltpu.CompilerParams(
                dimension_semantics=("parallel", "parallel", "arbitrary"),
                vmem_limit_bytes=_pick_vmem_limit(),
            ),
        )

    args = (x, x, wq_t, bq, wk_t, bk, wv_t, bv, wp_h, bp,
            wfc1_t, bfc1_r, wfc2_t, bfc2_r)
    try:
        out = jax.block_until_ready(build(True)(*args))
    except Exception:
        # Fallback if this Pallas build rejects pipeline_mode=pl.Buffered(1).
        out = jax.block_until_ready(build(False)(*args))
    return out


# ------------------------------ pure-JAX reference -----------------------------

def transformer_block_reference(x, params, num_heads):
    wqkv, bqkv, wproj, bproj, wfc1, bfc1, wfc2, bfc2 = params
    B, N, C = x.shape
    hd = C // num_heads
    scale = float(hd) ** -0.5
    hi = jax.lax.Precision.HIGHEST
    x = x.astype(jnp.float32)

    xn = _l2_normalize(x)                                            # norm1
    qkv = jnp.einsum('bnc,kc->bnk', xn, wqkv, precision=hi) + bqkv   # (B, N, 3C)
    qkv = qkv.reshape(B, N, 3, num_heads, hd).transpose(2, 0, 3, 1, 4)
    q, k, v = qkv[0] * scale, qkv[1], qkv[2]                         # (B, h, N, hd)
    s = jnp.einsum('bhqd,bhkd->bhqk', q, k, precision=hi)
    p = jax.nn.softmax(s, axis=-1)
    o = jnp.einsum('bhqk,bhkd->bhqd', p, v, precision=hi)
    o = o.transpose(0, 2, 1, 3).reshape(B, N, C)
    attn = jnp.einsum('bnc,oc->bno', o, wproj, precision=hi) + bproj
    w1 = x + attn                                                    # residual 1

    xn2 = _l2_normalize(w1)                                          # norm2
    h = jnp.einsum('bnc,hc->bnh', xn2, wfc1, precision=hi) + bfc1
    h = 0.5 * h * (1.0 + lax.erf(h * _SQRT_HALF))                    # exact erf GELU
    mlp = jnp.einsum('bnh,ch->bnc', h, wfc2, precision=hi) + bfc2
    return w1 + mlp                                                  # residual 2


# ------------------------------ demo --------------------------------------------

if __name__ == "__main__":
    B, N, C = 2, 128, 128        # lane-dense C; N tiled 2x2 to exercise the flash loop
    num_heads = 4                # head_dim = 32
    mlp_ratio = 4.0
    H = int(C * mlp_ratio)       # hidden = 512

    key = jax.random.PRNGKey(0)
    keys = jax.random.split(key, 9)
    x = jax.random.normal(keys[0], (B, N, C), dtype=jnp.float32)

    def linear_init(kw, kb, out_f, in_f):
        # nn.Linear init: U(-1/sqrt(fan_in), 1/sqrt(fan_in)) for weight and bias.
        bound = 1.0 / (in_f ** 0.5)
        w = jax.random.uniform(kw, (out_f, in_f), minval=-bound, maxval=bound,
                               dtype=jnp.float32)
        b = jax.random.uniform(kb, (out_f,), minval=-bound, maxval=bound,
                               dtype=jnp.float32)
        return w, b

    wqkv, bqkv = linear_init(keys[1], keys[2], 3 * C, C)
    wproj, bproj = linear_init(keys[3], keys[4], C, C)
    wfc1, bfc1 = linear_init(keys[5], keys[6], H, C)
    wfc2, bfc2 = linear_init(keys[7], keys[8], C, H)
    params = (wqkv, bqkv, wproj, bproj, wfc1, bfc1, wfc2, bfc2)

    # q/kv tiles of 64 -> grid (2, 2, 2): exercises the online-softmax kv loop.
    out = transformer_block_forward(x, params, num_heads, q_tile=64, kv_tile=64)
    out = jax.block_until_ready(out)

    ref = transformer_block_reference(x, params, num_heads)
    assert out.shape == (B, N, C)
    # Tolerance covers the approx-reciprocal softmax denominator (~2^-12 rel).
    assert jnp.allclose(out, ref, atol=2e-3, rtol=2e-3), \
        "kernel output mismatch vs pure-JAX reference"

    print("KERNEL_OK")
</pallas_src>

<mosaic_0001>
module attributes {stable_mosaic.version = 11 : i64} {
  func.func @transformer_block_kernel(%arg0: i32, %arg1: i32, %arg2: i32, %arg3: memref<1x64x128xf32, #tpu.memory_space<vmem>>, %arg4: memref<1x64x128xf32, #tpu.memory_space<vmem>>, %arg5: memref<4x128x32xf32, #tpu.memory_space<vmem>>, %arg6: memref<4x1x32xf32, #tpu.memory_space<vmem>>, %arg7: memref<4x128x32xf32, #tpu.memory_space<vmem>>, %arg8: memref<4x1x32xf32, #tpu.memory_space<vmem>>, %arg9: memref<4x128x32xf32, #tpu.memory_space<vmem>>, %arg10: memref<4x1x32xf32, #tpu.memory_space<vmem>>, %arg11: memref<4x32x128xf32, #tpu.memory_space<vmem>>, %arg12: memref<1x128xf32, #tpu.memory_space<vmem>>, %arg13: memref<128x512xf32, #tpu.memory_space<vmem>>, %arg14: memref<1x512xf32, #tpu.memory_space<vmem>>, %arg15: memref<512x128xf32, #tpu.memory_space<vmem>>, %arg16: memref<1x128xf32, #tpu.memory_space<vmem>>, %arg17: memref<1x64x128xf32, #tpu.memory_space<vmem>>, %arg18: memref<4x64x32xf32, #tpu.memory_space<vmem>>, %arg19: memref<4x64x1xf32, #tpu.memory_space<vmem>>, %arg20: memref<4x64x1xf32, #tpu.memory_space<vmem>>, %arg21: memref<4x64x32xf32, #tpu.memory_space<vmem>>) attributes {dimension_semantics = [#tpu.dimension_semantics<parallel>, #tpu.dimension_semantics<parallel>, #tpu.dimension_semantics<arbitrary>], iteration_bounds = array<i64: 2, 2, 2>, scalar_prefetch = 0 : i64, scratch_operands = 4 : i64, tpu.core_type = #tpu.core_type<tc>, window_params = [{transform_indices = @transform_0, window_bounds = array<i64: 1, 64, 128>}, {transform_indices = @transform_1, window_bounds = array<i64: 1, 64, 128>}, {pipeline_mode = #tpu.pipeline_mode<synchronous>, transform_indices = @transform_2, window_bounds = array<i64: 4, 128, 32>}, {pipeline_mode = #tpu.pipeline_mode<synchronous>, transform_indices = @transform_3, window_bounds = array<i64: 4, 1, 32>}, {pipeline_mode = #tpu.pipeline_mode<synchronous>, transform_indices = @transform_4, window_bounds = array<i64: 4, 128, 32>}, {pipeline_mode = #tpu.pipeline_mode<synchronous>, transform_indices = @transform_5, window_bounds = array<i64: 4, 1, 32>}, {pipeline_mode = #tpu.pipeline_mode<synchronous>, transform_indices = @transform_6, window_bounds = array<i64: 4, 128, 32>}, {pipeline_mode = #tpu.pipeline_mode<synchronous>, transform_indices = @transform_7, window_bounds = array<i64: 4, 1, 32>}, {pipeline_mode = #tpu.pipeline_mode<synchronous>, transform_indices = @transform_8, window_bounds = array<i64: 4, 32, 128>}, {pipeline_mode = #tpu.pipeline_mode<synchronous>, transform_indices = @transform_9, window_bounds = array<i64: 1, 128>}, {pipeline_mode = #tpu.pipeline_mode<synchronous>, transform_indices = @transform_10, window_bounds = array<i64: 128, 512>}, {pipeline_mode = #tpu.pipeline_mode<synchronous>, transform_indices = @transform_11, window_bounds = array<i64: 1, 512>}, {pipeline_mode = #tpu.pipeline_mode<synchronous>, transform_indices = @transform_12, window_bounds = array<i64: 512, 128>}, {pipeline_mode = #tpu.pipeline_mode<synchronous>, transform_indices = @transform_13, window_bounds = array<i64: 1, 128>}, {transform_indices = @transform_14, window_bounds = array<i64: 1, 64, 128>}]} {
    %c0 = arith.constant 0 : index
    %c0_0 = arith.constant 0 : index
    %c0_1 = arith.constant 0 : index
    %0 = vector.load %arg3[%c0, %c0_0, %c0_1] : memref<1x64x128xf32, #tpu.memory_space<vmem>>, vector<1x64x128xf32>
    %1 = vector.shape_cast %0 : vector<1x64x128xf32> to vector<64x128xf32>
    %c0_2 = arith.constant 0 : index
    %c0_3 = arith.constant 0 : index
    %c0_4 = arith.constant 0 : index
    %2 = vector.load %arg4[%c0_2, %c0_3, %c0_4] : memref<1x64x128xf32, #tpu.memory_space<vmem>>, vector<1x64x128xf32>
    %3 = vector.shape_cast %2 : vector<1x64x128xf32> to vector<64x128xf32>
    %4 = arith.mulf %3, %3 : vector<64x128xf32>
    %cst = arith.constant dense<0.000000e+00> : vector<64xf32>
    %5 = vector.multi_reduction <add>, %4, %cst [1] : vector<64x128xf32> to vector<64xf32>
    %6 = vector.shape_cast %5 : vector<64xf32> to vector<64x1xf32>
    %cst_5 = arith.constant 1.000000e-24 : f32
    %7 = vector.broadcast %cst_5 : f32 to vector<64x1xf32>
    %8 = arith.maximumf %6, %7 : vector<64x1xf32>
    %9 = math.rsqrt %8 : vector<64x1xf32>
    %10 = vector.broadcast %9 : vector<64x1xf32> to vector<64x128xf32>
    %11 = arith.mulf %3, %10 : vector<64x128xf32>
    %c0_i32 = arith.constant 0 : i32
    %12 = arith.cmpi eq, %arg2, %c0_i32 : i32
    %13 = arith.extui %12 : i1 to i32
    %c0_i32_6 = arith.constant 0 : i32
    %14 = arith.cmpi ne, %13, %c0_i32_6 : i32
    scf.if %14 {
      %cst_11 = arith.constant 0xFF800000 : f32
      %19 = vector.broadcast %cst_11 : f32 to vector<4x64x1xf32>
      %c0_12 = arith.constant 0 : index
      %c0_13 = arith.constant 0 : index
      %c0_14 = arith.constant 0 : index
      %20 = vector.load %arg19[%c0_12, %c0_13, %c0_14] : memref<4x64x1xf32, #tpu.memory_space<vmem>>, vector<4x64x1xf32>
      tpu.vector_store %arg19[%c0_12, %c0_13, %c0_14], %19 {strides = array<i32>} : memref<4x64x1xf32, #tpu.memory_space<vmem>>, vector<4x64x1xf32>,
      %cst_15 = arith.constant 0.000000e+00 : f32
      %21 = vector.broadcast %cst_15 : f32 to vector<4x64x1xf32>
      %c0_16 = arith.constant 0 : index
      %c0_17 = arith.constant 0 : index
      %c0_18 = arith.constant 0 : index
      %22 = vector.load %arg20[%c0_16, %c0_17, %c0_18] : memref<4x64x1xf32, #tpu.memory_space<vmem>>, vector<4x64x1xf32>
      tpu.vector_store %arg20[%c0_16, %c0_17, %c0_18], %21 {strides = array<i32>} : memref<4x64x1xf32, #tpu.memory_space<vmem>>, vector<4x64x1xf32>,
      %cst_19 = arith.constant 0.000000e+00 : f32
      %23 = vector.broadcast %cst_19 : f32 to vector<4x64x32xf32>
      %c0_20 = arith.constant 0 : index
      %c0_21 = arith.constant 0 : index
      %c0_22 = arith.constant 0 : index
      %24 = vector.load %arg21[%c0_20, %c0_21, %c0_22] : memref<4x64x32xf32, #tpu.memory_space<vmem>>, vector<4x64x32xf32>
      tpu.vector_store %arg21[%c0_20, %c0_21, %c0_22], %23 {strides = array<i32>} : memref<4x64x32xf32, #tpu.memory_space<vmem>>, vector<4x64x32xf32>,
      %25 = arith.mulf %1, %1 : vector<64x128xf32>
      %cst_23 = arith.constant dense<0.000000e+00> : vector<64xf32>
      %26 = vector.multi_reduction <add>, %25, %cst_23 [1] : vector<64x128xf32> to vector<64xf32>
      %27 = vector.shape_cast %26 : vector<64xf32> to vector<64x1xf32>
      %cst_24 = arith.constant 1.000000e-24 : f32
      %28 = vector.broadcast %cst_24 : f32 to vector<64x1xf32>
      %29 = arith.maximumf %27, %28 : vector<64x1xf32>
      %30 = math.rsqrt %29 : vector<64x1xf32>
      %31 = vector.broadcast %30 : vector<64x1xf32> to vector<64x128xf32>
      %32 = arith.mulf %1, %31 : vector<64x128xf32>
      %c0_i32_25 = arith.constant 0 : i32
      %c4_i32_26 = arith.constant 4 : i32
      %33 = arith.addi %c0_i32_25, %c4_i32_26 : i32
      %c1_i32_27 = arith.constant 1 : i32
      scf.for %arg22 = %c0_i32_25 to %33 step %c1_i32_27  : i32 {
        %34 = arith.index_cast %arg22 : i32 to index
        %c0_29 = arith.constant 0 : index
        %c0_30 = arith.constant 0 : index
        %35 = vector.load %arg5[%34, %c0_29, %c0_30] : memref<4x128x32xf32, #tpu.memory_space<vmem>>, vector<1x128x32xf32>
        %36 = vector.shape_cast %35 : vector<1x128x32xf32> to vector<128x32xf32>
        %cst_31 = arith.constant dense<0.000000e+00> : vector<64x32xf32>
        %37 = tpu.matmul %32, %36, %cst_31 {dimension_numbers = #tpu.dot_dimension_numbers<[1], [0], [0], [1], [0, 0, 1, 1], [], []>} : vector<64x128xf32>, vector<128x32xf32>, vector<64x32xf32> -> vector<64x32xf32>
        %38 = arith.index_cast %arg22 : i32 to index
        %c0_32 = arith.constant 0 : index
        %c0_33 = arith.constant 0 : index
        %39 = vector.load %arg6[%38, %c0_32, %c0_33] : memref<4x1x32xf32, #tpu.memory_space<vmem>>, vector<1x1x32xf32>
        %40 = vector.shape_cast %39 : vector<1x1x32xf32> to vector<1x32xf32>
        %41 = vector.broadcast %40 : vector<1x32xf32> to vector<64x32xf32>
        %42 = arith.addf %37, %41 : vector<64x32xf32>
        %cst_34 = arith.constant 0.176776692 : f32
        %43 = vector.broadcast %cst_34 : f32 to vector<64x32xf32>
        %44 = arith.mulf %42, %43 : vector<64x32xf32>
        %45 = arith.index_cast %arg22 : i32 to index
        %c0_35 = arith.constant 0 : index
        %c0_36 = arith.constant 0 : index
        %46 = vector.load %arg18[%45, %c0_35, %c0_36] : memref<4x64x32xf32, #tpu.memory_space<vmem>>, vector<1x64x32xf32>
        %47 = vector.shape_cast %46 : vector<1x64x32xf32> to vector<64x32xf32>
        %48 = vector.shape_cast %44 : vector<64x32xf32> to vector<1x64x32xf32>
        tpu.vector_store %arg18[%45, %c0_35, %c0_36], %48 {strides = array<i32>} : memref<4x64x32xf32, #tpu.memory_space<vmem>>, vector<1x64x32xf32>,
      }
      %c4_i32_28 = arith.constant 4 : i32
    } else {
    }
    %c0_i32_7 = arith.constant 0 : i32
    %c4_i32 = arith.constant 4 : i32
    %15 = arith.addi %c0_i32_7, %c4_i32 : i32
    %c1_i32 = arith.constant 1 : i32
    scf.for %arg22 = %c0_i32_7 to %15 step %c1_i32  : i32 {
      %19 = arith.index_cast %arg22 : i32 to index
      %c0_11 = arith.constant 0 : index
      %c0_12 = arith.constant 0 : index
      %20 = vector.load %arg7[%19, %c0_11, %c0_12] : memref<4x128x32xf32, #tpu.memory_space<vmem>>, vector<1x128x32xf32>
      %21 = vector.shape_cast %20 : vector<1x128x32xf32> to vector<128x32xf32>
      %cst_13 = arith.constant dense<0.000000e+00> : vector<64x32xf32>
      %22 = tpu.matmul %11, %21, %cst_13 {dimension_numbers = #tpu.dot_dimension_numbers<[1], [0], [0], [1], [0, 0, 1, 1], [], []>} : vector<64x128xf32>, vector<128x32xf32>, vector<64x32xf32> -> vector<64x32xf32>
      %23 = arith.index_cast %arg22 : i32 to index
      %c0_14 = arith.constant 0 : index
      %c0_15 = arith.constant 0 : index
      %24 = vector.load %arg8[%23, %c0_14, %c0_15] : memref<4x1x32xf32, #tpu.memory_space<vmem>>, vector<1x1x32xf32>
      %25 = vector.shape_cast %24 : vector<1x1x32xf32> to vector<1x32xf32>
      %26 = vector.broadcast %25 : vector<1x32xf32> to vector<64x32xf32>
      %27 = arith.addf %22, %26 : vector<64x32xf32>
      %28 = arith.index_cast %arg22 : i32 to index
      %c0_16 = arith.constant 0 : index
      %c0_17 = arith.constant 0 : index
      %29 = vector.load %arg9[%28, %c0_16, %c0_17] : memref<4x128x32xf32, #tpu.memory_space<vmem>>, vector<1x128x32xf32>
      %30 = vector.shape_cast %29 : vector<1x128x32xf32> to vector<128x32xf32>
      %cst_18 = arith.constant dense<0.000000e+00> : vector<64x32xf32>
      %31 = tpu.matmul %11, %30, %cst_18 {dimension_numbers = #tpu.dot_dimension_numbers<[1], [0], [0], [1], [0, 0, 1, 1], [], []>} : vector<64x128xf32>, vector<128x32xf32>, vector<64x32xf32> -> vector<64x32xf32>
      %32 = arith.index_cast %arg22 : i32 to index
      %c0_19 = arith.constant 0 : index
      %c0_20 = arith.constant 0 : index
      %33 = vector.load %arg10[%32, %c0_19, %c0_20] : memref<4x1x32xf32, #tpu.memory_space<vmem>>, vector<1x1x32xf32>
      %34 = vector.shape_cast %33 : vector<1x1x32xf32> to vector<1x32xf32>
      %35 = vector.broadcast %34 : vector<1x32xf32> to vector<64x32xf32>
      %36 = arith.addf %31, %35 : vector<64x32xf32>
      %37 = arith.index_cast %arg22 : i32 to index
      %c0_21 = arith.constant 0 : index
      %c0_22 = arith.constant 0 : index
      %38 = vector.load %arg18[%37, %c0_21, %c0_22] : memref<4x64x32xf32, #tpu.memory_space<vmem>>, vector<1x64x32xf32>
      %39 = vector.shape_cast %38 : vector<1x64x32xf32> to vector<64x32xf32>
      %cst_23 = arith.constant dense<0.000000e+00> : vector<64x64xf32>
      %40 = tpu.matmul %39, %27, %cst_23 {dimension_numbers = #tpu.dot_dimension_numbers<[1], [1], [0], [0], [0, 0, 1, 0], [], []>} : vector<64x32xf32>, vector<64x32xf32>, vector<64x64xf32> -> vector<64x64xf32>
      %41 = arith.index_cast %arg22 : i32 to index
      %c0_24 = arith.constant 0 : index
      %c0_25 = arith.constant 0 : index
      %42 = vector.load %arg19[%41, %c0_24, %c0_25] : memref<4x64x1xf32, #tpu.memory_space<vmem>>, vector<1x64x1xf32>
      %43 = vector.shape_cast %42 : vector<1x64x1xf32> to vector<64x1xf32>
      %cst_26 = arith.constant dense<0xFF800000> : vector<64xf32>
      %44 = vector.multi_reduction <maximumf>, %40, %cst_26 [1] : vector<64x64xf32> to vector<64xf32>
      %45 = vector.shape_cast %44 : vector<64xf32> to vector<64x1xf32>
      %46 = arith.maximumf %43, %45 : vector<64x1xf32>
      %47 = arith.subf %43, %46 : vector<64x1xf32>
      %48 = math.exp %47 : vector<64x1xf32>
      %49 = vector.broadcast %46 : vector<64x1xf32> to vector<64x64xf32>
      %50 = arith.subf %40, %49 : vector<64x64xf32>
      %51 = math.exp %50 : vector<64x64xf32>
      %52 = arith.index_cast %arg22 : i32 to index
      %c0_27 = arith.constant 0 : index
      %c0_28 = arith.constant 0 : index
      %53 = vector.load %arg20[%52, %c0_27, %c0_28] : memref<4x64x1xf32, #tpu.memory_space<vmem>>, vector<1x64x1xf32>
      %54 = vector.shape_cast %53 : vector<1x64x1xf32> to vector<64x1xf32>
      %55 = arith.mulf %48, %54 : vector<64x1xf32>
      %cst_29 = arith.constant dense<0.000000e+00> : vector<64xf32>
      %56 = vector.multi_reduction <add>, %51, %cst_29 [1] : vector<64x64xf32> to vector<64xf32>
      %57 = vector.shape_cast %56 : vector<64xf32> to vector<64x1xf32>
      %58 = arith.addf %55, %57 : vector<64x1xf32>
      %59 = arith.index_cast %arg22 : i32 to index
      %c0_30 = arith.constant 0 : index
      %c0_31 = arith.constant 0 : index
      %60 = vector.load %arg20[%59, %c0_30, %c0_31] : memref<4x64x1xf32, #tpu.memory_space<vmem>>, vector<1x64x1xf32>
      %61 = vector.shape_cast %60 : vector<1x64x1xf32> to vector<64x1xf32>
      %62 = vector.shape_cast %58 : vector<64x1xf32> to vector<1x64x1xf32>
      tpu.vector_store %arg20[%59, %c0_30, %c0_31], %62 {strides = array<i32>} : memref<4x64x1xf32, #tpu.memory_space<vmem>>, vector<1x64x1xf32>,
      %63 = arith.index_cast %arg22 : i32 to index
      %c0_32 = arith.constant 0 : index
      %c0_33 = arith.constant 0 : index
      %64 = vector.load %arg21[%63, %c0_32, %c0_33] : memref<4x64x32xf32, #tpu.memory_space<vmem>>, vector<1x64x32xf32>
      %65 = vector.shape_cast %64 : vector<1x64x32xf32> to vector<64x32xf32>
      %66 = vector.broadcast %48 : vector<64x1xf32> to vector<64x32xf32>
      %67 = arith.mulf %66, %65 : vector<64x32xf32>
      %cst_34 = arith.constant dense<0.000000e+00> : vector<64x32xf32>
      %68 = tpu.matmul %51, %36, %cst_34 {dimension_numbers = #tpu.dot_dimension_numbers<[1], [0], [0], [1], [0, 0, 1, 1], [], []>} : vector<64x64xf32>, vector<64x32xf32>, vector<64x32xf32> -> vector<64x32xf32>
      %69 = arith.addf %67, %68 : vector<64x32xf32>
      %70 = arith.index_cast %arg22 : i32 to index
      %c0_35 = arith.constant 0 : index
      %c0_36 = arith.constant 0 : index
      %71 = vector.load %arg21[%70, %c0_35, %c0_36] : memref<4x64x32xf32, #tpu.memory_space<vmem>>, vector<1x64x32xf32>
      %72 = vector.shape_cast %71 : vector<1x64x32xf32> to vector<64x32xf32>
      %73 = vector.shape_cast %69 : vector<64x32xf32> to vector<1x64x32xf32>
      tpu.vector_store %arg21[%70, %c0_35, %c0_36], %73 {strides = array<i32>} : memref<4x64x32xf32, #tpu.memory_space<vmem>>, vector<1x64x32xf32>,
      %74 = arith.index_cast %arg22 : i32 to index
      %c0_37 = arith.constant 0 : index
      %c0_38 = arith.constant 0 : index
      %75 = vector.load %arg19[%74, %c0_37, %c0_38] : memref<4x64x1xf32, #tpu.memory_space<vmem>>, vector<1x64x1xf32>
      %76 = vector.shape_cast %75 : vector<1x64x1xf32> to vector<64x1xf32>
      %77 = vector.shape_cast %46 : vector<64x1xf32> to vector<1x64x1xf32>
      tpu.vector_store %arg19[%74, %c0_37, %c0_38], %77 {strides = array<i32>} : memref<4x64x1xf32, #tpu.memory_space<vmem>>, vector<1x64x1xf32>,
    }
    %c4_i32_8 = arith.constant 4 : i32
    %c1_i32_9 = arith.constant 1 : i32
    %16 = arith.cmpi eq, %arg2, %c1_i32_9 : i32
    %17 = arith.extui %16 : i1 to i32
    %c0_i32_10 = arith.constant 0 : i32
    %18 = arith.cmpi ne, %17, %c0_i32_10 : i32
    scf.if %18 {
      %cst_11 = arith.constant 0.000000e+00 : f32
      %19 = vector.broadcast %cst_11 : f32 to vector<64x128xf32>
      %c0_i32_12 = arith.constant 0 : i32
      %c4_i32_13 = arith.constant 4 : i32
      %20 = arith.addi %c0_i32_12, %c4_i32_13 : i32
      %c1_i32_14 = arith.constant 1 : i32
      %21 = scf.for %arg22 = %c0_i32_12 to %20 step %c1_i32_14 iter_args(%arg23 = %19) -> (vector<64x128xf32>)  : i32 {
        %88 = arith.index_cast %arg22 : i32 to index
        %c0_48 = arith.constant 0 : index
        %c0_49 = arith.constant 0 : index
        %89 = vector.load %arg21[%88, %c0_48, %c0_49] : memref<4x64x32xf32, #tpu.memory_space<vmem>>, vector<1x64x32xf32>
        %90 = vector.shape_cast %89 : vector<1x64x32xf32> to vector<64x32xf32>
        %91 = arith.index_cast %arg22 : i32 to index
        %c0_50 = arith.constant 0 : index
        %c0_51 = arith.constant 0 : index
        %92 = vector.load %arg20[%91, %c0_50, %c0_51] : memref<4x64x1xf32, #tpu.memory_space<vmem>>, vector<1x64x1xf32>
        %93 = vector.shape_cast %92 : vector<1x64x1xf32> to vector<64x1xf32>
        %94 = tpu.reciprocal %93 {approx = true} : vector<64x1xf32> -> vector<64x1xf32>
        %95 = vector.broadcast %94 : vector<64x1xf32> to vector<64x32xf32>
        %96 = arith.mulf %90, %95 : vector<64x32xf32>
        %97 = arith.index_cast %arg22 : i32 to index
        %c0_52 = arith.constant 0 : index
        %c0_53 = arith.constant 0 : index
        %98 = vector.load %arg11[%97, %c0_52, %c0_53] : memref<4x32x128xf32, #tpu.memory_space<vmem>>, vector<1x32x128xf32>
        %99 = vector.shape_cast %98 : vector<1x32x128xf32> to vector<32x128xf32>
        %cst_54 = arith.constant dense<0.000000e+00> : vector<64x128xf32>
        %100 = tpu.matmul %96, %99, %cst_54 {dimension_numbers = #tpu.dot_dimension_numbers<[1], [0], [0], [1], [0, 0, 1, 1], [], []>} : vector<64x32xf32>, vector<32x128xf32>, vector<64x128xf32> -> vector<64x128xf32>
        %101 = arith.addf %arg23, %100 : vector<64x128xf32>
        scf.yield %101 : vector<64x128xf32>
      }
      %c4_i32_15 = arith.constant 4 : i32
      %22 = arith.addf %1, %21 : vector<64x128xf32>
      %c0_16 = arith.constant 0 : index
      %c0_17 = arith.constant 0 : index
      %23 = vector.load %arg12[%c0_16, %c0_17] : memref<1x128xf32, #tpu.memory_space<vmem>>, vector<1x128xf32>
      %24 = vector.broadcast %23 : vector<1x128xf32> to vector<64x128xf32>
      %25 = arith.addf %22, %24 : vector<64x128xf32>
      %26 = arith.mulf %25, %25 : vector<64x128xf32>
      %cst_18 = arith.constant dense<0.000000e+00> : vector<64xf32>
      %27 = vector.multi_reduction <add>, %26, %cst_18 [1] : vector<64x128xf32> to vector<64xf32>
      %28 = vector.shape_cast %27 : vector<64xf32> to vector<64x1xf32>
      %cst_19 = arith.constant 1.000000e-24 : f32
      %29 = vector.broadcast %cst_19 : f32 to vector<64x1xf32>
      %30 = arith.maximumf %28, %29 : vector<64x1xf32>
      %31 = math.rsqrt %30 : vector<64x1xf32>
      %32 = vector.broadcast %31 : vector<64x1xf32> to vector<64x128xf32>
      %33 = arith.mulf %25, %32 : vector<64x128xf32>
      %c0_20 = arith.constant 0 : index
      %c0_21 = arith.constant 0 : index
      %34 = vector.load %arg13[%c0_20, %c0_21] : memref<128x512xf32, #tpu.memory_space<vmem>>, vector<128x512xf32>
      %cst_22 = arith.constant dense<0.000000e+00> : vector<64x512xf32>
      %35 = tpu.matmul %33, %34, %cst_22 {dimension_numbers = #tpu.dot_dimension_numbers<[1], [0], [0], [1], [0, 0, 1, 1], [], []>} : vector<64x128xf32>, vector<128x512xf32>, vector<64x512xf32> -> vector<64x512xf32>
      %c0_23 = arith.constant 0 : index
      %c0_24 = arith.constant 0 : index
      %36 = vector.load %arg14[%c0_23, %c0_24] : memref<1x512xf32, #tpu.memory_space<vmem>>, vector<1x512xf32>
      %37 = vector.broadcast %36 : vector<1x512xf32> to vector<64x512xf32>
      %38 = arith.addf %35, %37 : vector<64x512xf32>
      %cst_25 = arith.constant 5.000000e-01 : f32
      %39 = vector.broadcast %cst_25 : f32 to vector<64x512xf32>
      %40 = arith.mulf %39, %38 : vector<64x512xf32>
      %cst_26 = arith.constant 0.707106769 : f32
      %41 = vector.broadcast %cst_26 : f32 to vector<64x512xf32>
      %42 = arith.mulf %38, %41 : vector<64x512xf32>
      %43 = math.absf %42 : vector<64x512xf32>
      %cst_27 = arith.constant 0.327591091 : f32
      %44 = vector.broadcast %cst_27 : f32 to vector<64x512xf32>
      %45 = arith.mulf %44, %43 : vector<64x512xf32>
      %cst_28 = arith.constant 1.000000e+00 : f32
      %46 = vector.broadcast %cst_28 : f32 to vector<64x512xf32>
      %47 = arith.addf %46, %45 : vector<64x512xf32>
      %cst_29 = arith.constant 1.000000e+00 : f32
      %48 = vector.broadcast %cst_29 : f32 to vector<64x512xf32>
      %49 = arith.divf %48, %47 : vector<64x512xf32>
      %cst_30 = arith.constant 1.06140542 : f32
      %50 = vector.broadcast %cst_30 : f32 to vector<64x512xf32>
      %51 = arith.mulf %49, %50 : vector<64x512xf32>
      %cst_31 = arith.constant -1.45315206 : f32
      %52 = vector.broadcast %cst_31 : f32 to vector<64x512xf32>
      %53 = arith.addf %52, %51 : vector<64x512xf32>
      %54 = arith.mulf %49, %53 : vector<64x512xf32>
      %cst_32 = arith.constant 1.42141378 : f32
      %55 = vector.broadcast %cst_32 : f32 to vector<64x512xf32>
      %56 = arith.addf %55, %54 : vector<64x512xf32>
      %57 = arith.mulf %49, %56 : vector<64x512xf32>
      %cst_33 = arith.constant -0.284496725 : f32
      %58 = vector.broadcast %cst_33 : f32 to vector<64x512xf32>
      %59 = arith.addf %58, %57 : vector<64x512xf32>
      %60 = arith.mulf %49, %59 : vector<64x512xf32>
      %cst_34 = arith.constant 0.254829586 : f32
      %61 = vector.broadcast %cst_34 : f32 to vector<64x512xf32>
      %62 = arith.addf %61, %60 : vector<64x512xf32>
      %63 = arith.mulf %49, %62 : vector<64x512xf32>
      %cst_35 = arith.constant 0.000000e+00 : f32
      %64 = vector.broadcast %cst_35 : f32 to vector<64x512xf32>
      %65 = arith.subf %64, %43 : vector<64x512xf32>
      %66 = arith.mulf %65, %43 : vector<64x512xf32>
      %67 = math.exp %66 : vector<64x512xf32>
      %68 = arith.mulf %63, %67 : vector<64x512xf32>
      %cst_36 = arith.constant 1.000000e+00 : f32
      %69 = vector.broadcast %cst_36 : f32 to vector<64x512xf32>
      %70 = arith.subf %69, %68 : vector<64x512xf32>
      %cst_37 = arith.constant 0.000000e+00 : f32
      %71 = vector.broadcast %cst_37 : f32 to vector<64x512xf32>
      %72 = arith.cmpf olt, %42, %71 : vector<64x512xf32>
      %cst_38 = arith.constant 0.000000e+00 : f32
      %73 = vector.broadcast %cst_38 : f32 to vector<64x512xf32>
      %74 = arith.subf %73, %70 : vector<64x512xf32>
      %75 = arith.select %72, %74, %70 : vector<64x512xi1>, vector<64x512xf32>
      %cst_39 = arith.constant 1.000000e+00 : f32
      %76 = vector.broadcast %cst_39 : f32 to vector<64x512xf32>
      %77 = arith.addf %76, %75 : vector<64x512xf32>
      %78 = arith.mulf %40, %77 : vector<64x512xf32>
      %c0_40 = arith.constant 0 : index
      %c0_41 = arith.constant 0 : index
      %79 = vector.load %arg15[%c0_40, %c0_41] : memref<512x128xf32, #tpu.memory_space<vmem>>, vector<512x128xf32>
      %cst_42 = arith.constant dense<0.000000e+00> : vector<64x128xf32>
      %80 = tpu.matmul %78, %79, %cst_42 {dimension_numbers = #tpu.dot_dimension_numbers<[1], [0], [0], [1], [0, 0, 1, 1], [], []>} : vector<64x512xf32>, vector<512x128xf32>, vector<64x128xf32> -> vector<64x128xf32>
      %c0_43 = arith.constant 0 : index
      %c0_44 = arith.constant 0 : index
      %81 = vector.load %arg16[%c0_43, %c0_44] : memref<1x128xf32, #tpu.memory_space<vmem>>, vector<1x128xf32>
      %82 = vector.broadcast %81 : vector<1x128xf32> to vector<64x128xf32>
      %83 = arith.addf %80, %82 : vector<64x128xf32>
      %84 = arith.addf %25, %83 : vector<64x128xf32>
      %c0_45 = arith.constant 0 : index
      %c0_46 = arith.constant 0 : index
      %c0_47 = arith.constant 0 : index
      %85 = vector.load %arg17[%c0_45, %c0_46, %c0_47] : memref<1x64x128xf32, #tpu.memory_space<vmem>>, vector<1x64x128xf32>
      %86 = vector.shape_cast %85 : vector<1x64x128xf32> to vector<64x128xf32>
      %87 = vector.shape_cast %84 : vector<64x128xf32> to vector<1x64x128xf32>
      tpu.vector_store %arg17[%c0_45, %c0_46, %c0_47], %87 {strides = array<i32>} : memref<1x64x128xf32, #tpu.memory_space<vmem>>, vector<1x64x128xf32>,
    } else {
    }
    return
  }
  func.func @transform_0(%arg0: i32, %arg1: i32, %arg2: i32) -> (i32, i32, i32) {
    %c0_i32 = arith.constant 0 : i32
    %c0_i32_0 = arith.constant 0 : i32
    return %arg0, %arg1, %c0_i32 : i32, i32, i32
  }
  func.func @transform_1(%arg0: i32, %arg1: i32, %arg2: i32) -> (i32, i32, i32) {
    %c0_i32 = arith.constant 0 : i32
    %c0_i32_0 = arith.constant 0 : i32
    return %arg0, %arg2, %c0_i32 : i32, i32, i32
  }
  func.func @transform_2(%arg0: i32, %arg1: i32, %arg2: i32) -> (i32, i32, i32) {
    %c0_i32 = arith.constant 0 : i32
    %c0_i32_0 = arith.constant 0 : i32
    %c0_i32_1 = arith.constant 0 : i32
    %c0_i32_2 = arith.constant 0 : i32
    return %c0_i32, %c0_i32_0, %c0_i32_1 : i32, i32, i32
  }
  func.func @transform_3(%arg0: i32, %arg1: i32, %arg2: i32) -> (i32, i32, i32) {
    %c0_i32 = arith.constant 0 : i32
    %c0_i32_0 = arith.constant 0 : i32
    %c0_i32_1 = arith.constant 0 : i32
    %c0_i32_2 = arith.constant 0 : i32
    return %c0_i32, %c0_i32_0, %c0_i32_1 : i32, i32, i32
  }
  func.func @transform_4(%arg0: i32, %arg1: i32, %arg2: i32) -> (i32, i32, i32) {
    %c0_i32 = arith.constant 0 : i32
    %c0_i32_0 = arith.constant 0 : i32
    %c0_i32_1 = arith.constant 0 : i32
    %c0_i32_2 = arith.constant 0 : i32
    return %c0_i32, %c0_i32_0, %c0_i32_1 : i32, i32, i32
  }
  func.func @transform_5(%arg0: i32, %arg1: i32, %arg2: i32) -> (i32, i32, i32) {
    %c0_i32 = arith.constant 0 : i32
    %c0_i32_0 = arith.constant 0 : i32
    %c0_i32_1 = arith.constant 0 : i32
    %c0_i32_2 = arith.constant 0 : i32
    return %c0_i32, %c0_i32_0, %c0_i32_1 : i32, i32, i32
  }
  func.func @transform_6(%arg0: i32, %arg1: i32, %arg2: i32) -> (i32, i32, i32) {
    %c0_i32 = arith.constant 0 : i32
    %c0_i32_0 = arith.constant 0 : i32
    %c0_i32_1 = arith.constant 0 : i32
    %c0_i32_2 = arith.constant 0 : i32
    return %c0_i32, %c0_i32_0, %c0_i32_1 : i32, i32, i32
  }
  func.func @transform_7(%arg0: i32, %arg1: i32, %arg2: i32) -> (i32, i32, i32) {
    %c0_i32 = arith.constant 0 : i32
    %c0_i32_0 = arith.constant 0 : i32
    %c0_i32_1 = arith.constant 0 : i32
    %c0_i32_2 = arith.constant 0 : i32
    return %c0_i32, %c0_i32_0, %c0_i32_1 : i32, i32, i32
  }
  func.func @transform_8(%arg0: i32, %arg1: i32, %arg2: i32) -> (i32, i32, i32) {
    %c0_i32 = arith.constant 0 : i32
    %c0_i32_0 = arith.constant 0 : i32
    %c0_i32_1 = arith.constant 0 : i32
    %c0_i32_2 = arith.constant 0 : i32
    return %c0_i32, %c0_i32_0, %c0_i32_1 : i32, i32, i32
  }
  func.func @transform_9(%arg0: i32, %arg1: i32, %arg2: i32) -> (i32, i32) {
    %c0_i32 = arith.constant 0 : i32
    %c0_i32_0 = arith.constant 0 : i32
    %c0_i32_1 = arith.constant 0 : i32
    return %c0_i32, %c0_i32_0 : i32, i32
  }
  func.func @transform_10(%arg0: i32, %arg1: i32, %arg2: i32) -> (i32, i32) {
    %c0_i32 = arith.constant 0 : i32
    %c0_i32_0 = arith.constant 0 : i32
    %c0_i32_1 = arith.constant 0 : i32
    return %c0_i32, %c0_i32_0 : i32, i32
  }
  func.func @transform_11(%arg0: i32, %arg1: i32, %arg2: i32) -> (i32, i32) {
    %c0_i32 = arith.constant 0 : i32
    %c0_i32_0 = arith.constant 0 : i32
    %c0_i32_1 = arith.constant 0 : i32
    return %c0_i32, %c0_i32_0 : i32, i32
  }
  func.func @transform_12(%arg0: i32, %arg1: i32, %arg2: i32) -> (i32, i32) {
    %c0_i32 = arith.constant 0 : i32
    %c0_i32_0 = arith.constant 0 : i32
    %c0_i32_1 = arith.constant 0 : i32
    return %c0_i32, %c0_i32_0 : i32, i32
  }
  func.func @transform_13(%arg0: i32, %arg1: i32, %arg2: i32) -> (i32, i32) {
    %c0_i32 = arith.constant 0 : i32
    %c0_i32_0 = arith.constant 0 : i32
    %c0_i32_1 = arith.constant 0 : i32
    return %c0_i32, %c0_i32_0 : i32, i32
  }
  func.func @transform_14(%arg0: i32, %arg1: i32, %arg2: i32) -> (i32, i32, i32) {
    %c0_i32 = arith.constant 0 : i32
    %c0_i32_0 = arith.constant 0 : i32
    return %arg0, %arg1, %c0_i32 : i32, i32, i32
  }
}

module attributes {stable_mosaic.version = 11 : i64} {
  func.func @transformer_block_kernel(%arg0: i32, %arg1: i32, %arg2: i32, %arg3: memref<1x64x128xf32, #tpu.memory_space<vmem>>, %arg4: memref<1x64x128xf32, #tpu.memory_space<vmem>>, %arg5: memref<4x128x32xf32, #tpu.memory_space<vmem>>, %arg6: memref<4x1x32xf32, #tpu.memory_space<vmem>>, %arg7: memref<4x128x32xf32, #tpu.memory_space<vmem>>, %arg8: memref<4x1x32xf32, #tpu.memory_space<vmem>>, %arg9: memref<4x128x32xf32, #tpu.memory_space<vmem>>, %arg10: memref<4x1x32xf32, #tpu.memory_space<vmem>>, %arg11: memref<4x32x128xf32, #tpu.memory_space<vmem>>, %arg12: memref<1x128xf32, #tpu.memory_space<vmem>>, %arg13: memref<128x512xf32, #tpu.memory_space<vmem>>, %arg14: memref<1x512xf32, #tpu.memory_space<vmem>>, %arg15: memref<512x128xf32, #tpu.memory_space<vmem>>, %arg16: memref<1x128xf32, #tpu.memory_space<vmem>>, %arg17: memref<1x64x128xf32, #tpu.memory_space<vmem>>, %arg18: memref<4x64x32xf32, #tpu.memory_space<vmem>>, %arg19: memref<4x64x1xf32, #tpu.memory_space<vmem>>, %arg20: memref<4x64x1xf32, #tpu.memory_space<vmem>>, %arg21: memref<4x64x32xf32, #tpu.memory_space<vmem>>) attributes {dimension_semantics = [#tpu.dimension_semantics<parallel>, #tpu.dimension_semantics<parallel>, #tpu.dimension_semantics<arbitrary>], iteration_bounds = array<i64: 2, 2, 2>, scalar_prefetch = 0 : i64, scratch_operands = 4 : i64, tpu.core_type = #tpu.core_type<tc>, window_params = [{transform_indices = @transform_0, window_bounds = array<i64: 1, 64, 128>}, {transform_indices = @transform_1, window_bounds = array<i64: 1, 64, 128>}, {pipeline_mode = #tpu.pipeline_mode<synchronous>, transform_indices = @transform_2, window_bounds = array<i64: 4, 128, 32>}, {pipeline_mode = #tpu.pipeline_mode<synchronous>, transform_indices = @transform_3, window_bounds = array<i64: 4, 1, 32>}, {pipeline_mode = #tpu.pipeline_mode<synchronous>, transform_indices = @transform_4, window_bounds = array<i64: 4, 128, 32>}, {pipeline_mode = #tpu.pipeline_mode<synchronous>, transform_indices = @transform_5, window_bounds = array<i64: 4, 1, 32>}, {pipeline_mode = #tpu.pipeline_mode<synchronous>, transform_indices = @transform_6, window_bounds = array<i64: 4, 128, 32>}, {pipeline_mode = #tpu.pipeline_mode<synchronous>, transform_indices = @transform_7, window_bounds = array<i64: 4, 1, 32>}, {pipeline_mode = #tpu.pipeline_mode<synchronous>, transform_indices = @transform_8, window_bounds = array<i64: 4, 32, 128>}, {pipeline_mode = #tpu.pipeline_mode<synchronous>, transform_indices = @transform_9, window_bounds = array<i64: 1, 128>}, {pipeline_mode = #tpu.pipeline_mode<synchronous>, transform_indices = @transform_10, window_bounds = array<i64: 128, 512>}, {pipeline_mode = #tpu.pipeline_mode<synchronous>, transform_indices = @transform_11, window_bounds = array<i64: 1, 512>}, {pipeline_mode = #tpu.pipeline_mode<synchronous>, transform_indices = @transform_12, window_bounds = array<i64: 512, 128>}, {pipeline_mode = #tpu.pipeline_mode<synchronous>, transform_indices = @transform_13, window_bounds = array<i64: 1, 128>}, {transform_indices = @transform_14, window_bounds = array<i64: 1, 64, 128>}]} {
    %c0 = arith.constant 0 : index
    %c0_0 = arith.constant 0 : index
    %c0_1 = arith.constant 0 : index
    %0 = vector.load %arg3[%c0, %c0_0, %c0_1] : memref<1x64x128xf32, #tpu.memory_space<vmem>>, vector<1x64x128xf32>
    %1 = vector.shape_cast %0 : vector<1x64x128xf32> to vector<64x128xf32>
    %c0_2 = arith.constant 0 : index
    %c0_3 = arith.constant 0 : index
    %c0_4 = arith.constant 0 : index
    %2 = vector.load %arg4[%c0_2, %c0_3, %c0_4] : memref<1x64x128xf32, #tpu.memory_space<vmem>>, vector<1x64x128xf32>
    %3 = vector.shape_cast %2 : vector<1x64x128xf32> to vector<64x128xf32>
    %4 = arith.mulf %3, %3 : vector<64x128xf32>
    %cst = arith.constant dense<0.000000e+00> : vector<64xf32>
    %5 = vector.multi_reduction <add>, %4, %cst [1] : vector<64x128xf32> to vector<64xf32>
    %6 = vector.shape_cast %5 : vector<64xf32> to vector<64x1xf32>
    %cst_5 = arith.constant 1.000000e-24 : f32
    %7 = vector.broadcast %cst_5 : f32 to vector<64x1xf32>
    %8 = arith.maximumf %6, %7 : vector<64x1xf32>
    %9 = math.rsqrt %8 : vector<64x1xf32>
    %10 = vector.broadcast %9 : vector<64x1xf32> to vector<64x128xf32>
    %11 = arith.mulf %3, %10 : vector<64x128xf32>
    %c0_i32 = arith.constant 0 : i32
    %12 = arith.cmpi eq, %arg2, %c0_i32 : i32
    %13 = arith.extui %12 : i1 to i32
    %c0_i32_6 = arith.constant 0 : i32
    %14 = arith.cmpi ne, %13, %c0_i32_6 : i32
    scf.if %14 {
      %cst_11 = arith.constant 0xFF800000 : f32
      %19 = vector.broadcast %cst_11 : f32 to vector<4x64x1xf32>
      %c0_12 = arith.constant 0 : index
      %c0_13 = arith.constant 0 : index
      %c0_14 = arith.constant 0 : index
      %20 = vector.load %arg19[%c0_12, %c0_13, %c0_14] : memref<4x64x1xf32, #tpu.memory_space<vmem>>, vector<4x64x1xf32>
      tpu.vector_store %arg19[%c0_12, %c0_13, %c0_14], %19 {strides = array<i32>} : memref<4x64x1xf32, #tpu.memory_space<vmem>>, vector<4x64x1xf32>,
      %cst_15 = arith.constant 0.000000e+00 : f32
      %21 = vector.broadcast %cst_15 : f32 to vector<4x64x1xf32>
      %c0_16 = arith.constant 0 : index
      %c0_17 = arith.constant 0 : index
      %c0_18 = arith.constant 0 : index
      %22 = vector.load %arg20[%c0_16, %c0_17, %c0_18] : memref<4x64x1xf32, #tpu.memory_space<vmem>>, vector<4x64x1xf32>
      tpu.vector_store %arg20[%c0_16, %c0_17, %c0_18], %21 {strides = array<i32>} : memref<4x64x1xf32, #tpu.memory_space<vmem>>, vector<4x64x1xf32>,
      %cst_19 = arith.constant 0.000000e+00 : f32
      %23 = vector.broadcast %cst_19 : f32 to vector<4x64x32xf32>
      %c0_20 = arith.constant 0 : index
      %c0_21 = arith.constant 0 : index
      %c0_22 = arith.constant 0 : index
      %24 = vector.load %arg21[%c0_20, %c0_21, %c0_22] : memref<4x64x32xf32, #tpu.memory_space<vmem>>, vector<4x64x32xf32>
      tpu.vector_store %arg21[%c0_20, %c0_21, %c0_22], %23 {strides = array<i32>} : memref<4x64x32xf32, #tpu.memory_space<vmem>>, vector<4x64x32xf32>,
      %25 = arith.mulf %1, %1 : vector<64x128xf32>
      %cst_23 = arith.constant dense<0.000000e+00> : vector<64xf32>
      %26 = vector.multi_reduction <add>, %25, %cst_23 [1] : vector<64x128xf32> to vector<64xf32>
      %27 = vector.shape_cast %26 : vector<64xf32> to vector<64x1xf32>
      %cst_24 = arith.constant 1.000000e-24 : f32
      %28 = vector.broadcast %cst_24 : f32 to vector<64x1xf32>
      %29 = arith.maximumf %27, %28 : vector<64x1xf32>
      %30 = math.rsqrt %29 : vector<64x1xf32>
      %31 = vector.broadcast %30 : vector<64x1xf32> to vector<64x128xf32>
      %32 = arith.mulf %1, %31 : vector<64x128xf32>
      %c0_i32_25 = arith.constant 0 : i32
      %c4_i32_26 = arith.constant 4 : i32
      %33 = arith.addi %c0_i32_25, %c4_i32_26 : i32
      %c1_i32_27 = arith.constant 1 : i32
      scf.for %arg22 = %c0_i32_25 to %33 step %c1_i32_27  : i32 {
        %34 = arith.index_cast %arg22 : i32 to index
        %c0_29 = arith.constant 0 : index
        %c0_30 = arith.constant 0 : index
        %35 = vector.load %arg5[%34, %c0_29, %c0_30] : memref<4x128x32xf32, #tpu.memory_space<vmem>>, vector<1x128x32xf32>
        %36 = vector.shape_cast %35 : vector<1x128x32xf32> to vector<128x32xf32>
        %cst_31 = arith.constant dense<0.000000e+00> : vector<64x32xf32>
        %37 = tpu.matmul %32, %36, %cst_31 {dimension_numbers = #tpu.dot_dimension_numbers<[1], [0], [0], [1], [0, 0, 1, 1], [], []>} : vector<64x128xf32>, vector<128x32xf32>, vector<64x32xf32> -> vector<64x32xf32>
        %38 = arith.index_cast %arg22 : i32 to index
        %c0_32 = arith.constant 0 : index
        %c0_33 = arith.constant 0 : index
        %39 = vector.load %arg6[%38, %c0_32, %c0_33] : memref<4x1x32xf32, #tpu.memory_space<vmem>>, vector<1x1x32xf32>
        %40 = vector.shape_cast %39 : vector<1x1x32xf32> to vector<1x32xf32>
        %41 = vector.broadcast %40 : vector<1x32xf32> to vector<64x32xf32>
        %42 = arith.addf %37, %41 : vector<64x32xf32>
        %cst_34 = arith.constant 0.176776692 : f32
        %43 = vector.broadcast %cst_34 : f32 to vector<64x32xf32>
        %44 = arith.mulf %42, %43 : vector<64x32xf32>
        %45 = arith.index_cast %arg22 : i32 to index
        %c0_35 = arith.constant 0 : index
        %c0_36 = arith.constant 0 : index
        %46 = vector.load %arg18[%45, %c0_35, %c0_36] : memref<4x64x32xf32, #tpu.memory_space<vmem>>, vector<1x64x32xf32>
        %47 = vector.shape_cast %46 : vector<1x64x32xf32> to vector<64x32xf32>
        %48 = vector.shape_cast %44 : vector<64x32xf32> to vector<1x64x32xf32>
        tpu.vector_store %arg18[%45, %c0_35, %c0_36], %48 {strides = array<i32>} : memref<4x64x32xf32, #tpu.memory_space<vmem>>, vector<1x64x32xf32>,
      }
      %c4_i32_28 = arith.constant 4 : i32
    } else {
    }
    %c0_i32_7 = arith.constant 0 : i32
    %c4_i32 = arith.constant 4 : i32
    %15 = arith.addi %c0_i32_7, %c4_i32 : i32
    %c1_i32 = arith.constant 1 : i32
    scf.for %arg22 = %c0_i32_7 to %15 step %c1_i32  : i32 {
      %19 = arith.index_cast %arg22 : i32 to index
      %c0_11 = arith.constant 0 : index
      %c0_12 = arith.constant 0 : index
      %20 = vector.load %arg7[%19, %c0_11, %c0_12] : memref<4x128x32xf32, #tpu.memory_space<vmem>>, vector<1x128x32xf32>
      %21 = vector.shape_cast %20 : vector<1x128x32xf32> to vector<128x32xf32>
      %cst_13 = arith.constant dense<0.000000e+00> : vector<64x32xf32>
      %22 = tpu.matmul %11, %21, %cst_13 {dimension_numbers = #tpu.dot_dimension_numbers<[1], [0], [0], [1], [0, 0, 1, 1], [], []>} : vector<64x128xf32>, vector<128x32xf32>, vector<64x32xf32> -> vector<64x32xf32>
      %23 = arith.index_cast %arg22 : i32 to index
      %c0_14 = arith.constant 0 : index
      %c0_15 = arith.constant 0 : index
      %24 = vector.load %arg8[%23, %c0_14, %c0_15] : memref<4x1x32xf32, #tpu.memory_space<vmem>>, vector<1x1x32xf32>
      %25 = vector.shape_cast %24 : vector<1x1x32xf32> to vector<1x32xf32>
      %26 = vector.broadcast %25 : vector<1x32xf32> to vector<64x32xf32>
      %27 = arith.addf %22, %26 : vector<64x32xf32>
      %28 = arith.index_cast %arg22 : i32 to index
      %c0_16 = arith.constant 0 : index
      %c0_17 = arith.constant 0 : index
      %29 = vector.load %arg9[%28, %c0_16, %c0_17] : memref<4x128x32xf32, #tpu.memory_space<vmem>>, vector<1x128x32xf32>
      %30 = vector.shape_cast %29 : vector<1x128x32xf32> to vector<128x32xf32>
      %cst_18 = arith.constant dense<0.000000e+00> : vector<64x32xf32>
      %31 = tpu.matmul %11, %30, %cst_18 {dimension_numbers = #tpu.dot_dimension_numbers<[1], [0], [0], [1], [0, 0, 1, 1], [], []>} : vector<64x128xf32>, vector<128x32xf32>, vector<64x32xf32> -> vector<64x32xf32>
      %32 = arith.index_cast %arg22 : i32 to index
      %c0_19 = arith.constant 0 : index
      %c0_20 = arith.constant 0 : index
      %33 = vector.load %arg10[%32, %c0_19, %c0_20] : memref<4x1x32xf32, #tpu.memory_space<vmem>>, vector<1x1x32xf32>
      %34 = vector.shape_cast %33 : vector<1x1x32xf32> to vector<1x32xf32>
      %35 = vector.broadcast %34 : vector<1x32xf32> to vector<64x32xf32>
      %36 = arith.addf %31, %35 : vector<64x32xf32>
      %37 = arith.index_cast %arg22 : i32 to index
      %c0_21 = arith.constant 0 : index
      %c0_22 = arith.constant 0 : index
      %38 = vector.load %arg18[%37, %c0_21, %c0_22] : memref<4x64x32xf32, #tpu.memory_space<vmem>>, vector<1x64x32xf32>
      %39 = vector.shape_cast %38 : vector<1x64x32xf32> to vector<64x32xf32>
      %cst_23 = arith.constant dense<0.000000e+00> : vector<64x64xf32>
      %40 = tpu.matmul %39, %27, %cst_23 {dimension_numbers = #tpu.dot_dimension_numbers<[1], [1], [0], [0], [0, 0, 1, 0], [], []>} : vector<64x32xf32>, vector<64x32xf32>, vector<64x64xf32> -> vector<64x64xf32>
      %41 = arith.index_cast %arg22 : i32 to index
      %c0_24 = arith.constant 0 : index
      %c0_25 = arith.constant 0 : index
      %42 = vector.load %arg19[%41, %c0_24, %c0_25] : memref<4x64x1xf32, #tpu.memory_space<vmem>>, vector<1x64x1xf32>
      %43 = vector.shape_cast %42 : vector<1x64x1xf32> to vector<64x1xf32>
      %cst_26 = arith.constant dense<0xFF800000> : vector<64xf32>
      %44 = vector.multi_reduction <maximumf>, %40, %cst_26 [1] : vector<64x64xf32> to vector<64xf32>
      %45 = vector.shape_cast %44 : vector<64xf32> to vector<64x1xf32>
      %46 = arith.maximumf %43, %45 : vector<64x1xf32>
      %47 = arith.subf %43, %46 : vector<64x1xf32>
      %48 = math.exp %47 : vector<64x1xf32>
      %49 = vector.broadcast %46 : vector<64x1xf32> to vector<64x64xf32>
      %50 = arith.subf %40, %49 : vector<64x64xf32>
      %51 = math.exp %50 : vector<64x64xf32>
      %52 = arith.index_cast %arg22 : i32 to index
      %c0_27 = arith.constant 0 : index
      %c0_28 = arith.constant 0 : index
      %53 = vector.load %arg20[%52, %c0_27, %c0_28] : memref<4x64x1xf32, #tpu.memory_space<vmem>>, vector<1x64x1xf32>
      %54 = vector.shape_cast %53 : vector<1x64x1xf32> to vector<64x1xf32>
      %55 = arith.mulf %48, %54 : vector<64x1xf32>
      %cst_29 = arith.constant dense<0.000000e+00> : vector<64xf32>
      %56 = vector.multi_reduction <add>, %51, %cst_29 [1] : vector<64x64xf32> to vector<64xf32>
      %57 = vector.shape_cast %56 : vector<64xf32> to vector<64x1xf32>
      %58 = arith.addf %55, %57 : vector<64x1xf32>
      %59 = arith.index_cast %arg22 : i32 to index
      %c0_30 = arith.constant 0 : index
      %c0_31 = arith.constant 0 : index
      %60 = vector.load %arg20[%59, %c0_30, %c0_31] : memref<4x64x1xf32, #tpu.memory_space<vmem>>, vector<1x64x1xf32>
      %61 = vector.shape_cast %60 : vector<1x64x1xf32> to vector<64x1xf32>
      %62 = vector.shape_cast %58 : vector<64x1xf32> to vector<1x64x1xf32>
      tpu.vector_store %arg20[%59, %c0_30, %c0_31], %62 {strides = array<i32>} : memref<4x64x1xf32, #tpu.memory_space<vmem>>, vector<1x64x1xf32>,
      %63 = arith.index_cast %arg22 : i32 to index
      %c0_32 = arith.constant 0 : index
      %c0_33 = arith.constant 0 : index
      %64 = vector.load %arg21[%63, %c0_32, %c0_33] : memref<4x64x32xf32, #tpu.memory_space<vmem>>, vector<1x64x32xf32>
      %65 = vector.shape_cast %64 : vector<1x64x32xf32> to vector<64x32xf32>
      %66 = vector.broadcast %48 : vector<64x1xf32> to vector<64x32xf32>
      %67 = arith.mulf %66, %65 : vector<64x32xf32>
      %cst_34 = arith.constant dense<0.000000e+00> : vector<64x32xf32>
      %68 = tpu.matmul %51, %36, %cst_34 {dimension_numbers = #tpu.dot_dimension_numbers<[1], [0], [0], [1], [0, 0, 1, 1], [], []>} : vector<64x64xf32>, vector<64x32xf32>, vector<64x32xf32> -> vector<64x32xf32>
      %69 = arith.addf %67, %68 : vector<64x32xf32>
      %70 = arith.index_cast %arg22 : i32 to index
      %c0_35 = arith.constant 0 : index
      %c0_36 = arith.constant 0 : index
      %71 = vector.load %arg21[%70, %c0_35, %c0_36] : memref<4x64x32xf32, #tpu.memory_space<vmem>>, vector<1x64x32xf32>
      %72 = vector.shape_cast %71 : vector<1x64x32xf32> to vector<64x32xf32>
      %73 = vector.shape_cast %69 : vector<64x32xf32> to vector<1x64x32xf32>
      tpu.vector_store %arg21[%70, %c0_35, %c0_36], %73 {strides = array<i32>} : memref<4x64x32xf32, #tpu.memory_space<vmem>>, vector<1x64x32xf32>,
      %74 = arith.index_cast %arg22 : i32 to index
      %c0_37 = arith.constant 0 : index
      %c0_38 = arith.constant 0 : index
      %75 = vector.load %arg19[%74, %c0_37, %c0_38] : memref<4x64x1xf32, #tpu.memory_space<vmem>>, vector<1x64x1xf32>
      %76 = vector.shape_cast %75 : vector<1x64x1xf32> to vector<64x1xf32>
      %77 = vector.shape_cast %46 : vector<64x1xf32> to vector<1x64x1xf32>
      tpu.vector_store %arg19[%74, %c0_37, %c0_38], %77 {strides = array<i32>} : memref<4x64x1xf32, #tpu.memory_space<vmem>>, vector<1x64x1xf32>,
    }
    %c4_i32_8 = arith.constant 4 : i32
    %c1_i32_9 = arith.constant 1 : i32
    %16 = arith.cmpi eq, %arg2, %c1_i32_9 : i32
    %17 = arith.extui %16 : i1 to i32
    %c0_i32_10 = arith.constant 0 : i32
    %18 = arith.cmpi ne, %17, %c0_i32_10 : i32
    scf.if %18 {
      %cst_11 = arith.constant 0.000000e+00 : f32
      %19 = vector.broadcast %cst_11 : f32 to vector<64x128xf32>
      %c0_i32_12 = arith.constant 0 : i32
      %c4_i32_13 = arith.constant 4 : i32
      %20 = arith.addi %c0_i32_12, %c4_i32_13 : i32
      %c1_i32_14 = arith.constant 1 : i32
      %21 = scf.for %arg22 = %c0_i32_12 to %20 step %c1_i32_14 iter_args(%arg23 = %19) -> (vector<64x128xf32>)  : i32 {
        %88 = arith.index_cast %arg22 : i32 to index
        %c0_48 = arith.constant 0 : index
        %c0_49 = arith.constant 0 : index
        %89 = vector.load %arg21[%88, %c0_48, %c0_49] : memref<4x64x32xf32, #tpu.memory_space<vmem>>, vector<1x64x32xf32>
        %90 = vector.shape_cast %89 : vector<1x64x32xf32> to vector<64x32xf32>
        %91 = arith.index_cast %arg22 : i32 to index
        %c0_50 = arith.constant 0 : index
        %c0_51 = arith.constant 0 : index
        %92 = vector.load %arg20[%91, %c0_50, %c0_51] : memref<4x64x1xf32, #tpu.memory_space<vmem>>, vector<1x64x1xf32>
        %93 = vector.shape_cast %92 : vector<1x64x1xf32> to vector<64x1xf32>
        %94 = tpu.reciprocal %93 {approx = true} : vector<64x1xf32> -> vector<64x1xf32>
        %95 = vector.broadcast %94 : vector<64x1xf32> to vector<64x32xf32>
        %96 = arith.mulf %90, %95 : vector<64x32xf32>
        %97 = arith.index_cast %arg22 : i32 to index
        %c0_52 = arith.constant 0 : index
        %c0_53 = arith.constant 0 : index
        %98 = vector.load %arg11[%97, %c0_52, %c0_53] : memref<4x32x128xf32, #tpu.memory_space<vmem>>, vector<1x32x128xf32>
        %99 = vector.shape_cast %98 : vector<1x32x128xf32> to vector<32x128xf32>
        %cst_54 = arith.constant dense<0.000000e+00> : vector<64x128xf32>
        %100 = tpu.matmul %96, %99, %cst_54 {dimension_numbers = #tpu.dot_dimension_numbers<[1], [0], [0], [1], [0, 0, 1, 1], [], []>} : vector<64x32xf32>, vector<32x128xf32>, vector<64x128xf32> -> vector<64x128xf32>
        %101 = arith.addf %arg23, %100 : vector<64x128xf32>
        scf.yield %101 : vector<64x128xf32>
      }
      %c4_i32_15 = arith.constant 4 : i32
      %22 = arith.addf %1, %21 : vector<64x128xf32>
      %c0_16 = arith.constant 0 : index
      %c0_17 = arith.constant 0 : index
      %23 = vector.load %arg12[%c0_16, %c0_17] : memref<1x128xf32, #tpu.memory_space<vmem>>, vector<1x128xf32>
      %24 = vector.broadcast %23 : vector<1x128xf32> to vector<64x128xf32>
      %25 = arith.addf %22, %24 : vector<64x128xf32>
      %26 = arith.mulf %25, %25 : vector<64x128xf32>
      %cst_18 = arith.constant dense<0.000000e+00> : vector<64xf32>
      %27 = vector.multi_reduction <add>, %26, %cst_18 [1] : vector<64x128xf32> to vector<64xf32>
      %28 = vector.shape_cast %27 : vector<64xf32> to vector<64x1xf32>
      %cst_19 = arith.constant 1.000000e-24 : f32
      %29 = vector.broadcast %cst_19 : f32 to vector<64x1xf32>
      %30 = arith.maximumf %28, %29 : vector<64x1xf32>
      %31 = math.rsqrt %30 : vector<64x1xf32>
      %32 = vector.broadcast %31 : vector<64x1xf32> to vector<64x128xf32>
      %33 = arith.mulf %25, %32 : vector<64x128xf32>
      %c0_20 = arith.constant 0 : index
      %c0_21 = arith.constant 0 : index
      %34 = vector.load %arg13[%c0_20, %c0_21] : memref<128x512xf32, #tpu.memory_space<vmem>>, vector<128x512xf32>
      %cst_22 = arith.constant dense<0.000000e+00> : vector<64x512xf32>
      %35 = tpu.matmul %33, %34, %cst_22 {dimension_numbers = #tpu.dot_dimension_numbers<[1], [0], [0], [1], [0, 0, 1, 1], [], []>} : vector<64x128xf32>, vector<128x512xf32>, vector<64x512xf32> -> vector<64x512xf32>
      %c0_23 = arith.constant 0 : index
      %c0_24 = arith.constant 0 : index
      %36 = vector.load %arg14[%c0_23, %c0_24] : memref<1x512xf32, #tpu.memory_space<vmem>>, vector<1x512xf32>
      %37 = vector.broadcast %36 : vector<1x512xf32> to vector<64x512xf32>
      %38 = arith.addf %35, %37 : vector<64x512xf32>
      %cst_25 = arith.constant 5.000000e-01 : f32
      %39 = vector.broadcast %cst_25 : f32 to vector<64x512xf32>
      %40 = arith.mulf %39, %38 : vector<64x512xf32>
      %cst_26 = arith.constant 0.707106769 : f32
      %41 = vector.broadcast %cst_26 : f32 to vector<64x512xf32>
      %42 = arith.mulf %38, %41 : vector<64x512xf32>
      %43 = math.absf %42 : vector<64x512xf32>
      %cst_27 = arith.constant 0.327591091 : f32
      %44 = vector.broadcast %cst_27 : f32 to vector<64x512xf32>
      %45 = arith.mulf %44, %43 : vector<64x512xf32>
      %cst_28 = arith.constant 1.000000e+00 : f32
      %46 = vector.broadcast %cst_28 : f32 to vector<64x512xf32>
      %47 = arith.addf %46, %45 : vector<64x512xf32>
      %cst_29 = arith.constant 1.000000e+00 : f32
      %48 = vector.broadcast %cst_29 : f32 to vector<64x512xf32>
      %49 = arith.divf %48, %47 : vector<64x512xf32>
      %cst_30 = arith.constant 1.06140542 : f32
      %50 = vector.broadcast %cst_30 : f32 to vector<64x512xf32>
      %51 = arith.mulf %49, %50 : vector<64x512xf32>
      %cst_31 = arith.constant -1.45315206 : f32
      %52 = vector.broadcast %cst_31 : f32 to vector<64x512xf32>
      %53 = arith.addf %52, %51 : vector<64x512xf32>
      %54 = arith.mulf %49, %53 : vector<64x512xf32>
      %cst_32 = arith.constant 1.42141378 : f32
      %55 = vector.broadcast %cst_32 : f32 to vector<64x512xf32>
      %56 = arith.addf %55, %54 : vector<64x512xf32>
      %57 = arith.mulf %49, %56 : vector<64x512xf32>
      %cst_33 = arith.constant -0.284496725 : f32
      %58 = vector.broadcast %cst_33 : f32 to vector<64x512xf32>
      %59 = arith.addf %58, %57 : vector<64x512xf32>
      %60 = arith.mulf %49, %59 : vector<64x512xf32>
      %cst_34 = arith.constant 0.254829586 : f32
      %61 = vector.broadcast %cst_34 : f32 to vector<64x512xf32>
      %62 = arith.addf %61, %60 : vector<64x512xf32>
      %63 = arith.mulf %49, %62 : vector<64x512xf32>
      %cst_35 = arith.constant 0.000000e+00 : f32
      %64 = vector.broadcast %cst_35 : f32 to vector<64x512xf32>
      %65 = arith.subf %64, %43 : vector<64x512xf32>
      %66 = arith.mulf %65, %43 : vector<64x512xf32>
      %67 = math.exp %66 : vector<64x512xf32>
      %68 = arith.mulf %63, %67 : vector<64x512xf32>
      %cst_36 = arith.constant 1.000000e+00 : f32
      %69 = vector.broadcast %cst_36 : f32 to vector<64x512xf32>
      %70 = arith.subf %69, %68 : vector<64x512xf32>
      %cst_37 = arith.constant 0.000000e+00 : f32
      %71 = vector.broadcast %cst_37 : f32 to vector<64x512xf32>
      %72 = arith.cmpf olt, %42, %71 : vector<64x512xf32>
      %cst_38 = arith.constant 0.000000e+00 : f32
      %73 = vector.broadcast %cst_38 : f32 to vector<64x512xf32>
      %74 = arith.subf %73, %70 : vector<64x512xf32>
      %75 = arith.select %72, %74, %70 : vector<64x512xi1>, vector<64x512xf32>
      %cst_39 = arith.constant 1.000000e+00 : f32
      %76 = vector.broadcast %cst_39 : f32 to vector<64x512xf32>
      %77 = arith.addf %76, %75 : vector<64x512xf32>
      %78 = arith.mulf %40, %77 : vector<64x512xf32>
      %c0_40 = arith.constant 0 : index
      %c0_41 = arith.constant 0 : index
      %79 = vector.load %arg15[%c0_40, %c0_41] : memref<512x128xf32, #tpu.memory_space<vmem>>, vector<512x128xf32>
      %cst_42 = arith.constant dense<0.000000e+00> : vector<64x128xf32>
      %80 = tpu.matmul %78, %79, %cst_42 {dimension_numbers = #tpu.dot_dimension_numbers<[1], [0], [0], [1], [0, 0, 1, 1], [], []>} : vector<64x512xf32>, vector<512x128xf32>, vector<64x128xf32> -> vector<64x128xf32>
      %c0_43 = arith.constant 0 : index
      %c0_44 = arith.constant 0 : index
      %81 = vector.load %arg16[%c0_43, %c0_44] : memref<1x128xf32, #tpu.memory_space<vmem>>, vector<1x128xf32>
      %82 = vector.broadcast %81 : vector<1x128xf32> to vector<64x128xf32>
      %83 = arith.addf %80, %82 : vector<64x128xf32>
      %84 = arith.addf %25, %83 : vector<64x128xf32>
      %c0_45 = arith.constant 0 : index
      %c0_46 = arith.constant 0 : index
      %c0_47 = arith.constant 0 : index
      %85 = vector.load %arg17[%c0_45, %c0_46, %c0_47] : memref<1x64x128xf32, #tpu.memory_space<vmem>>, vector<1x64x128xf32>
      %86 = vector.shape_cast %85 : vector<1x64x128xf32> to vector<64x128xf32>
      %87 = vector.shape_cast %84 : vector<64x128xf32> to vector<1x64x128xf32>
      tpu.vector_store %arg17[%c0_45, %c0_46, %c0_47], %87 {strides = array<i32>} : memref<1x64x128xf32, #tpu.memory_space<vmem>>, vector<1x64x128xf32>,
    } else {
    }
    return
  }
  func.func @transform_0(%arg0: i32, %arg1: i32, %arg2: i32) -> (i32, i32, i32) {
    %c0_i32 = arith.constant 0 : i32
    %c0_i32_0 = arith.constant 0 : i32
    return %arg0, %arg1, %c0_i32 : i32, i32, i32
  }
  func.func @transform_1(%arg0: i32, %arg1: i32, %arg2: i32) -> (i32, i32, i32) {
    %c0_i32 = arith.constant 0 : i32
    %c0_i32_0 = arith.constant 0 : i32
    return %arg0, %arg2, %c0_i32 : i32, i32, i32
  }
  func.func @transform_2(%arg0: i32, %arg1: i32, %arg2: i32) -> (i32, i32, i32) {
    %c0_i32 = arith.constant 0 : i32
    %c0_i32_0 = arith.constant 0 : i32
    %c0_i32_1 = arith.constant 0 : i32
    %c0_i32_2 = arith.constant 0 : i32
    return %c0_i32, %c0_i32_0, %c0_i32_1 : i32, i32, i32
  }
  func.func @transform_3(%arg0: i32, %arg1: i32, %arg2: i32) -> (i32, i32, i32) {
    %c0_i32 = arith.constant 0 : i32
    %c0_i32_0 = arith.constant 0 : i32
    %c0_i32_1 = arith.constant 0 : i32
    %c0_i32_2 = arith.constant 0 : i32
    return %c0_i32, %c0_i32_0, %c0_i32_1 : i32, i32, i32
  }
  func.func @transform_4(%arg0: i32, %arg1: i32, %arg2: i32) -> (i32, i32, i32) {
    %c0_i32 = arith.constant 0 : i32
    %c0_i32_0 = arith.constant 0 : i32
    %c0_i32_1 = arith.constant 0 : i32
    %c0_i32_2 = arith.constant 0 : i32
    return %c0_i32, %c0_i32_0, %c0_i32_1 : i32, i32, i32
  }
  func.func @transform_5(%arg0: i32, %arg1: i32, %arg2: i32) -> (i32, i32, i32) {
    %c0_i32 = arith.constant 0 : i32
    %c0_i32_0 = arith.constant 0 : i32
    %c0_i32_1 = arith.constant 0 : i32
    %c0_i32_2 = arith.constant 0 : i32
    return %c0_i32, %c0_i32_0, %c0_i32_1 : i32, i32, i32
  }
  func.func @transform_6(%arg0: i32, %arg1: i32, %arg2: i32) -> (i32, i32, i32) {
    %c0_i32 = arith.constant 0 : i32
    %c0_i32_0 = arith.constant 0 : i32
    %c0_i32_1 = arith.constant 0 : i32
    %c0_i32_2 = arith.constant 0 : i32
    return %c0_i32, %c0_i32_0, %c0_i32_1 : i32, i32, i32
  }
  func.func @transform_7(%arg0: i32, %arg1: i32, %arg2: i32) -> (i32, i32, i32) {
    %c0_i32 = arith.constant 0 : i32
    %c0_i32_0 = arith.constant 0 : i32
    %c0_i32_1 = arith.constant 0 : i32
    %c0_i32_2 = arith.constant 0 : i32
    return %c0_i32, %c0_i32_0, %c0_i32_1 : i32, i32, i32
  }
  func.func @transform_8(%arg0: i32, %arg1: i32, %arg2: i32) -> (i32, i32, i32) {
    %c0_i32 = arith.constant 0 : i32
    %c0_i32_0 = arith.constant 0 : i32
    %c0_i32_1 = arith.constant 0 : i32
    %c0_i32_2 = arith.constant 0 : i32
    return %c0_i32, %c0_i32_0, %c0_i32_1 : i32, i32, i32
  }
  func.func @transform_9(%arg0: i32, %arg1: i32, %arg2: i32) -> (i32, i32) {
    %c0_i32 = arith.constant 0 : i32
    %c0_i32_0 = arith.constant 0 : i32
    %c0_i32_1 = arith.constant 0 : i32
    return %c0_i32, %c0_i32_0 : i32, i32
  }
  func.func @transform_10(%arg0: i32, %arg1: i32, %arg2: i32) -> (i32, i32) {
    %c0_i32 = arith.constant 0 : i32
    %c0_i32_0 = arith.constant 0 : i32
    %c0_i32_1 = arith.constant 0 : i32
    return %c0_i32, %c0_i32_0 : i32, i32
  }
  func.func @transform_11(%arg0: i32, %arg1: i32, %arg2: i32) -> (i32, i32) {
    %c0_i32 = arith.constant 0 : i32
    %c0_i32_0 = arith.constant 0 : i32
    %c0_i32_1 = arith.constant 0 : i32
    return %c0_i32, %c0_i32_0 : i32, i32
  }
  func.func @transform_12(%arg0: i32, %arg1: i32, %arg2: i32) -> (i32, i32) {
    %c0_i32 = arith.constant 0 : i32
    %c0_i32_0 = arith.constant 0 : i32
    %c0_i32_1 = arith.constant 0 : i32
    return %c0_i32, %c0_i32_0 : i32, i32
  }
  func.func @transform_13(%arg0: i32, %arg1: i32, %arg2: i32) -> (i32, i32) {
    %c0_i32 = arith.constant 0 : i32
    %c0_i32_0 = arith.constant 0 : i32
    %c0_i32_1 = arith.constant 0 : i32
    return %c0_i32, %c0_i32_0 : i32, i32
  }
  func.func @transform_14(%arg0: i32, %arg1: i32, %arg2: i32) -> (i32, i32, i32) {
    %c0_i32 = arith.constant 0 : i32
    %c0_i32_0 = arith.constant 0 : i32
    return %arg0, %arg1, %c0_i32 : i32, i32, i32
  }
}

</mosaic_0001>

<bundles_post_ra>
// kernel: tpu_custom_call.1
= control target key start
LH: loop header
LB: loop body
LE: loop exit
PB: predicated region body
PF: predicated region fallthrough
CT: control target
= control target key end

     0   :  { %s7553_s0 = inlined_call_operand.vmem [shape: f32[2,128,128], index: 0, kind: input, shape index: {}]   ;;  %s7554_s1 = inlined_call_operand.vmem [shape: f32[2,128,128], index: 1, kind: input, shape index: {}]   ;;  %s7555_s2 = inlined_call_operand.vmem [shape: f32[4,128,32], index: 2, kind: input, shape index: {}]   ;;  %s7556_s3 = inlined_call_operand.hbm [shape: f32[4,1,32], index: 3, kind: input, shape index: {}]   ;;  %s7557_s4 = inlined_call_operand.vmem [shape: f32[4,128,32], index: 4, kind: input, shape index: {}]   ;;  %s7558_s5 = inlined_call_operand.hbm [shape: f32[4,1,32], index: 5, kind: input, shape index: {}]   ;;  %s7559_s6 = inlined_call_operand.vmem [shape: f32[4,128,32], index: 6, kind: input, shape index: {}]   ;;  %s7560_s7 = inlined_call_operand.vmem [shape: f32[4,1,32], index: 7, kind: input, shape index: {}]   ;;  %s7561_s8 = inlined_call_operand.vmem [shape: f32[4,32,128], index: 8, kind: input, shape index: {}]   ;;  %s7562_s9 = inlined_call_operand.vmem [shape: f32[1,128], index: 9, kind: input, shape index: {}]   ;;  %s7563_s10 = inlined_call_operand.vmem [shape: f32[128,512], index: 10, kind: input, shape index: {}]   ;;  %s7564_s11 = inlined_call_operand.vmem [shape: f32[1,512], index: 11, kind: input, shape index: {}]   ;;  %s7565_s12 = inlined_call_operand.vmem [shape: f32[512,128], index: 12, kind: input, shape index: {}]   ;;  %s7566_s13 = inlined_call_operand.vmem [shape: f32[1,128], index: 13, kind: input, shape index: {}]   ;;  %s7567_s14 = inlined_call_operand.hbm [shape: f32[2,128,128], index: 14, kind: output, shape index: {}]  }
   0x1   :  { %7658 = sst [smem:[#allocation112_spill]] %s7563_s10 }
   0x2   :  { %7659 = sst [smem:[#allocation113_spill]] %s7564_s11 }
   0x3   :  { %7660 = sst [smem:[#allocation114_spill]] %s7565_s12 }
   0x4   :  { %7661 = sst [smem:[#allocation115_spill]] %s7566_s13 }
   0x5   :  { %7662 = sst [smem:[#allocation116_spill]] %s7567_s14 }
   0x6   :  { %19 = vsyncpa [#allocation7], 0 }
   0x7   :  { %20 = vsyncpa [#allocation10], 0 }
   0x8   :  { %21 = vsyncpa [#allocation8], 0 }
   0x9   :  { %23 = vsyncpa [#allocation8 + $0x1], 0  ;;  %s5336_s29 = smov 0   ;;  %s5338_s30 = smov 0  }
   0xa   :  { %s5340_s15 = smov 0   ;;  %s5342_s16 = smov 0  }
   0xb   :  { %s5344_s17 = smov 0   ;;  %s5346_s18 = smov 0  }
   0xc   :  { %s5348_s19 = smov 0   ;;  %s5350_s20 = smov 0  }
   0xd   :  { %s5352_s21 = smov 0   ;;  %s5354_s22 = smov 0  }
   0xe LB: > { %7663 = sst [smem:[#allocation15_spill]] %s5167_s29  ;;  %s3757_s23 = sadd.s32 4294967295, %s5203_s22   ;;  %s5203_s22 = sphi %s5354_s22, %s29_s22   ;;  %s5199_s21 = sphi %s5352_s21, %s7889_s21   ;;  %s5195_s20 = sphi %s5350_s20, %s7885_s20   ;;  %s5191_s19 = sphi %s5348_s19, %s7884_s19   ;;  %s5187_s18 = sphi %s5346_s18, %s7883_s18   ;;  %s5183_s17 = sphi %s5344_s17, %s7882_s17   ;;  %s5179_s16 = sphi %s5342_s16, %s7881_s16   ;;  %s5175_s15 = sphi %s5340_s15, %s7880_s15   ;;  %s5171_s30 = sphi %s5338_s30, %s7888_s30   ;;  %s5167_s29 = sphi %s5336_s29, %s7887_s29  }
   0xf   : > { %7664 = sst [smem:[#allocation16_spill]] %s5175_s15  ;;  %s3758_s24 = sadd.s32 4294967294, %s5203_s22  }
  0x10   : > { %7665 = sst [smem:[#allocation17_spill]] %s5191_s19  ;;  %s41_s25 = sadd.s32 1, %s5191_s19 }
  0x11   : > { %7666 = sst [smem:[#allocation18_spill]] %s5195_s20  ;;  %s44_s26 = sadd.s32 1, %s5195_s20 }
  0x12   : > { %7667 = sst [smem:[#allocation19_spill]] %s5199_s21  ;;  %p42_p0 = scmp.ge.s32.totalorder %s41_s25, 2 }
  0x13   : > { %7668 = sst [smem:[#allocation20_spill]] %s5203_s22  ;;  %s48_s27 = sadd.s32 1, %s5199_s21 }
  0x14   : > { %s365_s28 = sadd.s32 1, %s5175_s15  ;;  %p375_p1 = scmp.ne.s32.totalorder %s5175_s15, %s5171_s30 }
  0x15   : > { %s7891_s25 = smov (%p42_p0, %s41_s25), 0  ;;  %s7893_s26 = smov (!%p42_p0, %s44_s26), %s5195_s20 }
  0x16   : > { %7669 = sst [smem:[#allocation21_spill]] %s7891_s25  ;;  %p376_p2 = scmp.eq.s32.totalorder %s3757_s23, 7 }
  0x17   : > { %p381_p3 = scmp.ne.s32.totalorder %s5171_s30, %s5167_s29  ;;  %p46_p4 = scmp.ge.s32.totalorder %s7893_s26, 2 }
  0x18   : > { %p382_p5 = scmp.eq.s32.totalorder %s3758_s24, 7  ;;  %p5399_p6 = por %p376_p2, %p375_p1 }
  0x19   : > { %p3759_p7 = scmp.ge.s32.totalorder %s5203_s22, 1  ;;  %s7895_s26 = smov (%p46_p4, %s7893_s26), 0 }
  0x1a   : > { %s7670_s14 = scalar_select %p5399_p6, 1, 0 }
  0x1b   : > { %7672 = sst [smem:[#allocation23_spill]] %s7895_s26  ;;  %s7897_s27 = smov (!%p46_p4, %s48_s27), %s5199_s21 }
  0x1c   : > { %7671 = sst [smem:[#allocation22_spill]] %s7670_s14  ;;  %s361_s19 = ssub.s32 %s5195_s20, %s7895_s26 }
  0x1d   : > { %p5409_p8 = por %p382_p5, %p381_p3  ;;  %p50_p9 = scmp.ge.s32.totalorder %s7897_s27, 2 }
  0x1e   : > { %p389_p10 = scmp.lt.s32.totalorder %s5203_s22, 9  ;;  %p5414_p11 = scmp.eq.s32.totalorder %s3757_s23, 0 }
  0x1f   : > { %s7673_s13 = scalar_select %p5409_p8, 1, 0 }
  0x20   : > { %s7675_s25 = scalar_select %p5414_p11, 1, 0 }
  0x21   : > { %7674 = sst [smem:[#allocation24_spill]] %s7673_s13  ;;  %s7899_s27 = smov (%p50_p9, %s7897_s27), 0 }
  0x22   : > { %7676 = sst [smem:[#allocation25_spill]] %s7899_s27  ;;  %p5420_p12 = pnand %p3759_p7, %p389_p10 }
  0x23   : > { %s360_s26 = ssub.s32 %s5199_s21, %s7899_s27  ;;  %s5249_s20 = smov [#allocation6]  }
  0x24   : > { %s7677_s24 = scalar_select %p5420_p12, 1, 0 }
  0x25   : > { %s404_s29 = sshll.u32 %s5249_s20, 4  ;;  %s362_s14 = sor.u32 %s361_s19, %s360_s26  ;;  %s405_s29 = int_to_ptr.vmem [resolvable:$true] %s404_s29 }
  0x26   : > { %p4562_p13 = pneg %p5420_p12  ;;  %p363_p0 = scmp.eq.s32.totalorder %s362_s14, 0 }
  0x27   : > { %s4985_s27 = scalar_lea.hbm %s7556_s3, 64 }
  0x28   : > { %p5430_p1 = pnand %p5414_p11, %p4562_p13  ;;  %p4986_p2 = scmp.ne.s32.totalorder %s7556_s3, %s4985_s27 }
  0x29   : > { %s5435_s13 = scalar_select %p363_p0, %s5175_s15, %s365_s28  }
  0x2a   : > { %p4987_p3 = pneg %p5430_p1  ;;  %p4992_p7 = scmp.lt.u32.totalorder %s4985_s27, %s7556_s3 }
  0x2b   : > { %7679 = sst [smem:[#allocation26_spill]] %s5435_s13 }
  0x2c   : > { %p4988_p4 = pnand %p4987_p3, %p4986_p2 }
  0x2e   : > { %p4989_p5 = pneg %p4988_p4 }
  0x30   : > { %p4994_p9 = pnand %p4992_p7, %p4989_p5 }
  0x32   : > { %4997 = shalt.err (!%p4994_p9)
}
  0x33   : > { %s4998_s26 = scalar_lea.vmem %s405_s29, 64  ;;  %p5006_p8 = scmp.lt.s32.totalorder %s405_s29, %s405_s29 }
  0x34   : > { %p4999_p10 = scmp.ne.s32.totalorder %s405_s29, %s4998_s26  ;;  %p5007_p6 = scmp.lt.s32.totalorder %s4998_s26, %s4998_s26 }
  0x36   : > { %p5001_p13 = pnand %p4999_p10, %p4987_p3  ;;  %p5008_p11 = por %p5007_p6, %p5006_p8 }
  0x38   : > { %p5002_p0 = pneg %p5001_p13 }
  0x3a   : > { %p5009_p12 = pnand %p5008_p11, %p5002_p0 }
  0x3c   : > { %5012 = shalt.err (!%p5009_p12)
}
  0x3d   : > { %s5250_s11 = smov 16   ;;  %s5251_s21 = smov 1  }
  0x3e   : > { %4565 = dma.hbm_to_vmem [thread:$0]  (!%p5430_p1), %s7556_s3, 64, %s405_s29, [#allocation7], %s5250_s11, %s5250_s11, %s5251_s21  }
  0x3f   : > { %s5252_s28 = smov [#allocation9]   ;;  %s5013_s13 = scalar_lea.hbm %s7558_s5, 64 }
  0x40   : > { %s420_s20 = sshll.u32 %s5252_s28, 4  ;;  %p5014_p6 = scmp.ne.s32.totalorder %s7558_s5, %s5013_s13  ;;  %s421_s20 = int_to_ptr.vmem [resolvable:$true] %s420_s20 }
  0x41   : > { %p5020_p12 = scmp.lt.u32.totalorder %s5013_s13, %s7558_s5 }
  0x42   : > { %p5016_p8 = pnand %p5014_p6, %p4987_p3 }
  0x44   : > { %p5017_p11 = pneg %p5016_p8 }
  0x46   : > { %p5022_p2 = pnand %p5020_p12, %p5017_p11 }
  0x48   : > { %5025 = shalt.err (!%p5022_p2)
}
  0x49   : > { %s5026_s29 = scalar_lea.vmem %s421_s20, 64  ;;  %p5034_p9 = scmp.lt.s32.totalorder %s421_s20, %s421_s20 }
  0x4a   : > { %p5027_p4 = scmp.ne.s32.totalorder %s421_s20, %s5026_s29  ;;  %p5035_p10 = scmp.lt.s32.totalorder %s5026_s29, %s5026_s29 }
  0x4c   : > { %p5029_p5 = pnand %p5027_p4, %p4987_p3  ;;  %p5036_p13 = por %p5035_p10, %p5034_p9 }
  0x4e   : > { %p5030_p7 = pneg %p5029_p5 }
  0x50   : > { %p5037_p0 = pnand %p5036_p13, %p5030_p7 }
  0x52   : > { %5040 = shalt.err (!%p5037_p0)
}
  0x53   : > { %4568 = dma.hbm_to_vmem [thread:$0]  (!%p5430_p1), %s7558_s5, 64, %s421_s20, [#allocation10], %s5250_s11, %s5250_s11, %s5251_s21  }
  0x54   : > { %p7680_p6 = scmp.ne.s32.totalorder %s7677_s24, 0 }
  0x55   : > { %p7681_p8 = scmp.ne.s32.totalorder (!%p7680_p6), %s7675_s25, 0 }
  0x56   : > { %486 = sbr.rel (%p7680_p6) target bundleno = 2839 (0xb17), region = 76 }
  0x5d   : > { %5154 = dma.done.wait (%p7681_p8), [#allocation7], 64  }
  0x5e   : > { %5156 = vsyncadd (%p7681_p8), [#allocation7], 4294967232 }
  0x5f   : > { %5158 = dma.done.wait (%p7681_p8), [#allocation10], 64  }
  0x60   : > { %5160 = vsyncadd (%p7681_p8), [#allocation10], 4294967232  ;;  %s5490_s10 = sshll.u32 %s5183_s17, 3  ;;  %p550_p1 = scmp.lt.s32.totalorder %s5187_s18, 1 }
  0x61   : > { %p552_p3 = scmp.lt.s32.totalorder %s5490_s10, 15  ;;  %s3770_s12 = sshll.u32 %s5179_s16, 3 }
  0x62   : > { %s551_s13 = scalar_select %p550_p1, %s5187_s18, 1 }
  0x63   : > { %s553_s24 = scalar_select %p552_p3, %s5490_s10, 15 }
  0x64   : > { %s3768_s23 = sshll.u32 %s551_s13, 4  ;;  %p562_p11 = scmp.lt.s32.totalorder %s3770_s12, 15 }
  0x65   : > { %s555_s11 = sadd.s32 %s3768_s23, %s553_s24  ;;  %s546_s29 = sand.u32 1, %s5171_s30  }
  0x66   : > { %s3769_s21 = sshll.u32 %s555_s11, 3  ;;  %s7901_s12 = smov (!%p562_p11, %s3770_s12), 15 }
  0x67   : > { %s557_s28 = scalar_lea.vmem %s7553_s0, %s3769_s21  ;;  %s565_s17 = sadd.s32 %s3768_s23, %s7901_s12 }
  0x68   : > { %v5500_v0 = vld [vmem:[%s557_s28] sm:$0xff]  ;;  %v5502_v1 = vld [vmem:[%s557_s28 + $0x8] sm:$0xff]  ;;  %v5504_v2 = vld [vmem:[%s557_s28 + $0x10] sm:$0xff]  ;;  %s3772_s20 = sshll.u32 %s565_s17, 3  ;;  %s5522_s15 = sshll.u32 %s546_s29, 6 }
  0x69   : > { %v5506_v3 = vld [vmem:[%s557_s28 + $0x18] sm:$0xff]  ;;  %v5508_v4 = vld [vmem:[%s557_s28 + $0x20] sm:$0xff]  ;;  %v5510_v5 = vld [vmem:[%s557_s28 + $0x28] sm:$0xff]  ;;  %s567_s26 = scalar_lea.vmem %s7554_s1, %s3772_s20  ;;  %s5541_s22 = scalar_lea.vmem [#allocation11], %s5522_s15 }
  0x6a   : > { %v5512_v6 = vld [vmem:[%s557_s28 + $0x30] sm:$0xff]  ;;  %v5514_v7 = vld [vmem:[%s557_s28 + $0x38] sm:$0xff]  ;;  %v578_v9 = vld [vmem:[%s567_s26] sm:$0xff]  ;;  %p3773_p12 = scmp.ne.s32.totalorder %s5179_s16, 0 }
  0x6b   : > { %v580_v8 = vld [vmem:[%s567_s26 + $0x10] sm:$0xff]  ;;  %v581_v10 = vld [vmem:[%s567_s26 + $0x18] sm:$0xff]  ;;  %v586_v12 = vmul.f32 %v578_v9, %v578_v9  ;;  %v579_v13 = vld [vmem:[%s567_s26 + $0x8] sm:$0xff]  ;;  %v738_v56 = vmul.f32 (!%p3773_p12), %v5504_v2, %v5504_v2  ;;  %v736_v57 = vmul.f32 (!%p3773_p12), %v5500_v0, %v5500_v0  ;;  %v739_v58 = vmul.f32 (!%p3773_p12), %v5506_v3, %v5506_v3  ;;  %s5744_s12 = smov (!%p3773_p12), 0  }
  0x6c   : > { %v588_v11 = vmul.f32 %v580_v8, %v580_v8  ;;  %v589_v14 = vmul.f32 %v581_v10, %v581_v10  ;;  %v587_v15 = vmul.f32 %v579_v13, %v579_v13  ;;  %v583_v16 = vld [vmem:[%s567_s26 + $0x28] sm:$0xff]  ;;  %v582_v17 = vld [vmem:[%s567_s26 + $0x20] sm:$0xff]  ;;  %v585_v20 = vld [vmem:[%s567_s26 + $0x38] sm:$0xff]  ;;  %v737_v59 = vmul.f32 (!%p3773_p12), %v5502_v1, %v5502_v1 }
  0x6d   : > { %594 = vadd.xlane.f32.xlu0 %v586_v12  ;;  %v591_v18 = vmul.f32 %v583_v16, %v583_v16  ;;  %v590_v19 = vmul.f32 %v582_v17, %v582_v17  ;;  %v584_v21 = vld [vmem:[%s567_s26 + $0x30] sm:$0xff]  ;;  %v593_v22 = vmul.f32 %v585_v20, %v585_v20  ;;  %v741_v60 = vmul.f32 (!%p3773_p12), %v5510_v5, %v5510_v5 }
  0x6e   : > { %598 = vadd.xlane.f32.xlu1 %v588_v11  ;;  %v592_v23 = vmul.f32 %v584_v21, %v584_v21  ;;  %v740_v61 = vmul.f32 (!%p3773_p12), %v5508_v4, %v5508_v4  ;;  %v743_v62 = vmul.f32 (!%p3773_p12), %v5514_v7, %v5514_v7  ;;  %v742_v63 = vmul.f32 (!%p3773_p12), %v5512_v6, %v5512_v6 }
  0x6f   : > { %vm638_vm0 = vcmask (!%p3773_p12), 7168   ;;  %vm703_vm1 = vcmask (!%p3773_p12), 261120  }
  0x71   : > { %596 = vadd.xlane.f32.xlu0 %v587_v15 }
  0x72   : > { %600 = vadd.xlane.f32.xlu1 %v589_v14 }
  0x75   : > { %602 = vadd.xlane.f32.xlu0 %v590_v19 }
  0x76   : > { %604 = vadd.xlane.f32.xlu1 %v591_v18 }
  0x79   : > { %606 = vadd.xlane.f32.xlu0 %v592_v23 }
  0x7a   : > { %608 = vadd.xlane.f32.xlu1 %v593_v22 }
  0x7d   : > { %744 = vadd.xlane.f32.xlu0 (!%p3773_p12), %v736_v57 }
  0x7e   : > { %748 = vadd.xlane.f32.xlu1 (!%p3773_p12), %v738_v56 }
  0x81   : > { %746 = vadd.xlane.f32.xlu0 (!%p3773_p12), %v737_v59 }
  0x82   : > { %750 = vadd.xlane.f32.xlu1 (!%p3773_p12), %v739_v58 }
  0x85   : > { %752 = vadd.xlane.f32.xlu0 (!%p3773_p12), %v740_v61 }
  0x86   : > { %754 = vadd.xlane.f32.xlu1 (!%p3773_p12), %v741_v60 }
  0x89   : > { %756 = vadd.xlane.f32.xlu0 (!%p3773_p12), %v742_v63 }
  0x8a   : > { %758 = vadd.xlane.f32.xlu1 (!%p3773_p12), %v743_v62 }
  0xfa   : > { %v595_v25 = vpop.xlane.xlu0 %594 }
  0xfb   : > { %v599_v24 = vpop.xlane.xlu1 %598  ;;  %v610_v27 = vmax.f32 %v595_v25, 1e-24 }
  0xfc   : > { %v612_v26 = vmax.f32 %v599_v24, 1e-24 }
  0xfe   : > { %4757 = vrsqrt.f32 %v612_v26  ;;  %v597_v29 = vpop.xlane.xlu0 %596 }
  0xff   : > { %4759 = vrsqrt.f32 %v610_v27  ;;  %v601_v28 = vpop.xlane.xlu1 %600  ;;  %v611_v31 = vmax.f32 %v597_v29, 1e-24 }
 0x100   : > { %v613_v30 = vmax.f32 %v601_v28, 1e-24 }
 0x102   : > { %4761 = vrsqrt.f32 %v613_v30  ;;  %v603_v33 = vpop.xlane.xlu0 %602 }
 0x103   : > { %4763 = vrsqrt.f32 %v611_v31  ;;  %v605_v32 = vpop.xlane.xlu1 %604  ;;  %v614_v35 = vmax.f32 %v603_v33, 1e-24 }
 0x104   : > { %v615_v34 = vmax.f32 %v605_v32, 1e-24 }
 0x106   : > { %4765 = vrsqrt.f32 %v615_v34  ;;  %v607_v37 = vpop.xlane.xlu0 %606 }
 0x107   : > { %4767 = vrsqrt.f32 %v614_v35  ;;  %v609_v36 = vpop.xlane.xlu1 %608  ;;  %v616_v40 = vmax.f32 %v607_v37, 1e-24 }
 0x108   : > { %v4758_v38 = vpop.eup %4757  ;;  %v617_v39 = vmax.f32 %v609_v36, 1e-24 }
 0x109   : > { %v4760_v41 = vpop.eup %4759  ;;  %v5524_v42 = vmul.f32 %v4758_v38, %v580_v8  ;;  %v5253_v8 = vmov (!%p3773_p12), -inf  }
 0x10a   : > { %v5526_v43 = vmul.f32 %v4760_v41, %v578_v9  ;;  %4769 = vrsqrt.f32 %v617_v39  ;;  %639 = vst.msk [vmem:[#allocation3] sm:$0xff] (!%p3773_p12), %vm638_vm0, %v5253_v8  ;;  %640 = vst.msk [vmem:[#allocation3 + $0x8] sm:$0xff] (!%p3773_p12), %vm638_vm0, %v5253_v8  ;;  %v5254_v9 = vmov (!%p3773_p12), 0.0   ;;  %v745_v11 = vpop.xlane.xlu0 (!%p3773_p12), %744 }
 0x10b   : > { %4771 = vrsqrt.f32 %v616_v40  ;;  %641 = vst.msk [vmem:[#allocation3 + $0x10] sm:$0xff] (!%p3773_p12), %vm638_vm0, %v5253_v8  ;;  %642 = vst.msk [vmem:[#allocation3 + $0x18] sm:$0xff] (!%p3773_p12), %vm638_vm0, %v5253_v8 }
 0x10c   : > { %v4762_v44 = vpop.eup %4761  ;;  %643 = vst.msk [vmem:[#allocation3 + $0x20] sm:$0xff] (!%p3773_p12), %vm638_vm0, %v5253_v8  ;;  %644 = vst.msk [vmem:[#allocation3 + $0x28] sm:$0xff] (!%p3773_p12), %vm638_vm0, %v5253_v8 }
 0x10d   : > { %v4764_v45 = vpop.eup %4763  ;;  %v5528_v46 = vmul.f32 %v4762_v44, %v581_v10  ;;  %645 = vst.msk [vmem:[#allocation3 + $0x30] sm:$0xff] (!%p3773_p12), %vm638_vm0, %v5253_v8  ;;  %646 = vst.msk [vmem:[#allocation3 + $0x38] sm:$0xff] (!%p3773_p12), %vm638_vm0, %v5253_v8  ;;  %v749_v10 = vpop.xlane.xlu1 (!%p3773_p12), %748 }
 0x10e   : > { %v5530_v47 = vmul.f32 %v4764_v45, %v579_v13  ;;  %647 = vst.msk [vmem:[#allocation3 + $0x40] sm:$0xff] (!%p3773_p12), %vm638_vm0, %v5253_v8  ;;  %648 = vst.msk [vmem:[#allocation3 + $0x48] sm:$0xff] (!%p3773_p12), %vm638_vm0, %v5253_v8  ;;  %v762_v12 = vmax.f32 (!%p3773_p12), %v749_v10, 1e-24  ;;  %v760_v13 = vmax.f32 (!%p3773_p12), %v745_v11, 1e-24  ;;  %v747_v15 = vpop.xlane.xlu0 (!%p3773_p12), %746 }
 0x10f   : > { %649 = vst.msk [vmem:[#allocation3 + $0x50] sm:$0xff] (!%p3773_p12), %vm638_vm0, %v5253_v8  ;;  %650 = vst.msk [vmem:[#allocation3 + $0x58] sm:$0xff] (!%p3773_p12), %vm638_vm0, %v5253_v8 }
 0x110   : > { %v4766_v48 = vpop.eup %4765  ;;  %637 = sbr.rel (%p3773_p12) target bundleno = 574 (0x23e), region = 88  ;;  %651 = vst.msk [vmem:[#allocation3 + $0x60] sm:$0xff] (!%p3773_p12), %vm638_vm0, %v5253_v8  ;;  %652 = vst.msk [vmem:[#allocation3 + $0x68] sm:$0xff] (!%p3773_p12), %vm638_vm0, %v5253_v8  ;;  %4773 = vrsqrt.f32 (!%p3773_p12), %v762_v12 }
 0x111   : > { %v4768_v49 = vpop.eup %4767  ;;  %v5532_v50 = vmul.f32 %v4766_v48, %v583_v16  ;;  %653 = vst.msk [vmem:[#allocation3 + $0x70] sm:$0xff] (!%p3773_p12), %vm638_vm0, %v5253_v8  ;;  %654 = vst.msk [vmem:[#allocation3 + $0x78] sm:$0xff] (!%p3773_p12), %vm638_vm0, %v5253_v8  ;;  %4775 = vrsqrt.f32 (!%p3773_p12), %v760_v13  ;;  %v751_v14 = vpop.xlane.xlu1 (!%p3773_p12), %750 }
 0x112   : > { %v5534_v51 = vmul.f32 %v4768_v49, %v582_v17  ;;  %655 = vst.msk [vmem:[#allocation3 + $0x80] sm:$0xff] (!%p3773_p12), %vm638_vm0, %v5253_v8  ;;  %656 = vst.msk [vmem:[#allocation3 + $0x88] sm:$0xff] (!%p3773_p12), %vm638_vm0, %v5253_v8  ;;  %v763_v16 = vmax.f32 (!%p3773_p12), %v751_v14, 1e-24  ;;  %v761_v17 = vmax.f32 (!%p3773_p12), %v747_v15, 1e-24  ;;  %v753_v19 = vpop.xlane.xlu0 (!%p3773_p12), %752 }
 0x113   : > { %657 = vst.msk [vmem:[#allocation3 + $0x90] sm:$0xff] (!%p3773_p12), %vm638_vm0, %v5253_v8  ;;  %658 = vst.msk [vmem:[#allocation3 + $0x98] sm:$0xff] (!%p3773_p12), %vm638_vm0, %v5253_v8 }
 0x114   : > { %v4770_v52 = vpop.eup %4769  ;;  %659 = vst.msk [vmem:[#allocation3 + $0xa0] sm:$0xff] (!%p3773_p12), %vm638_vm0, %v5253_v8  ;;  %660 = vst.msk [vmem:[#allocation3 + $0xa8] sm:$0xff] (!%p3773_p12), %vm638_vm0, %v5253_v8  ;;  %4777 = vrsqrt.f32 (!%p3773_p12), %v763_v16 }
 0x115   : > { %v4772_v53 = vpop.eup %4771  ;;  %v5536_v54 = vmul.f32 %v4770_v52, %v585_v20  ;;  %661 = vst.msk [vmem:[#allocation3 + $0xb0] sm:$0xff] (!%p3773_p12), %vm638_vm0, %v5253_v8  ;;  %662 = vst.msk [vmem:[#allocation3 + $0xb8] sm:$0xff] (!%p3773_p12), %vm638_vm0, %v5253_v8  ;;  %4779 = vrsqrt.f32 (!%p3773_p12), %v761_v17  ;;  %v755_v18 = vpop.xlane.xlu1 (!%p3773_p12), %754 }
 0x116   : > { %v5538_v55 = vmul.f32 %v4772_v53, %v584_v21  ;;  %663 = vst.msk [vmem:[#allocation3 + $0xc0] sm:$0xff] (!%p3773_p12), %vm638_vm0, %v5253_v8  ;;  %664 = vst.msk [vmem:[#allocation3 + $0xc8] sm:$0xff] (!%p3773_p12), %vm638_vm0, %v5253_v8  ;;  %v765_v20 = vmax.f32 (!%p3773_p12), %v755_v18, 1e-24  ;;  %v764_v21 = vmax.f32 (!%p3773_p12), %v753_v19, 1e-24  ;;  %v757_v23 = vpop.xlane.xlu0 (!%p3773_p12), %756 }
 0x117   : > { %665 = vst.msk [vmem:[#allocation3 + $0xd0] sm:$0xff] %vm638_vm0, %v5253_v8  ;;  %666 = vst.msk [vmem:[#allocation3 + $0xd8] sm:$0xff] %vm638_vm0, %v5253_v8  ;;  %v766_v26 = vmax.f32 %v757_v23, 1e-24 }
 0x118   : > { %667 = vst.msk [vmem:[#allocation3 + $0xe0] sm:$0xff] %vm638_vm0, %v5253_v8  ;;  %668 = vst.msk [vmem:[#allocation3 + $0xe8] sm:$0xff] %vm638_vm0, %v5253_v8  ;;  %4781 = vrsqrt.f32 %v765_v20 }
 0x119   : > { %669 = vst.msk [vmem:[#allocation3 + $0xf0] sm:$0xff] %vm638_vm0, %v5253_v8  ;;  %670 = vst.msk [vmem:[#allocation3 + $0xf8] sm:$0xff] %vm638_vm0, %v5253_v8  ;;  %4783 = vrsqrt.f32 %v764_v21  ;;  %v759_v22 = vpop.xlane.xlu1 %758 }
 0x11a   : > { %671 = vst.msk [vmem:[#allocation4] sm:$0xff] %vm638_vm0, %v5254_v9  ;;  %672 = vst.msk [vmem:[#allocation4 + $0x8] sm:$0xff] %vm638_vm0, %v5254_v9  ;;  %v4774_v24 = vpop.eup %4773  ;;  %v767_v25 = vmax.f32 %v759_v22, 1e-24 }
 0x11b   : > { %673 = vst.msk [vmem:[#allocation4 + $0x10] sm:$0xff] %vm638_vm0, %v5254_v9  ;;  %674 = vst.msk [vmem:[#allocation4 + $0x18] sm:$0xff] %vm638_vm0, %v5254_v9  ;;  %v4776_v27 = vpop.eup %4775  ;;  %v5721_v28 = vmul.f32 %v4774_v24, %v5504_v2 }
 0x11c   : > { %675 = vst.msk [vmem:[#allocation4 + $0x20] sm:$0xff] %vm638_vm0, %v5254_v9  ;;  %676 = vst.msk [vmem:[#allocation4 + $0x28] sm:$0xff] %vm638_vm0, %v5254_v9  ;;  %v5724_v29 = vmul.f32 %v4776_v27, %v5500_v0  ;;  %4785 = vrsqrt.f32 %v767_v25 }
 0x11d   : > { %677 = vst.msk [vmem:[#allocation4 + $0x30] sm:$0xff] %vm638_vm0, %v5254_v9  ;;  %678 = vst.msk [vmem:[#allocation4 + $0x38] sm:$0xff] %vm638_vm0, %v5254_v9  ;;  %4787 = vrsqrt.f32 %v766_v26 }
 0x11e   : > { %679 = vst.msk [vmem:[#allocation4 + $0x40] sm:$0xff] %vm638_vm0, %v5254_v9  ;;  %680 = vst.msk [vmem:[#allocation4 + $0x48] sm:$0xff] %vm638_vm0, %v5254_v9  ;;  %v4778_v30 = vpop.eup %4777 }
 0x11f   : > { %681 = vst.msk [vmem:[#allocation4 + $0x50] sm:$0xff] %vm638_vm0, %v5254_v9  ;;  %682 = vst.msk [vmem:[#allocation4 + $0x58] sm:$0xff] %vm638_vm0, %v5254_v9  ;;  %v4780_v31 = vpop.eup %4779  ;;  %v5727_v32 = vmul.f32 %v4778_v30, %v5506_v3 }
 0x120   : > { %683 = vst.msk [vmem:[#allocation4 + $0x60] sm:$0xff] %vm638_vm0, %v5254_v9  ;;  %684 = vst.msk [vmem:[#allocation4 + $0x68] sm:$0xff] %vm638_vm0, %v5254_v9  ;;  %v5730_v33 = vmul.f32 %v4780_v31, %v5502_v1 }
 0x121   : > { %685 = vst.msk [vmem:[#allocation4 + $0x70] sm:$0xff] %vm638_vm0, %v5254_v9  ;;  %686 = vst.msk [vmem:[#allocation4 + $0x78] sm:$0xff] %vm638_vm0, %v5254_v9 }
 0x122   : > { %687 = vst.msk [vmem:[#allocation4 + $0x80] sm:$0xff] %vm638_vm0, %v5254_v9  ;;  %688 = vst.msk [vmem:[#allocation4 + $0x88] sm:$0xff] %vm638_vm0, %v5254_v9  ;;  %v4782_v34 = vpop.eup %4781 }
 0x123   : > { %689 = vst.msk [vmem:[#allocation4 + $0x90] sm:$0xff] %vm638_vm0, %v5254_v9  ;;  %690 = vst.msk [vmem:[#allocation4 + $0x98] sm:$0xff] %vm638_vm0, %v5254_v9  ;;  %v4784_v35 = vpop.eup %4783  ;;  %v5733_v36 = vmul.f32 %v4782_v34, %v5510_v5 }
 0x124   : > { %691 = vst.msk [vmem:[#allocation4 + $0xa0] sm:$0xff] %vm638_vm0, %v5254_v9  ;;  %692 = vst.msk [vmem:[#allocation4 + $0xa8] sm:$0xff] %vm638_vm0, %v5254_v9  ;;  %v5736_v37 = vmul.f32 %v4784_v35, %v5508_v4 }
 0x125   : > { %693 = vst.msk [vmem:[#allocation4 + $0xb0] sm:$0xff] %vm638_vm0, %v5254_v9  ;;  %694 = vst.msk [vmem:[#allocation4 + $0xb8] sm:$0xff] %vm638_vm0, %v5254_v9 }
 0x126   : > { %695 = vst.msk [vmem:[#allocation4 + $0xc0] sm:$0xff] %vm638_vm0, %v5254_v9  ;;  %696 = vst.msk [vmem:[#allocation4 + $0xc8] sm:$0xff] %vm638_vm0, %v5254_v9  ;;  %v4786_v38 = vpop.eup %4785 }
 0x127   : > { %697 = vst.msk [vmem:[#allocation4 + $0xd0] sm:$0xff] %vm638_vm0, %v5254_v9  ;;  %698 = vst.msk [vmem:[#allocation4 + $0xd8] sm:$0xff] %vm638_vm0, %v5254_v9  ;;  %v4788_v39 = vpop.eup %4787  ;;  %v5739_v40 = vmul.f32 %v4786_v38, %v5514_v7 }
 0x128   : > { %699 = vst.msk [vmem:[#allocation4 + $0xe0] sm:$0xff] %vm638_vm0, %v5254_v9  ;;  %700 = vst.msk [vmem:[#allocation4 + $0xe8] sm:$0xff] %vm638_vm0, %v5254_v9  ;;  %v5742_v41 = vmul.f32 %v4788_v39, %v5512_v6 }
 0x129   : > { %701 = vst.msk [vmem:[#allocation4 + $0xf0] sm:$0xff] %vm638_vm0, %v5254_v9  ;;  %702 = vst.msk [vmem:[#allocation4 + $0xf8] sm:$0xff] %vm638_vm0, %v5254_v9 }
 0x12a   : > { %704 = vst.msk [vmem:[#allocation5] sm:$0xff] %vm703_vm1, %v5254_v9  ;;  %705 = vst.msk [vmem:[#allocation5 + $0x8] sm:$0xff] %vm703_vm1, %v5254_v9 }
 0x12b   : > { %706 = vst.msk [vmem:[#allocation5 + $0x10] sm:$0xff] %vm703_vm1, %v5254_v9  ;;  %707 = vst.msk [vmem:[#allocation5 + $0x18] sm:$0xff] %vm703_vm1, %v5254_v9 }
 0x12c   : > { %708 = vst.msk [vmem:[#allocation5 + $0x20] sm:$0xff] %vm703_vm1, %v5254_v9  ;;  %709 = vst.msk [vmem:[#allocation5 + $0x28] sm:$0xff] %vm703_vm1, %v5254_v9 }
 0x12d   : > { %710 = vst.msk [vmem:[#allocation5 + $0x30] sm:$0xff] %vm703_vm1, %v5254_v9  ;;  %711 = vst.msk [vmem:[#allocation5 + $0x38] sm:$0xff] %vm703_vm1, %v5254_v9 }
 0x12e   : > { %712 = vst.msk [vmem:[#allocation5 + $0x40] sm:$0xff] %vm703_vm1, %v5254_v9  ;;  %713 = vst.msk [vmem:[#allocation5 + $0x48] sm:$0xff] %vm703_vm1, %v5254_v9 }
 0x12f   : > { %714 = vst.msk [vmem:[#allocation5 + $0x50] sm:$0xff] %vm703_vm1, %v5254_v9  ;;  %715 = vst.msk [vmem:[#allocation5 + $0x58] sm:$0xff] %vm703_vm1, %v5254_v9 }
 0x130   : > { %716 = vst.msk [vmem:[#allocation5 + $0x60] sm:$0xff] %vm703_vm1, %v5254_v9  ;;  %717 = vst.msk [vmem:[#allocation5 + $0x68] sm:$0xff] %vm703_vm1, %v5254_v9 }
 0x131   : > { %718 = vst.msk [vmem:[#allocation5 + $0x70] sm:$0xff] %vm703_vm1, %v5254_v9  ;;  %719 = vst.msk [vmem:[#allocation5 + $0x78] sm:$0xff] %vm703_vm1, %v5254_v9 }
 0x132   : > { %720 = vst.msk [vmem:[#allocation5 + $0x80] sm:$0xff] %vm703_vm1, %v5254_v9  ;;  %721 = vst.msk [vmem:[#allocation5 + $0x88] sm:$0xff] %vm703_vm1, %v5254_v9 }
 0x133   : > { %722 = vst.msk [vmem:[#allocation5 + $0x90] sm:$0xff] %vm703_vm1, %v5254_v9  ;;  %723 = vst.msk [vmem:[#allocation5 + $0x98] sm:$0xff] %vm703_vm1, %v5254_v9 }
 0x134   : > { %724 = vst.msk [vmem:[#allocation5 + $0xa0] sm:$0xff] %vm703_vm1, %v5254_v9  ;;  %725 = vst.msk [vmem:[#allocation5 + $0xa8] sm:$0xff] %vm703_vm1, %v5254_v9 }
 0x135   : > { %726 = vst.msk [vmem:[#allocation5 + $0xb0] sm:$0xff] %vm703_vm1, %v5254_v9  ;;  %727 = vst.msk [vmem:[#allocation5 + $0xb8] sm:$0xff] %vm703_vm1, %v5254_v9 }
 0x136   : > { %728 = vst.msk [vmem:[#allocation5 + $0xc0] sm:$0xff] %vm703_vm1, %v5254_v9  ;;  %729 = vst.msk [vmem:[#allocation5 + $0xc8] sm:$0xff] %vm703_vm1, %v5254_v9 }
 0x137   : > { %730 = vst.msk [vmem:[#allocation5 + $0xd0] sm:$0xff] %vm703_vm1, %v5254_v9  ;;  %731 = vst.msk [vmem:[#allocation5 + $0xd8] sm:$0xff] %vm703_vm1, %v5254_v9 }
 0x138   : > { %732 = vst.msk [vmem:[#allocation5 + $0xe0] sm:$0xff] %vm703_vm1, %v5254_v9  ;;  %733 = vst.msk [vmem:[#allocation5 + $0xe8] sm:$0xff] %vm703_vm1, %v5254_v9 }
 0x139   : > { %734 = vst.msk [vmem:[#allocation5 + $0xf0] sm:$0xff] %vm703_vm1, %v5254_v9  ;;  %735 = vst.msk [vmem:[#allocation5 + $0xf8] sm:$0xff] %vm703_vm1, %v5254_v9 }
 0x13a LB: >> { %4084 = vmatprep.mubr.f32.mxu0 %v5724_v29  ;;  %4090 = vmatprep.mubr.f32.mxu1 %v5736_v37  ;;  %s3774_s13 = sshll.u32 %s5207_s12, 7  ;;  %s808_s21 = scalar_lea.vmem [#allocation6], %s5207_s12  ;;  %s5207_s12 = sphi %s5744_s12, %s789_s12  }
 0x13b   : >> { %s5755_s11 = scalar_lea.vmem %s7555_s2, %s3774_s13  ;;  %v3775_v18 = vld [vmem:[%s808_s21] ss:$0 sm:$0xff]  ;;  %s3776_s27 = sshll.u32 %s5207_s12, 6 }
 0x13c   : >> { %v792_v44 = vld [vmem:[%s5755_s11] sm:$0xff]  ;;  %v793_v45 = vld [vmem:[%s5755_s11 + $0x8] sm:$0xff]  ;;  %v794_v48 = vld [vmem:[%s5755_s11 + $0x10] sm:$0xff]  ;;  %s930_s25 = scalar_lea.vmem [#allocation2], %s3776_s27  ;;  %s789_s12 = sadd.s32 1, %s5207_s12  }
 0x13d   : >> { %v4260_v49 = vpack.c.bf16 %v793_v45, %v792_v44  ;;  %v795_v52 = vld [vmem:[%s5755_s11 + $0x18] sm:$0xff]  ;;  %v796_v56 = vld [vmem:[%s5755_s11 + $0x20] sm:$0xff]  ;;  %v797_v57 = vld [vmem:[%s5755_s11 + $0x28] sm:$0xff]  ;;  %p786_p2 = scmp.ge.s32.totalorder %s789_s12, 4  }
 0x13e   : >> { %v4264_v53 = vpack.c.bf16 %v795_v52, %v794_v48  ;;  %v4268_v58 = vpack.c.bf16 %v797_v57, %v796_v56  ;;  %v798_v59 = vld [vmem:[%s5755_s11 + $0x30] sm:$0xff]  ;;  %v799_v60 = vld [vmem:[%s5755_s11 + $0x38] sm:$0xff]  ;;  %v800_v62 = vld [vmem:[%s5755_s11 + $0x40] sm:$0xff] }
 0x13f   : >> { %4261 = vmatprep.subr.bf16.mxu0 %v4260_v49  ;;  %4532 = vmatprep.subr.bf16.mxu1 %v4260_v49  ;;  %v4272_v61 = vpack.c.bf16 %v799_v60, %v798_v59  ;;  %v801_v63 = vld [vmem:[%s5755_s11 + $0x48] sm:$0xff]  ;;  %v802_v9 = vld [vmem:[%s5755_s11 + $0x50] sm:$0xff]  ;;  %v803_v10 = vld [vmem:[%s5755_s11 + $0x58] sm:$0xff] }
 0x140   : >> { %4263 = vmatpush3.bf16.msra.mxu0 %v4260_v49  ;;  %4540 = vmatpush3.bf16.msra.mxu1 %v4260_v49  ;;  %v4276_v8 = vpack.c.bf16 %v801_v63, %v800_v62  ;;  %v4280_v11 = vpack.c.bf16 %v803_v10, %v802_v9  ;;  %v804_v12 = vld [vmem:[%s5755_s11 + $0x60] sm:$0xff]  ;;  %v805_v13 = vld [vmem:[%s5755_s11 + $0x68] sm:$0xff]  ;;  %v806_v15 = vld [vmem:[%s5755_s11 + $0x70] sm:$0xff] }
 0x141   : >> { %4265 = vmatprep.subr.bf16.mxu0 %v4264_v53  ;;  %4533 = vmatprep.subr.bf16.mxu1 %v4264_v53  ;;  %v4284_v14 = vpack.c.bf16 %v805_v13, %v804_v12  ;;  %v807_v16 = vld [vmem:[%s5755_s11 + $0x78] sm:$0xff] }
 0x142   : >> { %v4288_v17 = vpack.c.bf16 %v807_v16, %v806_v15 }
 0x144   : >> { %4267 = vmatpush3.bf16.msra.mxu0 %v4264_v53  ;;  %4541 = vmatpush3.bf16.msra.mxu1 %v4264_v53 }
 0x145   : >> { %4269 = vmatprep.subr.bf16.mxu0 %v4268_v58  ;;  %4534 = vmatprep.subr.bf16.mxu1 %v4268_v58 }
 0x148   : >> { %4271 = vmatpush3.bf16.msra.mxu0 %v4268_v58  ;;  %4542 = vmatpush3.bf16.msra.mxu1 %v4268_v58 }
 0x149   : >> { %4273 = vmatprep.subr.bf16.mxu0 %v4272_v61  ;;  %4535 = vmatprep.subr.bf16.mxu1 %v4272_v61 }
 0x14c   : >> { %4275 = vmatpush3.bf16.msra.mxu0 %v4272_v61  ;;  %4543 = vmatpush3.bf16.msra.mxu1 %v4272_v61 }
 0x14d   : >> { %4277 = vmatprep.subr.bf16.mxu0 %v4276_v8  ;;  %4536 = vmatprep.subr.bf16.mxu1 %v4276_v8 }
 0x150   : >> { %4279 = vmatpush3.bf16.msra.mxu0 %v4276_v8  ;;  %4544 = vmatpush3.bf16.msra.mxu1 %v4276_v8 }
 0x151   : >> { %4281 = vmatprep.subr.bf16.mxu0 %v4280_v11  ;;  %4537 = vmatprep.subr.bf16.mxu1 %v4280_v11 }
 0x154   : >> { %4283 = vmatpush3.bf16.msra.mxu0 %v4280_v11  ;;  %4545 = vmatpush3.bf16.msra.mxu1 %v4280_v11 }
 0x155   : >> { %4285 = vmatprep.subr.bf16.mxu0 %v4284_v14  ;;  %4538 = vmatprep.subr.bf16.mxu1 %v4284_v14 }
 0x158   : >> { %4287 = vmatpush3.bf16.msra.mxu0 %v4284_v14  ;;  %4546 = vmatpush3.bf16.msra.mxu1 %v4284_v14 }
 0x159   : >> { %4289 = vmatprep.subr.bf16.mxu0 %v4288_v17  ;;  %4539 = vmatprep.subr.bf16.mxu1 %v4288_v17 }
 0x15c   : >> { %4291 = vmatpush3.bf16.msra.mxu0 %v4288_v17  ;;  %4547 = vmatpush3.bf16.msra.mxu1 %v4288_v17 }
 0x15f   : >> { %4085 = vmatmul.mubr.f32.vlgmr.msra.gmra.mrb[0].mxu0 %v5730_v33  ;;  %4091 = vmatmul.mubr.f32.vlgmr.msra.gmra.mrb[0].mxu1 %v5733_v36 }
 0x160   : >> { %4087 = vmatprep.mubr.f32.mxu0 %v5721_v28  ;;  %4093 = vmatprep.mubr.f32.mxu1 %v5742_v41 }
 0x163   : >> { %4088 = vmatmul.mubr.f32.gmra.mrb[2].mxu0 %v5727_v32  ;;  %4094 = vmatmul.mubr.f32.gmra.mrb[2].mxu1 %v5739_v40 }
 0x232   : >> { %v4086_v19 = vpop.f32.mrb[0].mxu0  ;;  %v4092_v20 = vpop.f32.mrb[0].mxu1 }
 0x233   : >> { %v888_v21 = vadd.f32 %v4086_v19, %v3775_v18  ;;  %v908_v22 = vadd.f32 %v4092_v20, %v3775_v18  ;;  %v882_v23 = vpop.f32.mrb[1].mxu0  ;;  %v902_v24 = vpop.f32.mrb[1].mxu1 }
 0x234   : >> { %v883_v25 = vadd.f32 %v3775_v18, %v882_v23  ;;  %v903_v26 = vadd.f32 %v3775_v18, %v902_v24 }
 0x235   : >> { %v922_v27 = vmul.f32 0.17677669, %v888_v21  ;;  %v926_v30 = vmul.f32 0.17677669, %v908_v22 }
 0x236   : >> { %v921_v31 = vmul.f32 0.17677669, %v883_v25  ;;  %v925_v34 = vmul.f32 0.17677669, %v903_v26  ;;  %v4089_v35 = vpop.f32.mrb[2].mxu0  ;;  %v4095_v38 = vpop.f32.mrb[2].mxu1 }
 0x237   : >> { %932 = vst.msk [vmem:[%s930_s25 + $0x8] sm:$0xff] %vm703_vm1, %v922_v27  ;;  %936 = vst.msk [vmem:[%s930_s25 + $0x28] sm:$0xff] %vm703_vm1, %v926_v30  ;;  %v898_v39 = vadd.f32 %v4089_v35, %v3775_v18  ;;  %v918_v44 = vadd.f32 %v4095_v38, %v3775_v18  ;;  %v892_v45 = vpop.f32.mrb[3].mxu0  ;;  %v912_v48 = vpop.f32.mrb[3].mxu1  ;;  %788 = sbr.rel (!%p786_p2) target bundleno = 314 (0x13a), region = 166 }
 0x238   : >> { %931 = vst.msk [vmem:[%s930_s25] sm:$0xff] %vm703_vm1, %v921_v31  ;;  %935 = vst.msk [vmem:[%s930_s25 + $0x20] sm:$0xff] %vm703_vm1, %v925_v34  ;;  %v893_v49 = vadd.f32 %v3775_v18, %v892_v45  ;;  %v913_v52 = vadd.f32 %v3775_v18, %v912_v48 }
 0x239   : >> { %v924_v53 = vmul.f32 0.17677669, %v898_v39  ;;  %v928_v56 = vmul.f32 0.17677669, %v918_v44 }
 0x23a   : >> { %v923_v57 = vmul.f32 0.17677669, %v893_v49  ;;  %v927_v58 = vmul.f32 0.17677669, %v913_v52 }
 0x23b   : >> { %934 = vst.msk [vmem:[%s930_s25 + $0x18] sm:$0xff] %vm703_vm1, %v924_v53  ;;  %938 = vst.msk [vmem:[%s930_s25 + $0x38] sm:$0xff] %vm703_vm1, %v928_v56 }
 0x23c   : >> { %933 = vst.msk [vmem:[%s930_s25 + $0x10] sm:$0xff] %vm703_vm1, %v923_v57  ;;  %937 = vst.msk [vmem:[%s930_s25 + $0x30] sm:$0xff] %vm703_vm1, %v927_v58 }
 0x23e PF: > { %s5792_s28 = smov 0  }
 0x23f LB: >> { %4128 = vmatprep.mubr.f32.mxu0 %v5526_v43  ;;  %4172 = vmatprep.mubr.f32.mxu1 %v5526_v43  ;;  %s3777_s17 = sshll.u32 %s5211_s28, 7  ;;  %s5831_s26 = sshll.u32 %s5211_s28, 6  ;;  %vm1216_vm2 = vcmask 261120   ;;  %vm1379_vm4 = vcmask 523264   ;;  %vm1549_vm5 = vcmask 7168   ;;  %s5211_s28 = sphi %s5792_s28, %s944_s28  }
 0x240   : >> { %s5805_s19 = scalar_lea.vmem %s7557_s4, %s3777_s17  ;;  %s5834_s15 = scalar_lea.vmem [#allocation2], %s5831_s26  ;;  %vm5841_vm3 = vmpackc.low %vm1216_vm2, %vm1216_vm2 }
 0x241   : >> { %v947_v28 = vld [vmem:[%s5805_s19] sm:$0xff]  ;;  %v948_v29 = vld [vmem:[%s5805_s19 + $0x8] sm:$0xff]  ;;  %v949_v32 = vld [vmem:[%s5805_s19 + $0x10] sm:$0xff]  ;;  %s963_s12 = scalar_lea.vmem [#allocation9], %s5211_s28  ;;  %s5880_s23 = scalar_lea.vmem %s7559_s6, %s3777_s17 }
 0x242   : >> { %v4292_v33 = vpack.c.bf16 %v948_v29, %v947_v28  ;;  %v950_v36 = vld [vmem:[%s5805_s19 + $0x18] sm:$0xff]  ;;  %v951_v40 = vld [vmem:[%s5805_s19 + $0x20] sm:$0xff]  ;;  %v952_v41 = vld [vmem:[%s5805_s19 + $0x28] sm:$0xff]  ;;  %s1093_s27 = scalar_lea.vmem %s7560_s7, %s5211_s28  ;;  %s5946_s25 = scalar_lea.vmem [#allocation3], %s5831_s26 }
 0x243   : >> { %v4296_v37 = vpack.c.bf16 %v950_v36, %v949_v32  ;;  %v4300_v59 = vpack.c.bf16 %v952_v41, %v951_v40  ;;  %v953_v60 = vld [vmem:[%s5805_s19 + $0x30] sm:$0xff]  ;;  %v954_v61 = vld [vmem:[%s5805_s19 + $0x38] sm:$0xff]  ;;  %v955_v63 = vld [vmem:[%s5805_s19 + $0x40] sm:$0xff]  ;;  %s5986_s17 = scalar_lea.vmem [#allocation4], %s5831_s26  ;;  %s6022_s20 = scalar_lea.vmem [#allocation5], %s5831_s26 }
 0x244   : >> { %4293 = vmatprep.subr.bf16.mxu0 %v4292_v33  ;;  %v4304_v62 = vpack.c.bf16 %v954_v61, %v953_v60  ;;  %v956_v8 = vld [vmem:[%s5805_s19 + $0x48] sm:$0xff]  ;;  %v957_v10 = vld [vmem:[%s5805_s19 + $0x50] sm:$0xff]  ;;  %v958_v11 = vld [vmem:[%s5805_s19 + $0x58] sm:$0xff]  ;;  %s944_s28 = sadd.s32 1, %s5211_s28  }
 0x245   : >> { %4295 = vmatpush3.bf16.msra.mxu0 %v4292_v33  ;;  %v4308_v9 = vpack.c.bf16 %v956_v8, %v955_v63  ;;  %v4312_v12 = vpack.c.bf16 %v958_v11, %v957_v10  ;;  %v959_v13 = vld [vmem:[%s5805_s19 + $0x60] sm:$0xff]  ;;  %v960_v14 = vld [vmem:[%s5805_s19 + $0x68] sm:$0xff]  ;;  %v961_v16 = vld [vmem:[%s5805_s19 + $0x70] sm:$0xff]  ;;  %p941_p4 = scmp.ge.s32.totalorder %s944_s28, 4  }
 0x246   : >> { %4297 = vmatprep.subr.bf16.mxu0 %v4296_v37  ;;  %v4316_v15 = vpack.c.bf16 %v960_v14, %v959_v13  ;;  %v962_v17 = vld [vmem:[%s5805_s19 + $0x78] sm:$0xff]  ;;  %v1208_v19 = vld [vmem:[%s5834_s15] sm:$0xff]  ;;  %v1209_v58 = vld [vmem:[%s5834_s15 + $0x8] sm:$0xff]  ;;  %p3805_p5 = scmp.ne.s32.totalorder (%p941_p4), %s5179_s16, 1 }
 0x247   : >> { %v4320_v18 = vpack.c.bf16 %v962_v17, %v961_v16  ;;  %v3778_v20 = vld [vmem:[%s963_s12] ss:$0 sm:$0xff]  ;;  %v1210_v28 = vld [vmem:[%s5834_s15 + $0x10] sm:$0xff]  ;;  %v1211_v29 = vld [vmem:[%s5834_s15 + $0x18] sm:$0xff] }
 0x248   : >> { %v1212_v32 = vld [vmem:[%s5834_s15 + $0x20] sm:$0xff]  ;;  %v1213_v33 = vld [vmem:[%s5834_s15 + $0x28] sm:$0xff]  ;;  %v1214_v36 = vld [vmem:[%s5834_s15 + $0x30] sm:$0xff] }
 0x249   : >> { %4299 = vmatpush3.bf16.msra.mxu0 %v4296_v37  ;;  %v1215_v37 = vld [vmem:[%s5834_s15 + $0x38] sm:$0xff]  ;;  %v1077_v40 = vld [vmem:[%s5880_s23] sm:$0xff]  ;;  %v1078_v41 = vld [vmem:[%s5880_s23 + $0x8] sm:$0xff] }
 0x24a   : >> { %4301 = vmatprep.subr.bf16.mxu0 %v4300_v59  ;;  %v4324_v60 = vpack.c.bf16 %v1078_v41, %v1077_v40  ;;  %v1080_v61 = vld [vmem:[%s5880_s23 + $0x18] sm:$0xff]  ;;  %v1081_v63 = vld [vmem:[%s5880_s23 + $0x20] sm:$0xff]  ;;  %v1082_v8 = vld [vmem:[%s5880_s23 + $0x28] sm:$0xff] }
 0x24b   : >> { %v1083_v10 = vld [vmem:[%s5880_s23 + $0x30] sm:$0xff]  ;;  %v1084_v11 = vld [vmem:[%s5880_s23 + $0x38] sm:$0xff]  ;;  %v1085_v13 = vld [vmem:[%s5880_s23 + $0x40] sm:$0xff] }
 0x24c   : >> { %4325 = vmatprep.subr.bf16.mxu1 %v4324_v60  ;;  %v1086_v14 = vld [vmem:[%s5880_s23 + $0x48] sm:$0xff]  ;;  %v1087_v16 = vld [vmem:[%s5880_s23 + $0x50] sm:$0xff]  ;;  %v1088_v17 = vld [vmem:[%s5880_s23 + $0x58] sm:$0xff] }
 0x24d   : >> { %4303 = vmatpush3.bf16.msra.mxu0 %v4300_v59  ;;  %v1079_v59 = vld [vmem:[%s5880_s23 + $0x10] sm:$0xff]  ;;  %4327 = vmatpush3.bf16.msra.mxu1 %v4324_v60 }
 0x24e   : >> { %4305 = vmatprep.subr.bf16.mxu0 %v4304_v62  ;;  %v1373_v60 = vld [vmem:[%s5946_s25 + $0x10] sm:$0xff] }
 0x251   : >> { %4307 = vmatpush3.bf16.msra.mxu0 %v4304_v62  ;;  %v4328_v62 = vpack.c.bf16 %v1080_v61, %v1079_v59  ;;  %v1372_v59 = vld [vmem:[%s5946_s25 + $0x8] sm:$0xff] }
 0x252   : >> { %4309 = vmatprep.subr.bf16.mxu0 %v4308_v9 }
 0x253   : >> { %4329 = vmatprep.subr.bf16.mxu1 %v4328_v62 }
 0x254   : >> { %4331 = vmatpush3.bf16.msra.mxu1 %v4328_v62 }
 0x255   : >> { %4311 = vmatpush3.bf16.msra.mxu0 %v4308_v9  ;;  %v4332_v9 = vpack.c.bf16 %v1082_v8, %v1081_v63 }
 0x256   : >> { %4313 = vmatprep.subr.bf16.mxu0 %v4312_v12 }
 0x257   : >> { %4333 = vmatprep.subr.bf16.mxu1 %v4332_v9 }
 0x258   : >> { %4335 = vmatpush3.bf16.msra.mxu1 %v4332_v9 }
 0x259   : >> { %4315 = vmatpush3.bf16.msra.mxu0 %v4312_v12  ;;  %v4336_v12 = vpack.c.bf16 %v1084_v11, %v1083_v10 }
 0x25a   : >> { %4317 = vmatprep.subr.bf16.mxu0 %v4316_v15 }
 0x25b   : >> { %4337 = vmatprep.subr.bf16.mxu1 %v4336_v12 }
 0x25c   : >> { %4339 = vmatpush3.bf16.msra.mxu1 %v4336_v12  ;;  %v1374_v12 = vld [vmem:[%s5946_s25 + $0x18] sm:$0xff] }
 0x25d   : >> { %4319 = vmatpush3.bf16.msra.mxu0 %v4316_v15  ;;  %v4340_v15 = vpack.c.bf16 %v1086_v14, %v1085_v13  ;;  %v1375_v13 = vld [vmem:[%s5946_s25 + $0x20] sm:$0xff] }
 0x25e   : >> { %4321 = vmatprep.subr.bf16.mxu0 %v4320_v18 }
 0x25f   : >> { %4341 = vmatprep.subr.bf16.mxu1 %v4340_v15 }
 0x260   : >> { %4343 = vmatpush3.bf16.msra.mxu1 %v4340_v15 }
 0x261   : >> { %4323 = vmatpush3.bf16.msra.mxu0 %v4320_v18  ;;  %v4344_v18 = vpack.c.bf16 %v1088_v17, %v1087_v16 }
 0x263   : >> { %4345 = vmatprep.subr.bf16.mxu1 %v4344_v18 }
 0x264   : >> { %4129 = vmatmul.mubr.f32.vlgmr.msra.gmra.mrb[0].mxu0 %v5530_v47  ;;  %4347 = vmatpush3.bf16.msra.mxu1 %v4344_v18 }
 0x265   : >> { %4131 = vmatprep.mubr.f32.mxu0 %v5524_v42 }
 0x268   : >> { %4132 = vmatmul.mubr.f32.gmra.mrb[2].mxu0 %v5528_v46 }
 0x269   : >> { %4134 = vmatprep.mubr.f32.mxu0 %v5534_v51 }
 0x26c   : >> { %4135 = vmatmul.mubr.f32.gmra.mrb[4].mxu0 %v5532_v50 }
 0x26d   : >> { %4137 = vmatprep.mubr.f32.mxu0 %v5538_v55 }
 0x270   : >> { %4138 = vmatmul.mubr.f32.gmra.mrb[6].mxu0 %v5536_v54 }
 0x271   : >> { %4200 = vmatprep.mubr.msk.f32.mxu0 %vm1216_vm2, %v1208_v19  ;;  %v1089_v19 = vld [vmem:[%s5880_s23 + $0x60] sm:$0xff] }
 0x337   : >> { %v4130_v21 = vpop.f32.mrb[0].mxu0 }
 0x338   : >> { %v1043_v22 = vadd.f32 %v4130_v21, %v3778_v20  ;;  %v1037_v23 = vpop.f32.mrb[1].mxu0 }
 0x339   : >> { %v1038_v24 = vadd.f32 %v3778_v20, %v1037_v23  ;;  %v1092_v23 = vld [vmem:[%s5880_s23 + $0x78] sm:$0xff] }
 0x33b   : >> { %v4356_v26 = vpack.c.bf16 %v1043_v22, %v1038_v24  ;;  %v4133_v27 = vpop.f32.mrb[2].mxu0  ;;  %v1091_v22 = vld [vmem:[%s5880_s23 + $0x70] sm:$0xff] }
 0x33c   : >> { %v1053_v30 = vadd.f32 %v4133_v27, %v3778_v20  ;;  %v1047_v31 = vpop.f32.mrb[3].mxu0  ;;  %v4352_v24 = vpack.c.bf16 %v1092_v23, %v1091_v22 }
 0x33d   : >> { %4358 = vmatprep.subr.msk.bf16.mxu0 %vm5841_vm3, %v4356_v26  ;;  %v1048_v34 = vadd.f32 %v3778_v20, %v1047_v31 }
 0x33e   : >> { %4361 = vmatpush3.bf16.xpose.msk.msra.mxu0 %vm5841_vm3, %v4356_v26 }
 0x33f   : >> { %v4362_v35 = vpack.c.bf16 %v1053_v30, %v1048_v34  ;;  %v4136_v38 = vpop.f32.mrb[4].mxu0 }
 0x340   : >> { %v1063_v39 = vadd.f32 %v4136_v38, %v3778_v20  ;;  %v1057_v44 = vpop.f32.mrb[5].mxu0 }
 0x341   : >> { %4364 = vmatprep.subr.msk.bf16.mxu0 %vm5841_vm3, %v4362_v35  ;;  %v1058_v45 = vadd.f32 %v3778_v20, %v1057_v44 }
 0x343   : >> { %v4368_v48 = vpack.c.bf16 %v1063_v39, %v1058_v45  ;;  %v4139_v49 = vpop.f32.mrb[6].mxu0 }
 0x344   : >> { %v1073_v52 = vadd.f32 %v4139_v49, %v3778_v20  ;;  %v1067_v53 = vpop.f32.mrb[7].mxu0 }
 0x345   : >> { %v1068_v56 = vadd.f32 %v3778_v20, %v1067_v53  ;;  %v1090_v20 = vld [vmem:[%s5880_s23 + $0x68] sm:$0xff] }
 0x346   : >> { %4367 = vmatpush3.bf16.xpose.msk.msra.mxu0 %vm5841_vm3, %v4362_v35  ;;  %v4348_v21 = vpack.c.bf16 %v1090_v20, %v1089_v19 }
 0x347   : >> { %4370 = vmatprep.subr.msk.bf16.mxu0 %vm5841_vm3, %v4368_v48  ;;  %v4374_v57 = vpack.c.bf16 %v1073_v52, %v1068_v56 }
 0x348   : >> { %4349 = vmatprep.subr.bf16.mxu1 %v4348_v21 }
 0x349   : >> { %4351 = vmatpush3.bf16.msra.mxu1 %v4348_v21 }
 0x34a   : >> { %4353 = vmatprep.subr.bf16.mxu1 %v4352_v24 }
 0x34d   : >> { %4355 = vmatpush3.bf16.msra.mxu1 %v4352_v24 }
 0x34e   : >> { %4373 = vmatpush3.bf16.xpose.msk.msra.mxu0 %vm5841_vm3, %v4368_v48 }
 0x34f   : >> { %4376 = vmatprep.subr.msk.bf16.mxu0 %vm5841_vm3, %v4374_v57 }
 0x350   : >> { %4173 = vmatmul.mubr.f32.vlgmr.msra.gmra.mrb[0].mxu1 %v5530_v47 }
 0x351   : >> { %4175 = vmatprep.mubr.f32.mxu1 %v5524_v42 }
 0x354   : >> { %4176 = vmatmul.mubr.f32.gmra.mrb[2].mxu1 %v5528_v46 }
 0x355   : >> { %4178 = vmatprep.mubr.f32.mxu1 %v5534_v51 }
 0x356   : >> { %4379 = vmatpush3.bf16.xpose.msk.msra.mxu0 %vm5841_vm3, %v4374_v57  ;;  %v5255_v57 = vmov 0  }
 0x357   : >> { %4789 = vset.pattern.permute.xlu0 %v5255_v57  ;;  %4790 = vset.pattern.permute.xlu1 %v5255_v57 }
 0x358   : >> { %4179 = vmatmul.mubr.f32.gmra.mrb[4].mxu1 %v5532_v50 }
 0x359   : >> { %4181 = vmatprep.mubr.f32.mxu1 %v5538_v55 }
 0x35c   : >> { %4182 = vmatmul.mubr.f32.gmra.mrb[6].mxu1 %v5536_v54 }
 0x35d   : >> { %4201 = vmatmul.mubr.msk.f32.vlgmr.msra.gmra.mrb[8].mxu0 %vm1216_vm2, %v1209_v58  ;;  %v5941_v58 = vld [vmem:[%s1093_s27] ss:$0 sm:$0xff] }
 0x35e   : >> { %4203 = vmatprep.mubr.msk.f32.mxu0 %vm1216_vm2, %v1210_v28 }
 0x361   : >> { %4204 = vmatmul.mubr.msk.f32.gmra.mrb[10].mxu0 %vm1216_vm2, %v1211_v29 }
 0x362   : >> { %4206 = vmatprep.mubr.msk.f32.mxu0 %vm1216_vm2, %v1212_v32 }
 0x365   : >> { %4207 = vmatmul.mubr.msk.f32.gmra.mrb[12].mxu0 %vm1216_vm2, %v1213_v33 }
 0x366   : >> { %4209 = vmatprep.mubr.msk.f32.mxu0 %vm1216_vm2, %v1214_v36  ;;  %v1371_v36 = vld [vmem:[%s5946_s25] sm:$0xff] }
 0x369   : >> { %4210 = vmatmul.mubr.msk.f32.gmra.mrb[14].mxu0 %vm1216_vm2, %v1215_v37 }
 0x423   : >> { %v4174_v28 = vpop.f32.mrb[0].mxu1 }
 0x424   : >> { %v1173_v29 = vadd.f32 %v4174_v28, %v5941_v58  ;;  %v1167_v32 = vpop.f32.mrb[1].mxu1 }
 0x425   : >> { %v1168_v33 = vadd.f32 %v5941_v58, %v1167_v32 }
 0x427   : >> { %v4380_v37 = vpack.c.bf16 %v1173_v29, %v1168_v33  ;;  %v4177_v11 = vpop.f32.mrb[2].mxu1 }
 0x428   : >> { %v1177_v14 = vpop.f32.mrb[3].mxu1  ;;  %v1183_v17 = vadd.f32 %v4177_v11, %v5941_v58 }
 0x429   : >> { %4381 = vmatprep.subr.bf16.mxu1 %v4380_v37  ;;  %v1178_v20 = vadd.f32 %v5941_v58, %v1177_v14 }
 0x42a   : >> { %4383 = vmatpush3.bf16.msra.mxu1 %v4380_v37 }
 0x430   : >> { %v5905_v25 = vpop.f32.mrb[8].mxu0 }
 0x431   : >> { %v5907_v26 = vpop.f32.mrb[9].mxu0  ;;  %v1383_v34 = vsel %vm1379_vm4, %v5905_v25, -inf }
 0x432   : >> { %v1380_v27 = vsel %vm1379_vm4, %v5907_v26, -inf }
 0x433   : >> { %1381 = vmax.xlane.f32.xlu0 %v1380_v27  ;;  %v4180_v27 = vpop.f32.mrb[4].mxu1 }
 0x434   : >> { %v5911_v30 = vpop.f32.mrb[10].mxu0 }
 0x435   : >> { %v5913_v31 = vpop.f32.mrb[11].mxu0  ;;  %v1389_v44 = vsel %vm1379_vm4, %v5911_v30, -inf }
 0x436   : >> { %v1386_v35 = vsel %vm1379_vm4, %v5913_v31, -inf }
 0x437   : >> { %1384 = vmax.xlane.f32.xlu0 %v1383_v34  ;;  %1387 = vmax.xlane.f32.xlu1 %v1386_v35  ;;  %v1376_v34 = vld [vmem:[%s5946_s25 + $0x28] sm:$0xff]  ;;  %v5963_v35 = vld [vmem:[%s5946_s25 + $0x30] sm:$0xff] }
 0x438   : >> { %v5919_v38 = vpop.f32.mrb[12].mxu0 }
 0x439   : >> { %v5921_v39 = vpop.f32.mrb[13].mxu0  ;;  %v1395_v48 = vsel %vm1379_vm4, %v5919_v38, -inf }
 0x43a   : >> { %v1392_v45 = vsel %vm1379_vm4, %v5921_v39, -inf }
 0x43b   : >> { %1390 = vmax.xlane.f32.xlu1 %v1389_v44  ;;  %1393 = vmax.xlane.f32.xlu0 %v1392_v45  ;;  %v4384_v44 = vpack.c.bf16 %v1183_v17, %v1178_v20  ;;  %v1187_v45 = vpop.f32.mrb[5].mxu1  ;;  %v1503_v17 = vld [vmem:[%s5986_s17 + $0x10] sm:$0xff] }
 0x43c   : >> { %v5929_v49 = vpop.f32.mrb[14].mxu0  ;;  %v1188_v29 = vadd.f32 %v5941_v58, %v1187_v45  ;;  %v1506_v45 = vld [vmem:[%s5986_s17 + $0x28] sm:$0xff] }
 0x43d   : >> { %v5931_v52 = vpop.f32.mrb[15].mxu0  ;;  %v1401_v56 = vsel %vm1379_vm4, %v5929_v49, -inf  ;;  %4385 = vmatprep.subr.bf16.mxu1 %v4384_v44 }
 0x43e   : >> { %v1398_v53 = vsel %vm1379_vm4, %v5931_v52, -inf  ;;  %4387 = vmatpush3.bf16.msra.mxu1 %v4384_v44 }
 0x43f   : >> { %1396 = vmax.xlane.f32.xlu1 %v1395_v48  ;;  %1399 = vmax.xlane.f32.xlu0 %v1398_v53 }
 0x443   : >> { %1402 = vmax.xlane.f32.xlu1 %v1401_v56  ;;  %v1193_v56 = vadd.f32 %v4180_v27, %v5941_v58 }
 0x4c0   : >> { %v1382_v40 = vpop.xlane.xlu0 %1381 }
 0x4c1   : >> { %v1404_v41 = vmax.f32 %v1371_v36, %v1382_v40  ;;  %v4183_v40 = vpop.f32.mrb[6].mxu1 }
 0x4c3   : >> { %v1412_v61 = vsub.f32 %v1371_v36, %v1404_v41  ;;  %1760 = vst.msk [vmem:[%s5946_s25] sm:$0xff] %vm1549_vm5, %v1404_v41  ;;  %1438 = vperm.xlu0 %4789, %v1404_v41   ;;  %v5975_v41 = vld [vmem:[%s5946_s25 + $0x38] sm:$0xff] }
 0x4c4   : >> { %v1385_v62 = vpop.xlane.xlu0 %1384  ;;  %v1388_v63 = vpop.xlane.xlu1 %1387 }
 0x4c5   : >> { %v1420_v8 = vmul.f32 1.442695, %v1412_v61  ;;  %v1405_v9 = vmax.f32 %v1372_v59, %v1385_v62  ;;  %v1406_v10 = vmax.f32 %v1373_v60, %v1388_v63  ;;  %v1203_v63 = vadd.f32 %v4183_v40, %v5941_v58 }
 0x4c7   : >> { %4791 = vpow2.f32 %v1420_v8  ;;  %v1413_v15 = vsub.f32 %v1372_v59, %v1405_v9  ;;  %1761 = vst.msk [vmem:[%s5946_s25 + $0x8] sm:$0xff] %vm1549_vm5, %v1405_v9  ;;  %v1414_v16 = vsub.f32 %v1373_v60, %v1406_v10  ;;  %1762 = vst.msk [vmem:[%s5946_s25 + $0x10] sm:$0xff] %vm1549_vm5, %v1406_v10  ;;  %1443 = vperm.xlu1 %4790, %v1405_v9   ;;  %v1197_v60 = vpop.f32.mrb[7].mxu1  ;;  %v1501_v8 = vld [vmem:[%s5986_s17] sm:$0xff] }
 0x4c8   : >> { %v1391_v18 = vpop.xlane.xlu1 %1390  ;;  %v1394_v19 = vpop.xlane.xlu0 %1393  ;;  %v4388_v59 = vpack.c.bf16 %v1193_v56, %v1188_v29  ;;  %v1198_v11 = vadd.f32 %v5941_v58, %v1197_v60  ;;  %v1502_v58 = vld [vmem:[%s5986_s17 + $0x8] sm:$0xff] }
 0x4c9   : >> { %v1422_v21 = vmul.f32 1.442695, %v1413_v15  ;;  %v1424_v22 = vmul.f32 1.442695, %v1414_v16  ;;  %v1407_v23 = vmax.f32 %v1374_v12, %v1391_v18  ;;  %v1408_v24 = vmax.f32 %v1375_v13, %v1394_v19 }
 0x4ca   : >> { %4389 = vmatprep.subr.bf16.mxu1 %v4388_v59  ;;  %v4392_v14 = vpack.c.bf16 %v1203_v63, %v1198_v11  ;;  %v1559_v63 = vld [vmem:[%s6022_s20] sm:$0xff] }
 0x4cb   : >> { %4793 = vpow2.f32 %v1422_v21  ;;  %v1415_v48 = vsub.f32 %v1374_v12, %v1407_v23  ;;  %1763 = vst.msk [vmem:[%s5946_s25 + $0x18] sm:$0xff] %vm1549_vm5, %v1407_v23  ;;  %1453 = vperm.xlu1 %4790, %v1407_v23   ;;  %v1416_v53 = vsub.f32 %v1375_v13, %v1408_v24  ;;  %1764 = vst.msk [vmem:[%s5946_s25 + $0x20] sm:$0xff] %vm1549_vm5, %v1408_v24  ;;  %4391 = vmatpush3.bf16.msra.mxu1 %v4388_v59  ;;  %v1504_v21 = vld [vmem:[%s5986_s17 + $0x18] sm:$0xff]  ;;  %v1505_v23 = vld [vmem:[%s5986_s17 + $0x20] sm:$0xff] }
 0x4cc   : >> { %4795 = vpow2.f32 %v1424_v22  ;;  %v1397_v57 = vpop.xlane.xlu1 %1396  ;;  %v1400_v28 = vpop.xlane.xlu0 %1399  ;;  %4393 = vmatprep.subr.bf16.mxu1 %v4392_v14 }
 0x4cd   : >> { %v1426_v32 = vmul.f32 1.442695, %v1415_v48  ;;  %v1409_v33 = vmax.f32 %v1376_v34, %v1397_v57  ;;  %v1428_v36 = vmul.f32 1.442695, %v1416_v53  ;;  %v5972_v37 = vmax.f32 %v5963_v35, %v1400_v28 }
 0x4cf   : >> { %4797 = vpow2.f32 %v1426_v32  ;;  %v1417_v61 = vsub.f32 %v1376_v34, %v1409_v33  ;;  %1765 = vst.msk [vmem:[%s5946_s25 + $0x28] sm:$0xff] %vm1549_vm5, %v1409_v33  ;;  %1448 = vperm.xlu1 %4790, %v1406_v10   ;;  %v1418_v62 = vsub.f32 %v5963_v35, %v5972_v37  ;;  %1766 = vst.msk [vmem:[%s5946_s25 + $0x30] sm:$0xff] %vm1549_vm5, %v5972_v37  ;;  %4395 = vmatpush3.bf16.msra.mxu1 %v4392_v14 }
 0x4d0   : >> { %4799 = vpow2.f32 %v1428_v36  ;;  %v1403_v9 = vpop.xlane.xlu1 %1402 }
 0x4d1   : >> { %v4792_v10 = vpop.eup %4791  ;;  %v1430_v12 = vmul.f32 1.442695, %v1417_v61  ;;  %v5991_v13 = vmax.f32 %v5975_v41, %v1403_v9 }
 0x4d2   : >> { %1569 = vperm.xlu0 %4789, %v4792_v10   ;;  %v5993_v15 = vmul.f32 %v4792_v10, %v1501_v8 }
 0x4d3   : >> { %4801 = vpow2.f32 %v1430_v12  ;;  %1463 = vperm.xlu1 %4790, %v1409_v33   ;;  %v1419_v16 = vsub.f32 %v5975_v41, %v5991_v13  ;;  %1767 = vst.msk [vmem:[%s5946_s25 + $0x38] sm:$0xff] %vm1549_vm5, %v5991_v13 }
 0x4d5   : >> { %v4794_v18 = vpop.eup %4793 }
 0x4d6   : >> { %v4796_v19 = vpop.eup %4795  ;;  %v6002_v20 = vmul.f32 %v4794_v18, %v1502_v58 }
 0x4d7   : >> { %1458 = vperm.xlu1 %4790, %v1408_v24   ;;  %v6005_v22 = vmul.f32 %v4796_v19, %v1503_v17 }
 0x4d9   : >> { %v4798_v27 = vpop.eup %4797 }
 0x4da   : >> { %v4800_v34 = vpop.eup %4799  ;;  %1584 = vperm.xlu0 %4789, %v4798_v27   ;;  %v6008_v44 = vmul.f32 %v4798_v27, %v1504_v21 }
 0x4db   : >> { %1468 = vperm.xlu1 %4790, %v5972_v37   ;;  %v6012_v48 = vmul.f32 %v4800_v34, %v1505_v23 }
 0x4dd   : >> { %v4802_v53 = vpop.eup %4801 }
 0x4de   : >> { %1594 = vperm.xlu0 %4789, %v4802_v53   ;;  %v6014_v56 = vmul.f32 %v4802_v53, %v1506_v45 }
 0x4df   : >> { %1473 = vperm.xlu1 %4790, %v5991_v13  }
 0x4e3   : >> { %1574 = vperm.xlu1 %4790, %v4794_v18   ;;  %v1562_v18 = vld [vmem:[%s6022_s20 + $0x18] sm:$0xff] }
 0x4e7   : >> { %1579 = vperm.xlu1 %4790, %v4796_v19  }
 0x4eb   : >> { %1589 = vperm.xlu1 %4790, %v4800_v34  }
 0x542   : >> { %v1439_v24 = vpop.permute.xlu0 %1438 }
 0x543   : >> { %v1476_v57 = vsub.f32 %v5907_v26, %v1439_v24 }
 0x545   : >> { %v1484_v28 = vmul.f32 1.442695, %v1476_v57 }
 0x546   : >> { %v1444_v29 = vpop.permute.xlu1 %1443 }
 0x547   : >> { %4803 = vpow2.f32 %v1484_v28  ;;  %v1477_v32 = vsub.f32 %v5905_v25, %v1444_v29  ;;  %v1560_v29 = vld [vmem:[%s6022_s20 + $0x8] sm:$0xff] }
 0x549   : >> { %v1486_v33 = vmul.f32 1.442695, %v1477_v32 }
 0x54a   : >> { %v1454_v36 = vpop.permute.xlu1 %1453 }
 0x54b   : >> { %4805 = vpow2.f32 %v1486_v33  ;;  %v1479_v40 = vsub.f32 %v5911_v30, %v1454_v36 }
 0x54d   : >> { %v1490_v59 = vmul.f32 1.442695, %v1479_v40 }
 0x54e   : >> { %v1449_v60 = vpop.permute.xlu1 %1448 }
 0x54f   : >> { %4807 = vpow2.f32 %v1490_v59  ;;  %v1478_v61 = vsub.f32 %v5913_v31, %v1449_v60  ;;  %v1561_v59 = vld [vmem:[%s6022_s20 + $0x10] sm:$0xff] }
 0x551   : >> { %v4804_v26 = vpop.eup %4803  ;;  %v1488_v8 = vmul.f32 1.442695, %v1478_v61  ;;  %v1570_v9 = vpop.permute.xlu0 %1569 }
 0x552   : >> { %v6025_v11 = vmul.f32 %v1570_v9, %v1559_v63  ;;  %v1464_v25 = vpop.permute.xlu1 %1463  ;;  %4228 = vmatprep.mubr.msk.f32.mxu1 %vm1379_vm4, %v4804_v26  ;;  %v1517_v30 = vsel %vm1379_vm4, %v4804_v26, 0.0 }
 0x553   : >> { %4809 = vpow2.f32 %v1488_v8  ;;  %v1481_v10 = vsub.f32 %v5919_v38, %v1464_v25  ;;  %1518 = vadd.xlane.f32.xlu1 %v1517_v30  ;;  %v1432_v30 = vmul.f32 1.442695, %v1418_v62 }
 0x555   : >> { %v4806_v31 = vpop.eup %4805  ;;  %v1494_v12 = vmul.f32 1.442695, %v1481_v10  ;;  %v1434_v10 = vmul.f32 1.442695, %v1419_v16 }
 0x556   : >> { %v1459_v14 = vpop.permute.xlu1 %1458  ;;  %4229 = vmatmul.mubr.msk.f32.vlgmr.msra.gmra.mrb[8].mxu1 %vm1379_vm4, %v4806_v31  ;;  %v1520_v58 = vsel %vm1379_vm4, %v4806_v31, 0.0 }
 0x557   : >> { %4811 = vpow2.f32 %v1494_v12  ;;  %v1480_v17 = vsub.f32 %v5921_v39, %v1459_v14  ;;  %1521 = vadd.xlane.f32.xlu0 %v1520_v58 }
 0x559   : >> { %v4808_v19 = vpop.eup %4807  ;;  %v1492_v21 = vmul.f32 1.442695, %v1480_v17  ;;  %v1585_v23 = vpop.permute.xlu0 %1584 }
 0x55a   : >> { %v6034_v27 = vmul.f32 %v1585_v23, %v1562_v18  ;;  %v1469_v38 = vpop.permute.xlu1 %1468  ;;  %v1526_v34 = vsel %vm1379_vm4, %v4808_v19, 0.0 }
 0x55b   : >> { %4813 = vpow2.f32 %v1492_v21  ;;  %v1482_v45 = vsub.f32 %v5931_v52, %v1469_v38  ;;  %1527 = vadd.xlane.f32.xlu1 %v1526_v34  ;;  %v1507_v21 = vld [vmem:[%s5986_s17 + $0x30] sm:$0xff]  ;;  %v1508_v34 = vld [vmem:[%s5986_s17 + $0x38] sm:$0xff] }
 0x55d   : >> { %v4810_v53 = vpop.eup %4809  ;;  %v1496_v24 = vmul.f32 1.442695, %v1482_v45  ;;  %v1595_v58 = vpop.permute.xlu0 %1594 }
 0x55e   : >> { %v1474_v57 = vpop.permute.xlu1 %1473  ;;  %4231 = vmatprep.mubr.msk.f32.mxu1 %vm1379_vm4, %v4810_v53  ;;  %v1523_v39 = vsel %vm1379_vm4, %v4810_v53, 0.0 }
 0x55f   : >> { %4815 = vpow2.f32 %v1496_v24  ;;  %v1483_v28 = vsub.f32 %v5929_v49, %v1474_v57  ;;  %1524 = vadd.xlane.f32.xlu0 %v1523_v39  ;;  %4232 = vmatmul.mubr.msk.f32.gmra.mrb[10].mxu1 %vm1379_vm4, %v4808_v19 }
 0x561   : >> { %v4812_v32 = vpop.eup %4811  ;;  %v1498_v33 = vmul.f32 1.442695, %v1483_v28 }
 0x562   : >> { %v1575_v36 = vpop.permute.xlu1 %1574  ;;  %v1532_v52 = vsel %vm1379_vm4, %v4812_v32, 0.0 }
 0x563   : >> { %4817 = vpow2.f32 %v1498_v33  ;;  %v1608_v40 = vmul.f32 %v1575_v36, %v1560_v29  ;;  %1533 = vadd.xlane.f32.xlu1 %v1532_v52  ;;  %v1564_v36 = vld [vmem:[%s6022_s20 + $0x28] sm:$0xff]  ;;  %v1563_v52 = vld [vmem:[%s6022_s20 + $0x20] sm:$0xff] }
 0x564   : >> { %4819 = vpow2.f32 %v1432_v30 }
 0x565   : >> { %v4814_v60 = vpop.eup %4813  ;;  %4821 = vpow2.f32 %v1434_v10 }
 0x566   : >> { %v1580_v61 = vpop.permute.xlu1 %1579  ;;  %4234 = vmatprep.mubr.msk.f32.mxu1 %vm1379_vm4, %v4814_v60  ;;  %v1529_v63 = vsel %vm1379_vm4, %v4814_v60, 0.0 }
 0x567   : >> { %v1609_v49 = vmul.f32 %v1580_v61, %v1561_v59  ;;  %1530 = vadd.xlane.f32.xlu0 %v1529_v63  ;;  %4235 = vmatmul.mubr.msk.f32.gmra.mrb[12].mxu1 %vm1379_vm4, %v4812_v32 }
 0x569   : >> { %v4816_v26 = vpop.eup %4815 }
 0x56a   : >> { %4237 = vmatprep.mubr.msk.f32.mxu1 %vm1379_vm4, %v4816_v26  ;;  %v1535_v8 = vsel %vm1379_vm4, %v4816_v26, 0.0  ;;  %v1590_v14 = vpop.permute.xlu1 %1589  ;;  %v1566_v26 = vld [vmem:[%s6022_s20 + $0x38] sm:$0xff] }
 0x56b   : >> { %1536 = vadd.xlane.f32.xlu0 %v1535_v8 }
 0x56d   : >> { %v4818_v9 = vpop.eup %4817 }
 0x56e   : >> { %4238 = vmatmul.mubr.msk.f32.gmra.mrb[14].mxu1 %vm1379_vm4, %v4818_v9  ;;  %v1538_v25 = vsel %vm1379_vm4, %v4818_v9, 0.0  ;;  %v4820_v31 = vpop.eup %4819 }
 0x56f   : >> { %1539 = vadd.xlane.f32.xlu1 %v1538_v25  ;;  %v4822_v12 = vpop.eup %4821 }
 0x570   : >> { %v1516_v45 = vmul.f32 %v4822_v12, %v1508_v34 }
 0x580   : >> { %1599 = vperm.xlu1 %4790, %v4820_v31  }
 0x581   : >> { %1604 = vperm.xlu0 %4789, %v4822_v12  }
 0x5e0   : >> { %v1519_v17 = vpop.xlane.xlu1 %1518 }
 0x5e1   : >> { %v1541_v35 = vadd.f32 %v1519_v17, %v5993_v15 }
 0x5e3   : >> { %1550 = vst.msk [vmem:[%s5986_s17] sm:$0xff] %vm1549_vm5, %v1541_v35 }
 0x5e4   : >> { %v1522_v37 = vpop.xlane.xlu0 %1521 }
 0x5e5   : >> { %v1542_v41 = vadd.f32 %v1522_v37, %v6002_v20 }
 0x5e7   : >> { %1551 = vst.msk [vmem:[%s5986_s17 + $0x8] sm:$0xff] %vm1549_vm5, %v1542_v41 }
 0x5e8   : >> { %v1528_v62 = vpop.xlane.xlu1 %1527 }
 0x5e9   : >> { %v1544_v13 = vadd.f32 %v1528_v62, %v6008_v44  ;;  %v1515_v44 = vmul.f32 %v4820_v31, %v1507_v21 }
 0x5eb   : >> { %1553 = vst.msk [vmem:[%s5986_s17 + $0x18] sm:$0xff] %vm1549_vm5, %v1544_v13 }
 0x5ec   : >> { %v1525_v16 = vpop.xlane.xlu0 %1524 }
 0x5ed   : >> { %v1543_v18 = vadd.f32 %v1525_v16, %v6005_v22 }
 0x5ef   : >> { %1552 = vst.msk [vmem:[%s5986_s17 + $0x10] sm:$0xff] %vm1549_vm5, %v1543_v18 }
 0x5f0   : >> { %v1534_v15 = vpop.xlane.xlu1 %1533 }
 0x5f1   : >> { %v1546_v19 = vadd.f32 %v1534_v15, %v6014_v56 }
 0x5f3   : >> { %1555 = vst.msk [vmem:[%s5986_s17 + $0x28] sm:$0xff] %vm1549_vm5, %v1546_v19 }
 0x5f4   : >> { %v1531_v20 = vpop.xlane.xlu0 %1530 }
 0x5f5   : >> { %v1545_v23 = vadd.f32 %v1531_v20, %v6012_v48 }
 0x5f7   : >> { %1554 = vst.msk [vmem:[%s5986_s17 + $0x20] sm:$0xff] %vm1549_vm5, %v1545_v23 }
 0x5f8   : >> { %v1537_v38 = vpop.xlane.xlu0 %1536 }
 0x5f9   : >> { %v1547_v22 = vadd.f32 %v1537_v38, %v1515_v44 }
 0x5fb   : >> { %1556 = vst.msk [vmem:[%s5986_s17 + $0x30] sm:$0xff] %vm1549_vm5, %v1547_v22 }
 0x5fc   : >> { %v1540_v56 = vpop.xlane.xlu1 %1539 }
 0x5fd   : >> { %v1548_v53 = vadd.f32 %v1540_v56, %v1516_v45 }
 0x5ff   : >> { %1557 = vst.msk [vmem:[%s5986_s17 + $0x38] sm:$0xff] %vm1549_vm5, %v1548_v53 }
 0x600   : >> { %v1600_v8 = vpop.permute.xlu1 %1599 }
 0x629   : >> { %v4230_v24 = vpop.f32.mrb[8].mxu1 }
 0x62a   : >> { %v1745_v48 = vadd.f32 %v4230_v24, %v1608_v40  ;;  %v1705_v57 = vpop.f32.mrb[9].mxu1  ;;  %v1611_v40 = vmul.f32 %v1590_v14, %v1563_v52 }
 0x62b   : >> { %v1744_v39 = vadd.f32 %v1705_v57, %v6025_v11  ;;  %v1612_v11 = vmul.f32 %v1595_v58, %v1564_v36 }
 0x62c   : >> { %1753 = vst.msk [vmem:[%s6022_s20 + $0x8] sm:$0xff] %vm1216_vm2, %v1745_v48 }
 0x62d   : >> { %1752 = vst.msk [vmem:[%s6022_s20] sm:$0xff] %vm1216_vm2, %v1744_v39 }
 0x632   : >> { %v4233_v28 = vpop.f32.mrb[10].mxu1 }
 0x633   : >> { %v1747_v29 = vadd.f32 %v4233_v28, %v6034_v27  ;;  %v1715_v32 = vpop.f32.mrb[11].mxu1  ;;  %v1605_v27 = vpop.permute.xlu0 %1604 }
 0x634   : >> { %v1746_v33 = vadd.f32 %v1715_v32, %v1609_v49  ;;  %v1565_v49 = vld [vmem:[%s6022_s20 + $0x30] sm:$0xff]  ;;  %v1614_v9 = vmul.f32 %v1605_v27, %v1566_v26 }
 0x635   : >> { %1755 = vst.msk [vmem:[%s6022_s20 + $0x18] sm:$0xff] %vm1216_vm2, %v1747_v29  ;;  %v1613_v25 = vmul.f32 %v1600_v8, %v1565_v49 }
 0x636   : >> { %1754 = vst.msk [vmem:[%s6022_s20 + $0x10] sm:$0xff] %vm1216_vm2, %v1746_v33 }
 0x63a   : >> { %v4236_v59 = vpop.f32.mrb[12].mxu1 }
 0x63b   : >> { %v1749_v60 = vadd.f32 %v4236_v59, %v1612_v11  ;;  %v1725_v61 = vpop.f32.mrb[13].mxu1 }
 0x63c   : >> { %v1748_v63 = vadd.f32 %v1725_v61, %v1611_v40 }
 0x63d   : >> { %1757 = vst.msk [vmem:[%s6022_s20 + $0x28] sm:$0xff] %vm1216_vm2, %v1749_v60 }
 0x63e   : >> { %1756 = vst.msk [vmem:[%s6022_s20 + $0x20] sm:$0xff] %vm1216_vm2, %v1748_v63 }
 0x63f   : > { %943 = sbr.rel (!%p941_p4) target bundleno = 575 (0x23f), region = 177 }
 0x641   : >> { %v4239_v30 = vpop.f32.mrb[14].mxu1 }
 0x642   : >> { %v1751_v10 = vadd.f32 %v4239_v30, %v1614_v9  ;;  %v1735_v31 = vpop.f32.mrb[15].mxu1 }
 0x643   : >> { %v1750_v12 = vadd.f32 %v1735_v31, %v1613_v25 }
 0x644   : >> { %1759 = vst.msk [vmem:[%s6022_s20 + $0x38] sm:$0xff] %vm1216_vm2, %v1751_v10 }
 0x645   : >> { %1758 = vst.msk [vmem:[%s6022_s20 + $0x30] sm:$0xff] %vm1216_vm2, %v1750_v12 }
 0x646   : > { %1771 = sbr.rel (%p3805_p5) target bundleno = 2810 (0xafa), region = 106 }
 0x64d   : > { %v6108_v14 = vmov 0.0   ;;  %v6110_v58 = vmov 0.0   ;;  %v6112_v17 = vmov 0.0   ;;  %v6114_v35 = vmov 0.0   ;;  %s6124_s28 = smov 0  }
 0x64e   : > { %v6116_v37 = vmov 0.0   ;;  %v6118_v41 = vmov 0.0   ;;  %v6120_v62 = vmov 0.0   ;;  %v6122_v13 = vmov 0.0  }
 0x64f LB: >> { %v5256_v42 = vmov 0   ;;  %s3806_s16 = sshll.u32 %s5247_s28, 6  ;;  %s3807_s14 = sshll.u32 %s5247_s28, 5  ;;  %s5247_s28 = sphi %s6124_s28, %s1777_s28   ;;  %v5243_v13 = vphi %v6122_v13, %v7691_v13   ;;  %v5239_v62 = vphi %v6120_v62, %v7690_v62   ;;  %v5235_v41 = vphi %v6118_v41, %v7689_v41   ;;  %v5231_v37 = vphi %v6116_v37, %v7688_v37   ;;  %v5227_v35 = vphi %v6114_v35, %v7687_v35   ;;  %v5223_v17 = vphi %v6112_v17, %v7686_v17   ;;  %v5219_v58 = vphi %v6110_v58, %v7685_v58   ;;  %v5215_v14 = vphi %v6108_v14, %v7684_v14  }
 0x650   : >> { %4824 = vset.pattern.permute.xlu1 %v5256_v42  ;;  %4823 = vset.pattern.permute.xlu0 %v5256_v42  ;;  %s1862_s15 = scalar_lea.vmem %s7561_s8, %s3807_s14  ;;  %s1796_s12 = scalar_lea.vmem [#allocation4], %s3806_s16 }
 0x651   : >> { %v1798_v43 = vld [vmem:[%s1796_s12 + $0x8] sm:$0xff]  ;;  %v1797_v46 = vld [vmem:[%s1796_s12] sm:$0xff]  ;;  %v1865_v55 = vld [vmem:[%s1862_s15 + $0x10] sm:$0xff]  ;;  %s1787_s13 = scalar_lea.vmem [#allocation5], %s3806_s16  ;;  %s1777_s28 = sadd.s32 1, %s5247_s28  }
 0x652   : >> { %v1802_v47 = vld [vmem:[%s1796_s12 + $0x28] sm:$0xff]  ;;  %4825 = vrcp.f32 %v1798_v43  ;;  %v1801_v50 = vld [vmem:[%s1796_s12 + $0x20] sm:$0xff]  ;;  %v1866_v16 = vld [vmem:[%s1862_s15 + $0x18] sm:$0xff]  ;;  %p1774_p7 = scmp.ge.s32.totalorder %s1777_s28, 4  }
 0x653   : >> { %4827 = vrcp.f32 %v1797_v46  ;;  %v1863_v51 = vld [vmem:[%s1862_s15] sm:$0xff]  ;;  %v1864_v54 = vld [vmem:[%s1862_s15 + $0x8] sm:$0xff]  ;;  %v1803_v18 = vld [vmem:[%s1796_s12 + $0x30] sm:$0xff]  ;;  %v4400_v19 = vpack.c.bf16 %v1866_v16, %v1865_v55  ;;  %s7692_s27 = sld [smem:[#allocation112_spill]] (%p1774_p7)  ;;  %s7701_s15 = sld [smem:[#allocation114_spill]] (%p1774_p7) }
 0x654   : >> { %4829 = vrcp.f32 %v1802_v47  ;;  %v4396_v15 = vpack.c.bf16 %v1864_v54, %v1863_v51  ;;  %v1799_v20 = vld [vmem:[%s1796_s12 + $0x10] sm:$0xff]  ;;  %v1804_v21 = vld [vmem:[%s1796_s12 + $0x38] sm:$0xff]  ;;  %v1789_v48 = vld [vmem:[%s1787_s13 + $0x8] sm:$0xff]  ;;  %s7703_s23 = sld [smem:[#allocation113_spill]] (%p1774_p7)  ;;  %s7862_s25 = sld [smem:[#allocation115_spill]] (%p1774_p7) }
 0x655   : >> { %4831 = vrcp.f32 %v1801_v50  ;;  %v1800_v23 = vld [vmem:[%s1796_s12 + $0x18] sm:$0xff]  ;;  %v1788_v57 = vld [vmem:[%s1787_s13] sm:$0xff]  ;;  %v1793_v33 = vld [vmem:[%s1787_s13 + $0x28] sm:$0xff] }
 0x656   : >> { %4397 = vmatprep.subr.bf16.mxu0 %v4396_v15  ;;  %4548 = vmatprep.subr.bf16.mxu1 %v4396_v15  ;;  %4833 = vrcp.f32 %v1803_v18  ;;  %v1792_v36 = vld [vmem:[%s1787_s13 + $0x20] sm:$0xff]  ;;  %v1794_v60 = vld [vmem:[%s1787_s13 + $0x30] sm:$0xff]  ;;  %v1795_v8 = vld [vmem:[%s1787_s13 + $0x38] sm:$0xff] }
 0x657   : >> { %4399 = vmatpush3.bf16.msra.mxu0 %v4396_v15  ;;  %4550 = vmatpush3.bf16.msra.mxu1 %v4396_v15  ;;  %4835 = vrcp.f32 %v1799_v20  ;;  %v1790_v61 = vld [vmem:[%s1787_s13 + $0x10] sm:$0xff]  ;;  %v1791_v9 = vld [vmem:[%s1787_s13 + $0x18] sm:$0xff] }
 0x658   : >> { %4401 = vmatprep.subr.bf16.mxu0 %v4400_v19  ;;  %4549 = vmatprep.subr.bf16.mxu1 %v4400_v19  ;;  %4837 = vrcp.f32 %v1804_v21 }
 0x659   : >> { %4839 = vrcp.f32 %v1800_v23  ;;  %s7702_s12 = smov (%p1774_p7), %s7701_s15 }
 0x65b   : >> { %4403 = vmatpush3.bf16.msra.mxu0 %v4400_v19  ;;  %4551 = vmatpush3.bf16.msra.mxu1 %v4400_v19 }
 0x65c   : >> { %v4826_v44 = vpop.eup %4825 }
 0x65d   : >> { %v4828_v38 = vpop.eup %4827  ;;  %1820 = vperm.xlu1 %4824, %v4826_v44   ;;  %v3816_v44 = vld [vmem:[%s7562_s9] ss:$0 sm:$0xff] (%p1774_p7) }
 0x65e   : >> { %v4830_v34 = vpop.eup %4829  ;;  %1815 = vperm.xlu0 %4823, %v4828_v38  }
 0x65f   : >> { %v4832_v22 = vpop.eup %4831 }
 0x660   : >> { %v4834_v45 = vpop.eup %4833 }
 0x661   : >> { %1840 = vperm.xlu1 %4824, %v4830_v34   ;;  %v4836_v56 = vpop.eup %4835 }
 0x662   : >> { %1835 = vperm.xlu0 %4823, %v4832_v22   ;;  %v4838_v53 = vpop.eup %4837 }
 0x663   : >> { %v4840_v24 = vpop.eup %4839 }
 0x665   : >> { %1845 = vperm.xlu1 %4824, %v4834_v45  }
 0x666   : >> { %1825 = vperm.xlu0 %4823, %v4836_v56  }
 0x669   : >> { %1850 = vperm.xlu1 %4824, %v4838_v53   ;;  %v2077_v53 = vld [vmem:[%s7692_s27 + $0x8] sm:$0xff] (%p1774_p7) }
 0x66a   : >> { %1830 = vperm.xlu0 %4823, %v4840_v24  }
 0x6dc   : >> { %v1821_v39 = vpop.permute.xlu1 %1820 }
 0x6dd   : >> { %v1854_v28 = vmul.f32 %v1821_v39, %v1789_v48  ;;  %v1816_v29 = vpop.permute.xlu0 %1815  ;;  %v2089_v39 = vld [vmem:[%s7692_s27 + $0x68] sm:$0xff] (%p1774_p7) }
 0x6de   : >> { %v1853_v32 = vmul.f32 %v1816_v29, %v1788_v57  ;;  %v2091_v29 = vld [vmem:[%s7692_s27 + $0x78] sm:$0xff] (%p1774_p7) }
 0x6e0   : >> { %4248 = vmatprep.mubr.msk.f32.mxu0 %vm1216_vm2, %v1853_v32  ;;  %v1841_v52 = vpop.permute.xlu1 %1840 }
 0x6e1   : >> { %v1858_v11 = vmul.f32 %v1841_v52, %v1793_v33  ;;  %v1836_v40 = vpop.permute.xlu0 %1835  ;;  %4249 = vmatmul.mubr.msk.f32.vlgmr.msra.gmra.mrb[0].mxu0 %vm1216_vm2, %v1854_v28  ;;  %v2087_v28 = vld [vmem:[%s7692_s27 + $0x58] sm:$0xff] (%p1774_p7) }
 0x6e2   : >> { %v1857_v59 = vmul.f32 %v1836_v40, %v1792_v36  ;;  %v2084_v36 = vld [vmem:[%s7692_s27 + $0x40] sm:$0xff] (%p1774_p7) }
 0x6e4   : >> { %4254 = vmatprep.mubr.msk.f32.mxu1 %vm1216_vm2, %v1857_v59  ;;  %v1846_v63 = vpop.permute.xlu1 %1845  ;;  %v2088_v59 = vld [vmem:[%s7692_s27 + $0x60] sm:$0xff] (%p1774_p7) }
 0x6e5   : >> { %v1859_v26 = vmul.f32 %v1846_v63, %v1794_v60  ;;  %v1826_v27 = vpop.permute.xlu0 %1825  ;;  %4255 = vmatmul.mubr.msk.f32.vlgmr.msra.gmra.mrb[0].mxu1 %vm1216_vm2, %v1858_v11  ;;  %v2086_v60 = vld [vmem:[%s7692_s27 + $0x50] sm:$0xff] (%p1774_p7) }
 0x6e6   : >> { %v1855_v49 = vmul.f32 %v1826_v27, %v1790_v61  ;;  %v2090_v61 = vld [vmem:[%s7692_s27 + $0x70] sm:$0xff] (%p1774_p7)  ;;  %v4440_v27 = vpack.c.bf16 (%p1774_p7), %v2091_v29, %v2087_v28  ;;  %v2119_v28 = vld [vmem:[%s7692_s27 + $0x158] sm:$0xff] (%p1774_p7) }
 0x6e7   : >> { %4257 = vmatprep.mubr.msk.f32.mxu1 %vm1216_vm2, %v1859_v26 }
 0x6e8   : >> { %4251 = vmatprep.mubr.msk.f32.mxu0 %vm1216_vm2, %v1855_v49  ;;  %v1851_v25 = vpop.permute.xlu1 %1850  ;;  %v2093_v49 = vld [vmem:[%s7692_s27 + $0x88] sm:$0xff] (%p1774_p7) }
 0x6e9   : >> { %v1860_v30 = vmul.f32 %v1851_v25, %v1795_v8  ;;  %v1831_v10 = vpop.permute.xlu0 %1830  ;;  %v2097_v8 = vld [vmem:[%s7692_s27 + $0xa8] sm:$0xff] (%p1774_p7)  ;;  %v2099_v25 = vld [vmem:[%s7692_s27 + $0xb8] sm:$0xff] (%p1774_p7) }
 0x6ea   : >> { %v1856_v31 = vmul.f32 %v1831_v10, %v1791_v9  ;;  %v2095_v9 = vld [vmem:[%s7692_s27 + $0x98] sm:$0xff] (%p1774_p7)  ;;  %v4410_v10 = vpack.c.bf16 (%p1774_p7), %v2088_v59, %v2084_v36  ;;  %v2116_v36 = vld [vmem:[%s7692_s27 + $0x140] sm:$0xff] (%p1774_p7)  ;;  %v2118_v59 = vld [vmem:[%s7692_s27 + $0x150] sm:$0xff] (%p1774_p7) }
 0x6eb   : >> { %4258 = vmatmul.mubr.msk.f32.gmra.mrb[2].mxu1 %vm1216_vm2, %v1860_v30 }
 0x6ec   : >> { %4252 = vmatmul.mubr.msk.f32.gmra.mrb[2].mxu0 %vm1216_vm2, %v1856_v31  ;;  %v4442_v31 = vpack.c.bf16 (%p1774_p7), %v2090_v61, %v2086_v60  ;;  %v2122_v60 = vld [vmem:[%s7692_s27 + $0x170] sm:$0xff] (%p1774_p7)  ;;  %v2125_v61 = vld [vmem:[%s7692_s27 + $0x188] sm:$0xff] (%p1774_p7) }
 0x7b4   : >> { %v4250_v12 = vpop.f32.mrb[0].mxu0 }
 0x7b5   : >> { %v1998_v42 = vadd.f32 %v5239_v62, %v4250_v12   ;;  %v1958_v43 = vpop.f32.mrb[1].mxu0  ;;  %v2092_v12 = vld [vmem:[%s7692_s27 + $0x80] sm:$0xff] (%p1774_p7) }
 0x7b6   : >> { %v1997_v46 = vadd.f32 %v5243_v13, %v1958_v43  }
 0x7b7   : >> { %v7690_v62 = vmov %v1998_v42  ;;  %v2006_v38 = vadd.f32 (%p1774_p7), %v1998_v42, %v5502_v1  ;;  %v2079_v1 = vld [vmem:[%s7692_s27 + $0x18] sm:$0xff] (%p1774_p7) }
 0x7b8   : >> { %v4256_v47 = vpop.f32.mrb[0].mxu1  ;;  %v7691_v13 = vmov %v1997_v46 }
 0x7b9   : >> { %v2002_v50 = vadd.f32 %v5223_v17, %v4256_v47   ;;  %v1978_v51 = vpop.f32.mrb[1].mxu1  ;;  %v2005_v13 = vadd.f32 (%p1774_p7), %v1997_v46, %v5500_v0  ;;  %v2081_v0 = vld [vmem:[%s7692_s27 + $0x28] sm:$0xff] (%p1774_p7)  ;;  %v2096_v47 = vld [vmem:[%s7692_s27 + $0xa0] sm:$0xff] (%p1774_p7) }
 0x7ba   : >> { %v2001_v54 = vadd.f32 %v5227_v35, %v1978_v51   ;;  %v4404_v52 = vpack.c.bf16 (%p1774_p7), %v2081_v0, %v2077_v53  ;;  %v2098_v51 = vld [vmem:[%s7692_s27 + $0xb0] sm:$0xff] (%p1774_p7)  ;;  %v2113_v0 = vld [vmem:[%s7692_s27 + $0x128] sm:$0xff] (%p1774_p7) }
 0x7bb   : >> { %v7686_v17 = vmov %v2002_v50  ;;  %v2010_v56 = vadd.f32 (%p1774_p7), %v2002_v50, %v5510_v5  ;;  %v2083_v5 = vld [vmem:[%s7692_s27 + $0x38] sm:$0xff] (%p1774_p7)  ;;  %v2094_v50 = vld [vmem:[%s7692_s27 + $0x90] sm:$0xff] (%p1774_p7) }
 0x7bc   : >> { %v7687_v35 = vmov %v2001_v54  ;;  %v2009_v45 = vadd.f32 (%p1774_p7), %v2001_v54, %v5508_v4  ;;  %v2080_v17 = vld [vmem:[%s7692_s27 + $0x20] sm:$0xff] (%p1774_p7)  ;;  %v4436_v11 = vpack.c.bf16 (%p1774_p7), %v2083_v5, %v2079_v1  ;;  %4405 = vmatprep.subr.bf16.mxu0 (%p1774_p7), %v4404_v52  ;;  %v4412_v54 = vpack.c.bf16 (%p1774_p7), %v2097_v8, %v2093_v49  ;;  %v2111_v1 = vld [vmem:[%s7692_s27 + $0x118] sm:$0xff] (%p1774_p7) }
 0x7bd   : > { %1776 = sbr.rel (!%p1774_p7) target bundleno = 1615 (0x64f), region = 188  ;;  %v2078_v35 = vld [vmem:[%s7692_s27 + $0x10] sm:$0xff] (%p1774_p7)  ;;  %v2115_v5 = vld [vmem:[%s7692_s27 + $0x138] sm:$0xff] (%p1774_p7)  ;;  %v4458_v49 = vpack.c.bf16 (%p1774_p7), %v2122_v60, %v2118_v59 }
 0x7be   : >> { %v4259_v55 = vpop.f32.mrb[2].mxu1  ;;  %v6260_v33 = vadd.f32 (%p1774_p7), %v3816_v44, %v2009_v45  ;;  %4437 = vmatprep.subr.bf16.mxu1 (%p1774_p7), %v4436_v11  ;;  %v2109_v45 = vld [vmem:[%s7692_s27 + $0x108] sm:$0xff] (%p1774_p7)  ;;  %v2131_v8 = vld [vmem:[%s7692_s27 + $0x1b8] sm:$0xff] (%p1774_p7) }
 0x7bf   : >> { %v4253_v16 = vpop.f32.mrb[2].mxu0  ;;  %v2004_v18 = vadd.f32 %v5215_v14, %v4259_v55   ;;  %v1988_v15 = vpop.f32.mrb[3].mxu1  ;;  %v4444_v55 = vpack.c.bf16 (%p1774_p7), %v2099_v25, %v2095_v9  ;;  %v2124_v9 = vld [vmem:[%s7692_s27 + $0x180] sm:$0xff] (%p1774_p7) }
 0x7c0   : >> { %v2000_v19 = vadd.f32 %v5231_v37, %v4253_v16   ;;  %v1968_v20 = vpop.f32.mrb[3].mxu0  ;;  %v2003_v21 = vadd.f32 %v5219_v58, %v1988_v15   ;;  %7697 = vst [vmem:[#allocation31_spill] sm:$0xff] (%p1774_p7), %v6260_v33  ;;  %v2032_v42 = vmul.f32 (%p1774_p7), %v6260_v33, %v6260_v33  ;;  %v2101_v16 = vld [vmem:[%s7692_s27 + $0xc8] sm:$0xff] (%p1774_p7)  ;;  %v2103_v15 = vld [vmem:[%s7692_s27 + $0xd8] sm:$0xff] (%p1774_p7)  ;;  %v2128_v25 = vld [vmem:[%s7692_s27 + $0x1a0] sm:$0xff] (%p1774_p7) }
 0x7c1   : >> { %v1999_v23 = vadd.f32 %v5235_v41, %v1968_v20   ;;  %v7684_v14 = vmov %v2004_v18  ;;  %v2012_v57 = vadd.f32 (%p1774_p7), %v2004_v18, %v5514_v7  ;;  %v6262_v7 = vadd.f32 (%p1774_p7), %v3816_v44, %v2010_v56  ;;  %v2105_v18 = vld [vmem:[%s7692_s27 + $0xe8] sm:$0xff] (%p1774_p7) }
 0x7c2   : >> { %v7685_v58 = vmov %v2003_v21  ;;  %v7688_v37 = vmov %v2000_v19  ;;  %v2008_v22 = vadd.f32 (%p1774_p7), %v2000_v19, %v5506_v3  ;;  %v6215_v14 = vadd.f32 (%p1774_p7), %v3816_v44, %v2005_v13  ;;  %v2107_v19 = vld [vmem:[%s7692_s27 + $0xf8] sm:$0xff] (%p1774_p7)  ;;  %v2104_v13 = vld [vmem:[%s7692_s27 + $0xe0] sm:$0xff] (%p1774_p7) }
 0x7c3   : >> { %v7689_v41 = vmov %v1999_v23  ;;  %v2007_v34 = vadd.f32 (%p1774_p7), %v1999_v23, %v5504_v2  ;;  %v6217_v2 = vadd.f32 (%p1774_p7), %v3816_v44, %v2006_v38  ;;  %v2076_v58 = vld [vmem:[%s7692_s27] sm:$0xff] (%p1774_p7)  ;;  %v2082_v37 = vld [vmem:[%s7692_s27 + $0x30] sm:$0xff] (%p1774_p7)  ;;  %v2011_v48 = vadd.f32 (%p1774_p7), %v2003_v21, %v5512_v6  ;;  %7698 = vst [vmem:[#allocation32_spill] sm:$0xff] (%p1774_p7), %v6262_v7 }
 0x7c4   : > { %7693 = vst [vmem:[#allocation27_spill] sm:$0xff] %v6215_v14  ;;  %v6221_v4 = vadd.f32 %v3816_v44, %v2008_v22  ;;  %v2085_v41 = vld [vmem:[%s7692_s27 + $0x48] sm:$0xff]  ;;  %v2028_v62 = vmul.f32 %v6215_v14, %v6215_v14  ;;  %v4406_v40 = vpack.c.bf16 %v2080_v17, %v2076_v58  ;;  %v4438_v63 = vpack.c.bf16 %v2082_v37, %v2078_v35  ;;  %v2100_v23 = vld [vmem:[%s7692_s27 + $0xc0] sm:$0xff]  ;;  %v2106_v22 = vld [vmem:[%s7692_s27 + $0xf0] sm:$0xff] }
 0x7c5   : > { %7694 = vst [vmem:[#allocation28_spill] sm:$0xff] %v6217_v2  ;;  %v6219_v3 = vadd.f32 %v3816_v44, %v2007_v34  ;;  %v2029_v32 = vmul.f32 %v6217_v2, %v6217_v2  ;;  %v4408_v26 = vpack.c.bf16 %v2089_v39, %v2085_v41  ;;  %v6288_v30 = vadd.f32 %v3816_v44, %v2011_v48  ;;  %v2102_v34 = vld [vmem:[%s7692_s27 + $0xd0] sm:$0xff]  ;;  %v2108_v35 = vld [vmem:[%s7692_s27 + $0x100] sm:$0xff]  ;;  %v2121_v39 = vld [vmem:[%s7692_s27 + $0x168] sm:$0xff] }
 0x7c6   : > { %7696 = vst [vmem:[#allocation30_spill] sm:$0xff] %v6221_v4  ;;  %v2031_v6 = vmul.f32 %v6221_v4, %v6221_v4  ;;  %2036 = vadd.xlane.f32.xlu0 %v2028_v62  ;;  %4407 = vmatpush1.bf16.msra.mxu0 %v4406_v40  ;;  %v2033_v43 = vmul.f32 %v6262_v7, %v6262_v7  ;;  %v2112_v62 = vld [vmem:[%s7692_s27 + $0x120] sm:$0xff]  ;;  %v2114_v48 = vld [vmem:[%s7692_s27 + $0x130] sm:$0xff] }
 0x7c7   : > { %7695 = vst [vmem:[#allocation29_spill] sm:$0xff] %v6219_v3  ;;  %v2030_v24 = vmul.f32 %v6219_v3, %v6219_v3  ;;  %7699 = vst [vmem:[#allocation33_spill] sm:$0xff] %v6288_v30  ;;  %4439 = vmatpush1.bf16.msra.mxu1 %v4438_v63  ;;  %v6297_v46 = vadd.f32 %v3816_v44, %v2012_v57  ;;  %4409 = vmatprep.subr.bf16.mxu0 %v4408_v26  ;;  %v2117_v57 = vld [vmem:[%s7692_s27 + $0x148] sm:$0xff]  ;;  %v2120_v40 = vld [vmem:[%s7692_s27 + $0x160] sm:$0xff] }
 0x7c8   : > { %4441 = vmatprep.subr.bf16.mxu1 %v4440_v27  ;;  %v4414_v20 = vpack.c.bf16 %v2096_v47, %v2092_v12  ;;  %v4446_v21 = vpack.c.bf16 %v2098_v51, %v2094_v50  ;;  %v2034_v44 = vmul.f32 %v6288_v30, %v6288_v30  ;;  %v4416_v56 = vpack.c.bf16 %v2105_v18, %v2101_v16  ;;  %v2129_v63 = vld [vmem:[%s7692_s27 + $0x1a8] sm:$0xff]  ;;  %v2127_v26 = vld [vmem:[%s7692_s27 + $0x198] sm:$0xff]  ;;  %v2126_v12 = vld [vmem:[%s7692_s27 + $0x190] sm:$0xff] }
 0x7c9   : > { %2040 = vadd.xlane.f32.xlu1 %v2030_v24  ;;  %7700 = vst [vmem:[#allocation34_spill] sm:$0xff] %v6297_v46  ;;  %v2035_v38 = vmul.f32 %v6297_v46, %v6297_v46  ;;  %v4448_v53 = vpack.c.bf16 %v2107_v19, %v2103_v15  ;;  %v4418_v58 = vpack.c.bf16 %v2104_v13, %v2100_v23  ;;  %v2110_v24 = vld [vmem:[%s7692_s27 + $0x110] sm:$0xff]  ;;  %v2137_v47 = vld [vmem:[%s7692_s27 + $0x1e8] sm:$0xff]  ;;  %v2135_v50 = vld [vmem:[%s7692_s27 + $0x1d8] sm:$0xff] }
 0x7ca   : > { %2038 = vadd.xlane.f32.xlu0 %v2029_v32  ;;  %4411 = vmatpush1.bf16.msra.mxu0 %v4410_v10  ;;  %v4450_v17 = vpack.c.bf16 %v2106_v22, %v2102_v34  ;;  %v4420_v37 = vpack.c.bf16 %v2113_v0, %v2109_v45  ;;  %v4452_v41 = vpack.c.bf16 %v2115_v5, %v2111_v1  ;;  %v2139_v51 = vld [vmem:[%s7692_s27 + $0x1f8] sm:$0xff]  ;;  %v2132_v18 = vld [vmem:[%s7692_s27 + $0x1c0] sm:$0xff]  ;;  %v2138_v23 = vld [vmem:[%s7692_s27 + $0x1f0] sm:$0xff] }
 0x7cb   : > { %4443 = vmatpush1.bf16.msra.mxu1 %v4442_v31  ;;  %4413 = vmatprep.subr.bf16.mxu0 %v4412_v54  ;;  %v4422_v29 = vpack.c.bf16 %v2112_v62, %v2108_v35  ;;  %v4454_v32 = vpack.c.bf16 %v2114_v48, %v2110_v24  ;;  %v4424_v52 = vpack.c.bf16 %v2121_v39, %v2117_v57  ;;  %v5257_v54 = vmov 0.0  }
 0x7cc   : > { %4445 = vmatprep.subr.bf16.mxu1 %v4444_v55  ;;  %v4426_v27 = vpack.c.bf16 %v2120_v40, %v2116_v36  ;;  %v4428_v10 = vpack.c.bf16 %v2129_v63, %v2125_v61  ;;  %v4460_v31 = vpack.c.bf16 %v2131_v8, %v2127_v26  ;;  %2226 = vmatprep.mubr.f32.mxu0 %v5257_v54 }
 0x7cd   : > { %2042 = vadd.xlane.f32.xlu1 %v2031_v6  ;;  %v2123_v6 = vld [vmem:[%s7692_s27 + $0x178] sm:$0xff]  ;;  %2339 = vmatprep.mubr.f32.mxu1 %v5257_v54  ;;  %v4430_v55 = vpack.c.bf16 %v2128_v25, %v2124_v9  ;;  %v4464_v19 = vpack.c.bf16 %v2139_v51, %v2135_v50  ;;  %v3300_v9 = vld [vmem:[%s7702_s12 + $0x180] sm:$0xff]  ;;  %v3301_v25 = vld [vmem:[%s7702_s12 + $0x188] sm:$0xff] }
 0x7ce   : > { %2044 = vadd.xlane.f32.xlu0 %v2032_v42  ;;  %4415 = vmatpush1.bf16.msra.mxu0 %v4414_v20  ;;  %v4456_v11 = vpack.c.bf16 %v2123_v6, %v2119_v28  ;;  %v2130_v42 = vld [vmem:[%s7692_s27 + $0x1b0] sm:$0xff]  ;;  %v2136_v20 = vld [vmem:[%s7692_s27 + $0x1e0] sm:$0xff] }
 0x7cf   : > { %4447 = vmatpush1.bf16.msra.mxu1 %v4446_v21  ;;  %4417 = vmatprep.subr.bf16.mxu0 %v4416_v56  ;;  %v4462_v16 = vpack.c.bf16 %v2130_v42, %v2126_v12  ;;  %v2134_v21 = vld [vmem:[%s7692_s27 + $0x1d0] sm:$0xff]  ;;  %v4434_v13 = vpack.c.bf16 %v2136_v20, %v2132_v18  ;;  %v4500_v12 = vpack.c.bf16 %v3301_v25, %v3300_v9  ;;  %v3284_v42 = vld [vmem:[%s7702_s12 + $0x100] sm:$0xff]  ;;  %v3303_v18 = vld [vmem:[%s7702_s12 + $0x198] sm:$0xff] }
 0x7d0   : > { %4449 = vmatprep.subr.bf16.mxu1 %v4448_v53  ;;  %v3270_v51 = vld [vmem:[%s7702_s12 + $0x90] sm:$0xff] }
 0x7d1   : > { %2046 = vadd.xlane.f32.xlu1 %v2033_v43  ;;  %v2133_v43 = vld [vmem:[%s7692_s27 + $0x1c8] sm:$0xff]  ;;  %v3278_v25 = vld [vmem:[%s7702_s12 + $0xd0] sm:$0xff] }
 0x7d2   : > { %2048 = vadd.xlane.f32.xlu0 %v2034_v44  ;;  %4419 = vmatpush1.bf16.msra.mxu0 %v4418_v58  ;;  %v4432_v15 = vpack.c.bf16 %v2137_v47, %v2133_v43  ;;  %v4466_v44 = vpack.c.bf16 %v2138_v23, %v2134_v21  ;;  %v3285_v47 = vld [vmem:[%s7702_s12 + $0x108] sm:$0xff]  ;;  %v3286_v21 = vld [vmem:[%s7702_s12 + $0x110] sm:$0xff] }
 0x7d3   : > { %4451 = vmatpush1.bf16.msra.mxu1 %v4450_v17  ;;  %4421 = vmatprep.subr.bf16.mxu0 %v4420_v37  ;;  %v4502_v50 = vpack.c.bf16 %v3285_v47, %v3284_v42  ;;  %v3262_v42 = vld [vmem:[%s7702_s12 + $0x50] sm:$0xff]  ;;  %v3311_v47 = vld [vmem:[%s7702_s12 + $0x1d8] sm:$0xff] }
 0x7d4   : > { %4453 = vmatprep.subr.bf16.mxu1 %v4452_v41 }
 0x7d5   : > { %2050 = vadd.xlane.f32.xlu1 %v2035_v38 }
 0x7d6   : > { %4423 = vmatpush1.bf16.msra.mxu0 %v4422_v29 }
 0x7d7   : > { %4455 = vmatpush1.bf16.msra.mxu1 %v4454_v32  ;;  %4425 = vmatprep.subr.bf16.mxu0 %v4424_v52 }
 0x7d8   : > { %4457 = vmatprep.subr.bf16.mxu1 %v4456_v11 }
 0x7da   : > { %4427 = vmatpush1.bf16.msra.mxu0 %v4426_v27  ;;  %v3268_v27 = vld [vmem:[%s7701_s15 + $0x80] sm:$0xff] }
 0x7db   : > { %4459 = vmatpush1.bf16.msra.mxu1 %v4458_v49  ;;  %4429 = vmatprep.subr.bf16.mxu0 %v4428_v10  ;;  %v3269_v49 = vld [vmem:[%s7702_s12 + $0x88] sm:$0xff]  ;;  %v3252_v10 = vld [vmem:[%s7702_s12] sm:$0xff] }
 0x7dc   : > { %4461 = vmatprep.subr.bf16.mxu1 %v4460_v31  ;;  %v4468_v8 = vpack.c.bf16 %v3269_v49, %v3268_v27  ;;  %v3253_v31 = vld [vmem:[%s7702_s12 + $0x8] sm:$0xff]  ;;  %v3292_v49 = vld [vmem:[%s7702_s12 + $0x140] sm:$0xff] }
 0x7dd   : > { %v4470_v43 = vpack.c.bf16 %v3253_v31, %v3252_v10  ;;  %v3279_v10 = vld [vmem:[%s7702_s12 + $0xd8] sm:$0xff]  ;;  %v3310_v31 = vld [vmem:[%s7702_s12 + $0x1d0] sm:$0xff] }
 0x7de   : > { %4431 = vmatpush1.bf16.msra.mxu0 %v4430_v55 }
 0x7df   : > { %4463 = vmatpush1.bf16.msra.mxu1 %v4462_v16  ;;  %4433 = vmatprep.subr.bf16.mxu0 %v4432_v15  ;;  %v3302_v16 = vld [vmem:[%s7702_s12 + $0x190] sm:$0xff] }
 0x7e0   : > { %4465 = vmatprep.subr.bf16.mxu1 %v4464_v19  ;;  %v3254_v15 = vld [vmem:[%s7702_s12 + $0x10] sm:$0xff]  ;;  %v3255_v19 = vld [vmem:[%s7702_s12 + $0x18] sm:$0xff]  ;;  %v4504_v20 = vpack.c.bf16 %v3303_v18, %v3302_v16  ;;  %v3280_v18 = vld [vmem:[%s7702_s12 + $0xe0] sm:$0xff] }
 0x7e1   : > { %v4474_v23 = vpack.c.bf16 %v3255_v19, %v3254_v15  ;;  %v3281_v15 = vld [vmem:[%s7702_s12 + $0xe8] sm:$0xff]  ;;  %v3264_v19 = vld [vmem:[%s7702_s12 + $0x60] sm:$0xff] }
 0x7e2   : > { %4435 = vmatpush1.bf16.msra.mxu0 %v4434_v13  ;;  %v3287_v13 = vld [vmem:[%s7702_s12 + $0x118] sm:$0xff] }
 0x7e3   : > { %4467 = vmatpush1.bf16.msra.mxu1 %v4466_v44  ;;  %4469 = vmatprep.subr.bf16.mxu0 %v4468_v8  ;;  %v4506_v44 = vpack.c.bf16 %v3287_v13, %v3286_v21  ;;  %v3293_v8 = vld [vmem:[%s7702_s12 + $0x148] sm:$0xff] }
 0x7e4   : > { %4501 = vmatprep.subr.bf16.mxu1 %v4500_v12  ;;  %v4518_v9 = vpack.c.bf16 %v3293_v8, %v3292_v49  ;;  %v4488_v12 = vpack.c.bf16 %v3279_v10, %v3278_v25  ;;  %v3265_v21 = vld [vmem:[%s7702_s12 + $0x68] sm:$0xff] }
 0x7e5   : > { %v3313_v13 = vld [vmem:[%s7702_s12 + $0x1e8] sm:$0xff] }
 0x853   : > { %v2037_v38 = vpop.xlane.xlu0 %2036 }
 0x854   : > { %v2052_v22 = vmax.f32 %v2037_v38, 1e-24  ;;  %v3272_v38 = vld [vmem:[%s7702_s12 + $0xa0] sm:$0xff] }
 0x856   : > { %v2041_v34 = vpop.xlane.xlu1 %2040  ;;  %4841 = vrsqrt.f32 %v2052_v22 }
 0x857   : > { %v2054_v45 = vmax.f32 %v2041_v34, 1e-24  ;;  %v2039_v56 = vpop.xlane.xlu0 %2038  ;;  %v3273_v34 = vld [vmem:[%s7702_s12 + $0xa8] sm:$0xff] }
 0x858   : > { %v2053_v0 = vmax.f32 %v2039_v56, 1e-24  ;;  %v4476_v22 = vpack.c.bf16 %v3273_v34, %v3272_v38  ;;  %v3305_v56 = vld [vmem:[%s7702_s12 + $0x1a8] sm:$0xff]  ;;  %v3296_v34 = vld [vmem:[%s7702_s12 + $0x160] sm:$0xff] }
 0x859   : > { %4843 = vrsqrt.f32 %v2054_v45  ;;  %v3304_v45 = vld [vmem:[%s7702_s12 + $0x1a0] sm:$0xff] }
 0x85a   : > { %v2043_v53 = vpop.xlane.xlu1 %2042  ;;  %4845 = vrsqrt.f32 %v2053_v0  ;;  %v3257_v0 = vld [vmem:[%s7702_s12 + $0x28] sm:$0xff] }
 0x85b   : > { %v2055_v1 = vmax.f32 %v2043_v53, 1e-24  ;;  %v2045_v5 = vpop.xlane.xlu0 %2044  ;;  %v3256_v53 = vld [vmem:[%s7702_s12 + $0x20] sm:$0xff] }
 0x85c   : > { %v2056_v58 = vmax.f32 %v2045_v5, 1e-24  ;;  %v3288_v5 = vld [vmem:[%s7702_s12 + $0x120] sm:$0xff] }
 0x85d   : > { %4847 = vrsqrt.f32 %v2055_v1  ;;  %v4508_v1 = vpack.c.bf16 %v3305_v56, %v3304_v45  ;;  %v3282_v45 = vld [vmem:[%s7702_s12 + $0xf0] sm:$0xff]  ;;  %v2142_v56 = vlaneseq }
 0x85e   : > { %v2047_v17 = vpop.xlane.xlu1 %2046  ;;  %4849 = vrsqrt.f32 %v2056_v58  ;;  %v4478_v58 = vpack.c.bf16 %v3257_v0, %v3256_v53  ;;  %v3283_v0 = vld [vmem:[%s7702_s12 + $0xf8] sm:$0xff] }
 0x85f   : > { %v2057_v41 = vmax.f32 %v2047_v17, 1e-24  ;;  %v2049_v24 = vpop.xlane.xlu0 %2048  ;;  %v3289_v17 = vld [vmem:[%s7702_s12 + $0x128] sm:$0xff] }
 0x860   : > { %v4842_v35 = vpop.eup %4841  ;;  %v2058_v39 = vmax.f32 %v2049_v24, 1e-24 }
 0x861   : > { %v2068_v37 = vmul.f32 %v4842_v35, %v6215_v14  ;;  %4851 = vrsqrt.f32 %v2057_v41  ;;  %v4510_v35 = vpack.c.bf16 %v3289_v17, %v3288_v5  ;;  %v3275_v41 = vld [vmem:[%s7702_s12 + $0xb8] sm:$0xff] }
 0x862   : > { %v2051_v29 = vpop.xlane.xlu1 %2050  ;;  %4853 = vrsqrt.f32 %v2058_v39  ;;  %v3307_v39 = vld [vmem:[%s7702_s12 + $0x1b8] sm:$0xff] }
 0x863   : > { %v4844_v62 = vpop.eup %4843  ;;  %2227 = vmatmul.mubr.f32.vlgmr.msra.gmra.mrb[0].mxu0 %v2068_v37  ;;  %2340 = vmatmul.mubr.f32.vlgmr.msra.gmra.mrb[0].mxu1 %v2068_v37  ;;  %v2059_v6 = vmax.f32 %v2051_v29, 1e-24  ;;  %v3274_v37 = vld [vmem:[%s7702_s12 + $0xb0] sm:$0xff]  ;;  %v3267_v5 = vld [vmem:[%s7702_s12 + $0x78] sm:$0xff] }
 0x864   : > { %v4846_v48 = vpop.eup %4845  ;;  %2232 = vmatprep.mubr.f32.mxu0 %v5257_v54  ;;  %2345 = vmatprep.mubr.f32.mxu1 %v5257_v54  ;;  %v2070_v28 = vmul.f32 %v4844_v62, %v6219_v3  ;;  %v3306_v62 = vld [vmem:[%s7702_s12 + $0x1b0] sm:$0xff]  ;;  %v4480_v24 = vpack.c.bf16 %v3275_v41, %v3274_v37  ;;  %v3315_v37 = vld [vmem:[%s7702_s12 + $0x1f8] sm:$0xff] }
 0x865   : > { %v2069_v57 = vmul.f32 %v4846_v48, %v6217_v2  ;;  %4855 = vrsqrt.f32 %v2059_v6  ;;  %4471 = vmatpush3.bf16.msra.mxu0 %v4470_v43  ;;  %4503 = vmatpush3.bf16.msra.mxu1 %v4502_v50  ;;  %v3258_v48 = vld [vmem:[%s7702_s12 + $0x30] sm:$0xff]  ;;  %v4512_v29 = vpack.c.bf16 %v3307_v39, %v3306_v62  ;;  %v3291_v6 = vld [vmem:[%s7702_s12 + $0x138] sm:$0xff] }
 0x866   : > { %4505 = vmatprep.subr.bf16.mxu1 %v4504_v20  ;;  %v3263_v43 = vld [vmem:[%s7702_s12 + $0x58] sm:$0xff]  ;;  %v4492_v20 = vpack.c.bf16 %v3281_v15, %v3280_v18  ;;  %v3298_v41 = vld [vmem:[%s7702_s12 + $0x170] sm:$0xff] }
 0x867   : > { %2233 = vmatmul.mubr.f32.gmra.mrb[2].mxu0 %v2069_v57  ;;  %2346 = vmatmul.mubr.f32.gmra.mrb[2].mxu1 %v2069_v57  ;;  %v4848_v32 = vpop.eup %4847  ;;  %v3259_v57 = vld [vmem:[%s7702_s12 + $0x38] sm:$0xff]  ;;  %v4490_v50 = vpack.c.bf16 %v3263_v43, %v3262_v42 }
 0x868   : > { %2238 = vmatprep.mubr.f32.mxu0 %v5257_v54  ;;  %2351 = vmatprep.mubr.f32.mxu1 %v5257_v54  ;;  %v2071_v36 = vmul.f32 %v4848_v32, %v6221_v4  ;;  %v4850_v52 = vpop.eup %4849  ;;  %v3290_v32 = vld [vmem:[%s7702_s12 + $0x130] sm:$0xff] }
 0x869   : > { %v2072_v11 = vmul.f32 %v4850_v52, %v6260_v33  ;;  %4507 = vmatpush3.bf16.msra.mxu1 %v4506_v44  ;;  %v3276_v52 = vld [vmem:[%s7702_s12 + $0xc0] sm:$0xff]  ;;  %v4494_v44 = vpack.c.bf16 %v3265_v21, %v3264_v19 }
 0x86a   : > { %4509 = vmatprep.subr.bf16.mxu1 %v4508_v1  ;;  %v3266_v1 = vld [vmem:[%s7702_s12 + $0x70] sm:$0xff] }
 0x86b   : > { %2239 = vmatmul.mubr.f32.gmra.mrb[4].mxu0 %v2070_v28  ;;  %2352 = vmatmul.mubr.f32.gmra.mrb[4].mxu1 %v2070_v28  ;;  %v4852_v40 = vpop.eup %4851  ;;  %v4482_v28 = vpack.c.bf16 %v3259_v57, %v3258_v48  ;;  %v4498_v17 = vpack.c.bf16 %v3267_v5, %v3266_v1  ;;  %v2143_v57 = vshrl.u32 %v2142_v56, 7 }
 0x86c   : > { %2244 = vmatprep.mubr.f32.mxu0 %v5257_v54  ;;  %2357 = vmatprep.mubr.f32.mxu1 %v5257_v54  ;;  %v2073_v59 = vmul.f32 %v4852_v40, %v6262_v7  ;;  %v4854_v60 = vpop.eup %4853  ;;  %v3308_v40 = vld [vmem:[%s7702_s12 + $0x1c0] sm:$0xff] }
 0x86d   : > { %v2074_v61 = vmul.f32 %v4854_v60, %v6288_v30  ;;  %4511 = vmatpush3.bf16.msra.mxu1 %v4510_v35  ;;  %v3260_v60 = vld [vmem:[%s7702_s12 + $0x40] sm:$0xff]  ;;  %v3314_v35 = vld [vmem:[%s7702_s12 + $0x1f0] sm:$0xff]  ;;  %v2144_v39 = vsub.s32 0, %v2143_v57 }
 0x86e   : > { %4513 = vmatprep.subr.bf16.mxu1 %v4512_v29  ;;  %v4528_v62 = vpack.c.bf16 %v3315_v37, %v3314_v35  ;;  %v2140_v29 = vld [vmem:[%s7703_s23] sm:$0xf] }
 0x86f   : > { %2245 = vmatmul.mubr.f32.gmra.mrb[6].mxu0 %v2071_v36  ;;  %2358 = vmatmul.mubr.f32.gmra.mrb[6].mxu1 %v2071_v36  ;;  %v4856_v63 = vpop.eup %4855  ;;  %v4514_v36 = vpack.c.bf16 %v3291_v6, %v3290_v32  ;;  %v6651_v32 = vrot.slane %v2140_v29, %v2144_v39 }
 0x870   : > { %2250 = vmatprep.mubr.f32.mxu0 %v5257_v54  ;;  %2363 = vmatprep.mubr.f32.mxu1 %v5257_v54  ;;  %v2075_v26 = vmul.f32 %v4856_v63, %v6297_v46  ;;  %v3309_v63 = vld [vmem:[%s7702_s12 + $0x1c8] sm:$0xff] }
 0x871   : > { %4515 = vmatpush3.bf16.msra.mxu1 %v4514_v36  ;;  %v4516_v27 = vpack.c.bf16 %v3309_v63, %v3308_v40  ;;  %v2148_v36 = vsub.s32 1, %v2143_v57 }
 0x873   : > { %2251 = vmatmul.mubr.f32.gmra.mrb[8].mxu0 %v2072_v11  ;;  %2364 = vmatmul.mubr.f32.gmra.mrb[8].mxu1 %v2072_v11  ;;  %v3277_v11 = vld [vmem:[%s7702_s12 + $0xc8] sm:$0xff] }
 0x874   : > { %2256 = vmatprep.mubr.f32.mxu0 %v5257_v54  ;;  %2369 = vmatprep.mubr.f32.mxu1 %v5257_v54 }
 0x875   : > { %4517 = vmatprep.subr.bf16.mxu1 %v4516_v27 }
 0x876   : > { %4519 = vmatpush3.bf16.msra.mxu1 %v4518_v9 }
 0x877   : > { %2257 = vmatmul.mubr.f32.gmra.mrb[10].mxu0 %v2073_v59  ;;  %2370 = vmatmul.mubr.f32.gmra.mrb[10].mxu1 %v2073_v59  ;;  %v4484_v59 = vpack.c.bf16 %v3277_v11, %v3276_v52 }
 0x878   : > { %2262 = vmatprep.mubr.f32.mxu0 %v5257_v54  ;;  %2375 = vmatprep.mubr.f32.mxu1 %v5257_v54 }
 0x87b   : > { %2263 = vmatmul.mubr.f32.gmra.mrb[12].mxu0 %v2074_v61  ;;  %2376 = vmatmul.mubr.f32.gmra.mrb[12].mxu1 %v2074_v61  ;;  %v3261_v61 = vld [vmem:[%s7702_s12 + $0x48] sm:$0xff] }
 0x87c   : > { %2268 = vmatprep.mubr.f32.mxu0 %v5257_v54  ;;  %2381 = vmatprep.mubr.f32.mxu1 %v5257_v54  ;;  %v3271_v54 = vld [vmem:[%s7702_s12 + $0x98] sm:$0xff] }
 0x87d   : > { %v4472_v55 = vpack.c.bf16 %v3271_v54, %v3270_v51  ;;  %v4520_v51 = vpack.c.bf16 %v3311_v47, %v3310_v31  ;;  %v3294_v54 = vld [vmem:[%s7702_s12 + $0x150] sm:$0xff] }
 0x87f   : > { %2269 = vmatmul.mubr.f32.gmra.mrb[14].mxu0 %v2075_v26  ;;  %2382 = vmatmul.mubr.f32.gmra.mrb[14].mxu1 %v2075_v26  ;;  %v4486_v26 = vpack.c.bf16 %v3261_v61, %v3260_v60  ;;  %v2156_v61 = vsub.s32 3, %v2143_v57 }
 0x880   : > { %4473 = vmatprep.subr.bf16.mxu0 %v4472_v55  ;;  %v3295_v55 = vld [vmem:[%s7702_s12 + $0x158] sm:$0xff]  ;;  %4521 = vmatprep.subr.bf16.mxu1 %v4520_v51 }
 0x881   : > { %4475 = vmatpush3.bf16.msra.mxu0 %v4474_v23  ;;  %v4522_v16 = vpack.c.bf16 %v3295_v55, %v3294_v54  ;;  %v3312_v23 = vld [vmem:[%s7702_s12 + $0x1e0] sm:$0xff]  ;;  %v6665_v25 = vrot.slane %v2140_v29, %v2156_v61 }
 0x882   : > { %4477 = vmatprep.subr.bf16.mxu0 %v4476_v22  ;;  %v4524_v38 = vpack.c.bf16 %v3313_v13, %v3312_v23  ;;  %v3297_v22 = vld [vmem:[%s7702_s12 + $0x168] sm:$0xff] }
 0x883   : > { %4523 = vmatpush3.bf16.msra.mxu1 %v4522_v16  ;;  %v4526_v53 = vpack.c.bf16 %v3297_v22, %v3296_v34 }
 0x884   : > { %4525 = vmatprep.subr.bf16.mxu1 %v4524_v38 }
 0x885   : > { %4479 = vmatpush3.bf16.msra.mxu0 %v4478_v58  ;;  %v4496_v58 = vpack.c.bf16 %v3283_v0, %v3282_v45 }
 0x886   : > { %4481 = vmatprep.subr.bf16.mxu0 %v4480_v24  ;;  %v3299_v24 = vld [vmem:[%s7702_s12 + $0x178] sm:$0xff] }
 0x887   : > { %4527 = vmatpush3.bf16.msra.mxu1 %v4526_v53  ;;  %v4530_v48 = vpack.c.bf16 %v3299_v24, %v3298_v41 }
 0x888   : > { %4529 = vmatprep.subr.bf16.mxu1 %v4528_v62 }
 0x889   : > { %4483 = vmatpush3.bf16.msra.mxu0 %v4482_v28  ;;  %v2152_v28 = vsub.s32 2, %v2143_v57 }
 0x88a   : > { %4485 = vmatprep.subr.bf16.mxu0 %v4484_v59 }
 0x88b   : > { %4531 = vmatpush3.bf16.msra.mxu1 %v4530_v48  ;;  %v6653_v6 = vrot.slane %v2140_v29, %v2152_v28 }
 0x88d   : > { %4487 = vmatpush3.bf16.msra.mxu0 %v4486_v26  ;;  %v6657_v26 = vrot.slane %v2140_v29, %v2148_v36 }
 0x88e   : > { %4489 = vmatprep.subr.bf16.mxu0 %v4488_v12 }
 0x891   : > { %4491 = vmatpush3.bf16.msra.mxu0 %v4490_v50 }
 0x892   : > { %4493 = vmatprep.subr.bf16.mxu0 %v4492_v20 }
 0x895   : > { %4495 = vmatpush3.bf16.msra.mxu0 %v4494_v44 }
 0x896   : > { %4497 = vmatprep.subr.bf16.mxu0 %v4496_v58 }
 0x899   : > { %4499 = vmatpush3.bf16.msra.mxu0 %v4498_v17 }
 0x936   : > { %v2228_v52 = vpop.f32.mrb[0].mxu0  ;;  %v2341_v11 = vpop.f32.mrb[0].mxu1 }
 0x937   : > { %v2229_v40 = vadd.f32 %v2228_v52, %v6651_v32  ;;  %v2342_v59 = vadd.f32 %v2341_v11, %v6653_v6  ;;  %v2230_v60 = vpop.f32.mrb[1].mxu0  ;;  %v2343_v63 = vpop.f32.mrb[1].mxu1 }
 0x938   : > { %v2231_v10 = vadd.f32 %v2230_v60, %v6657_v26  ;;  %v2344_v47 = vadd.f32 %v2343_v63, %v6665_v25 }
 0x939   : > { %v6659_v27 = vmul.f32 0.70710677, %v2229_v40  ;;  %v6661_v49 = vmul.f32 0.70710677, %v2342_v59  ;;  %v6703_v41 = vmul.f32 0.5, %v2229_v40  ;;  %v6708_v48 = vmul.f32 0.5, %v2342_v59 }
 0x93a   : > { %v2234_v50 = vpop.f32.mrb[2].mxu0  ;;  %v2347_v51 = vpop.f32.mrb[2].mxu1  ;;  %v6669_v54 = vmul.f32 0.70710677, %v2231_v10  ;;  %v6677_v21 = vmul.f32 0.70710677, %v2344_v47 }
 0x93b   : > { %v2452_v8 = vand.u32 2147483647, %v6659_v27  ;;  %v2454_v9 = vand.u32 2147483647, %v6661_v49  ;;  %v2236_v55 = vpop.f32.mrb[3].mxu0  ;;  %v2349_v16 = vpop.f32.mrb[3].mxu1  ;;  %v6689_v56 = vadd.f32 %v2234_v50, %v6651_v32  ;;  %v6692_v53 = vadd.f32 %v2347_v51, %v6653_v6 }
 0x93c   : > { %7704 = vst [vmem:[#allocation35_spill] sm:$0xff] %v6677_v21  ;;  %v2453_v38 = vand.u32 2147483647, %v6669_v54  ;;  %v2455_v1 = vand.u32 2147483647, %v6677_v21  ;;  %v6710_v57 = vmul.f32 0.5, %v2231_v10  ;;  %v6724_v60 = vadd.f32 %v2236_v55, %v6657_v26 }
 0x93d   : > { %v2484_v31 = vmul.f32 0.3275911, %v2452_v8  ;;  %v2486_v12 = vmul.f32 0.3275911, %v2454_v9  ;;  %v2900_v44 = vsub.f32 0.0, %v2452_v8  ;;  %v2902_v45 = vsub.f32 0.0, %v2454_v9 }
 0x93e   : > { %v2240_v18 = vpop.f32.mrb[4].mxu0  ;;  %v6671_v15 = vpop.f32.mrb[4].mxu1  ;;  %v2901_v35 = vsub.f32 0.0, %v2453_v38  ;;  %v6706_v24 = vmul.f32 0.70710677, %v6689_v56  ;;  %7706 = vst [vmem:[#allocation37_spill] sm:$0xff] %v6710_v57 }
 0x93f   : > { %v2516_v42 = vadd.f32 1.0, %v2484_v31  ;;  %v2518_v43 = vadd.f32 1.0, %v2486_v12  ;;  %v6673_v19 = vpop.f32.mrb[5].mxu0  ;;  %v6675_v20 = vpop.f32.mrb[5].mxu1  ;;  %v2932_v17 = vmul.f32 %v2900_v44, %v2452_v8  ;;  %v2934_v62 = vmul.f32 %v2902_v45, %v2454_v9 }
 0x940   : > { %7705 = vst [vmem:[#allocation36_spill] sm:$0xff] %v6706_v24  ;;  %v6713_v39 = vmul.f32 0.70710677, %v6692_v53  ;;  %v2485_v52 = vmul.f32 0.3275911, %v2453_v38  ;;  %v6721_v11 = vmul.f32 0.5, %v2344_v47  ;;  %v2933_v9 = vmul.f32 %v2901_v35, %v2453_v38 }
 0x941   : > { %4857 = vrcp.f32 %v2516_v42  ;;  %v2487_v40 = vmul.f32 0.3275911, %v2455_v1  ;;  %v2964_v8 = vmul.f32 1.442695, %v2932_v17  ;;  %v2903_v10 = vsub.f32 0.0, %v2455_v1 }
 0x942   : > { %4859 = vrcp.f32 %v2518_v43  ;;  %v6679_v23 = vpop.f32.mrb[6].mxu0  ;;  %v6681_v13 = vpop.f32.mrb[6].mxu1  ;;  %7707 = vst [vmem:[#allocation38_spill] sm:$0xff] %v6713_v39  ;;  %7708 = vst [vmem:[#allocation39_spill] sm:$0xff] %v6721_v11  ;;  %v2968_v42 = vmul.f32 1.442695, %v2934_v62  ;;  %v6736_v47 = vadd.f32 %v2349_v16, %v6665_v25  ;;  %v6747_v35 = vadd.f32 %v2240_v18, %v6651_v32 }
 0x943   : > { %v6684_v34 = vpop.f32.mrb[7].mxu0  ;;  %v6686_v22 = vpop.f32.mrb[7].mxu1  ;;  %v2456_v43 = vand.u32 2147483647, %v6706_v24  ;;  %v2458_v51 = vand.u32 2147483647, %v6713_v39  ;;  %v2935_v30 = vmul.f32 %v2903_v10, %v2455_v1  ;;  %4861 = vpow2.f32 %v2964_v8 }
 0x944   : > { %v2517_v38 = vadd.f32 1.0, %v2485_v52  ;;  %v6744_v17 = vmul.f32 0.70710677, %v6724_v60  ;;  %v2966_v46 = vmul.f32 1.442695, %v2933_v9  ;;  %4863 = vpow2.f32 %v2968_v42 }
 0x945   : > { %v2488_v4 = vmul.f32 0.3275911, %v2456_v43  ;;  %v6756_v52 = vmul.f32 0.70710677, %v6736_v47  ;;  %v2490_v18 = vmul.f32 0.3275911, %v2458_v51  ;;  %v6765_v10 = vadd.f32 %v6671_v15, %v6653_v6 }
 0x946   : > { %v6694_v0 = vpop.f32.mrb[8].mxu0  ;;  %v6697_v5 = vpop.f32.mrb[8].mxu1  ;;  %7709 = vst [vmem:[#allocation40_spill] sm:$0xff] %v6744_v17  ;;  %v2906_v2 = vsub.f32 0.0, %v2458_v51  ;;  %4865 = vrcp.f32 %v2517_v38  ;;  %v2970_v9 = vmul.f32 1.442695, %v2935_v30 }
 0x947   : > { %v6699_v58 = vpop.f32.mrb[9].mxu0  ;;  %v6701_v37 = vpop.f32.mrb[9].mxu1  ;;  %7710 = vst [vmem:[#allocation41_spill] sm:$0xff] %v6756_v52  ;;  %4867 = vpow2.f32 %v2966_v46  ;;  %v2520_v30 = vadd.f32 1.0, %v2488_v4  ;;  %v2522_v39 = vadd.f32 1.0, %v2490_v18  ;;  %v6784_v46 = vadd.f32 %v6673_v19, %v6657_v26 }
 0x948   : > { %v2938_v38 = vmul.f32 %v2906_v2, %v2458_v51  ;;  %vm3092_vm6 = vcmp.lt.f32.partialorder %v6659_v27, 0.0  ;;  %vm3094_vm7 = vcmp.lt.f32.partialorder %v6661_v49, 0.0  ;;  %vm3093_vm8 = vcmp.lt.f32.partialorder %v6669_v54, 0.0 }
 0x94a   : > { %v6715_v28 = vpop.f32.mrb[10].mxu0  ;;  %v6717_v29 = vpop.f32.mrb[10].mxu1  ;;  %v2976_v18 = vmul.f32 1.442695, %v2938_v38  ;;  %v6805_v38 = vmul.f32 0.5, %v6724_v60 }
 0x94b   : > { %v6719_v36 = vpop.eup %4857  ;;  %v6726_v59 = vpop.f32.mrb[11].mxu0 }
 0x94c   : > { %v6728_v61 = vpop.eup %4859  ;;  %v2612_v63 = vmul.f32 1.0614054, %v6719_v36  ;;  %v6731_v31 = vpop.f32.mrb[11].mxu1  ;;  %7716 = vst [vmem:[#allocation47_spill] sm:$0xff] %v6805_v38 }
 0x94d   : > { %v2614_v12 = vmul.f32 1.0614054, %v6728_v61 }
 0x94e   : > { %v2644_v50 = vadd.f32 -1.4531521, %v2612_v63  ;;  %v6739_v55 = vpop.f32.mrb[12].mxu0  ;;  %v6741_v44 = vpop.f32.mrb[12].mxu1  ;;  %v2519_v63 = vadd.f32 1.0, %v2487_v40 }
 0x94f   : > { %v2646_v45 = vadd.f32 -1.4531521, %v2614_v12  ;;  %v6749_v62 = vpop.f32.mrb[13].mxu0  ;;  %v6752_v7 = vpop.f32.mrb[13].mxu1  ;;  %v2904_v12 = vsub.f32 0.0, %v2456_v43 }
 0x950   : > { %v2676_v16 = vmul.f32 %v6719_v36, %v2644_v50  ;;  %v2457_v50 = vand.u32 2147483647, %v6744_v17  ;;  %v6760_v40 = vmul.f32 0.70710677, %v6747_v35  ;;  %4869 = vrcp.f32 %v2519_v63 }
 0x951   : > { %v2678_v33 = vmul.f32 %v6728_v61, %v2646_v45  ;;  %v2936_v42 = vmul.f32 %v2904_v12, %v2456_v43  ;;  %4871 = vpow2.f32 %v2970_v9  ;;  %v6788_v12 = vmul.f32 0.5, %v6689_v56 }
 0x952   : > { %v2708_v3 = vadd.f32 1.4214138, %v2676_v16  ;;  %7711 = vst [vmem:[#allocation42_spill] sm:$0xff] %v6760_v40  ;;  %v6767_v45 = vpop.f32.mrb[14].mxu0  ;;  %v6769_v8 = vpop.f32.mrb[14].mxu1  ;;  %v2905_v24 = vsub.f32 0.0, %v2457_v50  ;;  %4873 = vrcp.f32 %v2520_v30 }
 0x953   : > { %v2710_v14 = vadd.f32 1.4214138, %v2678_v33  ;;  %v2459_v16 = vand.u32 2147483647, %v6756_v52  ;;  %v6773_v11 = vpop.f32.mrb[15].mxu0  ;;  %v6775_v57 = vpop.f32.mrb[15].mxu1  ;;  %4875 = vrcp.f32 %v2522_v39 }
 0x954   : > { %v2740_v1 = vmul.f32 %v6719_v36, %v2708_v3  ;;  %v2460_v17 = vand.u32 2147483647, %v6760_v40  ;;  %v2972_v63 = vmul.f32 1.442695, %v2936_v42  ;;  %v2489_v4 = vmul.f32 0.3275911, %v2457_v50 }
 0x955   : > { %v2742_v33 = vmul.f32 %v6728_v61, %v2710_v14  ;;  %v6780_v14 = vmul.f32 0.70710677, %v6765_v10  ;;  %v2907_v2 = vsub.f32 0.0, %v2459_v16  ;;  %7713 = vst [vmem:[#allocation44_spill] sm:$0xff] %v6788_v12  ;;  %v2937_v9 = vmul.f32 %v2905_v24, %v2457_v50 }
 0x956   : > { %v2772_v3 = vadd.f32 -0.28449672, %v2740_v1  ;;  %v2491_v40 = vmul.f32 0.3275911, %v2459_v16  ;;  %v6792_v52 = vmul.f32 0.70710677, %v6784_v46  ;;  %v6796_v42 = vadd.f32 %v6675_v20, %v6665_v25 }
 0x957   : > { %v2774_v15 = vadd.f32 -0.28449672, %v2742_v33  ;;  %7712 = vst [vmem:[#allocation43_spill] sm:$0xff] %v6780_v14  ;;  %v2908_v33 = vsub.f32 0.0, %v2460_v17  ;;  %v2462_v19 = vand.u32 2147483647, %v6780_v14  ;;  %4877 = vpow2.f32 %v2972_v63 }
 0x958   : > { %v2804_v21 = vmul.f32 %v6719_v36, %v2772_v3  ;;  %v4862_v3 = vpop.eup %4861  ;;  %7714 = vst [vmem:[#allocation45_spill] sm:$0xff] %v6792_v52  ;;  %v6799_v56 = vmul.f32 0.5, %v6692_v53  ;;  %v2521_v30 = vadd.f32 1.0, %v2489_v4  ;;  %v2939_v39 = vmul.f32 %v2907_v2, %v2459_v16 }
 0x959   : > { %v2806_v43 = vmul.f32 %v6728_v61, %v2774_v15  ;;  %4879 = vpow2.f32 %v2976_v18  ;;  %v2492_v15 = vmul.f32 0.3275911, %v2460_v17  ;;  %v2974_v14 = vmul.f32 1.442695, %v2937_v9 }
 0x95a   : > { %v2836_v51 = vadd.f32 0.2548296, %v2804_v21  ;;  %v4864_v21 = vpop.eup %4863  ;;  %7715 = vst [vmem:[#allocation46_spill] sm:$0xff] %v6799_v56  ;;  %v2940_v63 = vmul.f32 %v2908_v33, %v2460_v17  ;;  %v6812_v53 = vadd.f32 %v6679_v23, %v6651_v32  ;;  %v2523_v4 = vadd.f32 1.0, %v2491_v40 }
 0x95b   : > { %v2838_v1 = vadd.f32 0.2548296, %v2806_v43  ;;  %v6801_v24 = vpop.eup %4865  ;;  %v2910_v2 = vsub.f32 0.0, %v2462_v19  ;;  %v6818_v60 = vmul.f32 0.70710677, %v6796_v42  ;;  %4881 = vrcp.f32 %v2521_v30 }
 0x95c   : > { %v2868_v50 = vmul.f32 %v6719_v36, %v2836_v51  ;;  %v6807_v43 = vpop.eup %4867  ;;  %v2461_v36 = vand.u32 2147483647, %v6792_v52  ;;  %v6821_v51 = vmul.f32 0.5, %v6736_v47  ;;  %v6825_v17 = vadd.f32 %v6681_v13, %v6653_v6 }
 0x95d   : > { %v2870_v20 = vmul.f32 %v6728_v61, %v2838_v1  ;;  %v6814_v16 = vpop.eup %4869  ;;  %7717 = vst [vmem:[#allocation48_spill] sm:$0xff] %v6818_v60  ;;  %v2978_v61 = vmul.f32 1.442695, %v2939_v39  ;;  %v6830_v40 = vmul.f32 0.5, %v6747_v35  ;;  %v2524_v1 = vadd.f32 1.0, %v2492_v15 }
 0x95e   : > { %7718 = vst [vmem:[#allocation49_spill] sm:$0xff] %v6821_v51  ;;  %v6827_v23 = vpop.eup %4871  ;;  %v3028_v18 = vmul.f32 %v4862_v3, %v2868_v50  ;;  %v2494_v9 = vmul.f32 0.3275911, %v2462_v19  ;;  %4883 = vpow2.f32 %v2974_v14  ;;  %v2980_v56 = vmul.f32 1.442695, %v2940_v63 }
 0x95f   : > { %7719 = vst [vmem:[#allocation50_spill] sm:$0xff] %v6830_v40  ;;  %v3030_v33 = vmul.f32 %v4864_v21, %v2870_v20  ;;  %v6833_v30 = vmul.f32 0.70710677, %v6812_v53  ;;  %v6835_v47 = vpop.eup %4873  ;;  %4885 = vrcp.f32 %v2523_v4  ;;  %v2942_v39 = vmul.f32 %v2910_v2, %v2462_v19 }
 0x960   : > { %v2909_v13 = vsub.f32 0.0, %v2461_v36  ;;  %v2463_v12 = vand.u32 2147483647, %v6818_v60  ;;  %v6838_v51 = vpop.eup %4875  ;;  %4887 = vpow2.f32 %v2978_v61  ;;  %v6842_v35 = vmul.f32 0.5, %v6765_v10 }
 0x961   : > { %7720 = vst [vmem:[#allocation51_spill] sm:$0xff] %v6833_v30  ;;  %v6845_v14 = vmul.f32 0.70710677, %v6825_v17  ;;  %v6849_v3 = vadd.f32 %v6684_v34, %v6657_v26  ;;  %v3060_v21 = vsub.f32 1.0, %v3028_v18  ;;  %4889 = vrcp.f32 %v2524_v1  ;;  %v6852_v15 = vpop.eup %4877 }
 0x962   : > { %7721 = vst [vmem:[#allocation52_spill] sm:$0xff] %v6842_v35  ;;  %v2526_v19 = vadd.f32 1.0, %v2494_v9  ;;  %v2493_v50 = vmul.f32 0.3275911, %v2461_v36  ;;  %7723 = vst [vmem:[#allocation54_spill] sm:$0xff] %v6852_v15  ;;  %v3062_v20 = vsub.f32 1.0, %v3030_v33  ;;  %4891 = vpow2.f32 %v2980_v56 }
 0x963   : > { %7722 = vst [vmem:[#allocation53_spill] sm:$0xff] %v6845_v14  ;;  %v6855_v10 = vmul.f32 0.5, %v6784_v46  ;;  %v2464_v63 = vand.u32 2147483647, %v6833_v30  ;;  %v6858_v4 = vpop.eup %4879  ;;  %v2984_v2 = vmul.f32 1.442695, %v2942_v39  ;;  %v2941_v34 = vmul.f32 %v2909_v13, %v2461_v36 }
 0x964   : > { %7725 = vst [vmem:[#allocation56_spill] sm:$0xff] %v6858_v4  ;;  %v2495_v61 = vmul.f32 0.3275911, %v2463_v12  ;;  %v2911_v18 = vsub.f32 0.0, %v2463_v12  ;;  %v2466_v35 = vand.u32 2147483647, %v6845_v14  ;;  %v6866_v9 = vadd.f32 %v6686_v22, %v6665_v25 }
 0x965   : > { %7724 = vst [vmem:[#allocation55_spill] sm:$0xff] %v6855_v10  ;;  %v6862_v1 = vmul.f32 0.70710677, %v6849_v3  ;;  %v6870_v46 = vadd.f32 %v6694_v0, %v6651_v32  ;;  %v3124_v56 = vsub.f32 0.0, %v3060_v21  ;;  %4893 = vrcp.f32 %v2526_v19  ;;  %v6875_v39 = vpop.eup %4881 }
 0x966   : > { %v2525_v33 = vadd.f32 1.0, %v2493_v50  ;;  %v6873_v36 = vmul.f32 0.5, %v6796_v42  ;;  %v3126_v13 = vsub.f32 0.0, %v3062_v20  ;;  %v2912_v40 = vsub.f32 0.0, %v2464_v63 }
 0x967   : > { %7726 = vst [vmem:[#allocation57_spill] sm:$0xff] %v6862_v1  ;;  %v2465_v14 = vand.u32 2147483647, %v6862_v1  ;;  %v6879_v30 = vmul.f32 0.70710677, %v6866_v9  ;;  %4895 = vpow2.f32 %v2984_v2  ;;  %v2943_v10 = vmul.f32 %v2911_v18, %v2463_v12 }
 0x968   : > { %7727 = vst [vmem:[#allocation58_spill] sm:$0xff] %v6873_v36  ;;  %v2982_v22 = vmul.f32 1.442695, %v2941_v34  ;;  %v6883_v0 = vadd.f32 %v6697_v5, %v6653_v6  ;;  %v6885_v19 = vpop.eup %4883  ;;  %v2527_v42 = vadd.f32 1.0, %v2495_v61  ;;  %v2496_v50 = vmul.f32 0.3275911, %v2464_v63 }
 0x969   : > { %7728 = vst [vmem:[#allocation59_spill] sm:$0xff] %v6879_v30  ;;  %v2914_v36 = vsub.f32 0.0, %v2466_v35  ;;  %v6888_v60 = vmul.f32 0.70710677, %v6870_v46  ;;  %v6890_v38 = vpop.eup %4885  ;;  %v3156_v1 = vsel %vm3092_vm6, %v3124_v56, %v3060_v21  ;;  %4897 = vrcp.f32 %v2525_v33 }
 0x96a   : > { %v6895_v12 = vmul.f32 0.5, %v6812_v53  ;;  %v2467_v5 = vand.u32 2147483647, %v6879_v30  ;;  %v6898_v2 = vpop.eup %4887  ;;  %v3158_v34 = vsel %vm3094_vm7, %v3126_v13, %v3062_v20  ;;  %v2944_v61 = vmul.f32 %v2912_v40, %v2464_v63 }
 0x96b   : > { %7729 = vst [vmem:[#allocation60_spill] sm:$0xff] %v6888_v60  ;;  %v2913_v18 = vsub.f32 0.0, %v2465_v14  ;;  %v6904_v4 = vadd.f32 %v6699_v58, %v6657_v26  ;;  %v6906_v15 = vpop.eup %4889  ;;  %4899 = vpow2.f32 %v2982_v22  ;;  %v2986_v27 = vmul.f32 1.442695, %v2943_v10 }
 0x96c   : > { %7730 = vst [vmem:[#allocation61_spill] sm:$0xff] %v6895_v12  ;;  %7731 = vst [vmem:[#allocation62_spill] sm:$0xff] %v6906_v15  ;;  %v2498_v21 = vmul.f32 0.3275911, %v2466_v35  ;;  %v6909_v53 = vmul.f32 0.70710677, %v6883_v0  ;;  %v6911_v56 = vpop.eup %4891  ;;  %4901 = vrcp.f32 %v2527_v42  ;;  %v2946_v49 = vmul.f32 %v2914_v36, %v2466_v35 }
 0x96d   : > { %7733 = vst [vmem:[#allocation64_spill] sm:$0xff] %v6911_v56  ;;  %v2528_v33 = vadd.f32 1.0, %v2496_v50  ;;  %v2468_v40 = vand.u32 2147483647, %v6888_v60  ;;  %v3188_v20 = vadd.f32 1.0, %v3156_v1  ;;  %v3190_v63 = vadd.f32 1.0, %v3158_v34 }
 0x96e   : > { %7732 = vst [vmem:[#allocation63_spill] sm:$0xff] %v6909_v53  ;;  %v2497_v13 = vmul.f32 0.3275911, %v2465_v14  ;;  %v2915_v58 = vsub.f32 0.0, %v2467_v5  ;;  %v2988_v12 = vmul.f32 1.442695, %v2944_v61  ;;  %v2945_v30 = vmul.f32 %v2913_v18, %v2465_v14 }
 0x96f   : > { %v6915_v22 = vmul.f32 0.70710677, %v6904_v4  ;;  %v6919_v10 = vadd.f32 %v6701_v37, %v6665_v25  ;;  %v6921_v15 = vpop.eup %4893  ;;  %4903 = vpow2.f32 %v2986_v27  ;;  %v2530_v42 = vadd.f32 1.0, %v2498_v21 }
 0x970   : > { %7735 = vst [vmem:[#allocation66_spill] sm:$0xff] %v6921_v15  ;;  %v2499_v35 = vmul.f32 0.3275911, %v2467_v5  ;;  %v2470_v36 = vand.u32 2147483647, %v6909_v53  ;;  %4905 = vrcp.f32 %v2528_v33  ;;  %v2916_v50 = vsub.f32 0.0, %v2468_v40 }
 0x971   : > { %7734 = vst [vmem:[#allocation65_spill] sm:$0xff] %v6915_v22  ;;  %v2992_v1 = vmul.f32 1.442695, %v2946_v49  ;;  %v2469_v34 = vand.u32 2147483647, %v6915_v22  ;;  %v6925_v14 = vpop.eup %4895  ;;  %v2529_v61 = vadd.f32 1.0, %v2497_v13  ;;  %v2947_v18 = vmul.f32 %v2915_v58, %v2467_v5 }
 0x972   : > { %7736 = vst [vmem:[#allocation67_spill] sm:$0xff] %v6925_v14  ;;  %v6928_v60 = vmul.f32 0.70710677, %v6919_v10  ;;  %v6932_v37 = vadd.f32 %v6715_v28, %v6651_v32  ;;  %4907 = vpow2.f32 %v2988_v12  ;;  %v2990_v27 = vmul.f32 1.442695, %v2945_v30 }
 0x973   : > { %v2500_v21 = vmul.f32 0.3275911, %v2468_v40  ;;  %v6936_v33 = vadd.f32 %v6717_v29, %v6653_v6  ;;  %v6938_v49 = vpop.eup %4897  ;;  %4909 = vrcp.f32 %v2530_v42  ;;  %v2531_v53 = vadd.f32 1.0, %v2499_v35 }
 0x974   : > { %7737 = vst [vmem:[#allocation68_spill] sm:$0xff] %v6928_v60  ;;  %v2918_v13 = vsub.f32 0.0, %v2470_v36  ;;  %v2471_v5 = vand.u32 2147483647, %v6928_v60  ;;  %4911 = vpow2.f32 %v2992_v1  ;;  %v2948_v58 = vmul.f32 %v2916_v50, %v2468_v40 }
 0x975   : > { %v2917_v22 = vsub.f32 0.0, %v2469_v34  ;;  %v6942_v28 = vmul.f32 0.70710677, %v6932_v37  ;;  %v6944_v12 = vpop.eup %4899  ;;  %4913 = vrcp.f32 %v2529_v61  ;;  %v2994_v30 = vmul.f32 1.442695, %v2947_v18 }
 0x976   : > { %7739 = vst [vmem:[#allocation70_spill] sm:$0xff] %v6944_v12  ;;  %v2502_v14 = vmul.f32 0.3275911, %v2470_v36  ;;  %v6947_v29 = vmul.f32 0.70710677, %v6936_v33  ;;  %v6949_v56 = vpop.eup %4901  ;;  %v6952_v42 = vmul.f32 %v3188_v20, %v6703_v41  ;;  %v6955_v35 = vmul.f32 0.5, %v6825_v17 }
 0x977   : > { %7738 = vst [vmem:[#allocation69_spill] sm:$0xff] %v6942_v28  ;;  %4915 = vpow2.f32 %v2990_v27  ;;  %v2532_v40 = vadd.f32 1.0, %v2500_v21  ;;  %v2950_v1 = vmul.f32 %v2918_v13, %v2470_v36  ;;  %v2919_v50 = vsub.f32 0.0, %v2471_v5 }
 0x978   : > { %7740 = vst [vmem:[#allocation71_spill] sm:$0xff] %v6947_v29  ;;  %7741 = vst [vmem:[#allocation72_spill] sm:$0xff] %v6955_v35  ;;  %4917 = vrcp.f32 %v2531_v53  ;;  %v2472_v61 = vand.u32 2147483647, %v6942_v28  ;;  %v2996_v18 = vmul.f32 1.442695, %v2948_v58  ;;  %v2949_v15 = vmul.f32 %v2917_v22, %v2469_v34 }
 0x979   : > { %v2501_v60 = vmul.f32 0.3275911, %v2469_v34  ;;  %v6960_v12 = vadd.f32 %v6726_v59, %v6657_v26  ;;  %v6962_v52 = vpop.eup %4903  ;;  %v6965_v41 = vmul.f32 %v3190_v63, %v6708_v48  ;;  %4919 = vpow2.f32 %v2994_v30 }
 0x97a   : > { %v2534_v17 = vadd.f32 1.0, %v2502_v14  ;;  %v2474_v53 = vand.u32 2147483647, %v6947_v29  ;;  %v6968_v20 = vpop.eup %4905  ;;  %v6971_v36 = vmul.f32 0.5, %v6849_v3  ;;  %4921 = vrcp.f32 %v2532_v40 }
 0x97b   : > { %v2503_v22 = vmul.f32 0.3275911, %v2471_v5  ;;  %v6974_v34 = vmul.f32 0.70710677, %v6960_v12  ;;  %v3000_v59 = vmul.f32 1.442695, %v2950_v1  ;;  %v2951_v27 = vmul.f32 %v2919_v50, %v2471_v5 }
 0x97c   : > { %v2920_v21 = vsub.f32 0.0, %v2472_v61  ;;  %v6978_v48 = vadd.f32 %v6731_v31, %v6665_v25  ;;  %v6980_v63 = vpop.eup %4907  ;;  %v6983_v14 = vmul.f32 0.5, %v6866_v9  ;;  %4923 = vpow2.f32 %v2996_v18 }
 0x97d   : > { %7742 = vst [vmem:[#allocation73_spill] sm:$0xff] %v6974_v34  ;;  %v2533_v3 = vadd.f32 1.0, %v2501_v60  ;;  %v2998_v13 = vmul.f32 1.442695, %v2949_v15  ;;  %v6985_v58 = vpop.eup %4909  ;;  %4925 = vrcp.f32 %v2534_v17  ;;  %v2504_v30 = vmul.f32 0.3275911, %v2472_v61 }
 0x97e   : > { %v2922_v40 = vsub.f32 0.0, %v2474_v53  ;;  %v6988_v5 = vmul.f32 0.70710677, %v6978_v48  ;;  %v6990_v1 = vpop.eup %4911  ;;  %v2535_v31 = vadd.f32 1.0, %v2503_v22  ;;  %v2506_v50 = vmul.f32 0.3275911, %v2474_v53 }
 0x97f   : > { %v2473_v29 = vand.u32 2147483647, %v6974_v34  ;;  %v6995_v9 = vadd.f32 %v6739_v55, %v6651_v32  ;;  %v6997_v60 = vpop.eup %4913  ;;  %4927 = vpow2.f32 %v3000_v59  ;;  %v3002_v15 = vmul.f32 1.442695, %v2951_v27 }
 0x980   : > { %7743 = vst [vmem:[#allocation74_spill] sm:$0xff] %v6988_v5  ;;  %v2952_v18 = vmul.f32 %v2920_v21, %v2472_v61  ;;  %v7001_v17 = vadd.f32 %v6741_v44, %v6653_v6  ;;  %v7006_v22 = vmul.f32 0.5, %v6870_v46  ;;  %4929 = vrcp.f32 %v2533_v3 }
 0x981   : > { %7744 = vst [vmem:[#allocation75_spill] sm:$0xff] %v6995_v9  ;;  %v7003_v28 = vpop.eup %4915  ;;  %v2475_v34 = vand.u32 2147483647, %v6988_v5  ;;  %v7010_v55 = vmul.f32 0.70710677, %v6995_v9  ;;  %4931 = vpow2.f32 %v2998_v13  ;;  %v2536_v59 = vadd.f32 1.0, %v2504_v30 }
 0x982   : > { %7745 = vst [vmem:[#allocation76_spill] sm:$0xff] %v7001_v17  ;;  %7746 = vst [vmem:[#allocation77_spill] sm:$0xff] %v7006_v22  ;;  %v7012_v35 = vpop.eup %4917  ;;  %v2954_v61 = vmul.f32 %v2922_v40, %v2474_v53  ;;  %v7015_v27 = vmul.f32 0.70710677, %v7001_v17  ;;  %v7018_v44 = vmul.f32 0.5, %v6883_v0  ;;  %4933 = vrcp.f32 %v2535_v31 }
 0x983   : > { %7747 = vst [vmem:[#allocation78_spill] sm:$0xff] %v7010_v55  ;;  %v2538_v46 = vadd.f32 1.0, %v2506_v50  ;;  %v2921_v21 = vsub.f32 0.0, %v2473_v29  ;;  %v7020_v3 = vpop.eup %4919  ;;  %v7023_v22 = vmul.f32 0.5, %v6904_v4  ;;  %4935 = vpow2.f32 %v3002_v15 }
 0x984   : > { %7748 = vst [vmem:[#allocation79_spill] sm:$0xff] %v7015_v27  ;;  %7749 = vst [vmem:[#allocation80_spill] sm:$0xff] %v7018_v44  ;;  %v3004_v9 = vmul.f32 1.442695, %v2952_v18  ;;  %v2476_v13 = vand.u32 2147483647, %v7010_v55  ;;  %v7026_v30 = vpop.eup %4921  ;;  %v2267_v0 = vadd.f32 %v6749_v62, %v6657_v26  ;;  %4937 = vrcp.f32 %v2536_v59 }
 0x985   : > { %v2505_v53 = vmul.f32 0.3275911, %v2473_v29  ;;  %v2923_v40 = vsub.f32 0.0, %v2475_v34  ;;  %v2478_v17 = vand.u32 2147483647, %v7015_v27  ;;  %v7032_v31 = vmul.f32 0.5, %v6919_v10 }
 0x986   : > { %v7035_v50 = vmul.f32 0.5, %v6932_v37  ;;  %v3008_v4 = vmul.f32 1.442695, %v2954_v61  ;;  %v7037_v15 = vpop.eup %4923  ;;  %4939 = vrcp.f32 %v2538_v46  ;;  %v2953_v18 = vmul.f32 %v2921_v21, %v2473_v29 }
 0x987   : > { %7750 = vst [vmem:[#allocation81_spill] sm:$0xff] %v7032_v31  ;;  %7752 = vst [vmem:[#allocation83_spill] sm:$0xff] %v7037_v15  ;;  %v2507_v55 = vmul.f32 0.3275911, %v2475_v34  ;;  %v7039_v44 = vmul.f32 0.70710677, %v2267_v0  ;;  %v7041_v5 = vpop.eup %4925  ;;  %4941 = vpow2.f32 %v3004_v9  ;;  %v2380_v37 = vadd.f32 %v6752_v7, %v6665_v25 }
 0x988   : > { %7751 = vst [vmem:[#allocation82_spill] sm:$0xff] %v7035_v50  ;;  %v7044_v62 = vmul.f32 0.5, %v6936_v33  ;;  %v2924_v10 = vsub.f32 0.0, %v2476_v13  ;;  %v2537_v27 = vadd.f32 1.0, %v2505_v53  ;;  %v2955_v59 = vmul.f32 %v2923_v40, %v2475_v34 }
 0x989   : > { %7753 = vst [vmem:[#allocation84_spill] sm:$0xff] %v7039_v44  ;;  %v2926_v61 = vsub.f32 0.0, %v2478_v17  ;;  %v2477_v50 = vand.u32 2147483647, %v7039_v44  ;;  %v7049_v46 = vpop.eup %4927  ;;  %4943 = vpow2.f32 %v3008_v4  ;;  %v7052_v29 = vmul.f32 0.5, %v6960_v12 }
 0x98a   : > { %7754 = vst [vmem:[#allocation85_spill] sm:$0xff] %v7044_v62  ;;  %7755 = vst [vmem:[#allocation86_spill] sm:$0xff] %v7049_v46  ;;  %v2508_v21 = vmul.f32 0.3275911, %v2476_v13  ;;  %v7054_v9 = vmul.f32 0.70710677, %v2380_v37  ;;  %v7056_v33 = vpop.eup %4929  ;;  %v7060_v7 = vadd.f32 %v6767_v45, %v6651_v32  ;;  %v2956_v53 = vmul.f32 %v2924_v10, %v2476_v13 }
 0x98b   : > { %7756 = vst [vmem:[#allocation87_spill] sm:$0xff] %v7052_v29  ;;  %v3006_v62 = vmul.f32 1.442695, %v2953_v18  ;;  %v2539_v31 = vadd.f32 1.0, %v2507_v55  ;;  %v2510_v15 = vmul.f32 0.3275911, %v2478_v17  ;;  %v7062_v34 = vpop.eup %4931  ;;  %v7067_v12 = vadd.f32 %v6769_v8, %v6653_v6 }
 0x98c   : > { %7757 = vst [vmem:[#allocation88_spill] sm:$0xff] %v7054_v9  ;;  %7758 = vst [vmem:[#allocation89_spill] sm:$0xff] %v7060_v7  ;;  %v2925_v40 = vsub.f32 0.0, %v2477_v50  ;;  %v2479_v4 = vand.u32 2147483647, %v7054_v9  ;;  %v7069_v29 = vpop.eup %4933  ;;  %4945 = vrcp.f32 %v2537_v27  ;;  %v2958_v55 = vmul.f32 %v2926_v61, %v2478_v17 }
 0x98d   : > { %7759 = vst [vmem:[#allocation90_spill] sm:$0xff] %v7067_v12  ;;  %v3010_v18 = vmul.f32 1.442695, %v2955_v59  ;;  %v7072_v44 = vmul.f32 0.70710677, %v7060_v7  ;;  %v7074_v32 = vpop.eup %4935  ;;  %v2540_v45 = vadd.f32 1.0, %v2508_v21  ;;  %4947 = vpow2.f32 %v3006_v62 }
 0x98e   : > { %v2509_v46 = vmul.f32 0.3275911, %v2477_v50  ;;  %v2927_v13 = vsub.f32 0.0, %v2479_v4  ;;  %v7077_v10 = vmul.f32 0.70710677, %v7067_v12  ;;  %v7080_v6 = vmul.f32 0.5, %v6978_v48  ;;  %v7083_v59 = vpop.eup %4937 }
 0x98f   : > { %7760 = vst [vmem:[#allocation91_spill] sm:$0xff] %v7072_v44  ;;  %v2542_v8 = vadd.f32 1.0, %v2510_v15  ;;  %v2480_v27 = vand.u32 2147483647, %v7072_v44  ;;  %4949 = vrcp.f32 %v2539_v31  ;;  %v3012_v17 = vmul.f32 1.442695, %v2956_v53 }
 0x990   : > { %7761 = vst [vmem:[#allocation92_spill] sm:$0xff] %v7077_v10  ;;  %7762 = vst [vmem:[#allocation93_spill] sm:$0xff] %v7080_v6  ;;  %v2957_v61 = vmul.f32 %v2925_v40, %v2477_v50  ;;  %v2482_v7 = vand.u32 2147483647, %v7077_v10  ;;  %v7086_v21 = vpop.eup %4939  ;;  %4951 = vpow2.f32 %v3010_v18  ;;  %v3016_v9 = vmul.f32 1.442695, %v2958_v55 }
 0x991   : > { %v2511_v12 = vmul.f32 0.3275911, %v2479_v4  ;;  %v7090_v62 = vadd.f32 %v6773_v11, %v6657_v26  ;;  %v7092_v48 = vpop.eup %4941  ;;  %4953 = vrcp.f32 %v2540_v45  ;;  %v7094_v15 = vmul.f32 0.5, %v2267_v0 }
 0x992   : > { %7764 = vst [vmem:[#allocation95_spill] sm:$0xff] %v7092_v48  ;;  %v2541_v44 = vadd.f32 1.0, %v2509_v46  ;;  %v2959_v31 = vmul.f32 %v2927_v13, %v2479_v4  ;;  %4955 = vrcp.f32 %v2542_v8  ;;  %v2928_v50 = vsub.f32 0.0, %v2480_v27 }
 0x993   : > { %7763 = vst [vmem:[#allocation94_spill] sm:$0xff] %v7090_v62  ;;  %7765 = vst [vmem:[#allocation96_spill] sm:$0xff] %v7094_v15  ;;  %v2930_v53 = vsub.f32 0.0, %v2482_v7  ;;  %v7097_v40 = vmul.f32 0.70710677, %v7090_v62  ;;  %v7099_v18 = vpop.eup %4943  ;;  %4957 = vpow2.f32 %v3012_v17  ;;  %v7101_v10 = vmul.f32 0.5, %v2380_v37 }
 0x994   : > { %7767 = vst [vmem:[#allocation98_spill] sm:$0xff] %v7099_v18  ;;  %v3014_v55 = vmul.f32 1.442695, %v2957_v61  ;;  %v7105_v26 = vadd.f32 %v6775_v57, %v6665_v25  ;;  %4959 = vpow2.f32 %v3016_v9  ;;  %v2543_v11 = vadd.f32 1.0, %v2511_v12 }
 0x995   : > { %7766 = vst [vmem:[#allocation97_spill] sm:$0xff] %v7097_v40  ;;  %7768 = vst [vmem:[#allocation99_spill] sm:$0xff] %v7101_v10  ;;  %v2512_v0 = vmul.f32 0.3275911, %v2480_v27  ;;  %v2481_v46 = vand.u32 2147483647, %v7097_v40  ;;  %4961 = vrcp.f32 %v2541_v44  ;;  %v2960_v17 = vmul.f32 %v2928_v50, %v2480_v27 }
 0x996   : > { %7769 = vst [vmem:[#allocation100_spill] sm:$0xff] %v7105_v26  ;;  %v3018_v4 = vmul.f32 1.442695, %v2959_v31  ;;  %v2514_v45 = vmul.f32 0.3275911, %v2482_v7  ;;  %v7111_v8 = vpop.eup %4945  ;;  %v2962_v37 = vmul.f32 %v2930_v53, %v2482_v7  ;;  %4963 = vpow2.f32 %v3014_v55 }
 0x997   : > { %v7109_v13 = vmul.f32 0.70710677, %v7105_v26  ;;  %v2929_v61 = vsub.f32 0.0, %v2481_v46  ;;  %v2613_v62 = vmul.f32 1.0614054, %v6801_v24  ;;  %v7116_v12 = vpop.eup %4947  ;;  %4965 = vrcp.f32 %v2543_v11 }
 0x998   : > { %v2513_v25 = vmul.f32 0.3275911, %v2481_v46  ;;  %v2615_v9 = vmul.f32 1.0614054, %v6814_v16  ;;  %7771 = vst [vmem:[#allocation102_spill] sm:$0xff] %v7116_v12  ;;  %v2544_v44 = vadd.f32 1.0, %v2512_v0  ;;  %4967 = vpow2.f32 %v3018_v4 }
 0x999   : > { %7770 = vst [vmem:[#allocation101_spill] sm:$0xff] %v7109_v13  ;;  %v2483_v57 = vand.u32 2147483647, %v7109_v13  ;;  %v2645_v31 = vadd.f32 -1.4531521, %v2613_v62  ;;  %v7119_v40 = vpop.eup %4949  ;;  %v2546_v27 = vadd.f32 1.0, %v2514_v45  ;;  %v2961_v7 = vmul.f32 %v2929_v61, %v2481_v46 }
 0x99a   : > { %v2617_v26 = vmul.f32 1.0614054, %v6875_v39  ;;  %v2647_v53 = vadd.f32 -1.4531521, %v2615_v9  ;;  %v7121_v10 = vpop.eup %4951  ;;  %v7123_v55 = vmul.f32 1.442695, %v2960_v17  ;;  %4969 = vrcp.f32 %v2544_v44 }
 0x99b   : > { %v2931_v50 = vsub.f32 0.0, %v2483_v57  ;;  %7772 = vst [vmem:[#allocation103_spill] sm:$0xff] %v7121_v10  ;;  %v7125_v13 = vmul.f32 1.442695, %v2962_v37  ;;  %v2677_v15 = vmul.f32 %v6801_v24, %v2645_v31  ;;  %v7128_v11 = vpop.eup %4953  ;;  %v7130_v62 = vadd.f32 1.0, %v2513_v25  ;;  %v7784_v12 = vld [vmem:[#allocation41_spill] sm:$0xff] }
 0x99c   : > { %7773 = vst [vmem:[#allocation104_spill] sm:$0xff] %v7123_v55  ;;  %v2649_v6 = vadd.f32 -1.4531521, %v2617_v26  ;;  %7775 = vst [vmem:[#allocation106_spill] sm:$0xff] %v7128_v11  ;;  %v2679_v18 = vmul.f32 %v6814_v16, %v2647_v53  ;;  %v2619_v46 = vmul.f32 1.0614054, %v6890_v38  ;;  %v7134_v45 = vpop.eup %4955  ;;  %4971 = vrcp.f32 %v2546_v27 }
 0x99d   : > { %7774 = vst [vmem:[#allocation105_spill] sm:$0xff] %v7125_v13  ;;  %v2963_v0 = vmul.f32 %v2931_v50, %v2483_v57  ;;  %7776 = vst [vmem:[#allocation107_spill] sm:$0xff] %v7134_v45  ;;  %v7136_v61 = vmul.f32 0.3275911, %v2483_v57  ;;  %v2709_v17 = vadd.f32 1.4214138, %v2677_v15  ;;  %v7140_v31 = vpop.eup %4957  ;;  %4973 = vrcp.f32 %v7130_v62 }
 0x99e   : > { %v2681_v37 = vmul.f32 %v6875_v39, %v2649_v6  ;;  %v2616_v9 = vmul.f32 1.0614054, %v6835_v47  ;;  %7777 = vst [vmem:[#allocation108_spill] sm:$0xff] %v7140_v31  ;;  %v7142_v26 = vmul.f32 1.442695, %v2961_v7  ;;  %v7144_v13 = vpop.eup %4959  ;;  %vm3099_vm11 = vcmp.lt.f32.partialorder %v7784_v12, 0.0 }
 0x99f   : > { %v2711_v25 = vadd.f32 1.4214138, %v2679_v18  ;;  %v2651_v50 = vadd.f32 -1.4531521, %v2619_v46  ;;  %7778 = vst [vmem:[#allocation109_spill] sm:$0xff] %v7144_v13  ;;  %v2741_v53 = vmul.f32 %v6801_v24, %v2709_v17  ;;  %v7148_v15 = vpop.eup %4961 }
 0x9a0   : > { %v2713_v55 = vadd.f32 1.4214138, %v2681_v37  ;;  %v2648_v45 = vadd.f32 -1.4531521, %v2616_v9  ;;  %v2618_v57 = vmul.f32 1.0614054, %v6838_v51  ;;  %v7157_v37 = vpop.eup %4963  ;;  %4975 = vpow2.f32 %v7142_v26 }
 0x9a1   : > { %v7150_v6 = vmul.f32 1.442695, %v2963_v0  ;;  %v2743_v11 = vmul.f32 %v6814_v16, %v2711_v25  ;;  %v2683_v4 = vmul.f32 %v6890_v38, %v2651_v50  ;;  %v2621_v7 = vmul.f32 1.0614054, %v6938_v49  ;;  %7780 = vst [vmem:[#allocation111_spill] sm:$0xff] %v7157_v37  ;;  %v7159_v0 = vpop.eup %4965 }
 0x9a2   : > { %v2773_v18 = vadd.f32 -0.28449672, %v2741_v53  ;;  %v2745_v46 = vmul.f32 %v6875_v39, %v2713_v55  ;;  %v2680_v13 = vmul.f32 %v6835_v47, %v2648_v45  ;;  %v2650_v17 = vadd.f32 -1.4531521, %v2618_v57 }
 0x9a3   : > { %7779 = vst [vmem:[#allocation110_spill] sm:$0xff] %v7150_v6  ;;  %v2775_v9 = vadd.f32 -0.28449672, %v2743_v11  ;;  %v2715_v31 = vadd.f32 1.4214138, %v2683_v4 }
 0x9a4   : > { %v2653_v48 = vadd.f32 -1.4531521, %v2621_v7  ;;  %v2805_v25 = vmul.f32 %v6801_v24, %v2773_v18  ;;  %v2777_v6 = vadd.f32 -0.28449672, %v2745_v46  ;;  %v2712_v50 = vadd.f32 1.4214138, %v2680_v13 }
 0x9a5   : > { %v2682_v10 = vmul.f32 %v6838_v51, %v2650_v17  ;;  %v2807_v53 = vmul.f32 %v6814_v16, %v2775_v9  ;;  %v2747_v55 = vmul.f32 %v6890_v38, %v2715_v31  ;;  %v2623_v57 = vmul.f32 1.0614054, %v6949_v56  ;;  %v7781_v17 = vld [vmem:[#allocation35_spill] sm:$0xff] }
 0x9a6   : > { %v2685_v45 = vmul.f32 %v6938_v49, %v2653_v48  ;;  %v2837_v44 = vadd.f32 0.2548296, %v2805_v25  ;;  %v2809_v11 = vmul.f32 %v6875_v39, %v2777_v6  ;;  %v2744_v4 = vmul.f32 %v6835_v47, %v2712_v50  ;;  %v7173_v25 = vpop.eup %4967  ;;  %v7783_v6 = vld [vmem:[#allocation40_spill] sm:$0xff] }
 0x9a7   : > { %v2714_v7 = vadd.f32 1.4214138, %v2682_v10  ;;  %v2839_v13 = vadd.f32 0.2548296, %v2807_v53  ;;  %v2779_v18 = vadd.f32 -0.28449672, %v2747_v55 }
 0x9a8   : > { %v2717_v46 = vadd.f32 1.4214138, %v2685_v45  ;;  %vm3095_vm9 = vcmp.lt.f32.partialorder %v7781_v17, 0.0  ;;  %v2869_v31 = vmul.f32 %v6801_v24, %v2837_v44  ;;  %v2841_v9 = vadd.f32 0.2548296, %v2809_v11  ;;  %7782 = vst [vmem:[#allocation35_spill] sm:$0xff] %v7173_v25 }
 0x9a9   : > { %v2776_v48 = vadd.f32 -0.28449672, %v2744_v4  ;;  %v2746_v37 = vmul.f32 %v6838_v51, %v2714_v7  ;;  %vm3097_vm10 = vcmp.lt.f32.partialorder %v7783_v6, 0.0  ;;  %v2871_v10 = vmul.f32 %v6814_v16, %v2839_v13 }
 0x9aa   : > { %v2811_v50 = vmul.f32 %v6890_v38, %v2779_v18  ;;  %v2749_v27 = vmul.f32 %v6938_v49, %v2717_v46  ;;  %v2655_v53 = vadd.f32 -1.4531521, %v2623_v57  ;;  %v3029_v55 = vmul.f32 %v6807_v43, %v2869_v31  ;;  %v7187_v43 = vpop.eup %4969 }
 0x9ab   : > { %v2873_v45 = vmul.f32 %v6875_v39, %v2841_v9  ;;  %v2808_v24 = vmul.f32 %v6835_v47, %v2776_v48  ;;  %v2778_v44 = vadd.f32 -0.28449672, %v2746_v37  ;;  %v3031_v11 = vmul.f32 %v6827_v23, %v2871_v10  ;;  %v7785_v39 = vld [vmem:[#allocation36_spill] sm:$0xff] }
 0x9ac   : > { %v2843_v4 = vadd.f32 0.2548296, %v2811_v50  ;;  %v2781_v7 = vadd.f32 -0.28449672, %v2749_v27  ;;  %v2687_v25 = vmul.f32 %v6949_v56, %v2655_v53  ;;  %v3061_v16 = vsub.f32 1.0, %v3029_v55  ;;  %v7786_v27 = vld [vmem:[#allocation38_spill] sm:$0xff] }
 0x9ad   : > { %v3033_v13 = vmul.f32 %v6885_v19, %v2873_v45  ;;  %v2840_v18 = vadd.f32 0.2548296, %v2808_v24  ;;  %v2810_v57 = vmul.f32 %v6838_v51, %v2778_v44  ;;  %vm3096_vm12 = vcmp.lt.f32.partialorder %v7785_v39, 0.0  ;;  %v7787_v24 = vld [vmem:[#allocation45_spill] sm:$0xff] }
 0x9ae   : > { %v3063_v46 = vsub.f32 1.0, %v3031_v11  ;;  %v2875_v37 = vmul.f32 %v6890_v38, %v2843_v4  ;;  %v2813_v23 = vmul.f32 %v6938_v49, %v2781_v7  ;;  %v2719_v31 = vadd.f32 1.4214138, %v2687_v25  ;;  %v7788_v25 = vld [vmem:[#allocation54_spill] sm:$0xff] }
 0x9af   : > { %v3125_v9 = vsub.f32 0.0, %v3061_v16  ;;  %v3065_v48 = vsub.f32 1.0, %v3033_v13  ;;  %v2872_v10 = vmul.f32 %v6835_v47, %v2840_v18  ;;  %v2842_v50 = vadd.f32 0.2548296, %v2810_v57  ;;  %v7201_v47 = vpop.eup %4971 }
 0x9b0   : > { %vm3098_vm13 = vcmp.lt.f32.partialorder %v7786_v27, 0.0  ;;  %v3127_v19 = vsub.f32 0.0, %v3063_v46  ;;  %v3035_v53 = vmul.f32 %v6898_v2, %v2875_v37  ;;  %v2845_v55 = vadd.f32 0.2548296, %v2813_v23  ;;  %7789 = vst [vmem:[#allocation40_spill] sm:$0xff] %v7201_v47 }
 0x9b1   : > { %v2751_v45 = vmul.f32 %v6949_v56, %v2719_v31  ;;  %vm3101_vm14 = vcmp.lt.f32.partialorder %v7787_v24, 0.0  ;;  %v3157_v38 = vsel %vm3093_vm8, %v3125_v9, %v3061_v16  ;;  %v3129_v44 = vsub.f32 0.0, %v3065_v48  ;;  %v7790_v16 = vld [vmem:[#allocation56_spill] sm:$0xff]  ;;  %v7791_v31 = vld [vmem:[#allocation37_spill] sm:$0xff] }
 0x9b2   : > { %v3032_v11 = vmul.f32 %v7788_v25, %v2872_v10  ;;  %v2874_v4 = vmul.f32 %v6838_v51, %v2842_v50  ;;  %v3189_v7 = vadd.f32 1.0, %v3157_v38  ;;  %v3159_v13 = vsel %vm3095_vm9, %v3127_v19, %v3063_v46  ;;  %v7792_v50 = vld [vmem:[#allocation70_spill] sm:$0xff]  ;;  %v7793_v38 = vld [vmem:[#allocation39_spill] sm:$0xff] }
 0x9b3   : > { %v3067_v2 = vsub.f32 1.0, %v3035_v53  ;;  %v2877_v18 = vmul.f32 %v6938_v49, %v2845_v55  ;;  %v3191_v57 = vadd.f32 1.0, %v3159_v13  ;;  %v3161_v37 = vsel %vm3097_vm10, %v3129_v44, %v3065_v48  ;;  %v7794_v49 = vld [vmem:[#allocation47_spill] sm:$0xff]  ;;  %v7795_v55 = vld [vmem:[#allocation62_spill] sm:$0xff] }
 0x9b4   : > { %v3064_v54 = vsub.f32 1.0, %v3032_v11  ;;  %v3034_v23 = vmul.f32 %v7790_v16, %v2874_v4  ;;  %v3221_v9 = vmul.f32 %v3189_v7, %v7791_v31  ;;  %v3193_v10 = vadd.f32 1.0, %v3161_v37  ;;  %v7797_v37 = vld [vmem:[#allocation49_spill] sm:$0xff] }
 0x9b5   : > { %v3131_v51 = vsub.f32 0.0, %v3067_v2  ;;  %v3037_v25 = vmul.f32 %v7792_v50, %v2877_v18  ;;  %v3223_v47 = vmul.f32 %v3191_v57, %v7793_v38  ;;  %v2783_v19 = vadd.f32 -0.28449672, %v2751_v45  ;;  %v7800_v38 = vld [vmem:[#allocation46_spill] sm:$0xff] }
 0x9b6   : > { %v3128_v17 = vsub.f32 0.0, %v3064_v54  ;;  %v3066_v46 = vsub.f32 1.0, %v3034_v23  ;;  %3387 = vmatprep.mubr.f32.mxu0 %v3221_v9  ;;  %v3225_v53 = vmul.f32 %v3193_v10, %v7794_v49  ;;  %v2620_v44 = vmul.f32 1.0614054, %v7795_v55  ;;  %v7799_v23 = vld [vmem:[#allocation44_spill] sm:$0xff] }
 0x9b7   : > { %v3163_v6 = vsel %vm3099_vm11, %v3131_v51, %v3067_v2  ;;  %v3069_v48 = vsub.f32 1.0, %v3037_v25  ;;  %3492 = vmatprep.mubr.f32.mxu1 %v3223_v47  ;;  %3388 = vmatmul.mubr.f32.vlgmr.msra.gmra.mrb[16].mxu0 %v6952_v42  ;;  %v2815_v13 = vmul.f32 %v6949_v56, %v2783_v19  ;;  %v7796_v2 = vld [vmem:[#allocation66_spill] sm:$0xff]  ;;  %v2625_v39 = vmul.f32 1.0614054, %v6997_v60 }
 0x9b8   : > { %v3195_v11 = vadd.f32 1.0, %v3163_v6  ;;  %v3160_v4 = vsel %vm3096_vm12, %v3128_v17, %v3064_v54  ;;  %v3130_v7 = vsub.f32 0.0, %v3066_v46  ;;  %3493 = vmatmul.mubr.f32.vlgmr.msra.gmra.mrb[16].mxu1 %v6965_v41  ;;  %3392 = vmatprep.mubr.f32.mxu0 %v3225_v53  ;;  %v2652_v12 = vadd.f32 -1.4531521, %v2620_v44  ;;  %v7798_v54 = vld [vmem:[#allocation48_spill] sm:$0xff]  ;;  %v7801_v53 = vld [vmem:[#allocation55_spill] sm:$0xff] }
 0x9b9   : > { %v3192_v45 = vadd.f32 1.0, %v3160_v4  ;;  %v3133_v18 = vsub.f32 0.0, %v3069_v48  ;;  %v2622_v57 = vmul.f32 1.0614054, %v7796_v2  ;;  %v2847_v47 = vadd.f32 0.2548296, %v2815_v13 }
 0x9ba   : > { %v3227_v16 = vmul.f32 %v3195_v11, %v7797_v37  ;;  %v3162_v42 = vsel %vm3098_vm13, %v3130_v7, %v3066_v46  ;;  %vm3103_vm15 = vcmp.lt.f32.partialorder %v7798_v54, 0.0  ;;  %v2684_v10 = vmul.f32 %v7795_v55, %v2652_v12  ;;  %v7803_v54 = vld [vmem:[#allocation58_spill] sm:$0xff] }
 0x9bb   : > { %v3224_v31 = vmul.f32 %v3192_v45, %v7799_v23  ;;  %v3194_v9 = vadd.f32 1.0, %v3162_v42  ;;  %v3165_v41 = vsel %vm3101_vm14, %v3133_v18, %v3069_v48  ;;  %v2879_v50 = vmul.f32 %v6949_v56, %v2847_v47 }
 0x9bc   : > { %3497 = vmatprep.mubr.f32.mxu1 %v3227_v16  ;;  %v3197_v51 = vadd.f32 1.0, %v3165_v41  ;;  %v2654_v25 = vadd.f32 -1.4531521, %v2622_v57  ;;  %v2657_v27 = vadd.f32 -1.4531521, %v2625_v39 }
 0x9bd   : > { %3393 = vmatmul.mubr.f32.gmra.mrb[18].mxu0 %v3224_v31  ;;  %v3226_v17 = vmul.f32 %v3194_v9, %v7800_v38  ;;  %v2716_v46 = vadd.f32 1.4214138, %v2684_v10  ;;  %v2627_v19 = vmul.f32 1.0614054, %v7012_v35  ;;  %v2624_v49 = vmul.f32 1.0614054, %v6968_v20 }
 0x9be   : > { %v3229_v6 = vmul.f32 %v3197_v51, %v7801_v53  ;;  %v3039_v24 = vmul.f32 %v6962_v52, %v2879_v50  ;;  %v2686_v48 = vmul.f32 %v7796_v2, %v2654_v25  ;;  %v2689_v44 = vmul.f32 %v6997_v60, %v2657_v27 }
 0x9bf   : > { %3498 = vmatmul.mubr.f32.gmra.mrb[18].mxu1 %v3226_v17  ;;  %v2748_v56 = vmul.f32 %v7795_v55, %v2716_v46  ;;  %v2659_v11 = vadd.f32 -1.4531521, %v2627_v19  ;;  %v2656_v4 = vadd.f32 -1.4531521, %v2624_v49  ;;  %v2626_v7 = vmul.f32 1.0614054, %v6985_v58 }
 0x9c0   : > { %3397 = vmatprep.mubr.f32.mxu0 %v3229_v6  ;;  %v3071_v13 = vsub.f32 1.0, %v3039_v24  ;;  %v2718_v45 = vadd.f32 1.4214138, %v2686_v48  ;;  %v2721_v18 = vadd.f32 1.4214138, %v2689_v44  ;;  %v7802_v46 = vld [vmem:[#allocation42_spill] sm:$0xff] }
 0x9c1   : > { %v2780_v12 = vadd.f32 -0.28449672, %v2748_v56  ;;  %v2691_v52 = vmul.f32 %v7012_v35, %v2659_v11  ;;  %v2688_v57 = vmul.f32 %v6968_v20, %v2656_v4  ;;  %v2658_v37 = vadd.f32 -1.4531521, %v2626_v7 }
 0x9c2   : > { %v3135_v16 = vsub.f32 0.0, %v3071_v13  ;;  %v2750_v42 = vmul.f32 %v7796_v2, %v2718_v45  ;;  %v2753_v47 = vmul.f32 %v6997_v60, %v2721_v18  ;;  %v2629_v39 = vmul.f32 1.0614054, %v7056_v33  ;;  %v7804_v45 = vld [vmem:[#allocation43_spill] sm:$0xff]  ;;  %v7805_v18 = vld [vmem:[#allocation57_spill] sm:$0xff] }
 0x9c3   : > { %v2812_v23 = vmul.f32 %v7795_v55, %v2780_v12  ;;  %v2723_v62 = vadd.f32 1.4214138, %v2691_v52  ;;  %v2720_v31 = vadd.f32 1.4214138, %v2688_v57  ;;  %v2690_v9 = vmul.f32 %v6985_v58, %v2658_v37  ;;  %v7806_v12 = vld [vmem:[#allocation64_spill] sm:$0xff] }
 0x9c4   : > { %v3167_v41 = vsel %vm3103_vm15, %v3135_v16, %v3071_v13  ;;  %v2782_v10 = vadd.f32 -0.28449672, %v2750_v42  ;;  %v2785_v51 = vadd.f32 -0.28449672, %v2753_v47  ;;  %v2661_v50 = vadd.f32 -1.4531521, %v2629_v39  ;;  %v7266_v16 = vpop.eup %4973 }
 0x9c5   : > { %v3199_v25 = vadd.f32 1.0, %v3167_v41  ;;  %v2844_v27 = vadd.f32 0.2548296, %v2812_v23  ;;  %v2755_v38 = vmul.f32 %v7012_v35, %v2723_v62  ;;  %v2752_v17 = vmul.f32 %v6968_v20, %v2720_v31 }
 0x9c6   : > { %vm3100_vm0 = vcmp.lt.f32.partialorder %v7802_v46, 0.0  ;;  %v2814_v19 = vmul.f32 %v7796_v2, %v2782_v10  ;;  %v2817_v49 = vmul.f32 %v6997_v60, %v2785_v51  ;;  %v2722_v53 = vadd.f32 1.4214138, %v2690_v9  ;;  %v7807_v10 = vld [vmem:[#allocation51_spill] sm:$0xff] }
 0x9c7   : > { %v2693_v6 = vmul.f32 %v7056_v33, %v2661_v50  ;;  %v3231_v24 = vmul.f32 %v3199_v25, %v7803_v54  ;;  %v2876_v48 = vmul.f32 %v7795_v55, %v2844_v27  ;;  %v2787_v44 = vadd.f32 -0.28449672, %v2755_v38  ;;  %v7808_v51 = vld [vmem:[#allocation59_spill] sm:$0xff] }
 0x9c8   : > { %v2784_v56 = vadd.f32 -0.28449672, %v2752_v17  ;;  %v2846_v11 = vadd.f32 0.2548296, %v2814_v19  ;;  %v2849_v4 = vadd.f32 0.2548296, %v2817_v49  ;;  %v2754_v7 = vmul.f32 %v6985_v58, %v2722_v53 }
 0x9c9   : > { %v2725_v13 = vadd.f32 1.4214138, %v2693_v6  ;;  %vm3102_vm1 = vcmp.lt.f32.partialorder %v7804_v45, 0.0  ;;  %vm3105_vm2 = vcmp.lt.f32.partialorder %v7805_v18, 0.0  ;;  %3502 = vmatprep.mubr.f32.mxu1 %v3231_v24  ;;  %v3036_v52 = vmul.f32 %v7806_v12, %v2876_v48  ;;  %v7809_v50 = vld [vmem:[#allocation67_spill] sm:$0xff]  ;;  %v7810_v24 = vld [vmem:[#allocation53_spill] sm:$0xff] }
 0x9ca   : > { %v2819_v57 = vmul.f32 %v7012_v35, %v2787_v44  ;;  %v2816_v37 = vmul.f32 %v6968_v20, %v2784_v56  ;;  %v2631_v55 = vmul.f32 1.0614054, %v7069_v29  ;;  %v2878_v42 = vmul.f32 %v7796_v2, %v2846_v11 }
 0x9cb   : > { %v2881_v47 = vmul.f32 %v6997_v60, %v2849_v4  ;;  %v2786_v39 = vadd.f32 -0.28449672, %v2754_v7  ;;  %v2757_v23 = vmul.f32 %v7056_v33, %v2725_v13  ;;  %v7272_v62 = vadd.f32 1.0, %v7136_v61 }
 0x9cc   : > { %v3068_v31 = vsub.f32 1.0, %v3036_v52  ;;  %v2851_v9 = vadd.f32 0.2548296, %v2819_v57  ;;  %v2848_v41 = vadd.f32 0.2548296, %v2816_v37  ;;  %vm3104_vm3 = vcmp.lt.f32.partialorder %v7807_v10, 0.0 }
 0x9cd   : > { %vm3107_vm4 = vcmp.lt.f32.partialorder %v7808_v51, 0.0  ;;  %v3038_v25 = vmul.f32 %v7809_v50, %v2878_v42  ;;  %v3041_v27 = vmul.f32 %v7003_v28, %v2881_v47  ;;  %v2818_v2 = vmul.f32 %v6985_v58, %v2786_v39  ;;  %v7811_v57 = vld [vmem:[#allocation50_spill] sm:$0xff]  ;;  %v7814_v51 = vld [vmem:[#allocation61_spill] sm:$0xff] }
 0x9ce   : > { %v2789_v60 = vadd.f32 -0.28449672, %v2757_v23  ;;  %v3132_v38 = vsub.f32 0.0, %v3068_v31  ;;  %v2883_v17 = vmul.f32 %v7012_v35, %v2851_v9  ;;  %v2880_v61 = vmul.f32 %v6968_v20, %v2848_v41  ;;  %v7813_v41 = vld [vmem:[#allocation52_spill] sm:$0xff] }
 0x9cf   : > { %v2663_v19 = vadd.f32 -1.4531521, %v2631_v55  ;;  %v3070_v49 = vsub.f32 1.0, %v3038_v25  ;;  %v3073_v53 = vsub.f32 1.0, %v3041_v27  ;;  %v2850_v6 = vadd.f32 0.2548296, %v2818_v2 }
 0x9d0   : > { %v2821_v54 = vmul.f32 %v7056_v33, %v2789_v60  ;;  %vm3106_vm5 = vcmp.lt.f32.partialorder %v7810_v24, 0.0  ;;  %v3164_v48 = vsel %vm3100_vm0, %v3132_v38, %v3068_v31  ;;  %v3043_v28 = vmul.f32 %v7020_v3, %v2883_v17  ;;  %v7812_v55 = vld [vmem:[#allocation65_spill] sm:$0xff] }
 0x9d1   : > { %v3040_v44 = vmul.f32 %v6980_v63, %v2880_v61  ;;  %v2695_v56 = vmul.f32 %v7069_v29, %v2663_v19  ;;  %v3196_v35 = vadd.f32 1.0, %v3164_v48  ;;  %v3134_v11 = vsub.f32 0.0, %v3070_v49 }
 0x9d2   : > { %v3137_v20 = vsub.f32 0.0, %v3073_v53  ;;  %v2882_v4 = vmul.f32 %v6985_v58, %v2850_v6  ;;  %v3075_v7 = vsub.f32 1.0, %v3043_v28  ;;  %v2853_v12 = vadd.f32 0.2548296, %v2821_v54  ;;  %v7815_v28 = vld [vmem:[#allocation72_spill] sm:$0xff] }
 0x9d3   : > { %v3072_v13 = vsub.f32 1.0, %v3040_v44  ;;  %v2727_v52 = vadd.f32 1.4214138, %v2695_v56  ;;  %v3228_v37 = vmul.f32 %v3196_v35, %v7811_v57  ;;  %v3166_v46 = vsel %vm3102_vm1, %v3134_v11, %v3070_v49  ;;  %v7816_v11 = vld [vmem:[#allocation68_spill] sm:$0xff] }
 0x9d4   : > { %v3169_v3 = vsel %vm3105_vm2, %v3137_v20, %v3073_v53  ;;  %v3042_v63 = vmul.f32 %v6990_v1, %v2882_v4  ;;  %vm3109_vm6 = vcmp.lt.f32.partialorder %v7812_v55, 0.0  ;;  %v3198_v42 = vadd.f32 1.0, %v3166_v46 }
 0x9d5   : > { %v3201_v47 = vadd.f32 1.0, %v3169_v3  ;;  %v3139_v39 = vsub.f32 0.0, %v3075_v7  ;;  %v3136_v58 = vsub.f32 0.0, %v3072_v13  ;;  %3398 = vmatmul.mubr.f32.gmra.mrb[20].mxu0 %v3228_v37  ;;  %v2885_v31 = vmul.f32 %v7056_v33, %v2853_v12 }
 0x9d6   : > { %v3074_v23 = vsub.f32 1.0, %v3042_v63  ;;  %v2759_v9 = vmul.f32 %v7069_v29, %v2727_v52  ;;  %v2628_v45 = vmul.f32 1.0614054, %v7026_v30  ;;  %v3230_v50 = vmul.f32 %v3198_v42, %v7813_v41 }
 0x9d7   : > { %v3233_v18 = vmul.f32 %v3201_v47, %v6971_v36  ;;  %v3171_v1 = vsel %vm3107_vm4, %v3139_v39, %v3075_v7  ;;  %v3168_v25 = vsel %vm3104_vm3, %v3136_v58, %v3072_v13  ;;  %v3045_v38 = vmul.f32 %v7062_v34, %v2885_v31 }
 0x9d8   : > { %v3203_v27 = vadd.f32 1.0, %v3171_v1  ;;  %v3200_v2 = vadd.f32 1.0, %v3168_v25  ;;  %v3138_v60 = vsub.f32 0.0, %v3074_v23  ;;  %3503 = vmatmul.mubr.f32.gmra.mrb[20].mxu1 %v3230_v50  ;;  %v2791_v33 = vadd.f32 -0.28449672, %v2759_v9  ;;  %v7332_v9 = vpop.eup %4975 }
 0x9d9   : > { %3402 = vmatprep.mubr.f32.mxu0 %v3233_v18  ;;  %v2660_v17 = vadd.f32 -1.4531521, %v2628_v45  ;;  %v2630_v61 = vmul.f32 1.0614054, %v7041_v5  ;;  %v3077_v49 = vsub.f32 1.0, %v3045_v38  ;;  %4977 = vrcp.f32 %v7272_v62 }
 0x9da   : > { %v3235_v36 = vmul.f32 %v3203_v27, %v6983_v14  ;;  %v3232_v19 = vmul.f32 %v3200_v2, %v7814_v51  ;;  %v3170_v10 = vsel %vm3106_vm5, %v3138_v60, %v3074_v23  ;;  %v2823_v6 = vmul.f32 %v7069_v29, %v2791_v33 }
 0x9db   : > { %v3202_v53 = vadd.f32 1.0, %v3170_v10  ;;  %v2692_v34 = vmul.f32 %v7026_v30, %v2660_v17  ;;  %v2662_v26 = vadd.f32 -1.4531521, %v2630_v61  ;;  %v3141_v54 = vsub.f32 0.0, %v3077_v49  ;;  %v7817_v17 = vld [vmem:[#allocation60_spill] sm:$0xff] }
 0x9dc   : > { %3507 = vmatprep.mubr.f32.mxu1 %v3235_v36  ;;  %3403 = vmatmul.mubr.f32.gmra.mrb[22].mxu0 %v3232_v19  ;;  %v2633_v48 = vmul.f32 1.0614054, %v7111_v8  ;;  %v2635_v14 = vmul.f32 1.0614054, %v7119_v40  ;;  %v2855_v24 = vadd.f32 0.2548296, %v2823_v6 }
 0x9dd   : > { %v3234_v44 = vmul.f32 %v3202_v53, %v7815_v28  ;;  %v2724_v56 = vadd.f32 1.4214138, %v2692_v34  ;;  %v2694_v35 = vmul.f32 %v7041_v5, %v2662_v26  ;;  %vm3111_vm7 = vcmp.lt.f32.partialorder %v7816_v11, 0.0  ;;  %v7818_v34 = vld [vmem:[#allocation63_spill] sm:$0xff]  ;;  %v7820_v11 = vld [vmem:[#allocation81_spill] sm:$0xff] }
 0x9de   : > { %v3173_v20 = vsel %vm3109_vm6, %v3141_v54, %v3077_v49  ;;  %v2665_v4 = vadd.f32 -1.4531521, %v2633_v48  ;;  %v2667_v62 = vadd.f32 -1.4531521, %v2635_v14  ;;  %v2632_v7 = vmul.f32 1.0614054, %v7083_v59 }
 0x9df   : > { %3508 = vmatmul.mubr.f32.gmra.mrb[22].mxu1 %v3234_v44  ;;  %v3205_v13 = vadd.f32 1.0, %v3173_v20  ;;  %v2887_v12 = vmul.f32 %v7069_v29, %v2855_v24  ;;  %v2756_v52 = vmul.f32 %v7026_v30, %v2724_v56  ;;  %v2726_v57 = vadd.f32 1.4214138, %v2694_v35  ;;  %v7819_v28 = vld [vmem:[#allocation83_spill] sm:$0xff] }
 0x9e0   : > { %v2697_v37 = vmul.f32 %v7111_v8, %v2665_v4  ;;  %v2699_v46 = vmul.f32 %v7119_v40, %v2667_v62  ;;  %v2664_v3 = vadd.f32 -1.4531521, %v2632_v7  ;;  %v2634_v63 = vmul.f32 1.0614054, %v7086_v21  ;;  %v7821_v7 = vld [vmem:[#allocation73_spill] sm:$0xff] }
 0x9e1   : > { %v3237_v55 = vmul.f32 %v3205_v13, %v7023_v22  ;;  %v3047_v42 = vmul.f32 %v7074_v32, %v2887_v12  ;;  %v2788_v47 = vadd.f32 -0.28449672, %v2756_v52  ;;  %v2758_v39 = vmul.f32 %v7041_v5, %v2726_v57  ;;  %v7822_v13 = vld [vmem:[#allocation74_spill] sm:$0xff] }
 0x9e2   : > { %v2729_v58 = vadd.f32 1.4214138, %v2697_v37  ;;  %v2731_v23 = vadd.f32 1.4214138, %v2699_v46  ;;  %v2696_v29 = vmul.f32 %v7083_v59, %v2664_v3  ;;  %v2666_v31 = vadd.f32 -1.4531521, %v2634_v63 }
 0x9e3   : > { %3407 = vmatprep.mubr.f32.mxu0 %v3237_v55  ;;  %v3079_v45 = vsub.f32 1.0, %v3047_v42  ;;  %v2820_v41 = vmul.f32 %v7026_v30, %v2788_v47  ;;  %v2790_v50 = vadd.f32 -0.28449672, %v2758_v39  ;;  %v2637_v18 = vmul.f32 1.0614054, %v7148_v15  ;;  %v7340_v33 = vpop.eup %4977  ;;  %v7823_v52 = vld [vmem:[#allocation86_spill] sm:$0xff] }
 0x9e4   : > { %v2761_v22 = vmul.f32 %v7111_v8, %v2729_v58  ;;  %v2763_v32 = vmul.f32 %v7119_v40, %v2731_v23  ;;  %v2728_v1 = vadd.f32 1.4214138, %v2696_v29  ;;  %v2698_v25 = vmul.f32 %v7086_v21, %v2666_v31  ;;  %v7824_v23 = vld [vmem:[#allocation69_spill] sm:$0xff]  ;;  %v7825_v29 = vld [vmem:[#allocation102_spill] sm:$0xff] }
 0x9e5   : > { %v3143_v27 = vsub.f32 0.0, %v3079_v45  ;;  %v2852_v2 = vadd.f32 0.2548296, %v2820_v41  ;;  %v2822_v60 = vmul.f32 %v7041_v5, %v2790_v50  ;;  %v2669_v38 = vadd.f32 -1.4531521, %v2637_v18 }
 0x9e6   : > { %vm3108_vm8 = vcmp.lt.f32.partialorder %v7817_v17, 0.0  ;;  %v2793_v61 = vadd.f32 -0.28449672, %v2761_v22  ;;  %v2795_v36 = vadd.f32 -0.28449672, %v2763_v32  ;;  %v2760_v51 = vmul.f32 %v7083_v59, %v2728_v1  ;;  %v7827_v1 = vld [vmem:[#allocation71_spill] sm:$0xff] }
 0x9e7   : > { %v2730_v19 = vadd.f32 1.4214138, %v2698_v25  ;;  %v3175_v10 = vsel %vm3111_vm7, %v3143_v27, %v3079_v45  ;;  %v2884_v49 = vmul.f32 %v7026_v30, %v2852_v2  ;;  %v2854_v53 = vadd.f32 0.2548296, %v2822_v60  ;;  %v7826_v45 = vld [vmem:[#allocation103_spill] sm:$0xff] }
 0x9e8   : > { %v2701_v6 = vmul.f32 %v7148_v15, %v2669_v38  ;;  %vm3110_vm9 = vcmp.lt.f32.partialorder %v7818_v34, 0.0  ;;  %v3207_v26 = vadd.f32 1.0, %v3175_v10  ;;  %v2825_v54 = vmul.f32 %v7111_v8, %v2793_v61  ;;  %v7828_v60 = vld [vmem:[#allocation95_spill] sm:$0xff]  ;;  %v7832_v34 = vld [vmem:[#allocation80_spill] sm:$0xff] }
 0x9e9   : > { %v2827_v48 = vmul.f32 %v7119_v40, %v2795_v36  ;;  %v2792_v14 = vadd.f32 -0.28449672, %v2760_v51  ;;  %v3044_v44 = vmul.f32 %v7819_v28, %v2884_v49  ;;  %v2886_v24 = vmul.f32 %v7041_v5, %v2854_v53  ;;  %v7829_v51 = vld [vmem:[#allocation77_spill] sm:$0xff] }
 0x9ea   : > { %v2762_v56 = vmul.f32 %v7086_v21, %v2730_v19  ;;  %v2733_v35 = vadd.f32 1.4214138, %v2701_v6  ;;  %v3239_v30 = vmul.f32 %v3207_v26, %v7820_v11  ;;  %v2857_v20 = vadd.f32 0.2548296, %v2825_v54  ;;  %v7830_v6 = vld [vmem:[#allocation84_spill] sm:$0xff]  ;;  %v7831_v54 = vld [vmem:[#allocation98_spill] sm:$0xff] }
 0x9eb   : > { %v2859_v4 = vadd.f32 0.2548296, %v2827_v48  ;;  %v2824_v62 = vmul.f32 %v7083_v59, %v2792_v14  ;;  %vm3113_vm10 = vcmp.lt.f32.partialorder %v7821_v7, 0.0  ;;  %vm3115_vm11 = vcmp.lt.f32.partialorder %v7822_v13, 0.0 }
 0x9ec   : > { %v3076_v12 = vsub.f32 1.0, %v3044_v44  ;;  %v3046_v57 = vmul.f32 %v7823_v52, %v2886_v24  ;;  %v2794_v37 = vadd.f32 -0.28449672, %v2762_v56  ;;  %v2765_v46 = vmul.f32 %v7148_v15, %v2733_v35  ;;  %3512 = vmatprep.mubr.f32.mxu1 %v3239_v30  ;;  %v7833_v56 = vld [vmem:[#allocation106_spill] sm:$0xff] }
 0x9ed   : > { %v2889_v5 = vmul.f32 %v7111_v8, %v2857_v20  ;;  %v2891_v3 = vmul.f32 %v7119_v40, %v2859_v4  ;;  %v2856_v63 = vadd.f32 0.2548296, %v2824_v62  ;;  %v2639_v55 = vmul.f32 1.0614054, %v7159_v0  ;;  %v7834_v62 = vld [vmem:[#allocation111_spill] sm:$0xff] }
 0x9ee   : > { %v3140_v42 = vsub.f32 0.0, %v3076_v12  ;;  %v3078_v47 = vsub.f32 1.0, %v3046_v57  ;;  %v2826_v39 = vmul.f32 %v7086_v21, %v2794_v37  ;;  %v2797_v58 = vadd.f32 -0.28449672, %v2765_v46  ;;  %v7835_v57 = vld [vmem:[#allocation107_spill] sm:$0xff] }
 0x9ef   : > { %vm3112_vm12 = vcmp.lt.f32.partialorder %v7824_v23, 0.0  ;;  %v3049_v31 = vmul.f32 %v7825_v29, %v2889_v5  ;;  %v3051_v41 = vmul.f32 %v7826_v45, %v2891_v3  ;;  %v2888_v50 = vmul.f32 %v7083_v59, %v2856_v63  ;;  %v7836_v46 = vld [vmem:[#allocation87_spill] sm:$0xff]  ;;  %v7837_v5 = vld [vmem:[#allocation93_spill] sm:$0xff] }
 0x9f0   : > { %v2671_v18 = vadd.f32 -1.4531521, %v2639_v55  ;;  %v3172_v40 = vsel %vm3108_vm8, %v3140_v42, %v3076_v12  ;;  %v3142_v8 = vsub.f32 0.0, %v3078_v47  ;;  %v2858_v22 = vadd.f32 0.2548296, %v2826_v39 }
 0x9f1   : > { %v2829_v32 = vmul.f32 %v7148_v15, %v2797_v58  ;;  %vm3114_vm13 = vcmp.lt.f32.partialorder %v7827_v1, 0.0  ;;  %v3204_v25 = vadd.f32 1.0, %v3172_v40  ;;  %v3081_v27 = vsub.f32 1.0, %v3049_v31 }
 0x9f2   : > { %v3083_v2 = vsub.f32 1.0, %v3051_v41  ;;  %v3048_v38 = vmul.f32 %v7828_v60, %v2888_v50  ;;  %v3174_v61 = vsel %vm3110_vm9, %v3142_v8, %v3078_v47  ;;  %v2890_v59 = vmul.f32 %v7086_v21, %v2858_v22  ;;  %v7838_v41 = vld [vmem:[#allocation82_spill] sm:$0xff] }
 0x9f3   : > { %v2861_v36 = vadd.f32 0.2548296, %v2829_v32  ;;  %v2703_v17 = vmul.f32 %v7159_v0, %v2671_v18  ;;  %v3236_v19 = vmul.f32 %v3204_v25, %v7829_v51  ;;  %v3206_v10 = vadd.f32 1.0, %v3174_v61  ;;  %v7840_v61 = vld [vmem:[#allocation88_spill] sm:$0xff] }
 0x9f4   : > { %v3145_v49 = vsub.f32 0.0, %v3081_v27  ;;  %v3147_v53 = vsub.f32 0.0, %v3083_v2  ;;  %vm3117_vm14 = vcmp.lt.f32.partialorder %v7830_v6, 0.0  ;;  %v3080_v26 = vsub.f32 1.0, %v3048_v38 }
 0x9f5   : > { %v3050_v48 = vmul.f32 %v7831_v54, %v2890_v59  ;;  %v2893_v14 = vmul.f32 %v7148_v15, %v2861_v36  ;;  %v2735_v28 = vadd.f32 1.4214138, %v2703_v17  ;;  %3408 = vmatmul.mubr.f32.gmra.mrb[24].mxu0 %v3236_v19  ;;  %v3238_v44 = vmul.f32 %v3206_v10, %v7832_v34  ;;  %v7843_v34 = vld [vmem:[#allocation35_spill] sm:$0xff] }
 0x9f6   : > { %v3177_v21 = vsel %vm3113_vm10, %v3145_v49, %v3081_v27  ;;  %v3179_v24 = vsel %vm3115_vm11, %v3147_v53, %v3083_v2  ;;  %v2636_v35 = vmul.f32 1.0614054, %v7833_v56  ;;  %v3144_v20 = vsub.f32 0.0, %v3080_v26  ;;  %v7839_v27 = vld [vmem:[#allocation85_spill] sm:$0xff]  ;;  %v7841_v53 = vld [vmem:[#allocation40_spill] sm:$0xff] }
 0x9f7   : > { %v3209_v11 = vadd.f32 1.0, %v3177_v21  ;;  %v3211_v30 = vadd.f32 1.0, %v3179_v24  ;;  %v3082_v4 = vsub.f32 1.0, %v3050_v48  ;;  %3513 = vmatmul.mubr.f32.gmra.mrb[24].mxu1 %v3238_v44  ;;  %v3053_v12 = vmul.f32 %v7834_v62, %v2893_v14 }
 0x9f8   : > { %v2767_v15 = vmul.f32 %v7159_v0, %v2735_v28  ;;  %v2668_v52 = vadd.f32 -1.4531521, %v2636_v35  ;;  %v2638_v37 = vmul.f32 1.0614054, %v7835_v57  ;;  %v3176_v13 = vsel %vm3112_vm12, %v3144_v20, %v3080_v26  ;;  %v7842_v26 = vld [vmem:[#allocation96_spill] sm:$0xff] }
 0x9f9   : > { %v3241_v7 = vmul.f32 %v3209_v11, %v7836_v46  ;;  %v3243_v3 = vmul.f32 %v3211_v30, %v7837_v5  ;;  %v3146_v63 = vsub.f32 0.0, %v3082_v4  ;;  %v3208_v55 = vadd.f32 1.0, %v3176_v13  ;;  %v7844_v11 = vld [vmem:[#allocation110_spill] sm:$0xff] }
 0x9fa   : > { %v3085_v42 = vsub.f32 1.0, %v3053_v12  ;;  %v2799_v47 = vadd.f32 -0.28449672, %v2767_v15  ;;  %v2700_v39 = vmul.f32 %v7833_v56, %v2668_v52  ;;  %v2670_v29 = vadd.f32 -1.4531521, %v2638_v37  ;;  %v7845_v52 = vld [vmem:[#allocation104_spill] sm:$0xff] }
 0x9fb   : > { %3412 = vmatprep.mubr.f32.mxu0 %v3241_v7  ;;  %3517 = vmatprep.mubr.f32.mxu1 %v3243_v3  ;;  %v3178_v58 = vsel %vm3114_vm13, %v3146_v63, %v3082_v4  ;;  %v2641_v31 = vmul.f32 1.0614054, %v7266_v16  ;;  %v2643_v45 = vmul.f32 1.0614054, %v7340_v33  ;;  %v3240_v50 = vmul.f32 %v3208_v55, %v7838_v41  ;;  %v7846_v55 = vld [vmem:[#allocation105_spill] sm:$0xff] }
 0x9fc   : > { %v3210_v23 = vadd.f32 1.0, %v3178_v58  ;;  %v3149_v18 = vsub.f32 0.0, %v3085_v42  ;;  %v2831_v40 = vmul.f32 %v7159_v0, %v2799_v47  ;;  %v2732_v8 = vadd.f32 1.4214138, %v2700_v39 }
 0x9fd   : > { %v2702_v22 = vmul.f32 %v7835_v57, %v2670_v29  ;;  %v2673_v32 = vadd.f32 -1.4531521, %v2641_v31  ;;  %v2675_v25 = vadd.f32 -1.4531521, %v2643_v45  ;;  %3413 = vmatmul.mubr.f32.gmra.mrb[26].mxu0 %v3240_v50  ;;  %v2640_v38 = vmul.f32 1.0614054, %v7187_v43 }
 0x9fe   : > { %v3242_v1 = vmul.f32 %v3210_v23, %v7839_v27  ;;  %v3181_v2 = vsel %vm3117_vm14, %v3149_v18, %v3085_v42  ;;  %v2863_v60 = vadd.f32 0.2548296, %v2831_v40  ;;  %vm3119_vm15 = vcmp.lt.f32.partialorder %v7840_v61, 0.0  ;;  %v7847_v50 = vld [vmem:[#allocation108_spill] sm:$0xff] }
 0x9ff   : > { %v3213_v59 = vadd.f32 1.0, %v3181_v2  ;;  %v2764_v36 = vmul.f32 %v7833_v56, %v2732_v8  ;;  %v2734_v17 = vadd.f32 1.4214138, %v2702_v22  ;;  %v2705_v51 = vmul.f32 %v7266_v16, %v2673_v32  ;;  %v7848_v32 = vld [vmem:[#allocation99_spill] sm:$0xff] }
 0xa00   : > { %3518 = vmatmul.mubr.f32.gmra.mrb[26].mxu1 %v3242_v1  ;;  %v2895_v19 = vmul.f32 %v7159_v0, %v2863_v60  ;;  %v2707_v10 = vmul.f32 %v7340_v33, %v2675_v25  ;;  %v2672_v49 = vadd.f32 -1.4531521, %v2640_v38  ;;  %v2642_v6 = vmul.f32 1.0614054, %v7841_v53  ;;  %v7849_v1 = vld [vmem:[#allocation109_spill] sm:$0xff] }
 0xa01   : > { %v3245_v54 = vmul.f32 %v3213_v59, %v7842_v26  ;;  %v2796_v48 = vadd.f32 -0.28449672, %v2764_v36  ;;  %v2766_v14 = vmul.f32 %v7835_v57, %v2734_v17  ;;  %v2737_v28 = vadd.f32 1.4214138, %v2705_v51  ;;  %v7850_v17 = vld [vmem:[#allocation75_spill] sm:$0xff] }
 0xa02   : > { %v3055_v44 = vmul.f32 %v7843_v34, %v2895_v19  ;;  %v2739_v21 = vadd.f32 1.4214138, %v2707_v10  ;;  %v2704_v24 = vmul.f32 %v7187_v43, %v2672_v49  ;;  %v2674_v35 = vadd.f32 -1.4531521, %v2642_v6  ;;  %v7851_v49 = vld [vmem:[#allocation78_spill] sm:$0xff] }
 0xa03   : > { %4979 = vpow2.f32 %v7844_v11  ;;  %3417 = vmatprep.mubr.f32.mxu0 %v3245_v54  ;;  %v2828_v0 = vmul.f32 %v7833_v56, %v2796_v48  ;;  %v2798_v30 = vadd.f32 -0.28449672, %v2766_v14  ;;  %v2769_v20 = vmul.f32 %v7266_v16, %v2737_v28  ;;  %v7852_v48 = vld [vmem:[#allocation79_spill] sm:$0xff]  ;;  %v7853_v11 = vld [vmem:[#allocation76_spill] sm:$0xff] }
 0xa04   : > { %v3087_v4 = vsub.f32 1.0, %v3055_v44  ;;  %v2771_v62 = vmul.f32 %v7340_v33, %v2739_v21  ;;  %v2736_v12 = vadd.f32 1.4214138, %v2704_v24  ;;  %v2706_v15 = vmul.f32 %v7841_v53, %v2674_v35 }
 0xa05   : > { %4981 = vpow2.f32 %v7845_v52  ;;  %v2860_v37 = vadd.f32 0.2548296, %v2828_v0  ;;  %v2830_v46 = vmul.f32 %v7835_v57, %v2798_v30  ;;  %v2801_v7 = vadd.f32 -0.28449672, %v2769_v20  ;;  %v7854_v0 = vld [vmem:[#allocation97_spill] sm:$0xff] }
 0xa06   : > { %v3151_v5 = vsub.f32 0.0, %v3087_v4  ;;  %v2803_v3 = vadd.f32 -0.28449672, %v2771_v62  ;;  %v2768_v13 = vmul.f32 %v7187_v43, %v2736_v12  ;;  %v2738_v63 = vadd.f32 1.4214138, %v2706_v15  ;;  %v7855_v15 = vld [vmem:[#allocation94_spill] sm:$0xff] }
 0xa07   : > { %4983 = vpow2.f32 %v7846_v55  ;;  %v2892_v42 = vmul.f32 %v7833_v56, %v2860_v37  ;;  %v2862_v47 = vadd.f32 0.2548296, %v2830_v46  ;;  %v2833_v39 = vmul.f32 %v7266_v16, %v2801_v7  ;;  %v7856_v37 = vld [vmem:[#allocation101_spill] sm:$0xff]  ;;  %v7858_v55 = vld [vmem:[#allocation100_spill] sm:$0xff] }
 0xa08   : > { %v3183_v58 = vsel %vm3119_vm15, %v3151_v5, %v3087_v4  ;;  %v2835_v29 = vmul.f32 %v7340_v33, %v2803_v3  ;;  %v2800_v31 = vadd.f32 -0.28449672, %v2768_v13  ;;  %v2770_v45 = vmul.f32 %v7841_v53, %v2738_v63  ;;  %v7857_v63 = vld [vmem:[#allocation91_spill] sm:$0xff] }
 0xa09   : > { %v3215_v41 = vadd.f32 1.0, %v3183_v58  ;;  %v3052_v23 = vmul.f32 %v7847_v50, %v2892_v42  ;;  %v2894_v18 = vmul.f32 %v7835_v57, %v2862_v47  ;;  %v2865_v40 = vadd.f32 0.2548296, %v2833_v39 }
 0xa0a   : > { %v2867_v8 = vadd.f32 0.2548296, %v2835_v29  ;;  %v2832_v56 = vmul.f32 %v7187_v43, %v2800_v31  ;;  %v2802_v22 = vadd.f32 -0.28449672, %v2770_v45  ;;  %v2412_v57 = vmul.f32 0.5, %v7850_v17  ;;  %v7859_v31 = vld [vmem:[#allocation89_spill] sm:$0xff] }
 0xa0b   : > { %v3247_v25 = vmul.f32 %v3215_v41, %v7848_v32  ;;  %v3084_v27 = vsub.f32 1.0, %v3052_v23  ;;  %v3054_v2 = vmul.f32 %v7849_v1, %v2894_v18  ;;  %v2897_v60 = vmul.f32 %v7266_v16, %v2865_v40  ;;  %v7860_v18 = vld [vmem:[#allocation92_spill] sm:$0xff] }
 0xa0c   : > { %v2899_v38 = vmul.f32 %v7340_v33, %v2867_v8  ;;  %v2864_v61 = vadd.f32 0.2548296, %v2832_v56  ;;  %v2834_v59 = vmul.f32 %v7841_v53, %v2802_v22  ;;  %vm3116_vm0 = vcmp.lt.f32.partialorder %v7851_v49, 0.0  ;;  %v7861_v56 = vld [vmem:[#allocation90_spill] sm:$0xff]  ;;  %v7863_v49 = vld [vmem:[#allocation27_spill] sm:$0xff] }
 0xa0d   : > { %v4980_v36 = vpop.eup %4979  ;;  %3522 = vmatprep.mubr.f32.mxu1 %v3247_v25  ;;  %v3148_v51 = vsub.f32 0.0, %v3084_v27  ;;  %v3086_v19 = vsub.f32 1.0, %v3054_v2  ;;  %v3057_v10 = vmul.f32 %v7332_v9, %v2897_v60  ;;  %vm3118_vm1 = vcmp.lt.f32.partialorder %v7852_v48, 0.0  ;;  %v7457_v2 = vld [vmem:[%s7862_s25] ss:$0 sm:$0xff] }
 0xa0e   : > { %v3059_v6 = vmul.f32 %v4980_v36, %v2899_v38  ;;  %v2896_v26 = vmul.f32 %v7187_v43, %v2864_v61  ;;  %v2866_v54 = vadd.f32 0.2548296, %v2834_v59  ;;  %v2414_v9 = vmul.f32 0.5, %v7853_v11 }
 0xa0f   : > { %v4982_v16 = vpop.eup %4981  ;;  %v3180_v33 = vsel %vm3116_vm0, %v3148_v51, %v3084_v27  ;;  %v3150_v14 = vsub.f32 0.0, %v3086_v19  ;;  %v3089_v28 = vsub.f32 1.0, %v3057_v10  ;;  %vm3121_vm2 = vcmp.lt.f32.partialorder %v7854_v0, 0.0 }
 0xa10   : > { %v3212_v34 = vadd.f32 1.0, %v3180_v33  ;;  %v3091_v44 = vsub.f32 1.0, %v3059_v6  ;;  %v3056_v21 = vmul.f32 %v4982_v16, %v2896_v26  ;;  %v2898_v24 = vmul.f32 %v7841_v53, %v2866_v54  ;;  %v7864_v33 = vld [vmem:[#allocation28_spill] sm:$0xff] }
 0xa11   : > { %v4984_v35 = vpop.eup %4983  ;;  %v3182_v30 = vsel %vm3118_vm1, %v3150_v14, %v3086_v19  ;;  %v3153_v20 = vsub.f32 0.0, %v3089_v28  ;;  %v2417_v52 = vmul.f32 0.5, %v7855_v15  ;;  %vm3123_vm3 = vcmp.lt.f32.partialorder %v7856_v37, 0.0 }
 0xa12   : > { %v3244_v43 = vmul.f32 %v3212_v34, %v2412_v57  ;;  %v3214_v4 = vadd.f32 1.0, %v3182_v30  ;;  %v3155_v62 = vsub.f32 0.0, %v3091_v44  ;;  %v3088_v12 = vsub.f32 1.0, %v3056_v21 }
 0xa13   : > { %v3185_v46 = vsel %vm3121_vm2, %v3153_v20, %v3089_v28  ;;  %v3058_v7 = vmul.f32 %v4984_v35, %v2898_v24  ;;  %vm3120_vm4 = vcmp.lt.f32.partialorder %v7857_v63, 0.0  ;;  %v2419_v42 = vmul.f32 0.5, %v7858_v55 }
 0xa14   : > { %3418 = vmatmul.mubr.f32.gmra.mrb[28].mxu0 %v3244_v43  ;;  %v3246_v5 = vmul.f32 %v3214_v4, %v2414_v9  ;;  %v3217_v53 = vadd.f32 1.0, %v3185_v46  ;;  %v3187_v3 = vsel %vm3123_vm3, %v3155_v62, %v3091_v44  ;;  %v3152_v13 = vsub.f32 0.0, %v3088_v12  ;;  %v7865_v43 = vld [vmem:[#allocation29_spill] sm:$0xff]  ;;  %v7866_v46 = vld [vmem:[#allocation30_spill] sm:$0xff] }
 0xa15   : > { %v3219_v47 = vadd.f32 1.0, %v3187_v3  ;;  %v3090_v39 = vsub.f32 1.0, %v3058_v7  ;;  %v2416_v45 = vmul.f32 0.5, %v7859_v31  ;;  %vm3122_vm5 = vcmp.lt.f32.partialorder %v7860_v18, 0.0 }
 0xa16   : > { %3523 = vmatmul.mubr.f32.gmra.mrb[28].mxu1 %v3246_v5  ;;  %v3249_v58 = vmul.f32 %v3217_v53, %v2417_v52  ;;  %v3184_v29 = vsel %vm3120_vm4, %v3152_v13, %v3088_v12  ;;  %v2418_v22 = vmul.f32 0.5, %v7861_v56 }
 0xa17   : > { %v3251_v41 = vmul.f32 %v3219_v47, %v2419_v42  ;;  %v3216_v50 = vadd.f32 1.0, %v3184_v29  ;;  %v3154_v23 = vsub.f32 0.0, %v3090_v39 }
 0xa18   : > { %3422 = vmatprep.mubr.f32.mxu0 %v3249_v58 }
 0xa19   : > { %3527 = vmatprep.mubr.f32.mxu1 %v3251_v41  ;;  %v3248_v40 = vmul.f32 %v3216_v50, %v2416_v45  ;;  %v3186_v8 = vsel %vm3122_vm5, %v3154_v23, %v3090_v39  ;;  %v7867_v39 = vld [vmem:[#allocation31_spill] sm:$0xff] }
 0xa1a   : > { %v3218_v32 = vadd.f32 1.0, %v3186_v8  ;;  %v7868_v8 = vld [vmem:[#allocation32_spill] sm:$0xff] }
 0xa1b   : > { %3423 = vmatmul.mubr.f32.gmra.mrb[30].mxu0 %v3248_v40 }
 0xa1c   : > { %v3250_v25 = vmul.f32 %v3218_v32, %v2418_v22 }
 0xa1e   : > { %3528 = vmatmul.mubr.f32.gmra.mrb[30].mxu1 %v3250_v25 }
 0xa8a   : > { %v3972_v27 = vpop.f32.mrb[16].mxu0 }
 0xa8b   : > { %v4028_v1 = vpop.f32.mrb[16].mxu1  ;;  %v3973_v60 = vpop.f32.mrb[17].mxu0 }
 0xa8c   : > { %v3974_v38 = vadd.f32 %v3973_v60, %v3972_v27  ;;  %v4029_v61 = vpop.f32.mrb[17].mxu1 }
 0xa8d   : > { %v4030_v59 = vadd.f32 %v4029_v61, %v4028_v1 }
 0xa8e   : > { %v3390_v36 = vadd.f32 %v3974_v38, %v7457_v2 }
 0xa90   : > { %v3975_v17 = vpop.f32.mrb[18].mxu0  ;;  %v3495_v57 = vadd.f32 %v4030_v59, %v3390_v36  ;;  %v7869_v36 = vld [vmem:[#allocation33_spill] sm:$0xff] }
 0xa91   : > { %v3976_v51 = vpop.f32.mrb[19].mxu0 }
 0xa92   : > { %v4031_v19 = vpop.f32.mrb[18].mxu1  ;;  %v3977_v10 = vadd.f32 %v3976_v51, %v3975_v17  ;;  %v3533_v6 = vadd.f32 %v3495_v57, %v7863_v49 }
 0xa93   : > { %v4032_v26 = vpop.f32.mrb[19].mxu1 }
 0xa94   : > { %v3395_v54 = vadd.f32 %v3977_v10, %v7457_v2  ;;  %v4033_v16 = vadd.f32 %v4032_v26, %v4031_v19  ;;  %3541 = vst [vmem:[%s5541_s22] sm:$0xff] %v3533_v6 }
 0xa96   : > { %v3500_v48 = vadd.f32 %v4033_v16, %v3395_v54  ;;  %v7870_v54 = vld [vmem:[#allocation34_spill] sm:$0xff] }
 0xa98   : > { %v3534_v14 = vadd.f32 %v3500_v48, %v7864_v33 }
 0xa9a   : > { %3542 = vst [vmem:[%s5541_s22 + $0x8] sm:$0xff] %v3534_v14 }
 0xaa8   : > { %v3978_v28 = vpop.f32.mrb[20].mxu0 }
 0xaa9   : > { %v3979_v34 = vpop.f32.mrb[21].mxu0 }
 0xaaa   : > { %v3980_v44 = vadd.f32 %v3979_v34, %v3978_v28 }
 0xaab   : > { %v4034_v21 = vpop.f32.mrb[20].mxu1 }
 0xaac   : > { %v3400_v24 = vadd.f32 %v3980_v44, %v7457_v2  ;;  %v4035_v35 = vpop.f32.mrb[21].mxu1 }
 0xaad   : > { %v4036_v11 = vadd.f32 %v4035_v35, %v4034_v21 }
 0xaaf   : > { %v3981_v9 = vpop.f32.mrb[22].mxu0  ;;  %v3505_v0 = vadd.f32 %v4036_v11, %v3400_v24 }
 0xab0   : > { %v3982_v30 = vpop.f32.mrb[23].mxu0 }
 0xab1   : > { %v3983_v20 = vadd.f32 %v3982_v30, %v3981_v9  ;;  %v3535_v4 = vadd.f32 %v3505_v0, %v7865_v43 }
 0xab2   : > { %v4037_v62 = vpop.f32.mrb[22].mxu1 }
 0xab3   : > { %v3405_v12 = vadd.f32 %v3983_v20, %v7457_v2  ;;  %v4038_v15 = vpop.f32.mrb[23].mxu1  ;;  %3543 = vst [vmem:[%s5541_s22 + $0x10] sm:$0xff] %v3535_v4 }
 0xab4   : > { %v4039_v52 = vadd.f32 %v4038_v15, %v4037_v62 }
 0xab6   : > { %v3510_v37 = vadd.f32 %v4039_v52, %v3405_v12 }
 0xab8   : > { %v3536_v7 = vadd.f32 %v3510_v37, %v7866_v46 }
 0xaba   : > { %3544 = vst [vmem:[%s5541_s22 + $0x18] sm:$0xff] %v3536_v7 }
 0xac8   : > { %v3984_v5 = vpop.f32.mrb[24].mxu0 }
 0xac9   : > { %v3985_v53 = vpop.f32.mrb[25].mxu0 }
 0xaca   : > { %v4040_v3 = vpop.f32.mrb[24].mxu1  ;;  %v3986_v13 = vadd.f32 %v3985_v53, %v3984_v5 }
 0xacb   : > { %v4041_v63 = vpop.f32.mrb[25].mxu1 }
 0xacc   : > { %v3410_v55 = vadd.f32 %v3986_v13, %v7457_v2  ;;  %v4042_v42 = vadd.f32 %v4041_v63, %v4040_v3 }
 0xace   : > { %v3515_v47 = vadd.f32 %v4042_v42, %v3410_v55 }
 0xad0   : > { %v3537_v58 = vadd.f32 %v3515_v47, %v7867_v39  ;;  %v3987_v29 = vpop.f32.mrb[26].mxu0 }
 0xad1   : > { %v3988_v31 = vpop.f32.mrb[27].mxu0 }
 0xad2   : > { %3545 = vst [vmem:[%s5541_s22 + $0x20] sm:$0xff] %v3537_v58  ;;  %v3989_v41 = vadd.f32 %v3988_v31, %v3987_v29 }
 0xad3   : > { %v4043_v45 = vpop.f32.mrb[26].mxu1 }
 0xad4   : > { %v4044_v50 = vpop.f32.mrb[27].mxu1  ;;  %v3415_v23 = vadd.f32 %v3989_v41, %v7457_v2 }
 0xad5   : > { %v4045_v18 = vadd.f32 %v4044_v50, %v4043_v45 }
 0xad7   : > { %v3520_v40 = vadd.f32 %v4045_v18, %v3415_v23 }
 0xad9   : > { %v3538_v56 = vadd.f32 %v3520_v40, %v7868_v8 }
 0xadb   : > { %3546 = vst [vmem:[%s5541_s22 + $0x28] sm:$0xff] %v3538_v56 }
 0xae7   : > { %v3990_v22 = vpop.f32.mrb[28].mxu0 }
 0xae8   : > { %v3991_v32 = vpop.f32.mrb[29].mxu0 }
 0xae9   : > { %v4046_v25 = vpop.f32.mrb[28].mxu1  ;;  %v3992_v27 = vadd.f32 %v3991_v32, %v3990_v22 }
 0xaea   : > { %v4047_v1 = vpop.f32.mrb[29].mxu1 }
 0xaeb   : > { %v3420_v60 = vadd.f32 %v3992_v27, %v7457_v2  ;;  %v4048_v38 = vadd.f32 %v4047_v1, %v4046_v25 }
 0xaed   : > { %v3525_v61 = vadd.f32 %v4048_v38, %v3420_v60 }
 0xaee   : > { %v3993_v59 = vpop.f32.mrb[30].mxu0 }
 0xaef   : > { %v3539_v17 = vadd.f32 %v3525_v61, %v7869_v36  ;;  %v3994_v57 = vpop.f32.mrb[31].mxu0 }
 0xaf0   : > { %v3995_v51 = vadd.f32 %v3994_v57, %v3993_v59 }
 0xaf1   : > { %3547 = vst [vmem:[%s5541_s22 + $0x30] sm:$0xff] %v3539_v17  ;;  %v4049_v19 = vpop.f32.mrb[30].mxu1 }
 0xaf2   : > { %v3425_v10 = vadd.f32 %v3995_v51, %v7457_v2  ;;  %v4050_v49 = vpop.f32.mrb[31].mxu1 }
 0xaf3   : > { %v4051_v6 = vadd.f32 %v4050_v49, %v4049_v19 }
 0xaf5   : > { %v3530_v26 = vadd.f32 %v4051_v6, %v3425_v10 }
 0xaf7   : > { %v3540_v16 = vadd.f32 %v3530_v26, %v7870_v54 }
 0xaf9   : > { %3548 = vst [vmem:[%s5541_s22 + $0x38] sm:$0xff] %v3540_v16 }
 0xafa PF: > { %s7871_s17 = sld [smem:[#allocation22_spill]]  ;;  %s3820_s20 = sshll.u32 %s5187_s18, 4 }
 0xafb   : > { %s3562_s28 = sadd.s32 %s3820_s20, %s5490_s10  ;;  %s3565_s16 = sshll.u32 %s5541_s22, 4  ;;  %s7486_s16 = int_to_ptr.vmem [resolvable:$true] %s3565_s16 }
 0xafc   : > { %s3821_s14 = sshll.u32 %s3562_s28, 7  ;;  %s7872_s15 = sld [smem:[#allocation116_spill]] }
 0xafd   : > { %s7495_s23 = scalar_lea.sflag [#allocation8], %s546_s29  ;;  %s5041_s11 = scalar_lea.vmem %s7486_s16, 1024 }
 0xafe   : > { %p5042_p9 = scmp.ne.s32.totalorder %s7486_s16, %s5041_s11  ;;  %s5258_s18 = smov [#allocation11]  }
 0xaff   : > { %s5045_s10 = sshll.u32 %s5258_s18, 4  ;;  %s5046_s10 = int_to_ptr.vmem [resolvable:$false] %s5045_s10 }
 0xb00   : > { %p7874_p10 = scmp.ne.s32.totalorder %s7871_s17, 0  ;;  %s5047_s22 = scalar_lea.vmem %s5046_s10, 2048 }
 0xb01   : > { %p5048_p6 = scmp.lt.s32.totalorder %s7486_s16, %s5046_s10  ;;  %p5049_p8 = scmp.lt.s32.totalorder %s5047_s22, %s5041_s11 }
 0xb02   : > { %s7873_s13 = smov %s7872_s15  ;;  %s7491_s24 = scalar_lea.hbm %s7872_s15, %s3821_s14 }
 0xb03   : > { %p5043_p13 = pnand %p5042_p9, %p7874_p10  ;;  %p5050_p1 = por %p5049_p8, %p5048_p6 }
 0xb05   : > { %p5044_p0 = pneg %p5043_p13 }
 0xb07   : > { %p5051_p3 = pnand %p5050_p1, %p5044_p0 }
 0xb09   : > { %5054 = shalt.err (!%p5051_p3)
}
 0xb0a   : > { %s5055_s29 = scalar_lea.hbm %s7491_s24, 1024  ;;  %s5059_s20 = scalar_lea.hbm %s7873_s13, 4096 }
 0xb0b   : > { %p5056_p11 = scmp.ne.s32.totalorder %s7491_s24, %s5055_s29  ;;  %p5060_p4 = scmp.lt.u32.totalorder %s7491_s24, %s7873_s13 }
 0xb0c   : > { %p5061_p5 = scmp.lt.u32.totalorder %s5059_s20, %s5055_s29  ;;  %p5063_p9 = scmp.lt.u32.totalorder %s5055_s29, %s7491_s24 }
 0xb0d   : > { %p5057_p12 = pnand %p5056_p11, %p7874_p10 }
 0xb0e   : > { %p5062_p7 = por %p5061_p5, %p5060_p4 }
 0xb0f   : > { %p5058_p2 = pneg %p5057_p12 }
 0xb10   : > { %p5064_p13 = por %p5063_p9, %p5062_p7 }
 0xb12   : > { %p5065_p0 = pnand %p5064_p13, %p5058_p2 }
 0xb14   : > { %5068 = shalt.err (!%p5065_p0)
}
 0xb15   : > { %s5259_s19 = smov 128   ;;  %s5260_s26 = smov 8  }
 0xb16   : > { %4560 = dma.vmem_to_hbm [thread:$0]  (%p7874_p10), %s7486_s16, 1024, %s7491_s24, %s7495_s23, %s5259_s19, %s5259_s19, %s5260_s26  }
 0xb17 PF: > { %s7875_s15 = sld [smem:[#allocation20_spill]]  ;;  %s7876_s11 = sld [smem:[#allocation15_spill]] }
 0xb18   : > { %s7877_s18 = sld [smem:[#allocation24_spill]] }
 0xb1d   : > { %p4577_p6 = scmp.ge.s32.totalorder %s7875_s15, 2  ;;  %s3580_s10 = sand.u32 1, %s7876_s11  }
 0xb1e   : > { %p7878_p8 = scmp.ne.s32.totalorder %s7877_s18, 0  ;;  %s3581_s22 = scalar_lea.sflag [#allocation8], %s3580_s10 }
 0xb20   : > { %p4570_p1 = pnand %p4577_p6, %p7878_p8 }
 0xb22   : > { %5162 = dma.done.wait (!%p4570_p1), %s3581_s22, 1024  }
 0xb23   : > { %5164 = vsyncadd (!%p4570_p1), %s3581_s22, 4294966272  ;;  %s29_s22 = sadd.s32 1, %s7875_s15   ;;  %s7879_s21 = sld [smem:[#allocation16_spill]] }
 0xb24   : > { %p26_p3 = scmp.ge.s32.totalorder %s29_s22, 10   ;;  %s7880_s15 = sld [smem:[#allocation26_spill]] }
 0xb25   : > { %s7881_s16 = sld [smem:[#allocation17_spill]]  ;;  %s7882_s17 = sld [smem:[#allocation18_spill]] }
 0xb26   : > { %s7883_s18 = sld [smem:[#allocation19_spill]]  ;;  %s7884_s19 = sld [smem:[#allocation21_spill]] }
 0xb27   : > { %s7885_s20 = sld [smem:[#allocation23_spill]]  ;;  %s7886_s24 = sld [smem:[#allocation25_spill]] }
 0xb28   : > { %s7887_s29 = smov %s5171_s30  ;;  %28 = sbr.rel (!%p26_p3) target bundleno = 14 (0xe), region = 199 }
 0xb29   : > { %s7888_s30 = smov %s7879_s21 }
 0xb2d   : > { %s7889_s21 = smov %s7886_s24 }
 0xb2f   :  { %3586 = vsyncpa [#allocation7], 1 }
 0xb30   :  { %3588 = vsyncpa [#allocation7 + $0x1], 1 }
 0xb31   :  { %3589 = vsyncpa [#allocation10], 1 }
 0xb32   :  { %3590 = vsyncpa [#allocation8], 1 }
 0xb33   :  { %3592 = vsyncpa [#allocation8 + $0x1], 1 }

// kernel: tpu_custom_call.1
= control target key start
LH: loop header
LB: loop body
LE: loop exit
PB: predicated region body
PF: predicated region fallthrough
CT: control target
= control target key end

     0   :  { %s7553_s0 = inlined_call_operand.vmem [shape: f32[2,128,128], index: 0, kind: input, shape index: {}]   ;;  %s7554_s1 = inlined_call_operand.vmem [shape: f32[2,128,128], index: 1, kind: input, shape index: {}]   ;;  %s7555_s2 = inlined_call_operand.vmem [shape: f32[4,128,32], index: 2, kind: input, shape index: {}]   ;;  %s7556_s3 = inlined_call_operand.hbm [shape: f32[4,1,32], index: 3, kind: input, shape index: {}]   ;;  %s7557_s4 = inlined_call_operand.vmem [shape: f32[4,128,32], index: 4, kind: input, shape index: {}]   ;;  %s7558_s5 = inlined_call_operand.hbm [shape: f32[4,1,32], index: 5, kind: input, shape index: {}]   ;;  %s7559_s6 = inlined_call_operand.vmem [shape: f32[4,128,32], index: 6, kind: input, shape index: {}]   ;;  %s7560_s7 = inlined_call_operand.vmem [shape: f32[4,1,32], index: 7, kind: input, shape index: {}]   ;;  %s7561_s8 = inlined_call_operand.vmem [shape: f32[4,32,128], index: 8, kind: input, shape index: {}]   ;;  %s7562_s9 = inlined_call_operand.vmem [shape: f32[1,128], index: 9, kind: input, shape index: {}]   ;;  %s7563_s10 = inlined_call_operand.vmem [shape: f32[128,512], index: 10, kind: input, shape index: {}]   ;;  %s7564_s11 = inlined_call_operand.vmem [shape: f32[1,512], index: 11, kind: input, shape index: {}]   ;;  %s7565_s12 = inlined_call_operand.vmem [shape: f32[512,128], index: 12, kind: input, shape index: {}]   ;;  %s7566_s13 = inlined_call_operand.vmem [shape: f32[1,128], index: 13, kind: input, shape index: {}]   ;;  %s7567_s14 = inlined_call_operand.hbm [shape: f32[2,128,128], index: 14, kind: output, shape index: {}]  }
   0x1   :  { %7658 = sst [smem:[#allocation112_spill]] %s7563_s10 }
   0x2   :  { %7659 = sst [smem:[#allocation113_spill]] %s7564_s11 }
   0x3   :  { %7660 = sst [smem:[#allocation114_spill]] %s7565_s12 }
   0x4   :  { %7661 = sst [smem:[#allocation115_spill]] %s7566_s13 }
   0x5   :  { %7662 = sst [smem:[#allocation116_spill]] %s7567_s14 }
   0x6   :  { %19 = vsyncpa [#allocation7], 0 }
   0x7   :  { %20 = vsyncpa [#allocation10], 0 }
   0x8   :  { %21 = vsyncpa [#allocation8], 0 }
   0x9   :  { %23 = vsyncpa [#allocation8 + $0x1], 0  ;;  %s5336_s29 = smov 0   ;;  %s5338_s30 = smov 0  }
   0xa   :  { %s5340_s15 = smov 0   ;;  %s5342_s16 = smov 0  }
   0xb   :  { %s5344_s17 = smov 0   ;;  %s5346_s18 = smov 0  }
   0xc   :  { %s5348_s19 = smov 0   ;;  %s5350_s20 = smov 0  }
   0xd   :  { %s5352_s21 = smov 0   ;;  %s5354_s22 = smov 0  }
   0xe LB: > { %7663 = sst [smem:[#allocation15_spill]] %s5167_s29  ;;  %s3757_s23 = sadd.s32 4294967295, %s5203_s22   ;;  %s5203_s22 = sphi %s5354_s22, %s29_s22   ;;  %s5199_s21 = sphi %s5352_s21, %s7889_s21   ;;  %s5195_s20 = sphi %s5350_s20, %s7885_s20   ;;  %s5191_s19 = sphi %s5348_s19, %s7884_s19   ;;  %s5187_s18 = sphi %s5346_s18, %s7883_s18   ;;  %s5183_s17 = sphi %s5344_s17, %s7882_s17   ;;  %s5179_s16 = sphi %s5342_s16, %s7881_s16   ;;  %s5175_s15 = sphi %s5340_s15, %s7880_s15   ;;  %s5171_s30 = sphi %s5338_s30, %s7888_s30   ;;  %s5167_s29 = sphi %s5336_s29, %s7887_s29  }
   0xf   : > { %7664 = sst [smem:[#allocation16_spill]] %s5175_s15  ;;  %s3758_s24 = sadd.s32 4294967294, %s5203_s22  }
  0x10   : > { %7665 = sst [smem:[#allocation17_spill]] %s5191_s19  ;;  %s41_s25 = sadd.s32 1, %s5191_s19 }
  0x11   : > { %7666 = sst [smem:[#allocation18_spill]] %s5195_s20  ;;  %s44_s26 = sadd.s32 1, %s5195_s20 }
  0x12   : > { %7667 = sst [smem:[#allocation19_spill]] %s5199_s21  ;;  %p42_p0 = scmp.ge.s32.totalorder %s41_s25, 2 }
  0x13   : > { %7668 = sst [smem:[#allocation20_spill]] %s5203_s22  ;;  %s48_s27 = sadd.s32 1, %s5199_s21 }
  0x14   : > { %s365_s28 = sadd.s32 1, %s5175_s15  ;;  %p375_p1 = scmp.ne.s32.totalorder %s5175_s15, %s5171_s30 }
  0x15   : > { %s7891_s25 = smov (%p42_p0, %s41_s25), 0  ;;  %s7893_s26 = smov (!%p42_p0, %s44_s26), %s5195_s20 }
  0x16   : > { %7669 = sst [smem:[#allocation21_spill]] %s7891_s25  ;;  %p376_p2 = scmp.eq.s32.totalorder %s3757_s23, 7 }
  0x17   : > { %p381_p3 = scmp.ne.s32.totalorder %s5171_s30, %s5167_s29  ;;  %p46_p4 = scmp.ge.s32.totalorder %s7893_s26, 2 }
  0x18   : > { %p382_p5 = scmp.eq.s32.totalorder %s3758_s24, 7  ;;  %p5399_p6 = por %p376_p2, %p375_p1 }
  0x19   : > { %p3759_p7 = scmp.ge.s32.totalorder %s5203_s22, 1  ;;  %s7895_s26 = smov (%p46_p4, %s7893_s26), 0 }
  0x1a   : > { %s7670_s14 = scalar_select %p5399_p6, 1, 0 }
  0x1b   : > { %7672 = sst [smem:[#allocation23_spill]] %s7895_s26  ;;  %s7897_s27 = smov (!%p46_p4, %s48_s27), %s5199_s21 }
  0x1c   : > { %7671 = sst [smem:[#allocation22_spill]] %s7670_s14  ;;  %s361_s19 = ssub.s32 %s5195_s20, %s7895_s26 }
  0x1d   : > { %p5409_p8 = por %p382_p5, %p381_p3  ;;  %p50_p9 = scmp.ge.s32.totalorder %s7897_s27, 2 }
  0x1e   : > { %p389_p10 = scmp.lt.s32.totalorder %s5203_s22, 9  ;;  %p5414_p11 = scmp.eq.s32.totalorder %s3757_s23, 0 }
  0x1f   : > { %s7673_s13 = scalar_select %p5409_p8, 1, 0 }
  0x20   : > { %s7675_s25 = scalar_select %p5414_p11, 1, 0 }
  0x21   : > { %7674 = sst [smem:[#allocation24_spill]] %s7673_s13  ;;  %s7899_s27 = smov (%p50_p9, %s7897_s27), 0 }
  0x22   : > { %7676 = sst [smem:[#allocation25_spill]] %s7899_s27  ;;  %p5420_p12 = pnand %p3759_p7, %p389_p10 }
  0x23   : > { %s360_s26 = ssub.s32 %s5199_s21, %s7899_s27  ;;  %s5249_s20 = smov [#allocation6]  }
  0x24   : > { %s7677_s24 = scalar_select %p5420_p12, 1, 0 }
  0x25   : > { %s404_s29 = sshll.u32 %s5249_s20, 4  ;;  %s362_s14 = sor.u32 %s361_s19, %s360_s26  ;;  %s405_s29 = int_to_ptr.vmem [resolvable:$true] %s404_s29 }
  0x26   : > { %p4562_p13 = pneg %p5420_p12  ;;  %p363_p0 = scmp.eq.s32.totalorder %s362_s14, 0 }
  0x27   : > { %s4985_s27 = scalar_lea.hbm %s7556_s3, 64 }
  0x28   : > { %p5430_p1 = pnand %p5414_p11, %p4562_p13  ;;  %p4986_p2 = scmp.ne.s32.totalorder %s7556_s3, %s4985_s27 }
  0x29   : > { %s5435_s13 = scalar_select %p363_p0, %s5175_s15, %s365_s28  }
  0x2a   : > { %p4987_p3 = pneg %p5430_p1  ;;  %p4992_p7 = scmp.lt.u32.totalorder %s4985_s27, %s7556_s3 }
  0x2b   : > { %7679 = sst [smem:[#allocation26_spill]] %s5435_s13 }
  0x2c   : > { %p4988_p4 = pnand %p4987_p3, %p4986_p2 }
  0x2e   : > { %p4989_p5 = pneg %p4988_p4 }
  0x30   : > { %p4994_p9 = pnand %p4992_p7, %p4989_p5 }
  0x32   : > { %4997 = shalt.err (!%p4994_p9)
}
  0x33   : > { %s4998_s26 = scalar_lea.vmem %s405_s29, 64  ;;  %p5006_p8 = scmp.lt.s32.totalorder %s405_s29, %s405_s29 }
  0x34   : > { %p4999_p10 = scmp.ne.s32.totalorder %s405_s29, %s4998_s26  ;;  %p5007_p6 = scmp.lt.s32.totalorder %s4998_s26, %s4998_s26 }
  0x36   : > { %p5001_p13 = pnand %p4999_p10, %p4987_p3  ;;  %p5008_p11 = por %p5007_p6, %p5006_p8 }
  0x38   : > { %p5002_p0 = pneg %p5001_p13 }
  0x3a   : > { %p5009_p12 = pnand %p5008_p11, %p5002_p0 }
  0x3c   : > { %5012 = shalt.err (!%p5009_p12)
}
  0x3d   : > { %s5250_s11 = smov 16   ;;  %s5251_s21 = smov 1  }
  0x3e   : > { %4565 = dma.hbm_to_vmem [thread:$0]  (!%p5430_p1), %s7556_s3, 64, %s405_s29, [#allocation7], %s5250_s11, %s5250_s11, %s5251_s21  }
  0x3f   : > { %s5252_s28 = smov [#allocation9]   ;;  %s5013_s13 = scalar_lea.hbm %s7558_s5, 64 }
  0x40   : > { %s420_s20 = sshll.u32 %s5252_s28, 4  ;;  %p5014_p6 = scmp.ne.s32.totalorder %s7558_s5, %s5013_s13  ;;  %s421_s20 = int_to_ptr.vmem [resolvable:$true] %s420_s20 }
  0x41   : > { %p5020_p12 = scmp.lt.u32.totalorder %s5013_s13, %s7558_s5 }
  0x42   : > { %p5016_p8 = pnand %p5014_p6, %p4987_p3 }
  0x44   : > { %p5017_p11 = pneg %p5016_p8 }
  0x46   : > { %p5022_p2 = pnand %p5020_p12, %p5017_p11 }
  0x48   : > { %5025 = shalt.err (!%p5022_p2)
}
  0x49   : > { %s5026_s29 = scalar_lea.vmem %s421_s20, 64  ;;  %p5034_p9 = scmp.lt.s32.totalorder %s421_s20, %s421_s20 }
  0x4a   : > { %p5027_p4 = scmp.ne.s32.totalorder %s421_s20, %s5026_s29  ;;  %p5035_p10 = scmp.lt.s32.totalorder %s5026_s29, %s5026_s29 }
  0x4c   : > { %p5029_p5 = pnand %p5027_p4, %p4987_p3  ;;  %p5036_p13 = por %p5035_p10, %p5034_p9 }
  0x4e   : > { %p5030_p7 = pneg %p5029_p5 }
  0x50   : > { %p5037_p0 = pnand %p5036_p13, %p5030_p7 }
  0x52   : > { %5040 = shalt.err (!%p5037_p0)
}
  0x53   : > { %4568 = dma.hbm_to_vmem [thread:$0]  (!%p5430_p1), %s7558_s5, 64, %s421_s20, [#allocation10], %s5250_s11, %s5250_s11, %s5251_s21  }
  0x54   : > { %p7680_p6 = scmp.ne.s32.totalorder %s7677_s24, 0 }
  0x55   : > { %p7681_p8 = scmp.ne.s32.totalorder (!%p7680_p6), %s7675_s25, 0 }
  0x56   : > { %486 = sbr.rel (%p7680_p6) target bundleno = 2839 (0xb17), region = 76 }
  0x5d   : > { %5154 = dma.done.wait (%p7681_p8), [#allocation7], 64  }
  0x5e   : > { %5156 = vsyncadd (%p7681_p8), [#allocation7], 4294967232 }
  0x5f   : > { %5158 = dma.done.wait (%p7681_p8), [#allocation10], 64  }
  0x60   : > { %5160 = vsyncadd (%p7681_p8), [#allocation10], 4294967232  ;;  %s5490_s10 = sshll.u32 %s5183_s17, 3  ;;  %p550_p1 = scmp.lt.s32.totalorder %s5187_s18, 1 }
  0x61   : > { %p552_p3 = scmp.lt.s32.totalorder %s5490_s10, 15  ;;  %s3770_s12 = sshll.u32 %s5179_s16, 3 }
  0x62   : > { %s551_s13 = scalar_select %p550_p1, %s5187_s18, 1 }
  0x63   : > { %s553_s24 = scalar_select %p552_p3, %s5490_s10, 15 }
  0x64   : > { %s3768_s23 = sshll.u32 %s551_s13, 4  ;;  %p562_p11 = scmp.lt.s32.totalorder %s3770_s12, 15 }
  0x65   : > { %s555_s11 = sadd.s32 %s3768_s23, %s553_s24  ;;  %s546_s29 = sand.u32 1, %s5171_s30  }
  0x66   : > { %s3769_s21 = sshll.u32 %s555_s11, 3  ;;  %s7901_s12 = smov (!%p562_p11, %s3770_s12), 15 }
  0x67   : > { %s557_s28 = scalar_lea.vmem %s7553_s0, %s3769_s21  ;;  %s565_s17 = sadd.s32 %s3768_s23, %s7901_s12 }
  0x68   : > { %v5500_v0 = vld [vmem:[%s557_s28] sm:$0xff]  ;;  %v5502_v1 = vld [vmem:[%s557_s28 + $0x8] sm:$0xff]  ;;  %v5504_v2 = vld [vmem:[%s557_s28 + $0x10] sm:$0xff]  ;;  %s3772_s20 = sshll.u32 %s565_s17, 3  ;;  %s5522_s15 = sshll.u32 %s546_s29, 6 }
  0x69   : > { %v5506_v3 = vld [vmem:[%s557_s28 + $0x18] sm:$0xff]  ;;  %v5508_v4 = vld [vmem:[%s557_s28 + $0x20] sm:$0xff]  ;;  %v5510_v5 = vld [vmem:[%s557_s28 + $0x28] sm:$0xff]  ;;  %s567_s26 = scalar_lea.vmem %s7554_s1, %s3772_s20  ;;  %s5541_s22 = scalar_lea.vmem [#allocation11], %s5522_s15 }
  0x6a   : > { %v5512_v6 = vld [vmem:[%s557_s28 + $0x30] sm:$0xff]  ;;  %v5514_v7 = vld [vmem:[%s557_s28 + $0x38] sm:$0xff]  ;;  %v578_v9 = vld [vmem:[%s567_s26] sm:$0xff]  ;;  %p3773_p12 = scmp.ne.s32.totalorder %s5179_s16, 0 }
  0x6b   : > { %v580_v8 = vld [vmem:[%s567_s26 + $0x10] sm:$0xff]  ;;  %v581_v10 = vld [vmem:[%s567_s26 + $0x18] sm:$0xff]  ;;  %v586_v12 = vmul.f32 %v578_v9, %v578_v9  ;;  %v579_v13 = vld [vmem:[%s567_s26 + $0x8] sm:$0xff]  ;;  %v738_v56 = vmul.f32 (!%p3773_p12), %v5504_v2, %v5504_v2  ;;  %v736_v57 = vmul.f32 (!%p3773_p12), %v5500_v0, %v5500_v0  ;;  %v739_v58 = vmul.f32 (!%p3773_p12), %v5506_v3, %v5506_v3  ;;  %s5744_s12 = smov (!%p3773_p12), 0  }
  0x6c   : > { %v588_v11 = vmul.f32 %v580_v8, %v580_v8  ;;  %v589_v14 = vmul.f32 %v581_v10, %v581_v10  ;;  %v587_v15 = vmul.f32 %v579_v13, %v579_v13  ;;  %v583_v16 = vld [vmem:[%s567_s26 + $0x28] sm:$0xff]  ;;  %v582_v17 = vld [vmem:[%s567_s26 + $0x20] sm:$0xff]  ;;  %v585_v20 = vld [vmem:[%s567_s26 + $0x38] sm:$0xff]  ;;  %v737_v59 = vmul.f32 (!%p3773_p12), %v5502_v1, %v5502_v1 }
  0x6d   : > { %594 = vadd.xlane.f32.xlu0 %v586_v12  ;;  %v591_v18 = vmul.f32 %v583_v16, %v583_v16  ;;  %v590_v19 = vmul.f32 %v582_v17, %v582_v17  ;;  %v584_v21 = vld [vmem:[%s567_s26 + $0x30] sm:$0xff]  ;;  %v593_v22 = vmul.f32 %v585_v20, %v585_v20  ;;  %v741_v60 = vmul.f32 (!%p3773_p12), %v5510_v5, %v5510_v5 }
  0x6e   : > { %598 = vadd.xlane.f32.xlu1 %v588_v11  ;;  %v592_v23 = vmul.f32 %v584_v21, %v584_v21  ;;  %v740_v61 = vmul.f32 (!%p3773_p12), %v5508_v4, %v5508_v4  ;;  %v743_v62 = vmul.f32 (!%p3773_p12), %v5514_v7, %v5514_v7  ;;  %v742_v63 = vmul.f32 (!%p3773_p12), %v5512_v6, %v5512_v6 }
  0x6f   : > { %vm638_vm0 = vcmask (!%p3773_p12), 7168   ;;  %vm703_vm1 = vcmask (!%p3773_p12), 261120  }
  0x71   : > { %596 = vadd.xlane.f32.xlu0 %v587_v15 }
  0x72   : > { %600 = vadd.xlane.f32.xlu1 %v589_v14 }
  0x75   : > { %602 = vadd.xlane.f32.xlu0 %v590_v19 }
  0x76   : > { %604 = vadd.xlane.f32.xlu1 %v591_v18 }
  0x79   : > { %606 = vadd.xlane.f32.xlu0 %v592_v23 }
  0x7a   : > { %608 = vadd.xlane.f32.xlu1 %v593_v22 }
  0x7d   : > { %744 = vadd.xlane.f32.xlu0 (!%p3773_p12), %v736_v57 }
  0x7e   : > { %748 = vadd.xlane.f32.xlu1 (!%p3773_p12), %v738_v56 }
  0x81   : > { %746 = vadd.xlane.f32.xlu0 (!%p3773_p12), %v737_v59 }
  0x82   : > { %750 = vadd.xlane.f32.xlu1 (!%p3773_p12), %v739_v58 }
  0x85   : > { %752 = vadd.xlane.f32.xlu0 (!%p3773_p12), %v740_v61 }
  0x86   : > { %754 = vadd.xlane.f32.xlu1 (!%p3773_p12), %v741_v60 }
  0x89   : > { %756 = vadd.xlane.f32.xlu0 (!%p3773_p12), %v742_v63 }
  0x8a   : > { %758 = vadd.xlane.f32.xlu1 (!%p3773_p12), %v743_v62 }
  0xfa   : > { %v595_v25 = vpop.xlane.xlu0 %594 }
  0xfb   : > { %v599_v24 = vpop.xlane.xlu1 %598  ;;  %v610_v27 = vmax.f32 %v595_v25, 1e-24 }
  0xfc   : > { %v612_v26 = vmax.f32 %v599_v24, 1e-24 }
  0xfe   : > { %4757 = vrsqrt.f32 %v612_v26  ;;  %v597_v29 = vpop.xlane.xlu0 %596 }
  0xff   : > { %4759 = vrsqrt.f32 %v610_v27  ;;  %v601_v28 = vpop.xlane.xlu1 %600  ;;  %v611_v31 = vmax.f32 %v597_v29, 1e-24 }
 0x100   : > { %v613_v30 = vmax.f32 %v601_v28, 1e-24 }
 0x102   : > { %4761 = vrsqrt.f32 %v613_v30  ;;  %v603_v33 = vpop.xlane.xlu0 %602 }
 0x103   : > { %4763 = vrsqrt.f32 %v611_v31  ;;  %v605_v32 = vpop.xlane.xlu1 %604  ;;  %v614_v35 = vmax.f32 %v603_v33, 1e-24 }
 0x104   : > { %v615_v34 = vmax.f32 %v605_v32, 1e-24 }
 0x106   : > { %4765 = vrsqrt.f32 %v615_v34  ;;  %v607_v37 = vpop.xlane.xlu0 %606 }
 0x107   : > { %4767 = vrsqrt.f32 %v614_v35  ;;  %v609_v36 = vpop.xlane.xlu1 %608  ;;  %v616_v40 = vmax.f32 %v607_v37, 1e-24 }
 0x108   : > { %v4758_v38 = vpop.eup %4757  ;;  %v617_v39 = vmax.f32 %v609_v36, 1e-24 }
 0x109   : > { %v4760_v41 = vpop.eup %4759  ;;  %v5524_v42 = vmul.f32 %v4758_v38, %v580_v8  ;;  %v5253_v8 = vmov (!%p3773_p12), -inf  }
 0x10a   : > { %v5526_v43 = vmul.f32 %v4760_v41, %v578_v9  ;;  %4769 = vrsqrt.f32 %v617_v39  ;;  %639 = vst.msk [vmem:[#allocation3] sm:$0xff] (!%p3773_p12), %vm638_vm0, %v5253_v8  ;;  %640 = vst.msk [vmem:[#allocation3 + $0x8] sm:$0xff] (!%p3773_p12), %vm638_vm0, %v5253_v8  ;;  %v5254_v9 = vmov (!%p3773_p12), 0.0   ;;  %v745_v11 = vpop.xlane.xlu0 (!%p3773_p12), %744 }
 0x10b   : > { %4771 = vrsqrt.f32 %v616_v40  ;;  %641 = vst.msk [vmem:[#allocation3 + $0x10] sm:$0xff] (!%p3773_p12), %vm638_vm0, %v5253_v8  ;;  %642 = vst.msk [vmem:[#allocation3 + $0x18] sm:$0xff] (!%p3773_p12), %vm638_vm0, %v5253_v8 }
 0x10c   : > { %v4762_v44 = vpop.eup %4761  ;;  %643 = vst.msk [vmem:[#allocation3 + $0x20] sm:$0xff] (!%p3773_p12), %vm638_vm0, %v5253_v8  ;;  %644 = vst.msk [vmem:[#allocation3 + $0x28] sm:$0xff] (!%p3773_p12), %vm638_vm0, %v5253_v8 }
 0x10d   : > { %v4764_v45 = vpop.eup %4763  ;;  %v5528_v46 = vmul.f32 %v4762_v44, %v581_v10  ;;  %645 = vst.msk [vmem:[#allocation3 + $0x30] sm:$0xff] (!%p3773_p12), %vm638_vm0, %v5253_v8  ;;  %646 = vst.msk [vmem:[#allocation3 + $0x38] sm:$0xff] (!%p3773_p12), %vm638_vm0, %v5253_v8  ;;  %v749_v10 = vpop.xlane.xlu1 (!%p3773_p12), %748 }
 0x10e   : > { %v5530_v47 = vmul.f32 %v4764_v45, %v579_v13  ;;  %647 = vst.msk [vmem:[#allocation3 + $0x40] sm:$0xff] (!%p3773_p12), %vm638_vm0, %v5253_v8  ;;  %648 = vst.msk [vmem:[#allocation3 + $0x48] sm:$0xff] (!%p3773_p12), %vm638_vm0, %v5253_v8  ;;  %v762_v12 = vmax.f32 (!%p3773_p12), %v749_v10, 1e-24  ;;  %v760_v13 = vmax.f32 (!%p3773_p12), %v745_v11, 1e-24  ;;  %v747_v15 = vpop.xlane.xlu0 (!%p3773_p12), %746 }
 0x10f   : > { %649 = vst.msk [vmem:[#allocation3 + $0x50] sm:$0xff] (!%p3773_p12), %vm638_vm0, %v5253_v8  ;;  %650 = vst.msk [vmem:[#allocation3 + $0x58] sm:$0xff] (!%p3773_p12), %vm638_vm0, %v5253_v8 }
 0x110   : > { %v4766_v48 = vpop.eup %4765  ;;  %637 = sbr.rel (%p3773_p12) target bundleno = 574 (0x23e), region = 88  ;;  %651 = vst.msk [vmem:[#allocation3 + $0x60] sm:$0xff] (!%p3773_p12), %vm638_vm0, %v5253_v8  ;;  %652 = vst.msk [vmem:[#allocation3 + $0x68] sm:$0xff] (!%p3773_p12), %vm638_vm0, %v5253_v8  ;;  %4773 = vrsqrt.f32 (!%p3773_p12), %v762_v12 }
 0x111   : > { %v4768_v49 = vpop.eup %4767  ;;  %v5532_v50 = vmul.f32 %v4766_v48, %v583_v16  ;;  %653 = vst.msk [vmem:[#allocation3 + $0x70] sm:$0xff] (!%p3773_p12), %vm638_vm0, %v5253_v8  ;;  %654 = vst.msk [vmem:[#allocation3 + $0x78] sm:$0xff] (!%p3773_p12), %vm638_vm0, %v5253_v8  ;;  %4775 = vrsqrt.f32 (!%p3773_p12), %v760_v13  ;;  %v751_v14 = vpop.xlane.xlu1 (!%p3773_p12), %750 }
 0x112   : > { %v5534_v51 = vmul.f32 %v4768_v49, %v582_v17  ;;  %655 = vst.msk [vmem:[#allocation3 + $0x80] sm:$0xff] (!%p3773_p12), %vm638_vm0, %v5253_v8  ;;  %656 = vst.msk [vmem:[#allocation3 + $0x88] sm:$0xff] (!%p3773_p12), %vm638_vm0, %v5253_v8  ;;  %v763_v16 = vmax.f32 (!%p3773_p12), %v751_v14, 1e-24  ;;  %v761_v17 = vmax.f32 (!%p3773_p12), %v747_v15, 1e-24  ;;  %v753_v19 = vpop.xlane.xlu0 (!%p3773_p12), %752 }
 0x113   : > { %657 = vst.msk [vmem:[#allocation3 + $0x90] sm:$0xff] (!%p3773_p12), %vm638_vm0, %v5253_v8  ;;  %658 = vst.msk [vmem:[#allocation3 + $0x98] sm:$0xff] (!%p3773_p12), %vm638_vm0, %v5253_v8 }
 0x114   : > { %v4770_v52 = vpop.eup %4769  ;;  %659 = vst.msk [vmem:[#allocation3 + $0xa0] sm:$0xff] (!%p3773_p12), %vm638_vm0, %v5253_v8  ;;  %660 = vst.msk [vmem:[#allocation3 + $0xa8] sm:$0xff] (!%p3773_p12), %vm638_vm0, %v5253_v8  ;;  %4777 = vrsqrt.f32 (!%p3773_p12), %v763_v16 }
 0x115   : > { %v4772_v53 = vpop.eup %4771  ;;  %v5536_v54 = vmul.f32 %v4770_v52, %v585_v20  ;;  %661 = vst.msk [vmem:[#allocation3 + $0xb0] sm:$0xff] (!%p3773_p12), %vm638_vm0, %v5253_v8  ;;  %662 = vst.msk [vmem:[#allocation3 + $0xb8] sm:$0xff] (!%p3773_p12), %vm638_vm0, %v5253_v8  ;;  %4779 = vrsqrt.f32 (!%p3773_p12), %v761_v17  ;;  %v755_v18 = vpop.xlane.xlu1 (!%p3773_p12), %754 }
 0x116   : > { %v5538_v55 = vmul.f32 %v4772_v53, %v584_v21  ;;  %663 = vst.msk [vmem:[#allocation3 + $0xc0] sm:$0xff] (!%p3773_p12), %vm638_vm0, %v5253_v8  ;;  %664 = vst.msk [vmem:[#allocation3 + $0xc8] sm:$0xff] (!%p3773_p12), %vm638_vm0, %v5253_v8  ;;  %v765_v20 = vmax.f32 (!%p3773_p12), %v755_v18, 1e-24  ;;  %v764_v21 = vmax.f32 (!%p3773_p12), %v753_v19, 1e-24  ;;  %v757_v23 = vpop.xlane.xlu0 (!%p3773_p12), %756 }
 0x117   : > { %665 = vst.msk [vmem:[#allocation3 + $0xd0] sm:$0xff] %vm638_vm0, %v5253_v8  ;;  %666 = vst.msk [vmem:[#allocation3 + $0xd8] sm:$0xff] %vm638_vm0, %v5253_v8  ;;  %v766_v26 = vmax.f32 %v757_v23, 1e-24 }
 0x118   : > { %667 = vst.msk [vmem:[#allocation3 + $0xe0] sm:$0xff] %vm638_vm0, %v5253_v8  ;;  %668 = vst.msk [vmem:[#allocation3 + $0xe8] sm:$0xff] %vm638_vm0, %v5253_v8  ;;  %4781 = vrsqrt.f32 %v765_v20 }
 0x119   : > { %669 = vst.msk [vmem:[#allocation3 + $0xf0] sm:$0xff] %vm638_vm0, %v5253_v8  ;;  %670 = vst.msk [vmem:[#allocation3 + $0xf8] sm:$0xff] %vm638_vm0, %v5253_v8  ;;  %4783 = vrsqrt.f32 %v764_v21  ;;  %v759_v22 = vpop.xlane.xlu1 %758 }
 0x11a   : > { %671 = vst.msk [vmem:[#allocation4] sm:$0xff] %vm638_vm0, %v5254_v9  ;;  %672 = vst.msk [vmem:[#allocation4 + $0x8] sm:$0xff] %vm638_vm0, %v5254_v9  ;;  %v4774_v24 = vpop.eup %4773  ;;  %v767_v25 = vmax.f32 %v759_v22, 1e-24 }
 0x11b   : > { %673 = vst.msk [vmem:[#allocation4 + $0x10] sm:$0xff] %vm638_vm0, %v5254_v9  ;;  %674 = vst.msk [vmem:[#allocation4 + $0x18] sm:$0xff] %vm638_vm0, %v5254_v9  ;;  %v4776_v27 = vpop.eup %4775  ;;  %v5721_v28 = vmul.f32 %v4774_v24, %v5504_v2 }
 0x11c   : > { %675 = vst.msk [vmem:[#allocation4 + $0x20] sm:$0xff] %vm638_vm0, %v5254_v9  ;;  %676 = vst.msk [vmem:[#allocation4 + $0x28] sm:$0xff] %vm638_vm0, %v5254_v9  ;;  %v5724_v29 = vmul.f32 %v4776_v27, %v5500_v0  ;;  %4785 = vrsqrt.f32 %v767_v25 }
 0x11d   : > { %677 = vst.msk [vmem:[#allocation4 + $0x30] sm:$0xff] %vm638_vm0, %v5254_v9  ;;  %678 = vst.msk [vmem:[#allocation4 + $0x38] sm:$0xff] %vm638_vm0, %v5254_v9  ;;  %4787 = vrsqrt.f32 %v766_v26 }
 0x11e   : > { %679 = vst.msk [vmem:[#allocation4 + $0x40] sm:$0xff] %vm638_vm0, %v5254_v9  ;;  %680 = vst.msk [vmem:[#allocation4 + $0x48] sm:$0xff] %vm638_vm0, %v5254_v9  ;;  %v4778_v30 = vpop.eup %4777 }
 0x11f   : > { %681 = vst.msk [vmem:[#allocation4 + $0x50] sm:$0xff] %vm638_vm0, %v5254_v9  ;;  %682 = vst.msk [vmem:[#allocation4 + $0x58] sm:$0xff] %vm638_vm0, %v5254_v9  ;;  %v4780_v31 = vpop.eup %4779  ;;  %v5727_v32 = vmul.f32 %v4778_v30, %v5506_v3 }
 0x120   : > { %683 = vst.msk [vmem:[#allocation4 + $0x60] sm:$0xff] %vm638_vm0, %v5254_v9  ;;  %684 = vst.msk [vmem:[#allocation4 + $0x68] sm:$0xff] %vm638_vm0, %v5254_v9  ;;  %v5730_v33 = vmul.f32 %v4780_v31, %v5502_v1 }
 0x121   : > { %685 = vst.msk [vmem:[#allocation4 + $0x70] sm:$0xff] %vm638_vm0, %v5254_v9  ;;  %686 = vst.msk [vmem:[#allocation4 + $0x78] sm:$0xff] %vm638_vm0, %v5254_v9 }
 0x122   : > { %687 = vst.msk [vmem:[#allocation4 + $0x80] sm:$0xff] %vm638_vm0, %v5254_v9  ;;  %688 = vst.msk [vmem:[#allocation4 + $0x88] sm:$0xff] %vm638_vm0, %v5254_v9  ;;  %v4782_v34 = vpop.eup %4781 }
 0x123   : > { %689 = vst.msk [vmem:[#allocation4 + $0x90] sm:$0xff] %vm638_vm0, %v5254_v9  ;;  %690 = vst.msk [vmem:[#allocation4 + $0x98] sm:$0xff] %vm638_vm0, %v5254_v9  ;;  %v4784_v35 = vpop.eup %4783  ;;  %v5733_v36 = vmul.f32 %v4782_v34, %v5510_v5 }
 0x124   : > { %691 = vst.msk [vmem:[#allocation4 + $0xa0] sm:$0xff] %vm638_vm0, %v5254_v9  ;;  %692 = vst.msk [vmem:[#allocation4 + $0xa8] sm:$0xff] %vm638_vm0, %v5254_v9  ;;  %v5736_v37 = vmul.f32 %v4784_v35, %v5508_v4 }
 0x125   : > { %693 = vst.msk [vmem:[#allocation4 + $0xb0] sm:$0xff] %vm638_vm0, %v5254_v9  ;;  %694 = vst.msk [vmem:[#allocation4 + $0xb8] sm:$0xff] %vm638_vm0, %v5254_v9 }
 0x126   : > { %695 = vst.msk [vmem:[#allocation4 + $0xc0] sm:$0xff] %vm638_vm0, %v5254_v9  ;;  %696 = vst.msk [vmem:[#allocation4 + $0xc8] sm:$0xff] %vm638_vm0, %v5254_v9  ;;  %v4786_v38 = vpop.eup %4785 }
 0x127   : > { %697 = vst.msk [vmem:[#allocation4 + $0xd0] sm:$0xff] %vm638_vm0, %v5254_v9  ;;  %698 = vst.msk [vmem:[#allocation4 + $0xd8] sm:$0xff] %vm638_vm0, %v5254_v9  ;;  %v4788_v39 = vpop.eup %4787  ;;  %v5739_v40 = vmul.f32 %v4786_v38, %v5514_v7 }
 0x128   : > { %699 = vst.msk [vmem:[#allocation4 + $0xe0] sm:$0xff] %vm638_vm0, %v5254_v9  ;;  %700 = vst.msk [vmem:[#allocation4 + $0xe8] sm:$0xff] %vm638_vm0, %v5254_v9  ;;  %v5742_v41 = vmul.f32 %v4788_v39, %v5512_v6 }
 0x129   : > { %701 = vst.msk [vmem:[#allocation4 + $0xf0] sm:$0xff] %vm638_vm0, %v5254_v9  ;;  %702 = vst.msk [vmem:[#allocation4 + $0xf8] sm:$0xff] %vm638_vm0, %v5254_v9 }
 0x12a   : > { %704 = vst.msk [vmem:[#allocation5] sm:$0xff] %vm703_vm1, %v5254_v9  ;;  %705 = vst.msk [vmem:[#allocation5 + $0x8] sm:$0xff] %vm703_vm1, %v5254_v9 }
 0x12b   : > { %706 = vst.msk [vmem:[#allocation5 + $0x10] sm:$0xff] %vm703_vm1, %v5254_v9  ;;  %707 = vst.msk [vmem:[#allocation5 + $0x18] sm:$0xff] %vm703_vm1, %v5254_v9 }
 0x12c   : > { %708 = vst.msk [vmem:[#allocation5 + $0x20] sm:$0xff] %vm703_vm1, %v5254_v9  ;;  %709 = vst.msk [vmem:[#allocation5 + $0x28] sm:$0xff] %vm703_vm1, %v5254_v9 }
 0x12d   : > { %710 = vst.msk [vmem:[#allocation5 + $0x30] sm:$0xff] %vm703_vm1, %v5254_v9  ;;  %711 = vst.msk [vmem:[#allocation5 + $0x38] sm:$0xff] %vm703_vm1, %v5254_v9 }
 0x12e   : > { %712 = vst.msk [vmem:[#allocation5 + $0x40] sm:$0xff] %vm703_vm1, %v5254_v9  ;;  %713 = vst.msk [vmem:[#allocation5 + $0x48] sm:$0xff] %vm703_vm1, %v5254_v9 }
 0x12f   : > { %714 = vst.msk [vmem:[#allocation5 + $0x50] sm:$0xff] %vm703_vm1, %v5254_v9  ;;  %715 = vst.msk [vmem:[#allocation5 + $0x58] sm:$0xff] %vm703_vm1, %v5254_v9 }
 0x130   : > { %716 = vst.msk [vmem:[#allocation5 + $0x60] sm:$0xff] %vm703_vm1, %v5254_v9  ;;  %717 = vst.msk [vmem:[#allocation5 + $0x68] sm:$0xff] %vm703_vm1, %v5254_v9 }
 0x131   : > { %718 = vst.msk [vmem:[#allocation5 + $0x70] sm:$0xff] %vm703_vm1, %v5254_v9  ;;  %719 = vst.msk [vmem:[#allocation5 + $0x78] sm:$0xff] %vm703_vm1, %v5254_v9 }
 0x132   : > { %720 = vst.msk [vmem:[#allocation5 + $0x80] sm:$0xff] %vm703_vm1, %v5254_v9  ;;  %721 = vst.msk [vmem:[#allocation5 + $0x88] sm:$0xff] %vm703_vm1, %v5254_v9 }
 0x133   : > { %722 = vst.msk [vmem:[#allocation5 + $0x90] sm:$0xff] %vm703_vm1, %v5254_v9  ;;  %723 = vst.msk [vmem:[#allocation5 + $0x98] sm:$0xff] %vm703_vm1, %v5254_v9 }
 0x134   : > { %724 = vst.msk [vmem:[#allocation5 + $0xa0] sm:$0xff] %vm703_vm1, %v5254_v9  ;;  %725 = vst.msk [vmem:[#allocation5 + $0xa8] sm:$0xff] %vm703_vm1, %v5254_v9 }
 0x135   : > { %726 = vst.msk [vmem:[#allocation5 + $0xb0] sm:$0xff] %vm703_vm1, %v5254_v9  ;;  %727 = vst.msk [vmem:[#allocation5 + $0xb8] sm:$0xff] %vm703_vm1, %v5254_v9 }
 0x136   : > { %728 = vst.msk [vmem:[#allocation5 + $0xc0] sm:$0xff] %vm703_vm1, %v5254_v9  ;;  %729 = vst.msk [vmem:[#allocation5 + $0xc8] sm:$0xff] %vm703_vm1, %v5254_v9 }
 0x137   : > { %730 = vst.msk [vmem:[#allocation5 + $0xd0] sm:$0xff] %vm703_vm1, %v5254_v9  ;;  %731 = vst.msk [vmem:[#allocation5 + $0xd8] sm:$0xff] %vm703_vm1, %v5254_v9 }
 0x138   : > { %732 = vst.msk [vmem:[#allocation5 + $0xe0] sm:$0xff] %vm703_vm1, %v5254_v9  ;;  %733 = vst.msk [vmem:[#allocation5 + $0xe8] sm:$0xff] %vm703_vm1, %v5254_v9 }
 0x139   : > { %734 = vst.msk [vmem:[#allocation5 + $0xf0] sm:$0xff] %vm703_vm1, %v5254_v9  ;;  %735 = vst.msk [vmem:[#allocation5 + $0xf8] sm:$0xff] %vm703_vm1, %v5254_v9 }
 0x13a LB: >> { %4084 = vmatprep.mubr.f32.mxu0 %v5724_v29  ;;  %4090 = vmatprep.mubr.f32.mxu1 %v5736_v37  ;;  %s3774_s13 = sshll.u32 %s5207_s12, 7  ;;  %s808_s21 = scalar_lea.vmem [#allocation6], %s5207_s12  ;;  %s5207_s12 = sphi %s5744_s12, %s789_s12  }
 0x13b   : >> { %s5755_s11 = scalar_lea.vmem %s7555_s2, %s3774_s13  ;;  %v3775_v18 = vld [vmem:[%s808_s21] ss:$0 sm:$0xff]  ;;  %s3776_s27 = sshll.u32 %s5207_s12, 6 }
 0x13c   : >> { %v792_v44 = vld [vmem:[%s5755_s11] sm:$0xff]  ;;  %v793_v45 = vld [vmem:[%s5755_s11 + $0x8] sm:$0xff]  ;;  %v794_v48 = vld [vmem:[%s5755_s11 + $0x10] sm:$0xff]  ;;  %s930_s25 = scalar_lea.vmem [#allocation2], %s3776_s27  ;;  %s789_s12 = sadd.s32 1, %s5207_s12  }
 0x13d   : >> { %v4260_v49 = vpack.c.bf16 %v793_v45, %v792_v44  ;;  %v795_v52 = vld [vmem:[%s5755_s11 + $0x18] sm:$0xff]  ;;  %v796_v56 = vld [vmem:[%s5755_s11 + $0x20] sm:$0xff]  ;;  %v797_v57 = vld [vmem:[%s5755_s11 + $0x28] sm:$0xff]  ;;  %p786_p2 = scmp.ge.s32.totalorder %s789_s12, 4  }
 0x13e   : >> { %v4264_v53 = vpack.c.bf16 %v795_v52, %v794_v48  ;;  %v4268_v58 = vpack.c.bf16 %v797_v57, %v796_v56  ;;  %v798_v59 = vld [vmem:[%s5755_s11 + $0x30] sm:$0xff]  ;;  %v799_v60 = vld [vmem:[%s5755_s11 + $0x38] sm:$0xff]  ;;  %v800_v62 = vld [vmem:[%s5755_s11 + $0x40] sm:$0xff] }
 0x13f   : >> { %4261 = vmatprep.subr.bf16.mxu0 %v4260_v49  ;;  %4532 = vmatprep.subr.bf16.mxu1 %v4260_v49  ;;  %v4272_v61 = vpack.c.bf16 %v799_v60, %v798_v59  ;;  %v801_v63 = vld [vmem:[%s5755_s11 + $0x48] sm:$0xff]  ;;  %v802_v9 = vld [vmem:[%s5755_s11 + $0x50] sm:$0xff]  ;;  %v803_v10 = vld [vmem:[%s5755_s11 + $0x58] sm:$0xff] }
 0x140   : >> { %4263 = vmatpush3.bf16.msra.mxu0 %v4260_v49  ;;  %4540 = vmatpush3.bf16.msra.mxu1 %v4260_v49  ;;  %v4276_v8 = vpack.c.bf16 %v801_v63, %v800_v62  ;;  %v4280_v11 = vpack.c.bf16 %v803_v10, %v802_v9  ;;  %v804_v12 = vld [vmem:[%s5755_s11 + $0x60] sm:$0xff]  ;;  %v805_v13 = vld [vmem:[%s5755_s11 + $0x68] sm:$0xff]  ;;  %v806_v15 = vld [vmem:[%s5755_s11 + $0x70] sm:$0xff] }
 0x141   : >> { %4265 = vmatprep.subr.bf16.mxu0 %v4264_v53  ;;  %4533 = vmatprep.subr.bf16.mxu1 %v4264_v53  ;;  %v4284_v14 = vpack.c.bf16 %v805_v13, %v804_v12  ;;  %v807_v16 = vld [vmem:[%s5755_s11 + $0x78] sm:$0xff] }
 0x142   : >> { %v4288_v17 = vpack.c.bf16 %v807_v16, %v806_v15 }
 0x144   : >> { %4267 = vmatpush3.bf16.msra.mxu0 %v4264_v53  ;;  %4541 = vmatpush3.bf16.msra.mxu1 %v4264_v53 }
 0x145   : >> { %4269 = vmatprep.subr.bf16.mxu0 %v4268_v58  ;;  %4534 = vmatprep.subr.bf16.mxu1 %v4268_v58 }
 0x148   : >> { %4271 = vmatpush3.bf16.msra.mxu0 %v4268_v58  ;;  %4542 = vmatpush3.bf16.msra.mxu1 %v4268_v58 }
 0x149   : >> { %4273 = vmatprep.subr.bf16.mxu0 %v4272_v61  ;;  %4535 = vmatprep.subr.bf16.mxu1 %v4272_v61 }
 0x14c   : >> { %4275 = vmatpush3.bf16.msra.mxu0 %v4272_v61  ;;  %4543 = vmatpush3.bf16.msra.mxu1 %v4272_v61 }
 0x14d   : >> { %4277 = vmatprep.subr.bf16.mxu0 %v4276_v8  ;;  %4536 = vmatprep.subr.bf16.mxu1 %v4276_v8 }
 0x150   : >> { %4279 = vmatpush3.bf16.msra.mxu0 %v4276_v8  ;;  %4544 = vmatpush3.bf16.msra.mxu1 %v4276_v8 }
 0x151   : >> { %4281 = vmatprep.subr.bf16.mxu0 %v4280_v11  ;;  %4537 = vmatprep.subr.bf16.mxu1 %v4280_v11 }
 0x154   : >> { %4283 = vmatpush3.bf16.msra.mxu0 %v4280_v11  ;;  %4545 = vmatpush3.bf16.msra.mxu1 %v4280_v11 }
 0x155   : >> { %4285 = vmatprep.subr.bf16.mxu0 %v4284_v14  ;;  %4538 = vmatprep.subr.bf16.mxu1 %v4284_v14 }
 0x158   : >> { %4287 = vmatpush3.bf16.msra.mxu0 %v4284_v14  ;;  %4546 = vmatpush3.bf16.msra.mxu1 %v4284_v14 }
 0x159   : >> { %4289 = vmatprep.subr.bf16.mxu0 %v4288_v17  ;;  %4539 = vmatprep.subr.bf16.mxu1 %v4288_v17 }
 0x15c   : >> { %4291 = vmatpush3.bf16.msra.mxu0 %v4288_v17  ;;  %4547 = vmatpush3.bf16.msra.mxu1 %v4288_v17 }
 0x15f   : >> { %4085 = vmatmul.mubr.f32.vlgmr.msra.gmra.mrb[0].mxu0 %v5730_v33  ;;  %4091 = vmatmul.mubr.f32.vlgmr.msra.gmra.mrb[0].mxu1 %v5733_v36 }
 0x160   : >> { %4087 = vmatprep.mubr.f32.mxu0 %v5721_v28  ;;  %4093 = vmatprep.mubr.f32.mxu1 %v5742_v41 }
 0x163   : >> { %4088 = vmatmul.mubr.f32.gmra.mrb[2].mxu0 %v5727_v32  ;;  %4094 = vmatmul.mubr.f32.gmra.mrb[2].mxu1 %v5739_v40 }
 0x232   : >> { %v4086_v19 = vpop.f32.mrb[0].mxu0  ;;  %v4092_v20 = vpop.f32.mrb[0].mxu1 }
 0x233   : >> { %v888_v21 = vadd.f32 %v4086_v19, %v3775_v18  ;;  %v908_v22 = vadd.f32 %v4092_v20, %v3775_v18  ;;  %v882_v23 = vpop.f32.mrb[1].mxu0  ;;  %v902_v24 = vpop.f32.mrb[1].mxu1 }
 0x234   : >> { %v883_v25 = vadd.f32 %v3775_v18, %v882_v23  ;;  %v903_v26 = vadd.f32 %v3775_v18, %v902_v24 }
 0x235   : >> { %v922_v27 = vmul.f32 0.17677669, %v888_v21  ;;  %v926_v30 = vmul.f32 0.17677669, %v908_v22 }
 0x236   : >> { %v921_v31 = vmul.f32 0.17677669, %v883_v25  ;;  %v925_v34 = vmul.f32 0.17677669, %v903_v26  ;;  %v4089_v35 = vpop.f32.mrb[2].mxu0  ;;  %v4095_v38 = vpop.f32.mrb[2].mxu1 }
 0x237   : >> { %932 = vst.msk [vmem:[%s930_s25 + $0x8] sm:$0xff] %vm703_vm1, %v922_v27  ;;  %936 = vst.msk [vmem:[%s930_s25 + $0x28] sm:$0xff] %vm703_vm1, %v926_v30  ;;  %v898_v39 = vadd.f32 %v4089_v35, %v3775_v18  ;;  %v918_v44 = vadd.f32 %v4095_v38, %v3775_v18  ;;  %v892_v45 = vpop.f32.mrb[3].mxu0  ;;  %v912_v48 = vpop.f32.mrb[3].mxu1  ;;  %788 = sbr.rel (!%p786_p2) target bundleno = 314 (0x13a), region = 166 }
 0x238   : >> { %931 = vst.msk [vmem:[%s930_s25] sm:$0xff] %vm703_vm1, %v921_v31  ;;  %935 = vst.msk [vmem:[%s930_s25 + $0x20] sm:$0xff] %vm703_vm1, %v925_v34  ;;  %v893_v49 = vadd.f32 %v3775_v18, %v892_v45  ;;  %v913_v52 = vadd.f32 %v3775_v18, %v912_v48 }
 0x239   : >> { %v924_v53 = vmul.f32 0.17677669, %v898_v39  ;;  %v928_v56 = vmul.f32 0.17677669, %v918_v44 }
 0x23a   : >> { %v923_v57 = vmul.f32 0.17677669, %v893_v49  ;;  %v927_v58 = vmul.f32 0.17677669, %v913_v52 }
 0x23b   : >> { %934 = vst.msk [vmem:[%s930_s25 + $0x18] sm:$0xff] %vm703_vm1, %v924_v53  ;;  %938 = vst.msk [vmem:[%s930_s25 + $0x38] sm:$0xff] %vm703_vm1, %v928_v56 }
 0x23c   : >> { %933 = vst.msk [vmem:[%s930_s25 + $0x10] sm:$0xff] %vm703_vm1, %v923_v57  ;;  %937 = vst.msk [vmem:[%s930_s25 + $0x30] sm:$0xff] %vm703_vm1, %v927_v58 }
 0x23e PF: > { %s5792_s28 = smov 0  }
 0x23f LB: >> { %4128 = vmatprep.mubr.f32.mxu0 %v5526_v43  ;;  %4172 = vmatprep.mubr.f32.mxu1 %v5526_v43  ;;  %s3777_s17 = sshll.u32 %s5211_s28, 7  ;;  %s5831_s26 = sshll.u32 %s5211_s28, 6  ;;  %vm1216_vm2 = vcmask 261120   ;;  %vm1379_vm4 = vcmask 523264   ;;  %vm1549_vm5 = vcmask 7168   ;;  %s5211_s28 = sphi %s5792_s28, %s944_s28  }
 0x240   : >> { %s5805_s19 = scalar_lea.vmem %s7557_s4, %s3777_s17  ;;  %s5834_s15 = scalar_lea.vmem [#allocation2], %s5831_s26  ;;  %vm5841_vm3 = vmpackc.low %vm1216_vm2, %vm1216_vm2 }
 0x241   : >> { %v947_v28 = vld [vmem:[%s5805_s19] sm:$0xff]  ;;  %v948_v29 = vld [vmem:[%s5805_s19 + $0x8] sm:$0xff]  ;;  %v949_v32 = vld [vmem:[%s5805_s19 + $0x10] sm:$0xff]  ;;  %s963_s12 = scalar_lea.vmem [#allocation9], %s5211_s28  ;;  %s5880_s23 = scalar_lea.vmem %s7559_s6, %s3777_s17 }
 0x242   : >> { %v4292_v33 = vpack.c.bf16 %v948_v29, %v947_v28  ;;  %v950_v36 = vld [vmem:[%s5805_s19 + $0x18] sm:$0xff]  ;;  %v951_v40 = vld [vmem:[%s5805_s19 + $0x20] sm:$0xff]  ;;  %v952_v41 = vld [vmem:[%s5805_s19 + $0x28] sm:$0xff]  ;;  %s1093_s27 = scalar_lea.vmem %s7560_s7, %s5211_s28  ;;  %s5946_s25 = scalar_lea.vmem [#allocation3], %s5831_s26 }
 0x243   : >> { %v4296_v37 = vpack.c.bf16 %v950_v36, %v949_v32  ;;  %v4300_v59 = vpack.c.bf16 %v952_v41, %v951_v40  ;;  %v953_v60 = vld [vmem:[%s5805_s19 + $0x30] sm:$0xff]  ;;  %v954_v61 = vld [vmem:[%s5805_s19 + $0x38] sm:$0xff]  ;;  %v955_v63 = vld [vmem:[%s5805_s19 + $0x40] sm:$0xff]  ;;  %s5986_s17 = scalar_lea.vmem [#allocation4], %s5831_s26  ;;  %s6022_s20 = scalar_lea.vmem [#allocation5], %s5831_s26 }
 0x244   : >> { %4293 = vmatprep.subr.bf16.mxu0 %v4292_v33  ;;  %v4304_v62 = vpack.c.bf16 %v954_v61, %v953_v60  ;;  %v956_v8 = vld [vmem:[%s5805_s19 + $0x48] sm:$0xff]  ;;  %v957_v10 = vld [vmem:[%s5805_s19 + $0x50] sm:$0xff]  ;;  %v958_v11 = vld [vmem:[%s5805_s19 + $0x58] sm:$0xff]  ;;  %s944_s28 = sadd.s32 1, %s5211_s28  }
 0x245   : >> { %4295 = vmatpush3.bf16.msra.mxu0 %v4292_v33  ;;  %v4308_v9 = vpack.c.bf16 %v956_v8, %v955_v63  ;;  %v4312_v12 = vpack.c.bf16 %v958_v11, %v957_v10  ;;  %v959_v13 = vld [vmem:[%s5805_s19 + $0x60] sm:$0xff]  ;;  %v960_v14 = vld [vmem:[%s5805_s19 + $0x68] sm:$0xff]  ;;  %v961_v16 = vld [vmem:[%s5805_s19 + $0x70] sm:$0xff]  ;;  %p941_p4 = scmp.ge.s32.totalorder %s944_s28, 4  }
 0x246   : >> { %4297 = vmatprep.subr.bf16.mxu0 %v4296_v37  ;;  %v4316_v15 = vpack.c.bf16 %v960_v14, %v959_v13  ;;  %v962_v17 = vld [vmem:[%s5805_s19 + $0x78] sm:$0xff]  ;;  %v1208_v19 = vld [vmem:[%s5834_s15] sm:$0xff]  ;;  %v1209_v58 = vld [vmem:[%s5834_s15 + $0x8] sm:$0xff]  ;;  %p3805_p5 = scmp.ne.s32.totalorder (%p941_p4), %s5179_s16, 1 }
 0x247   : >> { %v4320_v18 = vpack.c.bf16 %v962_v17, %v961_v16  ;;  %v3778_v20 = vld [vmem:[%s963_s12] ss:$0 sm:$0xff]  ;;  %v1210_v28 = vld [vmem:[%s5834_s15 + $0x10] sm:$0xff]  ;;  %v1211_v29 = vld [vmem:[%s5834_s15 + $0x18] sm:$0xff] }
 0x248   : >> { %v1212_v32 = vld [vmem:[%s5834_s15 + $0x20] sm:$0xff]  ;;  %v1213_v33 = vld [vmem:[%s5834_s15 + $0x28] sm:$0xff]  ;;  %v1214_v36 = vld [vmem:[%s5834_s15 + $0x30] sm:$0xff] }
 0x249   : >> { %4299 = vmatpush3.bf16.msra.mxu0 %v4296_v37  ;;  %v1215_v37 = vld [vmem:[%s5834_s15 + $0x38] sm:$0xff]  ;;  %v1077_v40 = vld [vmem:[%s5880_s23] sm:$0xff]  ;;  %v1078_v41 = vld [vmem:[%s5880_s23 + $0x8] sm:$0xff] }
 0x24a   : >> { %4301 = vmatprep.subr.bf16.mxu0 %v4300_v59  ;;  %v4324_v60 = vpack.c.bf16 %v1078_v41, %v1077_v40  ;;  %v1080_v61 = vld [vmem:[%s5880_s23 + $0x18] sm:$0xff]  ;;  %v1081_v63 = vld [vmem:[%s5880_s23 + $0x20] sm:$0xff]  ;;  %v1082_v8 = vld [vmem:[%s5880_s23 + $0x28] sm:$0xff] }
 0x24b   : >> { %v1083_v10 = vld [vmem:[%s5880_s23 + $0x30] sm:$0xff]  ;;  %v1084_v11 = vld [vmem:[%s5880_s23 + $0x38] sm:$0xff]  ;;  %v1085_v13 = vld [vmem:[%s5880_s23 + $0x40] sm:$0xff] }
 0x24c   : >> { %4325 = vmatprep.subr.bf16.mxu1 %v4324_v60  ;;  %v1086_v14 = vld [vmem:[%s5880_s23 + $0x48] sm:$0xff]  ;;  %v1087_v16 = vld [vmem:[%s5880_s23 + $0x50] sm:$0xff]  ;;  %v1088_v17 = vld [vmem:[%s5880_s23 + $0x58] sm:$0xff] }
 0x24d   : >> { %4303 = vmatpush3.bf16.msra.mxu0 %v4300_v59  ;;  %v1079_v59 = vld [vmem:[%s5880_s23 + $0x10] sm:$0xff]  ;;  %4327 = vmatpush3.bf16.msra.mxu1 %v4324_v60 }
 0x24e   : >> { %4305 = vmatprep.subr.bf16.mxu0 %v4304_v62  ;;  %v1373_v60 = vld [vmem:[%s5946_s25 + $0x10] sm:$0xff] }
 0x251   : >> { %4307 = vmatpush3.bf16.msra.mxu0 %v4304_v62  ;;  %v4328_v62 = vpack.c.bf16 %v1080_v61, %v1079_v59  ;;  %v1372_v59 = vld [vmem:[%s5946_s25 + $0x8] sm:$0xff] }
 0x252   : >> { %4309 = vmatprep.subr.bf16.mxu0 %v4308_v9 }
 0x253   : >> { %4329 = vmatprep.subr.bf16.mxu1 %v4328_v62 }
 0x254   : >> { %4331 = vmatpush3.bf16.msra.mxu1 %v4328_v62 }
 0x255   : >> { %4311 = vmatpush3.bf16.msra.mxu0 %v4308_v9  ;;  %v4332_v9 = vpack.c.bf16 %v1082_v8, %v1081_v63 }
 0x256   : >> { %4313 = vmatprep.subr.bf16.mxu0 %v4312_v12 }
 0x257   : >> { %4333 = vmatprep.subr.bf16.mxu1 %v4332_v9 }
 0x258   : >> { %4335 = vmatpush3.bf16.msra.mxu1 %v4332_v9 }
 0x259   : >> { %4315 = vmatpush3.bf16.msra.mxu0 %v4312_v12  ;;  %v4336_v12 = vpack.c.bf16 %v1084_v11, %v1083_v10 }
 0x25a   : >> { %4317 = vmatprep.subr.bf16.mxu0 %v4316_v15 }
 0x25b   : >> { %4337 = vmatprep.subr.bf16.mxu1 %v4336_v12 }
 0x25c   : >> { %4339 = vmatpush3.bf16.msra.mxu1 %v4336_v12  ;;  %v1374_v12 = vld [vmem:[%s5946_s25 + $0x18] sm:$0xff] }
 0x25d   : >> { %4319 = vmatpush3.bf16.msra.mxu0 %v4316_v15  ;;  %v4340_v15 = vpack.c.bf16 %v1086_v14, %v1085_v13  ;;  %v1375_v13 = vld [vmem:[%s5946_s25 + $0x20] sm:$0xff] }
 0x25e   : >> { %4321 = vmatprep.subr.bf16.mxu0 %v4320_v18 }
 0x25f   : >> { %4341 = vmatprep.subr.bf16.mxu1 %v4340_v15 }
 0x260   : >> { %4343 = vmatpush3.bf16.msra.mxu1 %v4340_v15 }
 0x261   : >> { %4323 = vmatpush3.bf16.msra.mxu0 %v4320_v18  ;;  %v4344_v18 = vpack.c.bf16 %v1088_v17, %v1087_v16 }
 0x263   : >> { %4345 = vmatprep.subr.bf16.mxu1 %v4344_v18 }
 0x264   : >> { %4129 = vmatmul.mubr.f32.vlgmr.msra.gmra.mrb[0].mxu0 %v5530_v47  ;;  %4347 = vmatpush3.bf16.msra.mxu1 %v4344_v18 }
 0x265   : >> { %4131 = vmatprep.mubr.f32.mxu0 %v5524_v42 }
 0x268   : >> { %4132 = vmatmul.mubr.f32.gmra.mrb[2].mxu0 %v5528_v46 }
 0x269   : >> { %4134 = vmatprep.mubr.f32.mxu0 %v5534_v51 }
 0x26c   : >> { %4135 = vmatmul.mubr.f32.gmra.mrb[4].mxu0 %v5532_v50 }
 0x26d   : >> { %4137 = vmatprep.mubr.f32.mxu0 %v5538_v55 }
 0x270   : >> { %4138 = vmatmul.mubr.f32.gmra.mrb[6].mxu0 %v5536_v54 }
 0x271   : >> { %4200 = vmatprep.mubr.msk.f32.mxu0 %vm1216_vm2, %v1208_v19  ;;  %v1089_v19 = vld [vmem:[%s5880_s23 + $0x60] sm:$0xff] }
 0x337   : >> { %v4130_v21 = vpop.f32.mrb[0].mxu0 }
 0x338   : >> { %v1043_v22 = vadd.f32 %v4130_v21, %v3778_v20  ;;  %v1037_v23 = vpop.f32.mrb[1].mxu0 }
 0x339   : >> { %v1038_v24 = vadd.f32 %v3778_v20, %v1037_v23  ;;  %v1092_v23 = vld [vmem:[%s5880_s23 + $0x78] sm:$0xff] }
 0x33b   : >> { %v4356_v26 = vpack.c.bf16 %v1043_v22, %v1038_v24  ;;  %v4133_v27 = vpop.f32.mrb[2].mxu0  ;;  %v1091_v22 = vld [vmem:[%s5880_s23 + $0x70] sm:$0xff] }
 0x33c   : >> { %v1053_v30 = vadd.f32 %v4133_v27, %v3778_v20  ;;  %v1047_v31 = vpop.f32.mrb[3].mxu0  ;;  %v4352_v24 = vpack.c.bf16 %v1092_v23, %v1091_v22 }
 0x33d   : >> { %4358 = vmatprep.subr.msk.bf16.mxu0 %vm5841_vm3, %v4356_v26  ;;  %v1048_v34 = vadd.f32 %v3778_v20, %v1047_v31 }
 0x33e   : >> { %4361 = vmatpush3.bf16.xpose.msk.msra.mxu0 %vm5841_vm3, %v4356_v26 }
 0x33f   : >> { %v4362_v35 = vpack.c.bf16 %v1053_v30, %v1048_v34  ;;  %v4136_v38 = vpop.f32.mrb[4].mxu0 }
 0x340   : >> { %v1063_v39 = vadd.f32 %v4136_v38, %v3778_v20  ;;  %v1057_v44 = vpop.f32.mrb[5].mxu0 }
 0x341   : >> { %4364 = vmatprep.subr.msk.bf16.mxu0 %vm5841_vm3, %v4362_v35  ;;  %v1058_v45 = vadd.f32 %v3778_v20, %v1057_v44 }
 0x343   : >> { %v4368_v48 = vpack.c.bf16 %v1063_v39, %v1058_v45  ;;  %v4139_v49 = vpop.f32.mrb[6].mxu0 }
 0x344   : >> { %v1073_v52 = vadd.f32 %v4139_v49, %v3778_v20  ;;  %v1067_v53 = vpop.f32.mrb[7].mxu0 }
 0x345   : >> { %v1068_v56 = vadd.f32 %v3778_v20, %v1067_v53  ;;  %v1090_v20 = vld [vmem:[%s5880_s23 + $0x68] sm:$0xff] }
 0x346   : >> { %4367 = vmatpush3.bf16.xpose.msk.msra.mxu0 %vm5841_vm3, %v4362_v35  ;;  %v4348_v21 = vpack.c.bf16 %v1090_v20, %v1089_v19 }
 0x347   : >> { %4370 = vmatprep.subr.msk.bf16.mxu0 %vm5841_vm3, %v4368_v48  ;;  %v4374_v57 = vpack.c.bf16 %v1073_v52, %v1068_v56 }
 0x348   : >> { %4349 = vmatprep.subr.bf16.mxu1 %v4348_v21 }
 0x349   : >> { %4351 = vmatpush3.bf16.msra.mxu1 %v4348_v21 }
 0x34a   : >> { %4353 = vmatprep.subr.bf16.mxu1 %v4352_v24 }
 0x34d   : >> { %4355 = vmatpush3.bf16.msra.mxu1 %v4352_v24 }
 0x34e   : >> { %4373 = vmatpush3.bf16.xpose.msk.msra.mxu0 %vm5841_vm3, %v4368_v48 }
 0x34f   : >> { %4376 = vmatprep.subr.msk.bf16.mxu0 %vm5841_vm3, %v4374_v57 }
 0x350   : >> { %4173 = vmatmul.mubr.f32.vlgmr.msra.gmra.mrb[0].mxu1 %v5530_v47 }
 0x351   : >> { %4175 = vmatprep.mubr.f32.mxu1 %v5524_v42 }
 0x354   : >> { %4176 = vmatmul.mubr.f32.gmra.mrb[2].mxu1 %v5528_v46 }
 0x355   : >> { %4178 = vmatprep.mubr.f32.mxu1 %v5534_v51 }
 0x356   : >> { %4379 = vmatpush3.bf16.xpose.msk.msra.mxu0 %vm5841_vm3, %v4374_v57  ;;  %v5255_v57 = vmov 0  }
 0x357   : >> { %4789 = vset.pattern.permute.xlu0 %v5255_v57  ;;  %4790 = vset.pattern.permute.xlu1 %v5255_v57 }
 0x358   : >> { %4179 = vmatmul.mubr.f32.gmra.mrb[4].mxu1 %v5532_v50 }
 0x359   : >> { %4181 = vmatprep.mubr.f32.mxu1 %v5538_v55 }
 0x35c   : >> { %4182 = vmatmul.mubr.f32.gmra.mrb[6].mxu1 %v5536_v54 }
 0x35d   : >> { %4201 = vmatmul.mubr.msk.f32.vlgmr.msra.gmra.mrb[8].mxu0 %vm1216_vm2, %v1209_v58  ;;  %v5941_v58 = vld [vmem:[%s1093_s27] ss:$0 sm:$0xff] }
 0x35e   : >> { %4203 = vmatprep.mubr.msk.f32.mxu0 %vm1216_vm2, %v1210_v28 }
 0x361   : >> { %4204 = vmatmul.mubr.msk.f32.gmra.mrb[10].mxu0 %vm1216_vm2, %v1211_v29 }
 0x362   : >> { %4206 = vmatprep.mubr.msk.f32.mxu0 %vm1216_vm2, %v1212_v32 }
 0x365   : >> { %4207 = vmatmul.mubr.msk.f32.gmra.mrb[12].mxu0 %vm1216_vm2, %v1213_v33 }
 0x366   : >> { %4209 = vmatprep.mubr.msk.f32.mxu0 %vm1216_vm2, %v1214_v36  ;;  %v1371_v36 = vld [vmem:[%s5946_s25] sm:$0xff] }
 0x369   : >> { %4210 = vmatmul.mubr.msk.f32.gmra.mrb[14].mxu0 %vm1216_vm2, %v1215_v37 }
 0x423   : >> { %v4174_v28 = vpop.f32.mrb[0].mxu1 }
 0x424   : >> { %v1173_v29 = vadd.f32 %v4174_v28, %v5941_v58  ;;  %v1167_v32 = vpop.f32.mrb[1].mxu1 }
 0x425   : >> { %v1168_v33 = vadd.f32 %v5941_v58, %v1167_v32 }
 0x427   : >> { %v4380_v37 = vpack.c.bf16 %v1173_v29, %v1168_v33  ;;  %v4177_v11 = vpop.f32.mrb[2].mxu1 }
 0x428   : >> { %v1177_v14 = vpop.f32.mrb[3].mxu1  ;;  %v1183_v17 = vadd.f32 %v4177_v11, %v5941_v58 }
 0x429   : >> { %4381 = vmatprep.subr.bf16.mxu1 %v4380_v37  ;;  %v1178_v20 = vadd.f32 %v5941_v58, %v1177_v14 }
 0x42a   : >> { %4383 = vmatpush3.bf16.msra.mxu1 %v4380_v37 }
 0x430   : >> { %v5905_v25 = vpop.f32.mrb[8].mxu0 }
 0x431   : >> { %v5907_v26 = vpop.f32.mrb[9].mxu0  ;;  %v1383_v34 = vsel %vm1379_vm4, %v5905_v25, -inf }
 0x432   : >> { %v1380_v27 = vsel %vm1379_vm4, %v5907_v26, -inf }
 0x433   : >> { %1381 = vmax.xlane.f32.xlu0 %v1380_v27  ;;  %v4180_v27 = vpop.f32.mrb[4].mxu1 }
 0x434   : >> { %v5911_v30 = vpop.f32.mrb[10].mxu0 }
 0x435   : >> { %v5913_v31 = vpop.f32.mrb[11].mxu0  ;;  %v1389_v44 = vsel %vm1379_vm4, %v5911_v30, -inf }
 0x436   : >> { %v1386_v35 = vsel %vm1379_vm4, %v5913_v31, -inf }
 0x437   : >> { %1384 = vmax.xlane.f32.xlu0 %v1383_v34  ;;  %1387 = vmax.xlane.f32.xlu1 %v1386_v35  ;;  %v1376_v34 = vld [vmem:[%s5946_s25 + $0x28] sm:$0xff]  ;;  %v5963_v35 = vld [vmem:[%s5946_s25 + $0x30] sm:$0xff] }
 0x438   : >> { %v5919_v38 = vpop.f32.mrb[12].mxu0 }
 0x439   : >> { %v5921_v39 = vpop.f32.mrb[13].mxu0  ;;  %v1395_v48 = vsel %vm1379_vm4, %v5919_v38, -inf }
 0x43a   : >> { %v1392_v45 = vsel %vm1379_vm4, %v5921_v39, -inf }
 0x43b   : >> { %1390 = vmax.xlane.f32.xlu1 %v1389_v44  ;;  %1393 = vmax.xlane.f32.xlu0 %v1392_v45  ;;  %v4384_v44 = vpack.c.bf16 %v1183_v17, %v1178_v20  ;;  %v1187_v45 = vpop.f32.mrb[5].mxu1  ;;  %v1503_v17 = vld [vmem:[%s5986_s17 + $0x10] sm:$0xff] }
 0x43c   : >> { %v5929_v49 = vpop.f32.mrb[14].mxu0  ;;  %v1188_v29 = vadd.f32 %v5941_v58, %v1187_v45  ;;  %v1506_v45 = vld [vmem:[%s5986_s17 + $0x28] sm:$0xff] }
 0x43d   : >> { %v5931_v52 = vpop.f32.mrb[15].mxu0  ;;  %v1401_v56 = vsel %vm1379_vm4, %v5929_v49, -inf  ;;  %4385 = vmatprep.subr.bf16.mxu1 %v4384_v44 }
 0x43e   : >> { %v1398_v53 = vsel %vm1379_vm4, %v5931_v52, -inf  ;;  %4387 = vmatpush3.bf16.msra.mxu1 %v4384_v44 }
 0x43f   : >> { %1396 = vmax.xlane.f32.xlu1 %v1395_v48  ;;  %1399 = vmax.xlane.f32.xlu0 %v1398_v53 }
 0x443   : >> { %1402 = vmax.xlane.f32.xlu1 %v1401_v56  ;;  %v1193_v56 = vadd.f32 %v4180_v27, %v5941_v58 }
 0x4c0   : >> { %v1382_v40 = vpop.xlane.xlu0 %1381 }
 0x4c1   : >> { %v1404_v41 = vmax.f32 %v1371_v36, %v1382_v40  ;;  %v4183_v40 = vpop.f32.mrb[6].mxu1 }
 0x4c3   : >> { %v1412_v61 = vsub.f32 %v1371_v36, %v1404_v41  ;;  %1760 = vst.msk [vmem:[%s5946_s25] sm:$0xff] %vm1549_vm5, %v1404_v41  ;;  %1438 = vperm.xlu0 %4789, %v1404_v41   ;;  %v5975_v41 = vld [vmem:[%s5946_s25 + $0x38] sm:$0xff] }
 0x4c4   : >> { %v1385_v62 = vpop.xlane.xlu0 %1384  ;;  %v1388_v63 = vpop.xlane.xlu1 %1387 }
 0x4c5   : >> { %v1420_v8 = vmul.f32 1.442695, %v1412_v61  ;;  %v1405_v9 = vmax.f32 %v1372_v59, %v1385_v62  ;;  %v1406_v10 = vmax.f32 %v1373_v60, %v1388_v63  ;;  %v1203_v63 = vadd.f32 %v4183_v40, %v5941_v58 }
 0x4c7   : >> { %4791 = vpow2.f32 %v1420_v8  ;;  %v1413_v15 = vsub.f32 %v1372_v59, %v1405_v9  ;;  %1761 = vst.msk [vmem:[%s5946_s25 + $0x8] sm:$0xff] %vm1549_vm5, %v1405_v9  ;;  %v1414_v16 = vsub.f32 %v1373_v60, %v1406_v10  ;;  %1762 = vst.msk [vmem:[%s5946_s25 + $0x10] sm:$0xff] %vm1549_vm5, %v1406_v10  ;;  %1443 = vperm.xlu1 %4790, %v1405_v9   ;;  %v1197_v60 = vpop.f32.mrb[7].mxu1  ;;  %v1501_v8 = vld [vmem:[%s5986_s17] sm:$0xff] }
 0x4c8   : >> { %v1391_v18 = vpop.xlane.xlu1 %1390  ;;  %v1394_v19 = vpop.xlane.xlu0 %1393  ;;  %v4388_v59 = vpack.c.bf16 %v1193_v56, %v1188_v29  ;;  %v1198_v11 = vadd.f32 %v5941_v58, %v1197_v60  ;;  %v1502_v58 = vld [vmem:[%s5986_s17 + $0x8] sm:$0xff] }
 0x4c9   : >> { %v1422_v21 = vmul.f32 1.442695, %v1413_v15  ;;  %v1424_v22 = vmul.f32 1.442695, %v1414_v16  ;;  %v1407_v23 = vmax.f32 %v1374_v12, %v1391_v18  ;;  %v1408_v24 = vmax.f32 %v1375_v13, %v1394_v19 }
 0x4ca   : >> { %4389 = vmatprep.subr.bf16.mxu1 %v4388_v59  ;;  %v4392_v14 = vpack.c.bf16 %v1203_v63, %v1198_v11  ;;  %v1559_v63 = vld [vmem:[%s6022_s20] sm:$0xff] }
 0x4cb   : >> { %4793 = vpow2.f32 %v1422_v21  ;;  %v1415_v48 = vsub.f32 %v1374_v12, %v1407_v23  ;;  %1763 = vst.msk [vmem:[%s5946_s25 + $0x18] sm:$0xff] %vm1549_vm5, %v1407_v23  ;;  %1453 = vperm.xlu1 %4790, %v1407_v23   ;;  %v1416_v53 = vsub.f32 %v1375_v13, %v1408_v24  ;;  %1764 = vst.msk [vmem:[%s5946_s25 + $0x20] sm:$0xff] %vm1549_vm5, %v1408_v24  ;;  %4391 = vmatpush3.bf16.msra.mxu1 %v4388_v59  ;;  %v1504_v21 = vld [vmem:[%s5986_s17 + $0x18] sm:$0xff]  ;;  %v1505_v23 = vld [vmem:[%s5986_s17 + $0x20] sm:$0xff] }
 0x4cc   : >> { %4795 = vpow2.f32 %v1424_v22  ;;  %v1397_v57 = vpop.xlane.xlu1 %1396  ;;  %v1400_v28 = vpop.xlane.xlu0 %1399  ;;  %4393 = vmatprep.subr.bf16.mxu1 %v4392_v14 }
 0x4cd   : >> { %v1426_v32 = vmul.f32 1.442695, %v1415_v48  ;;  %v1409_v33 = vmax.f32 %v1376_v34, %v1397_v57  ;;  %v1428_v36 = vmul.f32 1.442695, %v1416_v53  ;;  %v5972_v37 = vmax.f32 %v5963_v35, %v1400_v28 }
 0x4cf   : >> { %4797 = vpow2.f32 %v1426_v32  ;;  %v1417_v61 = vsub.f32 %v1376_v34, %v1409_v33  ;;  %1765 = vst.msk [vmem:[%s5946_s25 + $0x28] sm:$0xff] %vm1549_vm5, %v1409_v33  ;;  %1448 = vperm.xlu1 %4790, %v1406_v10   ;;  %v1418_v62 = vsub.f32 %v5963_v35, %v5972_v37  ;;  %1766 = vst.msk [vmem:[%s5946_s25 + $0x30] sm:$0xff] %vm1549_vm5, %v5972_v37  ;;  %4395 = vmatpush3.bf16.msra.mxu1 %v4392_v14 }
 0x4d0   : >> { %4799 = vpow2.f32 %v1428_v36  ;;  %v1403_v9 = vpop.xlane.xlu1 %1402 }
 0x4d1   : >> { %v4792_v10 = vpop.eup %4791  ;;  %v1430_v12 = vmul.f32 1.442695, %v1417_v61  ;;  %v5991_v13 = vmax.f32 %v5975_v41, %v1403_v9 }
 0x4d2   : >> { %1569 = vperm.xlu0 %4789, %v4792_v10   ;;  %v5993_v15 = vmul.f32 %v4792_v10, %v1501_v8 }
 0x4d3   : >> { %4801 = vpow2.f32 %v1430_v12  ;;  %1463 = vperm.xlu1 %4790, %v1409_v33   ;;  %v1419_v16 = vsub.f32 %v5975_v41, %v5991_v13  ;;  %1767 = vst.msk [vmem:[%s5946_s25 + $0x38] sm:$0xff] %vm1549_vm5, %v5991_v13 }
 0x4d5   : >> { %v4794_v18 = vpop.eup %4793 }
 0x4d6   : >> { %v4796_v19 = vpop.eup %4795  ;;  %v6002_v20 = vmul.f32 %v4794_v18, %v1502_v58 }
 0x4d7   : >> { %1458 = vperm.xlu1 %4790, %v1408_v24   ;;  %v6005_v22 = vmul.f32 %v4796_v19, %v1503_v17 }
 0x4d9   : >> { %v4798_v27 = vpop.eup %4797 }
 0x4da   : >> { %v4800_v34 = vpop.eup %4799  ;;  %1584 = vperm.xlu0 %4789, %v4798_v27   ;;  %v6008_v44 = vmul.f32 %v4798_v27, %v1504_v21 }
 0x4db   : >> { %1468 = vperm.xlu1 %4790, %v5972_v37   ;;  %v6012_v48 = vmul.f32 %v4800_v34, %v1505_v23 }
 0x4dd   : >> { %v4802_v53 = vpop.eup %4801 }
 0x4de   : >> { %1594 = vperm.xlu0 %4789, %v4802_v53   ;;  %v6014_v56 = vmul.f32 %v4802_v53, %v1506_v45 }
 0x4df   : >> { %1473 = vperm.xlu1 %4790, %v5991_v13  }
 0x4e3   : >> { %1574 = vperm.xlu1 %4790, %v4794_v18   ;;  %v1562_v18 = vld [vmem:[%s6022_s20 + $0x18] sm:$0xff] }
 0x4e7   : >> { %1579 = vperm.xlu1 %4790, %v4796_v19  }
 0x4eb   : >> { %1589 = vperm.xlu1 %4790, %v4800_v34  }
 0x542   : >> { %v1439_v24 = vpop.permute.xlu0 %1438 }
 0x543   : >> { %v1476_v57 = vsub.f32 %v5907_v26, %v1439_v24 }
 0x545   : >> { %v1484_v28 = vmul.f32 1.442695, %v1476_v57 }
 0x546   : >> { %v1444_v29 = vpop.permute.xlu1 %1443 }
 0x547   : >> { %4803 = vpow2.f32 %v1484_v28  ;;  %v1477_v32 = vsub.f32 %v5905_v25, %v1444_v29  ;;  %v1560_v29 = vld [vmem:[%s6022_s20 + $0x8] sm:$0xff] }
 0x549   : >> { %v1486_v33 = vmul.f32 1.442695, %v1477_v32 }
 0x54a   : >> { %v1454_v36 = vpop.permute.xlu1 %1453 }
 0x54b   : >> { %4805 = vpow2.f32 %v1486_v33  ;;  %v1479_v40 = vsub.f32 %v5911_v30, %v1454_v36 }
 0x54d   : >> { %v1490_v59 = vmul.f32 1.442695, %v1479_v40 }
 0x54e   : >> { %v1449_v60 = vpop.permute.xlu1 %1448 }
 0x54f   : >> { %4807 = vpow2.f32 %v1490_v59  ;;  %v1478_v61 = vsub.f32 %v5913_v31, %v1449_v60  ;;  %v1561_v59 = vld [vmem:[%s6022_s20 + $0x10] sm:$0xff] }
 0x551   : >> { %v4804_v26 = vpop.eup %4803  ;;  %v1488_v8 = vmul.f32 1.442695, %v1478_v61  ;;  %v1570_v9 = vpop.permute.xlu0 %1569 }
 0x552   : >> { %v6025_v11 = vmul.f32 %v1570_v9, %v1559_v63  ;;  %v1464_v25 = vpop.permute.xlu1 %1463  ;;  %4228 = vmatprep.mubr.msk.f32.mxu1 %vm1379_vm4, %v4804_v26  ;;  %v1517_v30 = vsel %vm1379_vm4, %v4804_v26, 0.0 }
 0x553   : >> { %4809 = vpow2.f32 %v1488_v8  ;;  %v1481_v10 = vsub.f32 %v5919_v38, %v1464_v25  ;;  %1518 = vadd.xlane.f32.xlu1 %v1517_v30  ;;  %v1432_v30 = vmul.f32 1.442695, %v1418_v62 }
 0x555   : >> { %v4806_v31 = vpop.eup %4805  ;;  %v1494_v12 = vmul.f32 1.442695, %v1481_v10  ;;  %v1434_v10 = vmul.f32 1.442695, %v1419_v16 }
 0x556   : >> { %v1459_v14 = vpop.permute.xlu1 %1458  ;;  %4229 = vmatmul.mubr.msk.f32.vlgmr.msra.gmra.mrb[8].mxu1 %vm1379_vm4, %v4806_v31  ;;  %v1520_v58 = vsel %vm1379_vm4, %v4806_v31, 0.0 }
 0x557   : >> { %4811 = vpow2.f32 %v1494_v12  ;;  %v1480_v17 = vsub.f32 %v5921_v39, %v1459_v14  ;;  %1521 = vadd.xlane.f32.xlu0 %v1520_v58 }
 0x559   : >> { %v4808_v19 = vpop.eup %4807  ;;  %v1492_v21 = vmul.f32 1.442695, %v1480_v17  ;;  %v1585_v23 = vpop.permute.xlu0 %1584 }
 0x55a   : >> { %v6034_v27 = vmul.f32 %v1585_v23, %v1562_v18  ;;  %v1469_v38 = vpop.permute.xlu1 %1468  ;;  %v1526_v34 = vsel %vm1379_vm4, %v4808_v19, 0.0 }
 0x55b   : >> { %4813 = vpow2.f32 %v1492_v21  ;;  %v1482_v45 = vsub.f32 %v5931_v52, %v1469_v38  ;;  %1527 = vadd.xlane.f32.xlu1 %v1526_v34  ;;  %v1507_v21 = vld [vmem:[%s5986_s17 + $0x30] sm:$0xff]  ;;  %v1508_v34 = vld [vmem:[%s5986_s17 + $0x38] sm:$0xff] }
 0x55d   : >> { %v4810_v53 = vpop.eup %4809  ;;  %v1496_v24 = vmul.f32 1.442695, %v1482_v45  ;;  %v1595_v58 = vpop.permute.xlu0 %1594 }
 0x55e   : >> { %v1474_v57 = vpop.permute.xlu1 %1473  ;;  %4231 = vmatprep.mubr.msk.f32.mxu1 %vm1379_vm4, %v4810_v53  ;;  %v1523_v39 = vsel %vm1379_vm4, %v4810_v53, 0.0 }
 0x55f   : >> { %4815 = vpow2.f32 %v1496_v24  ;;  %v1483_v28 = vsub.f32 %v5929_v49, %v1474_v57  ;;  %1524 = vadd.xlane.f32.xlu0 %v1523_v39  ;;  %4232 = vmatmul.mubr.msk.f32.gmra.mrb[10].mxu1 %vm1379_vm4, %v4808_v19 }
 0x561   : >> { %v4812_v32 = vpop.eup %4811  ;;  %v1498_v33 = vmul.f32 1.442695, %v1483_v28 }
 0x562   : >> { %v1575_v36 = vpop.permute.xlu1 %1574  ;;  %v1532_v52 = vsel %vm1379_vm4, %v4812_v32, 0.0 }
 0x563   : >> { %4817 = vpow2.f32 %v1498_v33  ;;  %v1608_v40 = vmul.f32 %v1575_v36, %v1560_v29  ;;  %1533 = vadd.xlane.f32.xlu1 %v1532_v52  ;;  %v1564_v36 = vld [vmem:[%s6022_s20 + $0x28] sm:$0xff]  ;;  %v1563_v52 = vld [vmem:[%s6022_s20 + $0x20] sm:$0xff] }
 0x564   : >> { %4819 = vpow2.f32 %v1432_v30 }
 0x565   : >> { %v4814_v60 = vpop.eup %4813  ;;  %4821 = vpow2.f32 %v1434_v10 }
 0x566   : >> { %v1580_v61 = vpop.permute.xlu1 %1579  ;;  %4234 = vmatprep.mubr.msk.f32.mxu1 %vm1379_vm4, %v4814_v60  ;;  %v1529_v63 = vsel %vm1379_vm4, %v4814_v60, 0.0 }
 0x567   : >> { %v1609_v49 = vmul.f32 %v1580_v61, %v1561_v59  ;;  %1530 = vadd.xlane.f32.xlu0 %v1529_v63  ;;  %4235 = vmatmul.mubr.msk.f32.gmra.mrb[12].mxu1 %vm1379_vm4, %v4812_v32 }
 0x569   : >> { %v4816_v26 = vpop.eup %4815 }
 0x56a   : >> { %4237 = vmatprep.mubr.msk.f32.mxu1 %vm1379_vm4, %v4816_v26  ;;  %v1535_v8 = vsel %vm1379_vm4, %v4816_v26, 0.0  ;;  %v1590_v14 = vpop.permute.xlu1 %1589  ;;  %v1566_v26 = vld [vmem:[%s6022_s20 + $0x38] sm:$0xff] }
 0x56b   : >> { %1536 = vadd.xlane.f32.xlu0 %v1535_v8 }
 0x56d   : >> { %v4818_v9 = vpop.eup %4817 }
 0x56e   : >> { %4238 = vmatmul.mubr.msk.f32.gmra.mrb[14].mxu1 %vm1379_vm4, %v4818_v9  ;;  %v1538_v25 = vsel %vm1379_vm4, %v4818_v9, 0.0  ;;  %v4820_v31 = vpop.eup %4819 }
 0x56f   : >> { %1539 = vadd.xlane.f32.xlu1 %v1538_v25  ;;  %v4822_v12 = vpop.eup %4821 }
 0x570   : >> { %v1516_v45 = vmul.f32 %v4822_v12, %v1508_v34 }
 0x580   : >> { %1599 = vperm.xlu1 %4790, %v4820_v31  }
 0x581   : >> { %1604 = vperm.xlu0 %4789, %v4822_v12  }
 0x5e0   : >> { %v1519_v17 = vpop.xlane.xlu1 %1518 }
 0x5e1   : >> { %v1541_v35 = vadd.f32 %v1519_v17, %v5993_v15 }
 0x5e3   : >> { %1550 = vst.msk [vmem:[%s5986_s17] sm:$0xff] %vm1549_vm5, %v1541_v35 }
 0x5e4   : >> { %v1522_v37 = vpop.xlane.xlu0 %1521 }
 0x5e5   : >> { %v1542_v41 = vadd.f32 %v1522_v37, %v6002_v20 }
 0x5e7   : >> { %1551 = vst.msk [vmem:[%s5986_s17 + $0x8] sm:$0xff] %vm1549_vm5, %v1542_v41 }
 0x5e8   : >> { %v1528_v62 = vpop.xlane.xlu1 %1527 }
 0x5e9   : >> { %v1544_v13 = vadd.f32 %v1528_v62, %v6008_v44  ;;  %v1515_v44 = vmul.f32 %v4820_v31, %v1507_v21 }
 0x5eb   : >> { %1553 = vst.msk [vmem:[%s5986_s17 + $0x18] sm:$0xff] %vm1549_vm5, %v1544_v13 }
 0x5ec   : >> { %v1525_v16 = vpop.xlane.xlu0 %1524 }
 0x5ed   : >> { %v1543_v18 = vadd.f32 %v1525_v16, %v6005_v22 }
 0x5ef   : >> { %1552 = vst.msk [vmem:[%s5986_s17 + $0x10] sm:$0xff] %vm1549_vm5, %v1543_v18 }
 0x5f0   : >> { %v1534_v15 = vpop.xlane.xlu1 %1533 }
 0x5f1   : >> { %v1546_v19 = vadd.f32 %v1534_v15, %v6014_v56 }
 0x5f3   : >> { %1555 = vst.msk [vmem:[%s5986_s17 + $0x28] sm:$0xff] %vm1549_vm5, %v1546_v19 }
 0x5f4   : >> { %v1531_v20 = vpop.xlane.xlu0 %1530 }
 0x5f5   : >> { %v1545_v23 = vadd.f32 %v1531_v20, %v6012_v48 }
 0x5f7   : >> { %1554 = vst.msk [vmem:[%s5986_s17 + $0x20] sm:$0xff] %vm1549_vm5, %v1545_v23 }
 0x5f8   : >> { %v1537_v38 = vpop.xlane.xlu0 %1536 }
 0x5f9   : >> { %v1547_v22 = vadd.f32 %v1537_v38, %v1515_v44 }
 0x5fb   : >> { %1556 = vst.msk [vmem:[%s5986_s17 + $0x30] sm:$0xff] %vm1549_vm5, %v1547_v22 }
 0x5fc   : >> { %v1540_v56 = vpop.xlane.xlu1 %1539 }
 0x5fd   : >> { %v1548_v53 = vadd.f32 %v1540_v56, %v1516_v45 }
 0x5ff   : >> { %1557 = vst.msk [vmem:[%s5986_s17 + $0x38] sm:$0xff] %vm1549_vm5, %v1548_v53 }
 0x600   : >> { %v1600_v8 = vpop.permute.xlu1 %1599 }
 0x629   : >> { %v4230_v24 = vpop.f32.mrb[8].mxu1 }
 0x62a   : >> { %v1745_v48 = vadd.f32 %v4230_v24, %v1608_v40  ;;  %v1705_v57 = vpop.f32.mrb[9].mxu1  ;;  %v1611_v40 = vmul.f32 %v1590_v14, %v1563_v52 }
 0x62b   : >> { %v1744_v39 = vadd.f32 %v1705_v57, %v6025_v11  ;;  %v1612_v11 = vmul.f32 %v1595_v58, %v1564_v36 }
 0x62c   : >> { %1753 = vst.msk [vmem:[%s6022_s20 + $0x8] sm:$0xff] %vm1216_vm2, %v1745_v48 }
 0x62d   : >> { %1752 = vst.msk [vmem:[%s6022_s20] sm:$0xff] %vm1216_vm2, %v1744_v39 }
 0x632   : >> { %v4233_v28 = vpop.f32.mrb[10].mxu1 }
 0x633   : >> { %v1747_v29 = vadd.f32 %v4233_v28, %v6034_v27  ;;  %v1715_v32 = vpop.f32.mrb[11].mxu1  ;;  %v1605_v27 = vpop.permute.xlu0 %1604 }
 0x634   : >> { %v1746_v33 = vadd.f32 %v1715_v32, %v1609_v49  ;;  %v1565_v49 = vld [vmem:[%s6022_s20 + $0x30] sm:$0xff]  ;;  %v1614_v9 = vmul.f32 %v1605_v27, %v1566_v26 }
 0x635   : >> { %1755 = vst.msk [vmem:[%s6022_s20 + $0x18] sm:$0xff] %vm1216_vm2, %v1747_v29  ;;  %v1613_v25 = vmul.f32 %v1600_v8, %v1565_v49 }
 0x636   : >> { %1754 = vst.msk [vmem:[%s6022_s20 + $0x10] sm:$0xff] %vm1216_vm2, %v1746_v33 }
 0x63a   : >> { %v4236_v59 = vpop.f32.mrb[12].mxu1 }
 0x63b   : >> { %v1749_v60 = vadd.f32 %v4236_v59, %v1612_v11  ;;  %v1725_v61 = vpop.f32.mrb[13].mxu1 }
 0x63c   : >> { %v1748_v63 = vadd.f32 %v1725_v61, %v1611_v40 }
 0x63d   : >> { %1757 = vst.msk [vmem:[%s6022_s20 + $0x28] sm:$0xff] %vm1216_vm2, %v1749_v60 }
 0x63e   : >> { %1756 = vst.msk [vmem:[%s6022_s20 + $0x20] sm:$0xff] %vm1216_vm2, %v1748_v63 }
 0x63f   : > { %943 = sbr.rel (!%p941_p4) target bundleno = 575 (0x23f), region = 177 }
 0x641   : >> { %v4239_v30 = vpop.f32.mrb[14].mxu1 }
 0x642   : >> { %v1751_v10 = vadd.f32 %v4239_v30, %v1614_v9  ;;  %v1735_v31 = vpop.f32.mrb[15].mxu1 }
 0x643   : >> { %v1750_v12 = vadd.f32 %v1735_v31, %v1613_v25 }
 0x644   : >> { %1759 = vst.msk [vmem:[%s6022_s20 + $0x38] sm:$0xff] %vm1216_vm2, %v1751_v10 }
 0x645   : >> { %1758 = vst.msk [vmem:[%s6022_s20 + $0x30] sm:$0xff] %vm1216_vm2, %v1750_v12 }
 0x646   : > { %1771 = sbr.rel (%p3805_p5) target bundleno = 2810 (0xafa), region = 106 }
 0x64d   : > { %v6108_v14 = vmov 0.0   ;;  %v6110_v58 = vmov 0.0   ;;  %v6112_v17 = vmov 0.0   ;;  %v6114_v35 = vmov 0.0   ;;  %s6124_s28 = smov 0  }
 0x64e   : > { %v6116_v37 = vmov 0.0   ;;  %v6118_v41 = vmov 0.0   ;;  %v6120_v62 = vmov 0.0   ;;  %v6122_v13 = vmov 0.0  }
 0x64f LB: >> { %v5256_v42 = vmov 0   ;;  %s3806_s16 = sshll.u32 %s5247_s28, 6  ;;  %s3807_s14 = sshll.u32 %s5247_s28, 5  ;;  %s5247_s28 = sphi %s6124_s28, %s1777_s28   ;;  %v5243_v13 = vphi %v6122_v13, %v7691_v13   ;;  %v5239_v62 = vphi %v6120_v62, %v7690_v62   ;;  %v5235_v41 = vphi %v6118_v41, %v7689_v41   ;;  %v5231_v37 = vphi %v6116_v37, %v7688_v37   ;;  %v5227_v35 = vphi %v6114_v35, %v7687_v35   ;;  %v5223_v17 = vphi %v6112_v17, %v7686_v17   ;;  %v5219_v58 = vphi %v6110_v58, %v7685_v58   ;;  %v5215_v14 = vphi %v6108_v14, %v7684_v14  }
 0x650   : >> { %4824 = vset.pattern.permute.xlu1 %v5256_v42  ;;  %4823 = vset.pattern.permute.xlu0 %v5256_v42  ;;  %s1862_s15 = scalar_lea.vmem %s7561_s8, %s3807_s14  ;;  %s1796_s12 = scalar_lea.vmem [#allocation4], %s3806_s16 }
 0x651   : >> { %v1798_v43 = vld [vmem:[%s1796_s12 + $0x8] sm:$0xff]  ;;  %v1797_v46 = vld [vmem:[%s1796_s12] sm:$0xff]  ;;  %v1865_v55 = vld [vmem:[%s1862_s15 + $0x10] sm:$0xff]  ;;  %s1787_s13 = scalar_lea.vmem [#allocation5], %s3806_s16  ;;  %s1777_s28 = sadd.s32 1, %s5247_s28  }
 0x652   : >> { %v1802_v47 = vld [vmem:[%s1796_s12 + $0x28] sm:$0xff]  ;;  %4825 = vrcp.f32 %v1798_v43  ;;  %v1801_v50 = vld [vmem:[%s1796_s12 + $0x20] sm:$0xff]  ;;  %v1866_v16 = vld [vmem:[%s1862_s15 + $0x18] sm:$0xff]  ;;  %p1774_p7 = scmp.ge.s32.totalorder %s1777_s28, 4  }
 0x653   : >> { %4827 = vrcp.f32 %v1797_v46  ;;  %v1863_v51 = vld [vmem:[%s1862_s15] sm:$0xff]  ;;  %v1864_v54 = vld [vmem:[%s1862_s15 + $0x8] sm:$0xff]  ;;  %v1803_v18 = vld [vmem:[%s1796_s12 + $0x30] sm:$0xff]  ;;  %v4400_v19 = vpack.c.bf16 %v1866_v16, %v1865_v55  ;;  %s7692_s27 = sld [smem:[#allocation112_spill]] (%p1774_p7)  ;;  %s7701_s15 = sld [smem:[#allocation114_spill]] (%p1774_p7) }
 0x654   : >> { %4829 = vrcp.f32 %v1802_v47  ;;  %v4396_v15 = vpack.c.bf16 %v1864_v54, %v1863_v51  ;;  %v1799_v20 = vld [vmem:[%s1796_s12 + $0x10] sm:$0xff]  ;;  %v1804_v21 = vld [vmem:[%s1796_s12 + $0x38] sm:$0xff]  ;;  %v1789_v48 = vld [vmem:[%s1787_s13 + $0x8] sm:$0xff]  ;;  %s7703_s23 = sld [smem:[#allocation113_spill]] (%p1774_p7)  ;;  %s7862_s25 = sld [smem:[#allocation115_spill]] (%p1774_p7) }
 0x655   : >> { %4831 = vrcp.f32 %v1801_v50  ;;  %v1800_v23 = vld [vmem:[%s1796_s12 + $0x18] sm:$0xff]  ;;  %v1788_v57 = vld [vmem:[%s1787_s13] sm:$0xff]  ;;  %v1793_v33 = vld [vmem:[%s1787_s13 + $0x28] sm:$0xff] }
 0x656   : >> { %4397 = vmatprep.subr.bf16.mxu0 %v4396_v15  ;;  %4548 = vmatprep.subr.bf16.mxu1 %v4396_v15  ;;  %4833 = vrcp.f32 %v1803_v18  ;;  %v1792_v36 = vld [vmem:[%s1787_s13 + $0x20] sm:$0xff]  ;;  %v1794_v60 = vld [vmem:[%s1787_s13 + $0x30] sm:$0xff]  ;;  %v1795_v8 = vld [vmem:[%s1787_s13 + $0x38] sm:$0xff] }
 0x657   : >> { %4399 = vmatpush3.bf16.msra.mxu0 %v4396_v15  ;;  %4550 = vmatpush3.bf16.msra.mxu1 %v4396_v15  ;;  %4835 = vrcp.f32 %v1799_v20  ;;  %v1790_v61 = vld [vmem:[%s1787_s13 + $0x10] sm:$0xff]  ;;  %v1791_v9 = vld [vmem:[%s1787_s13 + $0x18] sm:$0xff] }
 0x658   : >> { %4401 = vmatprep.subr.bf16.mxu0 %v4400_v19  ;;  %4549 = vmatprep.subr.bf16.mxu1 %v4400_v19  ;;  %4837 = vrcp.f32 %v1804_v21 }
 0x659   : >> { %4839 = vrcp.f32 %v1800_v23  ;;  %s7702_s12 = smov (%p1774_p7), %s7701_s15 }
 0x65b   : >> { %4403 = vmatpush3.bf16.msra.mxu0 %v4400_v19  ;;  %4551 = vmatpush3.bf16.msra.mxu1 %v4400_v19 }
 0x65c   : >> { %v4826_v44 = vpop.eup %4825 }
 0x65d   : >> { %v4828_v38 = vpop.eup %4827  ;;  %1820 = vperm.xlu1 %4824, %v4826_v44   ;;  %v3816_v44 = vld [vmem:[%s7562_s9] ss:$0 sm:$0xff] (%p1774_p7) }
 0x65e   : >> { %v4830_v34 = vpop.eup %4829  ;;  %1815 = vperm.xlu0 %4823, %v4828_v38  }
 0x65f   : >> { %v4832_v22 = vpop.eup %4831 }
 0x660   : >> { %v4834_v45 = vpop.eup %4833 }
 0x661   : >> { %1840 = vperm.xlu1 %4824, %v4830_v34   ;;  %v4836_v56 = vpop.eup %4835 }
 0x662   : >> { %1835 = vperm.xlu0 %4823, %v4832_v22   ;;  %v4838_v53 = vpop.eup %4837 }
 0x663   : >> { %v4840_v24 = vpop.eup %4839 }
 0x665   : >> { %1845 = vperm.xlu1 %4824, %v4834_v45  }
 0x666   : >> { %1825 = vperm.xlu0 %4823, %v4836_v56  }
 0x669   : >> { %1850 = vperm.xlu1 %4824, %v4838_v53   ;;  %v2077_v53 = vld [vmem:[%s7692_s27 + $0x8] sm:$0xff] (%p1774_p7) }
 0x66a   : >> { %1830 = vperm.xlu0 %4823, %v4840_v24  }
 0x6dc   : >> { %v1821_v39 = vpop.permute.xlu1 %1820 }
 0x6dd   : >> { %v1854_v28 = vmul.f32 %v1821_v39, %v1789_v48  ;;  %v1816_v29 = vpop.permute.xlu0 %1815  ;;  %v2089_v39 = vld [vmem:[%s7692_s27 + $0x68] sm:$0xff] (%p1774_p7) }
 0x6de   : >> { %v1853_v32 = vmul.f32 %v1816_v29, %v1788_v57  ;;  %v2091_v29 = vld [vmem:[%s7692_s27 + $0x78] sm:$0xff] (%p1774_p7) }
 0x6e0   : >> { %4248 = vmatprep.mubr.msk.f32.mxu0 %vm1216_vm2, %v1853_v32  ;;  %v1841_v52 = vpop.permute.xlu1 %1840 }
 0x6e1   : >> { %v1858_v11 = vmul.f32 %v1841_v52, %v1793_v33  ;;  %v1836_v40 = vpop.permute.xlu0 %1835  ;;  %4249 = vmatmul.mubr.msk.f32.vlgmr.msra.gmra.mrb[0].mxu0 %vm1216_vm2, %v1854_v28  ;;  %v2087_v28 = vld [vmem:[%s7692_s27 + $0x58] sm:$0xff] (%p1774_p7) }
 0x6e2   : >> { %v1857_v59 = vmul.f32 %v1836_v40, %v1792_v36  ;;  %v2084_v36 = vld [vmem:[%s7692_s27 + $0x40] sm:$0xff] (%p1774_p7) }
 0x6e4   : >> { %4254 = vmatprep.mubr.msk.f32.mxu1 %vm1216_vm2, %v1857_v59  ;;  %v1846_v63 = vpop.permute.xlu1 %1845  ;;  %v2088_v59 = vld [vmem:[%s7692_s27 + $0x60] sm:$0xff] (%p1774_p7) }
 0x6e5   : >> { %v1859_v26 = vmul.f32 %v1846_v63, %v1794_v60  ;;  %v1826_v27 = vpop.permute.xlu0 %1825  ;;  %4255 = vmatmul.mubr.msk.f32.vlgmr.msra.gmra.mrb[0].mxu1 %vm1216_vm2, %v1858_v11  ;;  %v2086_v60 = vld [vmem:[%s7692_s27 + $0x50] sm:$0xff] (%p1774_p7) }
 0x6e6   : >> { %v1855_v49 = vmul.f32 %v1826_v27, %v1790_v61  ;;  %v2090_v61 = vld [vmem:[%s7692_s27 + $0x70] sm:$0xff] (%p1774_p7)  ;;  %v4440_v27 = vpack.c.bf16 (%p1774_p7), %v2091_v29, %v2087_v28  ;;  %v2119_v28 = vld [vmem:[%s7692_s27 + $0x158] sm:$0xff] (%p1774_p7) }
 0x6e7   : >> { %4257 = vmatprep.mubr.msk.f32.mxu1 %vm1216_vm2, %v1859_v26 }
 0x6e8   : >> { %4251 = vmatprep.mubr.msk.f32.mxu0 %vm1216_vm2, %v1855_v49  ;;  %v1851_v25 = vpop.permute.xlu1 %1850  ;;  %v2093_v49 = vld [vmem:[%s7692_s27 + $0x88] sm:$0xff] (%p1774_p7) }
 0x6e9   : >> { %v1860_v30 = vmul.f32 %v1851_v25, %v1795_v8  ;;  %v1831_v10 = vpop.permute.xlu0 %1830  ;;  %v2097_v8 = vld [vmem:[%s7692_s27 + $0xa8] sm:$0xff] (%p1774_p7)  ;;  %v2099_v25 = vld [vmem:[%s7692_s27 + $0xb8] sm:$0xff] (%p1774_p7) }
 0x6ea   : >> { %v1856_v31 = vmul.f32 %v1831_v10, %v1791_v9  ;;  %v2095_v9 = vld [vmem:[%s7692_s27 + $0x98] sm:$0xff] (%p1774_p7)  ;;  %v4410_v10 = vpack.c.bf16 (%p1774_p7), %v2088_v59, %v2084_v36  ;;  %v2116_v36 = vld [vmem:[%s7692_s27 + $0x140] sm:$0xff] (%p1774_p7)  ;;  %v2118_v59 = vld [vmem:[%s7692_s27 + $0x150] sm:$0xff] (%p1774_p7) }
 0x6eb   : >> { %4258 = vmatmul.mubr.msk.f32.gmra.mrb[2].mxu1 %vm1216_vm2, %v1860_v30 }
 0x6ec   : >> { %4252 = vmatmul.mubr.msk.f32.gmra.mrb[2].mxu0 %vm1216_vm2, %v1856_v31  ;;  %v4442_v31 = vpack.c.bf16 (%p1774_p7), %v2090_v61, %v2086_v60  ;;  %v2122_v60 = vld [vmem:[%s7692_s27 + $0x170] sm:$0xff] (%p1774_p7)  ;;  %v2125_v61 = vld [vmem:[%s7692_s27 + $0x188] sm:$0xff] (%p1774_p7) }
 0x7b4   : >> { %v4250_v12 = vpop.f32.mrb[0].mxu0 }
 0x7b5   : >> { %v1998_v42 = vadd.f32 %v5239_v62, %v4250_v12   ;;  %v1958_v43 = vpop.f32.mrb[1].mxu0  ;;  %v2092_v12 = vld [vmem:[%s7692_s27 + $0x80] sm:$0xff] (%p1774_p7) }
 0x7b6   : >> { %v1997_v46 = vadd.f32 %v5243_v13, %v1958_v43  }
 0x7b7   : >> { %v7690_v62 = vmov %v1998_v42  ;;  %v2006_v38 = vadd.f32 (%p1774_p7), %v1998_v42, %v5502_v1  ;;  %v2079_v1 = vld [vmem:[%s7692_s27 + $0x18] sm:$0xff] (%p1774_p7) }
 0x7b8   : >> { %v4256_v47 = vpop.f32.mrb[0].mxu1  ;;  %v7691_v13 = vmov %v1997_v46 }
 0x7b9   : >> { %v2002_v50 = vadd.f32 %v5223_v17, %v4256_v47   ;;  %v1978_v51 = vpop.f32.mrb[1].mxu1  ;;  %v2005_v13 = vadd.f32 (%p1774_p7), %v1997_v46, %v5500_v0  ;;  %v2081_v0 = vld [vmem:[%s7692_s27 + $0x28] sm:$0xff] (%p1774_p7)  ;;  %v2096_v47 = vld [vmem:[%s7692_s27 + $0xa0] sm:$0xff] (%p1774_p7) }
 0x7ba   : >> { %v2001_v54 = vadd.f32 %v5227_v35, %v1978_v51   ;;  %v4404_v52 = vpack.c.bf16 (%p1774_p7), %v2081_v0, %v2077_v53  ;;  %v2098_v51 = vld [vmem:[%s7692_s27 + $0xb0] sm:$0xff] (%p1774_p7)  ;;  %v2113_v0 = vld [vmem:[%s7692_s27 + $0x128] sm:$0xff] (%p1774_p7) }
 0x7bb   : >> { %v7686_v17 = vmov %v2002_v50  ;;  %v2010_v56 = vadd.f32 (%p1774_p7), %v2002_v50, %v5510_v5  ;;  %v2083_v5 = vld [vmem:[%s7692_s27 + $0x38] sm:$0xff] (%p1774_p7)  ;;  %v2094_v50 = vld [vmem:[%s7692_s27 + $0x90] sm:$0xff] (%p1774_p7) }
 0x7bc   : >> { %v7687_v35 = vmov %v2001_v54  ;;  %v2009_v45 = vadd.f32 (%p1774_p7), %v2001_v54, %v5508_v4  ;;  %v2080_v17 = vld [vmem:[%s7692_s27 + $0x20] sm:$0xff] (%p1774_p7)  ;;  %v4436_v11 = vpack.c.bf16 (%p1774_p7), %v2083_v5, %v2079_v1  ;;  %4405 = vmatprep.subr.bf16.mxu0 (%p1774_p7), %v4404_v52  ;;  %v4412_v54 = vpack.c.bf16 (%p1774_p7), %v2097_v8, %v2093_v49  ;;  %v2111_v1 = vld [vmem:[%s7692_s27 + $0x118] sm:$0xff] (%p1774_p7) }
 0x7bd   : > { %1776 = sbr.rel (!%p1774_p7) target bundleno = 1615 (0x64f), region = 188  ;;  %v2078_v35 = vld [vmem:[%s7692_s27 + $0x10] sm:$0xff] (%p1774_p7)  ;;  %v2115_v5 = vld [vmem:[%s7692_s27 + $0x138] sm:$0xff] (%p1774_p7)  ;;  %v4458_v49 = vpack.c.bf16 (%p1774_p7), %v2122_v60, %v2118_v59 }
 0x7be   : >> { %v4259_v55 = vpop.f32.mrb[2].mxu1  ;;  %v6260_v33 = vadd.f32 (%p1774_p7), %v3816_v44, %v2009_v45  ;;  %4437 = vmatprep.subr.bf16.mxu1 (%p1774_p7), %v4436_v11  ;;  %v2109_v45 = vld [vmem:[%s7692_s27 + $0x108] sm:$0xff] (%p1774_p7)  ;;  %v2131_v8 = vld [vmem:[%s7692_s27 + $0x1b8] sm:$0xff] (%p1774_p7) }
 0x7bf   : >> { %v4253_v16 = vpop.f32.mrb[2].mxu0  ;;  %v2004_v18 = vadd.f32 %v5215_v14, %v4259_v55   ;;  %v1988_v15 = vpop.f32.mrb[3].mxu1  ;;  %v4444_v55 = vpack.c.bf16 (%p1774_p7), %v2099_v25, %v2095_v9  ;;  %v2124_v9 = vld [vmem:[%s7692_s27 + $0x180] sm:$0xff] (%p1774_p7) }
 0x7c0   : >> { %v2000_v19 = vadd.f32 %v5231_v37, %v4253_v16   ;;  %v1968_v20 = vpop.f32.mrb[3].mxu0  ;;  %v2003_v21 = vadd.f32 %v5219_v58, %v1988_v15   ;;  %7697 = vst [vmem:[#allocation31_spill] sm:$0xff] (%p1774_p7), %v6260_v33  ;;  %v2032_v42 = vmul.f32 (%p1774_p7), %v6260_v33, %v6260_v33  ;;  %v2101_v16 = vld [vmem:[%s7692_s27 + $0xc8] sm:$0xff] (%p1774_p7)  ;;  %v2103_v15 = vld [vmem:[%s7692_s27 + $0xd8] sm:$0xff] (%p1774_p7)  ;;  %v2128_v25 = vld [vmem:[%s7692_s27 + $0x1a0] sm:$0xff] (%p1774_p7) }
 0x7c1   : >> { %v1999_v23 = vadd.f32 %v5235_v41, %v1968_v20   ;;  %v7684_v14 = vmov %v2004_v18  ;;  %v2012_v57 = vadd.f32 (%p1774_p7), %v2004_v18, %v5514_v7  ;;  %v6262_v7 = vadd.f32 (%p1774_p7), %v3816_v44, %v2010_v56  ;;  %v2105_v18 = vld [vmem:[%s7692_s27 + $0xe8] sm:$0xff] (%p1774_p7) }
 0x7c2   : >> { %v7685_v58 = vmov %v2003_v21  ;;  %v7688_v37 = vmov %v2000_v19  ;;  %v2008_v22 = vadd.f32 (%p1774_p7), %v2000_v19, %v5506_v3  ;;  %v6215_v14 = vadd.f32 (%p1774_p7), %v3816_v44, %v2005_v13  ;;  %v2107_v19 = vld [vmem:[%s7692_s27 + $0xf8] sm:$0xff] (%p1774_p7)  ;;  %v2104_v13 = vld [vmem:[%s7692_s27 + $0xe0] sm:$0xff] (%p1774_p7) }
 0x7c3   : >> { %v7689_v41 = vmov %v1999_v23  ;;  %v2007_v34 = vadd.f32 (%p1774_p7), %v1999_v23, %v5504_v2  ;;  %v6217_v2 = vadd.f32 (%p1774_p7), %v3816_v44, %v2006_v38  ;;  %v2076_v58 = vld [vmem:[%s7692_s27] sm:$0xff] (%p1774_p7)  ;;  %v2082_v37 = vld [vmem:[%s7692_s27 + $0x30] sm:$0xff] (%p1774_p7)  ;;  %v2011_v48 = vadd.f32 (%p1774_p7), %v2003_v21, %v5512_v6  ;;  %7698 = vst [vmem:[#allocation32_spill] sm:$0xff] (%p1774_p7), %v6262_v7 }
 0x7c4   : > { %7693 = vst [vmem:[#allocation27_spill] sm:$0xff] %v6215_v14  ;;  %v6221_v4 = vadd.f32 %v3816_v44, %v2008_v22  ;;  %v2085_v41 = vld [vmem:[%s7692_s27 + $0x48] sm:$0xff]  ;;  %v2028_v62 = vmul.f32 %v6215_v14, %v6215_v14  ;;  %v4406_v40 = vpack.c.bf16 %v2080_v17, %v2076_v58  ;;  %v4438_v63 = vpack.c.bf16 %v2082_v37, %v2078_v35  ;;  %v2100_v23 = vld [vmem:[%s7692_s27 + $0xc0] sm:$0xff]  ;;  %v2106_v22 = vld [vmem:[%s7692_s27 + $0xf0] sm:$0xff] }
 0x7c5   : > { %7694 = vst [vmem:[#allocation28_spill] sm:$0xff] %v6217_v2  ;;  %v6219_v3 = vadd.f32 %v3816_v44, %v2007_v34  ;;  %v2029_v32 = vmul.f32 %v6217_v2, %v6217_v2  ;;  %v4408_v26 = vpack.c.bf16 %v2089_v39, %v2085_v41  ;;  %v6288_v30 = vadd.f32 %v3816_v44, %v2011_v48  ;;  %v2102_v34 = vld [vmem:[%s7692_s27 + $0xd0] sm:$0xff]  ;;  %v2108_v35 = vld [vmem:[%s7692_s27 + $0x100] sm:$0xff]  ;;  %v2121_v39 = vld [vmem:[%s7692_s27 + $0x168] sm:$0xff] }
 0x7c6   : > { %7696 = vst [vmem:[#allocation30_spill] sm:$0xff] %v6221_v4  ;;  %v2031_v6 = vmul.f32 %v6221_v4, %v6221_v4  ;;  %2036 = vadd.xlane.f32.xlu0 %v2028_v62  ;;  %4407 = vmatpush1.bf16.msra.mxu0 %v4406_v40  ;;  %v2033_v43 = vmul.f32 %v6262_v7, %v6262_v7  ;;  %v2112_v62 = vld [vmem:[%s7692_s27 + $0x120] sm:$0xff]  ;;  %v2114_v48 = vld [vmem:[%s7692_s27 + $0x130] sm:$0xff] }
 0x7c7   : > { %7695 = vst [vmem:[#allocation29_spill] sm:$0xff] %v6219_v3  ;;  %v2030_v24 = vmul.f32 %v6219_v3, %v6219_v3  ;;  %7699 = vst [vmem:[#allocation33_spill] sm:$0xff] %v6288_v30  ;;  %4439 = vmatpush1.bf16.msra.mxu1 %v4438_v63  ;;  %v6297_v46 = vadd.f32 %v3816_v44, %v2012_v57  ;;  %4409 = vmatprep.subr.bf16.mxu0 %v4408_v26  ;;  %v2117_v57 = vld [vmem:[%s7692_s27 + $0x148] sm:$0xff]  ;;  %v2120_v40 = vld [vmem:[%s7692_s27 + $0x160] sm:$0xff] }
 0x7c8   : > { %4441 = vmatprep.subr.bf16.mxu1 %v4440_v27  ;;  %v4414_v20 = vpack.c.bf16 %v2096_v47, %v2092_v12  ;;  %v4446_v21 = vpack.c.bf16 %v2098_v51, %v2094_v50  ;;  %v2034_v44 = vmul.f32 %v6288_v30, %v6288_v30  ;;  %v4416_v56 = vpack.c.bf16 %v2105_v18, %v2101_v16  ;;  %v2129_v63 = vld [vmem:[%s7692_s27 + $0x1a8] sm:$0xff]  ;;  %v2127_v26 = vld [vmem:[%s7692_s27 + $0x198] sm:$0xff]  ;;  %v2126_v12 = vld [vmem:[%s7692_s27 + $0x190] sm:$0xff] }
 0x7c9   : > { %2040 = vadd.xlane.f32.xlu1 %v2030_v24  ;;  %7700 = vst [vmem:[#allocation34_spill] sm:$0xff] %v6297_v46  ;;  %v2035_v38 = vmul.f32 %v6297_v46, %v6297_v46  ;;  %v4448_v53 = vpack.c.bf16 %v2107_v19, %v2103_v15  ;;  %v4418_v58 = vpack.c.bf16 %v2104_v13, %v2100_v23  ;;  %v2110_v24 = vld [vmem:[%s7692_s27 + $0x110] sm:$0xff]  ;;  %v2137_v47 = vld [vmem:[%s7692_s27 + $0x1e8] sm:$0xff]  ;;  %v2135_v50 = vld [vmem:[%s7692_s27 + $0x1d8] sm:$0xff] }
 0x7ca   : > { %2038 = vadd.xlane.f32.xlu0 %v2029_v32  ;;  %4411 = vmatpush1.bf16.msra.mxu0 %v4410_v10  ;;  %v4450_v17 = vpack.c.bf16 %v2106_v22, %v2102_v34  ;;  %v4420_v37 = vpack.c.bf16 %v2113_v0, %v2109_v45  ;;  %v4452_v41 = vpack.c.bf16 %v2115_v5, %v2111_v1  ;;  %v2139_v51 = vld [vmem:[%s7692_s27 + $0x1f8] sm:$0xff]  ;;  %v2132_v18 = vld [vmem:[%s7692_s27 + $0x1c0] sm:$0xff]  ;;  %v2138_v23 = vld [vmem:[%s7692_s27 + $0x1f0] sm:$0xff] }
 0x7cb   : > { %4443 = vmatpush1.bf16.msra.mxu1 %v4442_v31  ;;  %4413 = vmatprep.subr.bf16.mxu0 %v4412_v54  ;;  %v4422_v29 = vpack.c.bf16 %v2112_v62, %v2108_v35  ;;  %v4454_v32 = vpack.c.bf16 %v2114_v48, %v2110_v24  ;;  %v4424_v52 = vpack.c.bf16 %v2121_v39, %v2117_v57  ;;  %v5257_v54 = vmov 0.0  }
 0x7cc   : > { %4445 = vmatprep.subr.bf16.mxu1 %v4444_v55  ;;  %v4426_v27 = vpack.c.bf16 %v2120_v40, %v2116_v36  ;;  %v4428_v10 = vpack.c.bf16 %v2129_v63, %v2125_v61  ;;  %v4460_v31 = vpack.c.bf16 %v2131_v8, %v2127_v26  ;;  %2226 = vmatprep.mubr.f32.mxu0 %v5257_v54 }
 0x7cd   : > { %2042 = vadd.xlane.f32.xlu1 %v2031_v6  ;;  %v2123_v6 = vld [vmem:[%s7692_s27 + $0x178] sm:$0xff]  ;;  %2339 = vmatprep.mubr.f32.mxu1 %v5257_v54  ;;  %v4430_v55 = vpack.c.bf16 %v2128_v25, %v2124_v9  ;;  %v4464_v19 = vpack.c.bf16 %v2139_v51, %v2135_v50  ;;  %v3300_v9 = vld [vmem:[%s7702_s12 + $0x180] sm:$0xff]  ;;  %v3301_v25 = vld [vmem:[%s7702_s12 + $0x188] sm:$0xff] }
 0x7ce   : > { %2044 = vadd.xlane.f32.xlu0 %v2032_v42  ;;  %4415 = vmatpush1.bf16.msra.mxu0 %v4414_v20  ;;  %v4456_v11 = vpack.c.bf16 %v2123_v6, %v2119_v28  ;;  %v2130_v42 = vld [vmem:[%s7692_s27 + $0x1b0] sm:$0xff]  ;;  %v2136_v20 = vld [vmem:[%s7692_s27 + $0x1e0] sm:$0xff] }
 0x7cf   : > { %4447 = vmatpush1.bf16.msra.mxu1 %v4446_v21  ;;  %4417 = vmatprep.subr.bf16.mxu0 %v4416_v56  ;;  %v4462_v16 = vpack.c.bf16 %v2130_v42, %v2126_v12  ;;  %v2134_v21 = vld [vmem:[%s7692_s27 + $0x1d0] sm:$0xff]  ;;  %v4434_v13 = vpack.c.bf16 %v2136_v20, %v2132_v18  ;;  %v4500_v12 = vpack.c.bf16 %v3301_v25, %v3300_v9  ;;  %v3284_v42 = vld [vmem:[%s7702_s12 + $0x100] sm:$0xff]  ;;  %v3303_v18 = vld [vmem:[%s7702_s12 + $0x198] sm:$0xff] }
 0x7d0   : > { %4449 = vmatprep.subr.bf16.mxu1 %v4448_v53  ;;  %v3270_v51 = vld [vmem:[%s7702_s12 + $0x90] sm:$0xff] }
 0x7d1   : > { %2046 = vadd.xlane.f32.xlu1 %v2033_v43  ;;  %v2133_v43 = vld [vmem:[%s7692_s27 + $0x1c8] sm:$0xff]  ;;  %v3278_v25 = vld [vmem:[%s7702_s12 + $0xd0] sm:$0xff] }
 0x7d2   : > { %2048 = vadd.xlane.f32.xlu0 %v2034_v44  ;;  %4419 = vmatpush1.bf16.msra.mxu0 %v4418_v58  ;;  %v4432_v15 = vpack.c.bf16 %v2137_v47, %v2133_v43  ;;  %v4466_v44 = vpack.c.bf16 %v2138_v23, %v2134_v21  ;;  %v3285_v47 = vld [vmem:[%s7702_s12 + $0x108] sm:$0xff]  ;;  %v3286_v21 = vld [vmem:[%s7702_s12 + $0x110] sm:$0xff] }
 0x7d3   : > { %4451 = vmatpush1.bf16.msra.mxu1 %v4450_v17  ;;  %4421 = vmatprep.subr.bf16.mxu0 %v4420_v37  ;;  %v4502_v50 = vpack.c.bf16 %v3285_v47, %v3284_v42  ;;  %v3262_v42 = vld [vmem:[%s7702_s12 + $0x50] sm:$0xff]  ;;  %v3311_v47 = vld [vmem:[%s7702_s12 + $0x1d8] sm:$0xff] }
 0x7d4   : > { %4453 = vmatprep.subr.bf16.mxu1 %v4452_v41 }
 0x7d5   : > { %2050 = vadd.xlane.f32.xlu1 %v2035_v38 }
 0x7d6   : > { %4423 = vmatpush1.bf16.msra.mxu0 %v4422_v29 }
 0x7d7   : > { %4455 = vmatpush1.bf16.msra.mxu1 %v4454_v32  ;;  %4425 = vmatprep.subr.bf16.mxu0 %v4424_v52 }
 0x7d8   : > { %4457 = vmatprep.subr.bf16.mxu1 %v4456_v11 }
 0x7da   : > { %4427 = vmatpush1.bf16.msra.mxu0 %v4426_v27  ;;  %v3268_v27 = vld [vmem:[%s7701_s15 + $0x80] sm:$0xff] }
 0x7db   : > { %4459 = vmatpush1.bf16.msra.mxu1 %v4458_v49  ;;  %4429 = vmatprep.subr.bf16.mxu0 %v4428_v10  ;;  %v3269_v49 = vld [vmem:[%s7702_s12 + $0x88] sm:$0xff]  ;;  %v3252_v10 = vld [vmem:[%s7702_s12] sm:$0xff] }
 0x7dc   : > { %4461 = vmatprep.subr.bf16.mxu1 %v4460_v31  ;;  %v4468_v8 = vpack.c.bf16 %v3269_v49, %v3268_v27  ;;  %v3253_v31 = vld [vmem:[%s7702_s12 + $0x8] sm:$0xff]  ;;  %v3292_v49 = vld [vmem:[%s7702_s12 + $0x140] sm:$0xff] }
 0x7dd   : > { %v4470_v43 = vpack.c.bf16 %v3253_v31, %v3252_v10  ;;  %v3279_v10 = vld [vmem:[%s7702_s12 + $0xd8] sm:$0xff]  ;;  %v3310_v31 = vld [vmem:[%s7702_s12 + $0x1d0] sm:$0xff] }
 0x7de   : > { %4431 = vmatpush1.bf16.msra.mxu0 %v4430_v55 }
 0x7df   : > { %4463 = vmatpush1.bf16.msra.mxu1 %v4462_v16  ;;  %4433 = vmatprep.subr.bf16.mxu0 %v4432_v15  ;;  %v3302_v16 = vld [vmem:[%s7702_s12 + $0x190] sm:$0xff] }
 0x7e0   : > { %4465 = vmatprep.subr.bf16.mxu1 %v4464_v19  ;;  %v3254_v15 = vld [vmem:[%s7702_s12 + $0x10] sm:$0xff]  ;;  %v3255_v19 = vld [vmem:[%s7702_s12 + $0x18] sm:$0xff]  ;;  %v4504_v20 = vpack.c.bf16 %v3303_v18, %v3302_v16  ;;  %v3280_v18 = vld [vmem:[%s7702_s12 + $0xe0] sm:$0xff] }
 0x7e1   : > { %v4474_v23 = vpack.c.bf16 %v3255_v19, %v3254_v15  ;;  %v3281_v15 = vld [vmem:[%s7702_s12 + $0xe8] sm:$0xff]  ;;  %v3264_v19 = vld [vmem:[%s7702_s12 + $0x60] sm:$0xff] }
 0x7e2   : > { %4435 = vmatpush1.bf16.msra.mxu0 %v4434_v13  ;;  %v3287_v13 = vld [vmem:[%s7702_s12 + $0x118] sm:$0xff] }
 0x7e3   : > { %4467 = vmatpush1.bf16.msra.mxu1 %v4466_v44  ;;  %4469 = vmatprep.subr.bf16.mxu0 %v4468_v8  ;;  %v4506_v44 = vpack.c.bf16 %v3287_v13, %v3286_v21  ;;  %v3293_v8 = vld [vmem:[%s7702_s12 + $0x148] sm:$0xff] }
 0x7e4   : > { %4501 = vmatprep.subr.bf16.mxu1 %v4500_v12  ;;  %v4518_v9 = vpack.c.bf16 %v3293_v8, %v3292_v49  ;;  %v4488_v12 = vpack.c.bf16 %v3279_v10, %v3278_v25  ;;  %v3265_v21 = vld [vmem:[%s7702_s12 + $0x68] sm:$0xff] }
 0x7e5   : > { %v3313_v13 = vld [vmem:[%s7702_s12 + $0x1e8] sm:$0xff] }
 0x853   : > { %v2037_v38 = vpop.xlane.xlu0 %2036 }
 0x854   : > { %v2052_v22 = vmax.f32 %v2037_v38, 1e-24  ;;  %v3272_v38 = vld [vmem:[%s7702_s12 + $0xa0] sm:$0xff] }
 0x856   : > { %v2041_v34 = vpop.xlane.xlu1 %2040  ;;  %4841 = vrsqrt.f32 %v2052_v22 }
 0x857   : > { %v2054_v45 = vmax.f32 %v2041_v34, 1e-24  ;;  %v2039_v56 = vpop.xlane.xlu0 %2038  ;;  %v3273_v34 = vld [vmem:[%s7702_s12 + $0xa8] sm:$0xff] }
 0x858   : > { %v2053_v0 = vmax.f32 %v2039_v56, 1e-24  ;;  %v4476_v22 = vpack.c.bf16 %v3273_v34, %v3272_v38  ;;  %v3305_v56 = vld [vmem:[%s7702_s12 + $0x1a8] sm:$0xff]  ;;  %v3296_v34 = vld [vmem:[%s7702_s12 + $0x160] sm:$0xff] }
 0x859   : > { %4843 = vrsqrt.f32 %v2054_v45  ;;  %v3304_v45 = vld [vmem:[%s7702_s12 + $0x1a0] sm:$0xff] }
 0x85a   : > { %v2043_v53 = vpop.xlane.xlu1 %2042  ;;  %4845 = vrsqrt.f32 %v2053_v0  ;;  %v3257_v0 = vld [vmem:[%s7702_s12 + $0x28] sm:$0xff] }
 0x85b   : > { %v2055_v1 = vmax.f32 %v2043_v53, 1e-24  ;;  %v2045_v5 = vpop.xlane.xlu0 %2044  ;;  %v3256_v53 = vld [vmem:[%s7702_s12 + $0x20] sm:$0xff] }
 0x85c   : > { %v2056_v58 = vmax.f32 %v2045_v5, 1e-24  ;;  %v3288_v5 = vld [vmem:[%s7702_s12 + $0x120] sm:$0xff] }
 0x85d   : > { %4847 = vrsqrt.f32 %v2055_v1  ;;  %v4508_v1 = vpack.c.bf16 %v3305_v56, %v3304_v45  ;;  %v3282_v45 = vld [vmem:[%s7702_s12 + $0xf0] sm:$0xff]  ;;  %v2142_v56 = vlaneseq }
 0x85e   : > { %v2047_v17 = vpop.xlane.xlu1 %2046  ;;  %4849 = vrsqrt.f32 %v2056_v58  ;;  %v4478_v58 = vpack.c.bf16 %v3257_v0, %v3256_v53  ;;  %v3283_v0 = vld [vmem:[%s7702_s12 + $0xf8] sm:$0xff] }
 0x85f   : > { %v2057_v41 = vmax.f32 %v2047_v17, 1e-24  ;;  %v2049_v24 = vpop.xlane.xlu0 %2048  ;;  %v3289_v17 = vld [vmem:[%s7702_s12 + $0x128] sm:$0xff] }
 0x860   : > { %v4842_v35 = vpop.eup %4841  ;;  %v2058_v39 = vmax.f32 %v2049_v24, 1e-24 }
 0x861   : > { %v2068_v37 = vmul.f32 %v4842_v35, %v6215_v14  ;;  %4851 = vrsqrt.f32 %v2057_v41  ;;  %v4510_v35 = vpack.c.bf16 %v3289_v17, %v3288_v5  ;;  %v3275_v41 = vld [vmem:[%s7702_s12 + $0xb8] sm:$0xff] }
 0x862   : > { %v2051_v29 = vpop.xlane.xlu1 %2050  ;;  %4853 = vrsqrt.f32 %v2058_v39  ;;  %v3307_v39 = vld [vmem:[%s7702_s12 + $0x1b8] sm:$0xff] }
 0x863   : > { %v4844_v62 = vpop.eup %4843  ;;  %2227 = vmatmul.mubr.f32.vlgmr.msra.gmra.mrb[0].mxu0 %v2068_v37  ;;  %2340 = vmatmul.mubr.f32.vlgmr.msra.gmra.mrb[0].mxu1 %v2068_v37  ;;  %v2059_v6 = vmax.f32 %v2051_v29, 1e-24  ;;  %v3274_v37 = vld [vmem:[%s7702_s12 + $0xb0] sm:$0xff]  ;;  %v3267_v5 = vld [vmem:[%s7702_s12 + $0x78] sm:$0xff] }
 0x864   : > { %v4846_v48 = vpop.eup %4845  ;;  %2232 = vmatprep.mubr.f32.mxu0 %v5257_v54  ;;  %2345 = vmatprep.mubr.f32.mxu1 %v5257_v54  ;;  %v2070_v28 = vmul.f32 %v4844_v62, %v6219_v3  ;;  %v3306_v62 = vld [vmem:[%s7702_s12 + $0x1b0] sm:$0xff]  ;;  %v4480_v24 = vpack.c.bf16 %v3275_v41, %v3274_v37  ;;  %v3315_v37 = vld [vmem:[%s7702_s12 + $0x1f8] sm:$0xff] }
 0x865   : > { %v2069_v57 = vmul.f32 %v4846_v48, %v6217_v2  ;;  %4855 = vrsqrt.f32 %v2059_v6  ;;  %4471 = vmatpush3.bf16.msra.mxu0 %v4470_v43  ;;  %4503 = vmatpush3.bf16.msra.mxu1 %v4502_v50  ;;  %v3258_v48 = vld [vmem:[%s7702_s12 + $0x30] sm:$0xff]  ;;  %v4512_v29 = vpack.c.bf16 %v3307_v39, %v3306_v62  ;;  %v3291_v6 = vld [vmem:[%s7702_s12 + $0x138] sm:$0xff] }
 0x866   : > { %4505 = vmatprep.subr.bf16.mxu1 %v4504_v20  ;;  %v3263_v43 = vld [vmem:[%s7702_s12 + $0x58] sm:$0xff]  ;;  %v4492_v20 = vpack.c.bf16 %v3281_v15, %v3280_v18  ;;  %v3298_v41 = vld [vmem:[%s7702_s12 + $0x170] sm:$0xff] }
 0x867   : > { %2233 = vmatmul.mubr.f32.gmra.mrb[2].mxu0 %v2069_v57  ;;  %2346 = vmatmul.mubr.f32.gmra.mrb[2].mxu1 %v2069_v57  ;;  %v4848_v32 = vpop.eup %4847  ;;  %v3259_v57 = vld [vmem:[%s7702_s12 + $0x38] sm:$0xff]  ;;  %v4490_v50 = vpack.c.bf16 %v3263_v43, %v3262_v42 }
 0x868   : > { %2238 = vmatprep.mubr.f32.mxu0 %v5257_v54  ;;  %2351 = vmatprep.mubr.f32.mxu1 %v5257_v54  ;;  %v2071_v36 = vmul.f32 %v4848_v32, %v6221_v4  ;;  %v4850_v52 = vpop.eup %4849  ;;  %v3290_v32 = vld [vmem:[%s7702_s12 + $0x130] sm:$0xff] }
 0x869   : > { %v2072_v11 = vmul.f32 %v4850_v52, %v6260_v33  ;;  %4507 = vmatpush3.bf16.msra.mxu1 %v4506_v44  ;;  %v3276_v52 = vld [vmem:[%s7702_s12 + $0xc0] sm:$0xff]  ;;  %v4494_v44 = vpack.c.bf16 %v3265_v21, %v3264_v19 }
 0x86a   : > { %4509 = vmatprep.subr.bf16.mxu1 %v4508_v1  ;;  %v3266_v1 = vld [vmem:[%s7702_s12 + $0x70] sm:$0xff] }
 0x86b   : > { %2239 = vmatmul.mubr.f32.gmra.mrb[4].mxu0 %v2070_v28  ;;  %2352 = vmatmul.mubr.f32.gmra.mrb[4].mxu1 %v2070_v28  ;;  %v4852_v40 = vpop.eup %4851  ;;  %v4482_v28 = vpack.c.bf16 %v3259_v57, %v3258_v48  ;;  %v4498_v17 = vpack.c.bf16 %v3267_v5, %v3266_v1  ;;  %v2143_v57 = vshrl.u32 %v2142_v56, 7 }
 0x86c   : > { %2244 = vmatprep.mubr.f32.mxu0 %v5257_v54  ;;  %2357 = vmatprep.mubr.f32.mxu1 %v5257_v54  ;;  %v2073_v59 = vmul.f32 %v4852_v40, %v6262_v7  ;;  %v4854_v60 = vpop.eup %4853  ;;  %v3308_v40 = vld [vmem:[%s7702_s12 + $0x1c0] sm:$0xff] }
 0x86d   : > { %v2074_v61 = vmul.f32 %v4854_v60, %v6288_v30  ;;  %4511 = vmatpush3.bf16.msra.mxu1 %v4510_v35  ;;  %v3260_v60 = vld [vmem:[%s7702_s12 + $0x40] sm:$0xff]  ;;  %v3314_v35 = vld [vmem:[%s7702_s12 + $0x1f0] sm:$0xff]  ;;  %v2144_v39 = vsub.s32 0, %v2143_v57 }
 0x86e   : > { %4513 = vmatprep.subr.bf16.mxu1 %v4512_v29  ;;  %v4528_v62 = vpack.c.bf16 %v3315_v37, %v3314_v35  ;;  %v2140_v29 = vld [vmem:[%s7703_s23] sm:$0xf] }
 0x86f   : > { %2245 = vmatmul.mubr.f32.gmra.mrb[6].mxu0 %v2071_v36  ;;  %2358 = vmatmul.mubr.f32.gmra.mrb[6].mxu1 %v2071_v36  ;;  %v4856_v63 = vpop.eup %4855  ;;  %v4514_v36 = vpack.c.bf16 %v3291_v6, %v3290_v32  ;;  %v6651_v32 = vrot.slane %v2140_v29, %v2144_v39 }
 0x870   : > { %2250 = vmatprep.mubr.f32.mxu0 %v5257_v54  ;;  %2363 = vmatprep.mubr.f32.mxu1 %v5257_v54  ;;  %v2075_v26 = vmul.f32 %v4856_v63, %v6297_v46  ;;  %v3309_v63 = vld [vmem:[%s7702_s12 + $0x1c8] sm:$0xff] }
 0x871   : > { %4515 = vmatpush3.bf16.msra.mxu1 %v4514_v36  ;;  %v4516_v27 = vpack.c.bf16 %v3309_v63, %v3308_v40  ;;  %v2148_v36 = vsub.s32 1, %v2143_v57 }
 0x873   : > { %2251 = vmatmul.mubr.f32.gmra.mrb[8].mxu0 %v2072_v11  ;;  %2364 = vmatmul.mubr.f32.gmra.mrb[8].mxu1 %v2072_v11  ;;  %v3277_v11 = vld [vmem:[%s7702_s12 + $0xc8] sm:$0xff] }
 0x874   : > { %2256 = vmatprep.mubr.f32.mxu0 %v5257_v54  ;;  %2369 = vmatprep.mubr.f32.mxu1 %v5257_v54 }
 0x875   : > { %4517 = vmatprep.subr.bf16.mxu1 %v4516_v27 }
 0x876   : > { %4519 = vmatpush3.bf16.msra.mxu1 %v4518_v9 }
 0x877   : > { %2257 = vmatmul.mubr.f32.gmra.mrb[10].mxu0 %v2073_v59  ;;  %2370 = vmatmul.mubr.f32.gmra.mrb[10].mxu1 %v2073_v59  ;;  %v4484_v59 = vpack.c.bf16 %v3277_v11, %v3276_v52 }
 0x878   : > { %2262 = vmatprep.mubr.f32.mxu0 %v5257_v54  ;;  %2375 = vmatprep.mubr.f32.mxu1 %v5257_v54 }
 0x87b   : > { %2263 = vmatmul.mubr.f32.gmra.mrb[12].mxu0 %v2074_v61  ;;  %2376 = vmatmul.mubr.f32.gmra.mrb[12].mxu1 %v2074_v61  ;;  %v3261_v61 = vld [vmem:[%s7702_s12 + $0x48] sm:$0xff] }
 0x87c   : > { %2268 = vmatprep.mubr.f32.mxu0 %v5257_v54  ;;  %2381 = vmatprep.mubr.f32.mxu1 %v5257_v54  ;;  %v3271_v54 = vld [vmem:[%s7702_s12 + $0x98] sm:$0xff] }
 0x87d   : > { %v4472_v55 = vpack.c.bf16 %v3271_v54, %v3270_v51  ;;  %v4520_v51 = vpack.c.bf16 %v3311_v47, %v3310_v31  ;;  %v3294_v54 = vld [vmem:[%s7702_s12 + $0x150] sm:$0xff] }
 0x87f   : > { %2269 = vmatmul.mubr.f32.gmra.mrb[14].mxu0 %v2075_v26  ;;  %2382 = vmatmul.mubr.f32.gmra.mrb[14].mxu1 %v2075_v26  ;;  %v4486_v26 = vpack.c.bf16 %v3261_v61, %v3260_v60  ;;  %v2156_v61 = vsub.s32 3, %v2143_v57 }
 0x880   : > { %4473 = vmatprep.subr.bf16.mxu0 %v4472_v55  ;;  %v3295_v55 = vld [vmem:[%s7702_s12 + $0x158] sm:$0xff]  ;;  %4521 = vmatprep.subr.bf16.mxu1 %v4520_v51 }
 0x881   : > { %4475 = vmatpush3.bf16.msra.mxu0 %v4474_v23  ;;  %v4522_v16 = vpack.c.bf16 %v3295_v55, %v3294_v54  ;;  %v3312_v23 = vld [vmem:[%s7702_s12 + $0x1e0] sm:$0xff]  ;;  %v6665_v25 = vrot.slane %v2140_v29, %v2156_v61 }
 0x882   : > { %4477 = vmatprep.subr.bf16.mxu0 %v4476_v22  ;;  %v4524_v38 = vpack.c.bf16 %v3313_v13, %v3312_v23  ;;  %v3297_v22 = vld [vmem:[%s7702_s12 + $0x168] sm:$0xff] }
 0x883   : > { %4523 = vmatpush3.bf16.msra.mxu1 %v4522_v16  ;;  %v4526_v53 = vpack.c.bf16 %v3297_v22, %v3296_v34 }
 0x884   : > { %4525 = vmatprep.subr.bf16.mxu1 %v4524_v38 }
 0x885   : > { %4479 = vmatpush3.bf16.msra.mxu0 %v4478_v58  ;;  %v4496_v58 = vpack.c.bf16 %v3283_v0, %v3282_v45 }
 0x886   : > { %4481 = vmatprep.subr.bf16.mxu0 %v4480_v24  ;;  %v3299_v24 = vld [vmem:[%s7702_s12 + $0x178] sm:$0xff] }
 0x887   : > { %4527 = vmatpush3.bf16.msra.mxu1 %v4526_v53  ;;  %v4530_v48 = vpack.c.bf16 %v3299_v24, %v3298_v41 }
 0x888   : > { %4529 = vmatprep.subr.bf16.mxu1 %v4528_v62 }
 0x889   : > { %4483 = vmatpush3.bf16.msra.mxu0 %v4482_v28  ;;  %v2152_v28 = vsub.s32 2, %v2143_v57 }
 0x88a   : > { %4485 = vmatprep.subr.bf16.mxu0 %v4484_v59 }
 0x88b   : > { %4531 = vmatpush3.bf16.msra.mxu1 %v4530_v48  ;;  %v6653_v6 = vrot.slane %v2140_v29, %v2152_v28 }
 0x88d   : > { %4487 = vmatpush3.bf16.msra.mxu0 %v4486_v26  ;;  %v6657_v26 = vrot.slane %v2140_v29, %v2148_v36 }
 0x88e   : > { %4489 = vmatprep.subr.bf16.mxu0 %v4488_v12 }
 0x891   : > { %4491 = vmatpush3.bf16.msra.mxu0 %v4490_v50 }
 0x892   : > { %4493 = vmatprep.subr.bf16.mxu0 %v4492_v20 }
 0x895   : > { %4495 = vmatpush3.bf16.msra.mxu0 %v4494_v44 }
 0x896   : > { %4497 = vmatprep.subr.bf16.mxu0 %v4496_v58 }
 0x899   : > { %4499 = vmatpush3.bf16.msra.mxu0 %v4498_v17 }
 0x936   : > { %v2228_v52 = vpop.f32.mrb[0].mxu0  ;;  %v2341_v11 = vpop.f32.mrb[0].mxu1 }
 0x937   : > { %v2229_v40 = vadd.f32 %v2228_v52, %v6651_v32  ;;  %v2342_v59 = vadd.f32 %v2341_v11, %v6653_v6  ;;  %v2230_v60 = vpop.f32.mrb[1].mxu0  ;;  %v2343_v63 = vpop.f32.mrb[1].mxu1 }
 0x938   : > { %v2231_v10 = vadd.f32 %v2230_v60, %v6657_v26  ;;  %v2344_v47 = vadd.f32 %v2343_v63, %v6665_v25 }
 0x939   : > { %v6659_v27 = vmul.f32 0.70710677, %v2229_v40  ;;  %v6661_v49 = vmul.f32 0.70710677, %v2342_v59  ;;  %v6703_v41 = vmul.f32 0.5, %v2229_v40  ;;  %v6708_v48 = vmul.f32 0.5, %v2342_v59 }
 0x93a   : > { %v2234_v50 = vpop.f32.mrb[2].mxu0  ;;  %v2347_v51 = vpop.f32.mrb[2].mxu1  ;;  %v6669_v54 = vmul.f32 0.70710677, %v2231_v10  ;;  %v6677_v21 = vmul.f32 0.70710677, %v2344_v47 }
 0x93b   : > { %v2452_v8 = vand.u32 2147483647, %v6659_v27  ;;  %v2454_v9 = vand.u32 2147483647, %v6661_v49  ;;  %v2236_v55 = vpop.f32.mrb[3].mxu0  ;;  %v2349_v16 = vpop.f32.mrb[3].mxu1  ;;  %v6689_v56 = vadd.f32 %v2234_v50, %v6651_v32  ;;  %v6692_v53 = vadd.f32 %v2347_v51, %v6653_v6 }
 0x93c   : > { %7704 = vst [vmem:[#allocation35_spill] sm:$0xff] %v6677_v21  ;;  %v2453_v38 = vand.u32 2147483647, %v6669_v54  ;;  %v2455_v1 = vand.u32 2147483647, %v6677_v21  ;;  %v6710_v57 = vmul.f32 0.5, %v2231_v10  ;;  %v6724_v60 = vadd.f32 %v2236_v55, %v6657_v26 }
 0x93d   : > { %v2484_v31 = vmul.f32 0.3275911, %v2452_v8  ;;  %v2486_v12 = vmul.f32 0.3275911, %v2454_v9  ;;  %v2900_v44 = vsub.f32 0.0, %v2452_v8  ;;  %v2902_v45 = vsub.f32 0.0, %v2454_v9 }
 0x93e   : > { %v2240_v18 = vpop.f32.mrb[4].mxu0  ;;  %v6671_v15 = vpop.f32.mrb[4].mxu1  ;;  %v2901_v35 = vsub.f32 0.0, %v2453_v38  ;;  %v6706_v24 = vmul.f32 0.70710677, %v6689_v56  ;;  %7706 = vst [vmem:[#allocation37_spill] sm:$0xff] %v6710_v57 }
 0x93f   : > { %v2516_v42 = vadd.f32 1.0, %v2484_v31  ;;  %v2518_v43 = vadd.f32 1.0, %v2486_v12  ;;  %v6673_v19 = vpop.f32.mrb[5].mxu0  ;;  %v6675_v20 = vpop.f32.mrb[5].mxu1  ;;  %v2932_v17 = vmul.f32 %v2900_v44, %v2452_v8  ;;  %v2934_v62 = vmul.f32 %v2902_v45, %v2454_v9 }
 0x940   : > { %7705 = vst [vmem:[#allocation36_spill] sm:$0xff] %v6706_v24  ;;  %v6713_v39 = vmul.f32 0.70710677, %v6692_v53  ;;  %v2485_v52 = vmul.f32 0.3275911, %v2453_v38  ;;  %v6721_v11 = vmul.f32 0.5, %v2344_v47  ;;  %v2933_v9 = vmul.f32 %v2901_v35, %v2453_v38 }
 0x941   : > { %4857 = vrcp.f32 %v2516_v42  ;;  %v2487_v40 = vmul.f32 0.3275911, %v2455_v1  ;;  %v2964_v8 = vmul.f32 1.442695, %v2932_v17  ;;  %v2903_v10 = vsub.f32 0.0, %v2455_v1 }
 0x942   : > { %4859 = vrcp.f32 %v2518_v43  ;;  %v6679_v23 = vpop.f32.mrb[6].mxu0  ;;  %v6681_v13 = vpop.f32.mrb[6].mxu1  ;;  %7707 = vst [vmem:[#allocation38_spill] sm:$0xff] %v6713_v39  ;;  %7708 = vst [vmem:[#allocation39_spill] sm:$0xff] %v6721_v11  ;;  %v2968_v42 = vmul.f32 1.442695, %v2934_v62  ;;  %v6736_v47 = vadd.f32 %v2349_v16, %v6665_v25  ;;  %v6747_v35 = vadd.f32 %v2240_v18, %v6651_v32 }
 0x943   : > { %v6684_v34 = vpop.f32.mrb[7].mxu0  ;;  %v6686_v22 = vpop.f32.mrb[7].mxu1  ;;  %v2456_v43 = vand.u32 2147483647, %v6706_v24  ;;  %v2458_v51 = vand.u32 2147483647, %v6713_v39  ;;  %v2935_v30 = vmul.f32 %v2903_v10, %v2455_v1  ;;  %4861 = vpow2.f32 %v2964_v8 }
 0x944   : > { %v2517_v38 = vadd.f32 1.0, %v2485_v52  ;;  %v6744_v17 = vmul.f32 0.70710677, %v6724_v60  ;;  %v2966_v46 = vmul.f32 1.442695, %v2933_v9  ;;  %4863 = vpow2.f32 %v2968_v42 }
 0x945   : > { %v2488_v4 = vmul.f32 0.3275911, %v2456_v43  ;;  %v6756_v52 = vmul.f32 0.70710677, %v6736_v47  ;;  %v2490_v18 = vmul.f32 0.3275911, %v2458_v51  ;;  %v6765_v10 = vadd.f32 %v6671_v15, %v6653_v6 }
 0x946   : > { %v6694_v0 = vpop.f32.mrb[8].mxu0  ;;  %v6697_v5 = vpop.f32.mrb[8].mxu1  ;;  %7709 = vst [vmem:[#allocation40_spill] sm:$0xff] %v6744_v17  ;;  %v2906_v2 = vsub.f32 0.0, %v2458_v51  ;;  %4865 = vrcp.f32 %v2517_v38  ;;  %v2970_v9 = vmul.f32 1.442695, %v2935_v30 }
 0x947   : > { %v6699_v58 = vpop.f32.mrb[9].mxu0  ;;  %v6701_v37 = vpop.f32.mrb[9].mxu1  ;;  %7710 = vst [vmem:[#allocation41_spill] sm:$0xff] %v6756_v52  ;;  %4867 = vpow2.f32 %v2966_v46  ;;  %v2520_v30 = vadd.f32 1.0, %v2488_v4  ;;  %v2522_v39 = vadd.f32 1.0, %v2490_v18  ;;  %v6784_v46 = vadd.f32 %v6673_v19, %v6657_v26 }
 0x948   : > { %v2938_v38 = vmul.f32 %v2906_v2, %v2458_v51  ;;  %vm3092_vm6 = vcmp.lt.f32.partialorder %v6659_v27, 0.0  ;;  %vm3094_vm7 = vcmp.lt.f32.partialorder %v6661_v49, 0.0  ;;  %vm3093_vm8 = vcmp.lt.f32.partialorder %v6669_v54, 0.0 }
 0x94a   : > { %v6715_v28 = vpop.f32.mrb[10].mxu0  ;;  %v6717_v29 = vpop.f32.mrb[10].mxu1  ;;  %v2976_v18 = vmul.f32 1.442695, %v2938_v38  ;;  %v6805_v38 = vmul.f32 0.5, %v6724_v60 }
 0x94b   : > { %v6719_v36 = vpop.eup %4857  ;;  %v6726_v59 = vpop.f32.mrb[11].mxu0 }
 0x94c   : > { %v6728_v61 = vpop.eup %4859  ;;  %v2612_v63 = vmul.f32 1.0614054, %v6719_v36  ;;  %v6731_v31 = vpop.f32.mrb[11].mxu1  ;;  %7716 = vst [vmem:[#allocation47_spill] sm:$0xff] %v6805_v38 }
 0x94d   : > { %v2614_v12 = vmul.f32 1.0614054, %v6728_v61 }
 0x94e   : > { %v2644_v50 = vadd.f32 -1.4531521, %v2612_v63  ;;  %v6739_v55 = vpop.f32.mrb[12].mxu0  ;;  %v6741_v44 = vpop.f32.mrb[12].mxu1  ;;  %v2519_v63 = vadd.f32 1.0, %v2487_v40 }
 0x94f   : > { %v2646_v45 = vadd.f32 -1.4531521, %v2614_v12  ;;  %v6749_v62 = vpop.f32.mrb[13].mxu0  ;;  %v6752_v7 = vpop.f32.mrb[13].mxu1  ;;  %v2904_v12 = vsub.f32 0.0, %v2456_v43 }
 0x950   : > { %v2676_v16 = vmul.f32 %v6719_v36, %v2644_v50  ;;  %v2457_v50 = vand.u32 2147483647, %v6744_v17  ;;  %v6760_v40 = vmul.f32 0.70710677, %v6747_v35  ;;  %4869 = vrcp.f32 %v2519_v63 }
 0x951   : > { %v2678_v33 = vmul.f32 %v6728_v61, %v2646_v45  ;;  %v2936_v42 = vmul.f32 %v2904_v12, %v2456_v43  ;;  %4871 = vpow2.f32 %v2970_v9  ;;  %v6788_v12 = vmul.f32 0.5, %v6689_v56 }
 0x952   : > { %v2708_v3 = vadd.f32 1.4214138, %v2676_v16  ;;  %7711 = vst [vmem:[#allocation42_spill] sm:$0xff] %v6760_v40  ;;  %v6767_v45 = vpop.f32.mrb[14].mxu0  ;;  %v6769_v8 = vpop.f32.mrb[14].mxu1  ;;  %v2905_v24 = vsub.f32 0.0, %v2457_v50  ;;  %4873 = vrcp.f32 %v2520_v30 }
 0x953   : > { %v2710_v14 = vadd.f32 1.4214138, %v2678_v33  ;;  %v2459_v16 = vand.u32 2147483647, %v6756_v52  ;;  %v6773_v11 = vpop.f32.mrb[15].mxu0  ;;  %v6775_v57 = vpop.f32.mrb[15].mxu1  ;;  %4875 = vrcp.f32 %v2522_v39 }
 0x954   : > { %v2740_v1 = vmul.f32 %v6719_v36, %v2708_v3  ;;  %v2460_v17 = vand.u32 2147483647, %v6760_v40  ;;  %v2972_v63 = vmul.f32 1.442695, %v2936_v42  ;;  %v2489_v4 = vmul.f32 0.3275911, %v2457_v50 }
 0x955   : > { %v2742_v33 = vmul.f32 %v6728_v61, %v2710_v14  ;;  %v6780_v14 = vmul.f32 0.70710677, %v6765_v10  ;;  %v2907_v2 = vsub.f32 0.0, %v2459_v16  ;;  %7713 = vst [vmem:[#allocation44_spill] sm:$0xff] %v6788_v12  ;;  %v2937_v9 = vmul.f32 %v2905_v24, %v2457_v50 }
 0x956   : > { %v2772_v3 = vadd.f32 -0.28449672, %v2740_v1  ;;  %v2491_v40 = vmul.f32 0.3275911, %v2459_v16  ;;  %v6792_v52 = vmul.f32 0.70710677, %v6784_v46  ;;  %v6796_v42 = vadd.f32 %v6675_v20, %v6665_v25 }
 0x957   : > { %v2774_v15 = vadd.f32 -0.28449672, %v2742_v33  ;;  %7712 = vst [vmem:[#allocation43_spill] sm:$0xff] %v6780_v14  ;;  %v2908_v33 = vsub.f32 0.0, %v2460_v17  ;;  %v2462_v19 = vand.u32 2147483647, %v6780_v14  ;;  %4877 = vpow2.f32 %v2972_v63 }
 0x958   : > { %v2804_v21 = vmul.f32 %v6719_v36, %v2772_v3  ;;  %v4862_v3 = vpop.eup %4861  ;;  %7714 = vst [vmem:[#allocation45_spill] sm:$0xff] %v6792_v52  ;;  %v6799_v56 = vmul.f32 0.5, %v6692_v53  ;;  %v2521_v30 = vadd.f32 1.0, %v2489_v4  ;;  %v2939_v39 = vmul.f32 %v2907_v2, %v2459_v16 }
 0x959   : > { %v2806_v43 = vmul.f32 %v6728_v61, %v2774_v15  ;;  %4879 = vpow2.f32 %v2976_v18  ;;  %v2492_v15 = vmul.f32 0.3275911, %v2460_v17  ;;  %v2974_v14 = vmul.f32 1.442695, %v2937_v9 }
 0x95a   : > { %v2836_v51 = vadd.f32 0.2548296, %v2804_v21  ;;  %v4864_v21 = vpop.eup %4863  ;;  %7715 = vst [vmem:[#allocation46_spill] sm:$0xff] %v6799_v56  ;;  %v2940_v63 = vmul.f32 %v2908_v33, %v2460_v17  ;;  %v6812_v53 = vadd.f32 %v6679_v23, %v6651_v32  ;;  %v2523_v4 = vadd.f32 1.0, %v2491_v40 }
 0x95b   : > { %v2838_v1 = vadd.f32 0.2548296, %v2806_v43  ;;  %v6801_v24 = vpop.eup %4865  ;;  %v2910_v2 = vsub.f32 0.0, %v2462_v19  ;;  %v6818_v60 = vmul.f32 0.70710677, %v6796_v42  ;;  %4881 = vrcp.f32 %v2521_v30 }
 0x95c   : > { %v2868_v50 = vmul.f32 %v6719_v36, %v2836_v51  ;;  %v6807_v43 = vpop.eup %4867  ;;  %v2461_v36 = vand.u32 2147483647, %v6792_v52  ;;  %v6821_v51 = vmul.f32 0.5, %v6736_v47  ;;  %v6825_v17 = vadd.f32 %v6681_v13, %v6653_v6 }
 0x95d   : > { %v2870_v20 = vmul.f32 %v6728_v61, %v2838_v1  ;;  %v6814_v16 = vpop.eup %4869  ;;  %7717 = vst [vmem:[#allocation48_spill] sm:$0xff] %v6818_v60  ;;  %v2978_v61 = vmul.f32 1.442695, %v2939_v39  ;;  %v6830_v40 = vmul.f32 0.5, %v6747_v35  ;;  %v2524_v1 = vadd.f32 1.0, %v2492_v15 }
 0x95e   : > { %7718 = vst [vmem:[#allocation49_spill] sm:$0xff] %v6821_v51  ;;  %v6827_v23 = vpop.eup %4871  ;;  %v3028_v18 = vmul.f32 %v4862_v3, %v2868_v50  ;;  %v2494_v9 = vmul.f32 0.3275911, %v2462_v19  ;;  %4883 = vpow2.f32 %v2974_v14  ;;  %v2980_v56 = vmul.f32 1.442695, %v2940_v63 }
 0x95f   : > { %7719 = vst [vmem:[#allocation50_spill] sm:$0xff] %v6830_v40  ;;  %v3030_v33 = vmul.f32 %v4864_v21, %v2870_v20  ;;  %v6833_v30 = vmul.f32 0.70710677, %v6812_v53  ;;  %v6835_v47 = vpop.eup %4873  ;;  %4885 = vrcp.f32 %v2523_v4  ;;  %v2942_v39 = vmul.f32 %v2910_v2, %v2462_v19 }
 0x960   : > { %v2909_v13 = vsub.f32 0.0, %v2461_v36  ;;  %v2463_v12 = vand.u32 2147483647, %v6818_v60  ;;  %v6838_v51 = vpop.eup %4875  ;;  %4887 = vpow2.f32 %v2978_v61  ;;  %v6842_v35 = vmul.f32 0.5, %v6765_v10 }
 0x961   : > { %7720 = vst [vmem:[#allocation51_spill] sm:$0xff] %v6833_v30  ;;  %v6845_v14 = vmul.f32 0.70710677, %v6825_v17  ;;  %v6849_v3 = vadd.f32 %v6684_v34, %v6657_v26  ;;  %v3060_v21 = vsub.f32 1.0, %v3028_v18  ;;  %4889 = vrcp.f32 %v2524_v1  ;;  %v6852_v15 = vpop.eup %4877 }
 0x962   : > { %7721 = vst [vmem:[#allocation52_spill] sm:$0xff] %v6842_v35  ;;  %v2526_v19 = vadd.f32 1.0, %v2494_v9  ;;  %v2493_v50 = vmul.f32 0.3275911, %v2461_v36  ;;  %7723 = vst [vmem:[#allocation54_spill] sm:$0xff] %v6852_v15  ;;  %v3062_v20 = vsub.f32 1.0, %v3030_v33  ;;  %4891 = vpow2.f32 %v2980_v56 }
 0x963   : > { %7722 = vst [vmem:[#allocation53_spill] sm:$0xff] %v6845_v14  ;;  %v6855_v10 = vmul.f32 0.5, %v6784_v46  ;;  %v2464_v63 = vand.u32 2147483647, %v6833_v30  ;;  %v6858_v4 = vpop.eup %4879  ;;  %v2984_v2 = vmul.f32 1.442695, %v2942_v39  ;;  %v2941_v34 = vmul.f32 %v2909_v13, %v2461_v36 }
 0x964   : > { %7725 = vst [vmem:[#allocation56_spill] sm:$0xff] %v6858_v4  ;;  %v2495_v61 = vmul.f32 0.3275911, %v2463_v12  ;;  %v2911_v18 = vsub.f32 0.0, %v2463_v12  ;;  %v2466_v35 = vand.u32 2147483647, %v6845_v14  ;;  %v6866_v9 = vadd.f32 %v6686_v22, %v6665_v25 }
 0x965   : > { %7724 = vst [vmem:[#allocation55_spill] sm:$0xff] %v6855_v10  ;;  %v6862_v1 = vmul.f32 0.70710677, %v6849_v3  ;;  %v6870_v46 = vadd.f32 %v6694_v0, %v6651_v32  ;;  %v3124_v56 = vsub.f32 0.0, %v3060_v21  ;;  %4893 = vrcp.f32 %v2526_v19  ;;  %v6875_v39 = vpop.eup %4881 }
 0x966   : > { %v2525_v33 = vadd.f32 1.0, %v2493_v50  ;;  %v6873_v36 = vmul.f32 0.5, %v6796_v42  ;;  %v3126_v13 = vsub.f32 0.0, %v3062_v20  ;;  %v2912_v40 = vsub.f32 0.0, %v2464_v63 }
 0x967   : > { %7726 = vst [vmem:[#allocation57_spill] sm:$0xff] %v6862_v1  ;;  %v2465_v14 = vand.u32 2147483647, %v6862_v1  ;;  %v6879_v30 = vmul.f32 0.70710677, %v6866_v9  ;;  %4895 = vpow2.f32 %v2984_v2  ;;  %v2943_v10 = vmul.f32 %v2911_v18, %v2463_v12 }
 0x968   : > { %7727 = vst [vmem:[#allocation58_spill] sm:$0xff] %v6873_v36  ;;  %v2982_v22 = vmul.f32 1.442695, %v2941_v34  ;;  %v6883_v0 = vadd.f32 %v6697_v5, %v6653_v6  ;;  %v6885_v19 = vpop.eup %4883  ;;  %v2527_v42 = vadd.f32 1.0, %v2495_v61  ;;  %v2496_v50 = vmul.f32 0.3275911, %v2464_v63 }
 0x969   : > { %7728 = vst [vmem:[#allocation59_spill] sm:$0xff] %v6879_v30  ;;  %v2914_v36 = vsub.f32 0.0, %v2466_v35  ;;  %v6888_v60 = vmul.f32 0.70710677, %v6870_v46  ;;  %v6890_v38 = vpop.eup %4885  ;;  %v3156_v1 = vsel %vm3092_vm6, %v3124_v56, %v3060_v21  ;;  %4897 = vrcp.f32 %v2525_v33 }
 0x96a   : > { %v6895_v12 = vmul.f32 0.5, %v6812_v53  ;;  %v2467_v5 = vand.u32 2147483647, %v6879_v30  ;;  %v6898_v2 = vpop.eup %4887  ;;  %v3158_v34 = vsel %vm3094_vm7, %v3126_v13, %v3062_v20  ;;  %v2944_v61 = vmul.f32 %v2912_v40, %v2464_v63 }
 0x96b   : > { %7729 = vst [vmem:[#allocation60_spill] sm:$0xff] %v6888_v60  ;;  %v2913_v18 = vsub.f32 0.0, %v2465_v14  ;;  %v6904_v4 = vadd.f32 %v6699_v58, %v6657_v26  ;;  %v6906_v15 = vpop.eup %4889  ;;  %4899 = vpow2.f32 %v2982_v22  ;;  %v2986_v27 = vmul.f32 1.442695, %v2943_v10 }
 0x96c   : > { %7730 = vst [vmem:[#allocation61_spill] sm:$0xff] %v6895_v12  ;;  %7731 = vst [vmem:[#allocation62_spill] sm:$0xff] %v6906_v15  ;;  %v2498_v21 = vmul.f32 0.3275911, %v2466_v35  ;;  %v6909_v53 = vmul.f32 0.70710677, %v6883_v0  ;;  %v6911_v56 = vpop.eup %4891  ;;  %4901 = vrcp.f32 %v2527_v42  ;;  %v2946_v49 = vmul.f32 %v2914_v36, %v2466_v35 }
 0x96d   : > { %7733 = vst [vmem:[#allocation64_spill] sm:$0xff] %v6911_v56  ;;  %v2528_v33 = vadd.f32 1.0, %v2496_v50  ;;  %v2468_v40 = vand.u32 2147483647, %v6888_v60  ;;  %v3188_v20 = vadd.f32 1.0, %v3156_v1  ;;  %v3190_v63 = vadd.f32 1.0, %v3158_v34 }
 0x96e   : > { %7732 = vst [vmem:[#allocation63_spill] sm:$0xff] %v6909_v53  ;;  %v2497_v13 = vmul.f32 0.3275911, %v2465_v14  ;;  %v2915_v58 = vsub.f32 0.0, %v2467_v5  ;;  %v2988_v12 = vmul.f32 1.442695, %v2944_v61  ;;  %v2945_v30 = vmul.f32 %v2913_v18, %v2465_v14 }
 0x96f   : > { %v6915_v22 = vmul.f32 0.70710677, %v6904_v4  ;;  %v6919_v10 = vadd.f32 %v6701_v37, %v6665_v25  ;;  %v6921_v15 = vpop.eup %4893  ;;  %4903 = vpow2.f32 %v2986_v27  ;;  %v2530_v42 = vadd.f32 1.0, %v2498_v21 }
 0x970   : > { %7735 = vst [vmem:[#allocation66_spill] sm:$0xff] %v6921_v15  ;;  %v2499_v35 = vmul.f32 0.3275911, %v2467_v5  ;;  %v2470_v36 = vand.u32 2147483647, %v6909_v53  ;;  %4905 = vrcp.f32 %v2528_v33  ;;  %v2916_v50 = vsub.f32 0.0, %v2468_v40 }
 0x971   : > { %7734 = vst [vmem:[#allocation65_spill] sm:$0xff] %v6915_v22  ;;  %v2992_v1 = vmul.f32 1.442695, %v2946_v49  ;;  %v2469_v34 = vand.u32 2147483647, %v6915_v22  ;;  %v6925_v14 = vpop.eup %4895  ;;  %v2529_v61 = vadd.f32 1.0, %v2497_v13  ;;  %v2947_v18 = vmul.f32 %v2915_v58, %v2467_v5 }
 0x972   : > { %7736 = vst [vmem:[#allocation67_spill] sm:$0xff] %v6925_v14  ;;  %v6928_v60 = vmul.f32 0.70710677, %v6919_v10  ;;  %v6932_v37 = vadd.f32 %v6715_v28, %v6651_v32  ;;  %4907 = vpow2.f32 %v2988_v12  ;;  %v2990_v27 = vmul.f32 1.442695, %v2945_v30 }
 0x973   : > { %v2500_v21 = vmul.f32 0.3275911, %v2468_v40  ;;  %v6936_v33 = vadd.f32 %v6717_v29, %v6653_v6  ;;  %v6938_v49 = vpop.eup %4897  ;;  %4909 = vrcp.f32 %v2530_v42  ;;  %v2531_v53 = vadd.f32 1.0, %v2499_v35 }
 0x974   : > { %7737 = vst [vmem:[#allocation68_spill] sm:$0xff] %v6928_v60  ;;  %v2918_v13 = vsub.f32 0.0, %v2470_v36  ;;  %v2471_v5 = vand.u32 2147483647, %v6928_v60  ;;  %4911 = vpow2.f32 %v2992_v1  ;;  %v2948_v58 = vmul.f32 %v2916_v50, %v2468_v40 }
 0x975   : > { %v2917_v22 = vsub.f32 0.0, %v2469_v34  ;;  %v6942_v28 = vmul.f32 0.70710677, %v6932_v37  ;;  %v6944_v12 = vpop.eup %4899  ;;  %4913 = vrcp.f32 %v2529_v61  ;;  %v2994_v30 = vmul.f32 1.442695, %v2947_v18 }
 0x976   : > { %7739 = vst [vmem:[#allocation70_spill] sm:$0xff] %v6944_v12  ;;  %v2502_v14 = vmul.f32 0.3275911, %v2470_v36  ;;  %v6947_v29 = vmul.f32 0.70710677, %v6936_v33  ;;  %v6949_v56 = vpop.eup %4901  ;;  %v6952_v42 = vmul.f32 %v3188_v20, %v6703_v41  ;;  %v6955_v35 = vmul.f32 0.5, %v6825_v17 }
 0x977   : > { %7738 = vst [vmem:[#allocation69_spill] sm:$0xff] %v6942_v28  ;;  %4915 = vpow2.f32 %v2990_v27  ;;  %v2532_v40 = vadd.f32 1.0, %v2500_v21  ;;  %v2950_v1 = vmul.f32 %v2918_v13, %v2470_v36  ;;  %v2919_v50 = vsub.f32 0.0, %v2471_v5 }
 0x978   : > { %7740 = vst [vmem:[#allocation71_spill] sm:$0xff] %v6947_v29  ;;  %7741 = vst [vmem:[#allocation72_spill] sm:$0xff] %v6955_v35  ;;  %4917 = vrcp.f32 %v2531_v53  ;;  %v2472_v61 = vand.u32 2147483647, %v6942_v28  ;;  %v2996_v18 = vmul.f32 1.442695, %v2948_v58  ;;  %v2949_v15 = vmul.f32 %v2917_v22, %v2469_v34 }
 0x979   : > { %v2501_v60 = vmul.f32 0.3275911, %v2469_v34  ;;  %v6960_v12 = vadd.f32 %v6726_v59, %v6657_v26  ;;  %v6962_v52 = vpop.eup %4903  ;;  %v6965_v41 = vmul.f32 %v3190_v63, %v6708_v48  ;;  %4919 = vpow2.f32 %v2994_v30 }
 0x97a   : > { %v2534_v17 = vadd.f32 1.0, %v2502_v14  ;;  %v2474_v53 = vand.u32 2147483647, %v6947_v29  ;;  %v6968_v20 = vpop.eup %4905  ;;  %v6971_v36 = vmul.f32 0.5, %v6849_v3  ;;  %4921 = vrcp.f32 %v2532_v40 }
 0x97b   : > { %v2503_v22 = vmul.f32 0.3275911, %v2471_v5  ;;  %v6974_v34 = vmul.f32 0.70710677, %v6960_v12  ;;  %v3000_v59 = vmul.f32 1.442695, %v2950_v1  ;;  %v2951_v27 = vmul.f32 %v2919_v50, %v2471_v5 }
 0x97c   : > { %v2920_v21 = vsub.f32 0.0, %v2472_v61  ;;  %v6978_v48 = vadd.f32 %v6731_v31, %v6665_v25  ;;  %v6980_v63 = vpop.eup %4907  ;;  %v6983_v14 = vmul.f32 0.5, %v6866_v9  ;;  %4923 = vpow2.f32 %v2996_v18 }
 0x97d   : > { %7742 = vst [vmem:[#allocation73_spill] sm:$0xff] %v6974_v34  ;;  %v2533_v3 = vadd.f32 1.0, %v2501_v60  ;;  %v2998_v13 = vmul.f32 1.442695, %v2949_v15  ;;  %v6985_v58 = vpop.eup %4909  ;;  %4925 = vrcp.f32 %v2534_v17  ;;  %v2504_v30 = vmul.f32 0.3275911, %v2472_v61 }
 0x97e   : > { %v2922_v40 = vsub.f32 0.0, %v2474_v53  ;;  %v6988_v5 = vmul.f32 0.70710677, %v6978_v48  ;;  %v6990_v1 = vpop.eup %4911  ;;  %v2535_v31 = vadd.f32 1.0, %v2503_v22  ;;  %v2506_v50 = vmul.f32 0.3275911, %v2474_v53 }
 0x97f   : > { %v2473_v29 = vand.u32 2147483647, %v6974_v34  ;;  %v6995_v9 = vadd.f32 %v6739_v55, %v6651_v32  ;;  %v6997_v60 = vpop.eup %4913  ;;  %4927 = vpow2.f32 %v3000_v59  ;;  %v3002_v15 = vmul.f32 1.442695, %v2951_v27 }
 0x980   : > { %7743 = vst [vmem:[#allocation74_spill] sm:$0xff] %v6988_v5  ;;  %v2952_v18 = vmul.f32 %v2920_v21, %v2472_v61  ;;  %v7001_v17 = vadd.f32 %v6741_v44, %v6653_v6  ;;  %v7006_v22 = vmul.f32 0.5, %v6870_v46  ;;  %4929 = vrcp.f32 %v2533_v3 }
 0x981   : > { %7744 = vst [vmem:[#allocation75_spill] sm:$0xff] %v6995_v9  ;;  %v7003_v28 = vpop.eup %4915  ;;  %v2475_v34 = vand.u32 2147483647, %v6988_v5  ;;  %v7010_v55 = vmul.f32 0.70710677, %v6995_v9  ;;  %4931 = vpow2.f32 %v2998_v13  ;;  %v2536_v59 = vadd.f32 1.0, %v2504_v30 }
 0x982   : > { %7745 = vst [vmem:[#allocation76_spill] sm:$0xff] %v7001_v17  ;;  %7746 = vst [vmem:[#allocation77_spill] sm:$0xff] %v7006_v22  ;;  %v7012_v35 = vpop.eup %4917  ;;  %v2954_v61 = vmul.f32 %v2922_v40, %v2474_v53  ;;  %v7015_v27 = vmul.f32 0.70710677, %v7001_v17  ;;  %v7018_v44 = vmul.f32 0.5, %v6883_v0  ;;  %4933 = vrcp.f32 %v2535_v31 }
 0x983   : > { %7747 = vst [vmem:[#allocation78_spill] sm:$0xff] %v7010_v55  ;;  %v2538_v46 = vadd.f32 1.0, %v2506_v50  ;;  %v2921_v21 = vsub.f32 0.0, %v2473_v29  ;;  %v7020_v3 = vpop.eup %4919  ;;  %v7023_v22 = vmul.f32 0.5, %v6904_v4  ;;  %4935 = vpow2.f32 %v3002_v15 }
 0x984   : > { %7748 = vst [vmem:[#allocation79_spill] sm:$0xff] %v7015_v27  ;;  %7749 = vst [vmem:[#allocation80_spill] sm:$0xff] %v7018_v44  ;;  %v3004_v9 = vmul.f32 1.442695, %v2952_v18  ;;  %v2476_v13 = vand.u32 2147483647, %v7010_v55  ;;  %v7026_v30 = vpop.eup %4921  ;;  %v2267_v0 = vadd.f32 %v6749_v62, %v6657_v26  ;;  %4937 = vrcp.f32 %v2536_v59 }
 0x985   : > { %v2505_v53 = vmul.f32 0.3275911, %v2473_v29  ;;  %v2923_v40 = vsub.f32 0.0, %v2475_v34  ;;  %v2478_v17 = vand.u32 2147483647, %v7015_v27  ;;  %v7032_v31 = vmul.f32 0.5, %v6919_v10 }
 0x986   : > { %v7035_v50 = vmul.f32 0.5, %v6932_v37  ;;  %v3008_v4 = vmul.f32 1.442695, %v2954_v61  ;;  %v7037_v15 = vpop.eup %4923  ;;  %4939 = vrcp.f32 %v2538_v46  ;;  %v2953_v18 = vmul.f32 %v2921_v21, %v2473_v29 }
 0x987   : > { %7750 = vst [vmem:[#allocation81_spill] sm:$0xff] %v7032_v31  ;;  %7752 = vst [vmem:[#allocation83_spill] sm:$0xff] %v7037_v15  ;;  %v2507_v55 = vmul.f32 0.3275911, %v2475_v34  ;;  %v7039_v44 = vmul.f32 0.70710677, %v2267_v0  ;;  %v7041_v5 = vpop.eup %4925  ;;  %4941 = vpow2.f32 %v3004_v9  ;;  %v2380_v37 = vadd.f32 %v6752_v7, %v6665_v25 }
 0x988   : > { %7751 = vst [vmem:[#allocation82_spill] sm:$0xff] %v7035_v50  ;;  %v7044_v62 = vmul.f32 0.5, %v6936_v33  ;;  %v2924_v10 = vsub.f32 0.0, %v2476_v13  ;;  %v2537_v27 = vadd.f32 1.0, %v2505_v53  ;;  %v2955_v59 = vmul.f32 %v2923_v40, %v2475_v34 }
 0x989   : > { %7753 = vst [vmem:[#allocation84_spill] sm:$0xff] %v7039_v44  ;;  %v2926_v61 = vsub.f32 0.0, %v2478_v17  ;;  %v2477_v50 = vand.u32 2147483647, %v7039_v44  ;;  %v7049_v46 = vpop.eup %4927  ;;  %4943 = vpow2.f32 %v3008_v4  ;;  %v7052_v29 = vmul.f32 0.5, %v6960_v12 }
 0x98a   : > { %7754 = vst [vmem:[#allocation85_spill] sm:$0xff] %v7044_v62  ;;  %7755 = vst [vmem:[#allocation86_spill] sm:$0xff] %v7049_v46  ;;  %v2508_v21 = vmul.f32 0.3275911, %v2476_v13  ;;  %v7054_v9 = vmul.f32 0.70710677, %v2380_v37  ;;  %v7056_v33 = vpop.eup %4929  ;;  %v7060_v7 = vadd.f32 %v6767_v45, %v6651_v32  ;;  %v2956_v53 = vmul.f32 %v2924_v10, %v2476_v13 }
 0x98b   : > { %7756 = vst [vmem:[#allocation87_spill] sm:$0xff] %v7052_v29  ;;  %v3006_v62 = vmul.f32 1.442695, %v2953_v18  ;;  %v2539_v31 = vadd.f32 1.0, %v2507_v55  ;;  %v2510_v15 = vmul.f32 0.3275911, %v2478_v17  ;;  %v7062_v34 = vpop.eup %4931  ;;  %v7067_v12 = vadd.f32 %v6769_v8, %v6653_v6 }
 0x98c   : > { %7757 = vst [vmem:[#allocation88_spill] sm:$0xff] %v7054_v9  ;;  %7758 = vst [vmem:[#allocation89_spill] sm:$0xff] %v7060_v7  ;;  %v2925_v40 = vsub.f32 0.0, %v2477_v50  ;;  %v2479_v4 = vand.u32 2147483647, %v7054_v9  ;;  %v7069_v29 = vpop.eup %4933  ;;  %4945 = vrcp.f32 %v2537_v27  ;;  %v2958_v55 = vmul.f32 %v2926_v61, %v2478_v17 }
 0x98d   : > { %7759 = vst [vmem:[#allocation90_spill] sm:$0xff] %v7067_v12  ;;  %v3010_v18 = vmul.f32 1.442695, %v2955_v59  ;;  %v7072_v44 = vmul.f32 0.70710677, %v7060_v7  ;;  %v7074_v32 = vpop.eup %4935  ;;  %v2540_v45 = vadd.f32 1.0, %v2508_v21  ;;  %4947 = vpow2.f32 %v3006_v62 }
 0x98e   : > { %v2509_v46 = vmul.f32 0.3275911, %v2477_v50  ;;  %v2927_v13 = vsub.f32 0.0, %v2479_v4  ;;  %v7077_v10 = vmul.f32 0.70710677, %v7067_v12  ;;  %v7080_v6 = vmul.f32 0.5, %v6978_v48  ;;  %v7083_v59 = vpop.eup %4937 }
 0x98f   : > { %7760 = vst [vmem:[#allocation91_spill] sm:$0xff] %v7072_v44  ;;  %v2542_v8 = vadd.f32 1.0, %v2510_v15  ;;  %v2480_v27 = vand.u32 2147483647, %v7072_v44  ;;  %4949 = vrcp.f32 %v2539_v31  ;;  %v3012_v17 = vmul.f32 1.442695, %v2956_v53 }
 0x990   : > { %7761 = vst [vmem:[#allocation92_spill] sm:$0xff] %v7077_v10  ;;  %7762 = vst [vmem:[#allocation93_spill] sm:$0xff] %v7080_v6  ;;  %v2957_v61 = vmul.f32 %v2925_v40, %v2477_v50  ;;  %v2482_v7 = vand.u32 2147483647, %v7077_v10  ;;  %v7086_v21 = vpop.eup %4939  ;;  %4951 = vpow2.f32 %v3010_v18  ;;  %v3016_v9 = vmul.f32 1.442695, %v2958_v55 }
 0x991   : > { %v2511_v12 = vmul.f32 0.3275911, %v2479_v4  ;;  %v7090_v62 = vadd.f32 %v6773_v11, %v6657_v26  ;;  %v7092_v48 = vpop.eup %4941  ;;  %4953 = vrcp.f32 %v2540_v45  ;;  %v7094_v15 = vmul.f32 0.5, %v2267_v0 }
 0x992   : > { %7764 = vst [vmem:[#allocation95_spill] sm:$0xff] %v7092_v48  ;;  %v2541_v44 = vadd.f32 1.0, %v2509_v46  ;;  %v2959_v31 = vmul.f32 %v2927_v13, %v2479_v4  ;;  %4955 = vrcp.f32 %v2542_v8  ;;  %v2928_v50 = vsub.f32 0.0, %v2480_v27 }
 0x993   : > { %7763 = vst [vmem:[#allocation94_spill] sm:$0xff] %v7090_v62  ;;  %7765 = vst [vmem:[#allocation96_spill] sm:$0xff] %v7094_v15  ;;  %v2930_v53 = vsub.f32 0.0, %v2482_v7  ;;  %v7097_v40 = vmul.f32 0.70710677, %v7090_v62  ;;  %v7099_v18 = vpop.eup %4943  ;;  %4957 = vpow2.f32 %v3012_v17  ;;  %v7101_v10 = vmul.f32 0.5, %v2380_v37 }
 0x994   : > { %7767 = vst [vmem:[#allocation98_spill] sm:$0xff] %v7099_v18  ;;  %v3014_v55 = vmul.f32 1.442695, %v2957_v61  ;;  %v7105_v26 = vadd.f32 %v6775_v57, %v6665_v25  ;;  %4959 = vpow2.f32 %v3016_v9  ;;  %v2543_v11 = vadd.f32 1.0, %v2511_v12 }
 0x995   : > { %7766 = vst [vmem:[#allocation97_spill] sm:$0xff] %v7097_v40  ;;  %7768 = vst [vmem:[#allocation99_spill] sm:$0xff] %v7101_v10  ;;  %v2512_v0 = vmul.f32 0.3275911, %v2480_v27  ;;  %v2481_v46 = vand.u32 2147483647, %v7097_v40  ;;  %4961 = vrcp.f32 %v2541_v44  ;;  %v2960_v17 = vmul.f32 %v2928_v50, %v2480_v27 }
 0x996   : > { %7769 = vst [vmem:[#allocation100_spill] sm:$0xff] %v7105_v26  ;;  %v3018_v4 = vmul.f32 1.442695, %v2959_v31  ;;  %v2514_v45 = vmul.f32 0.3275911, %v2482_v7  ;;  %v7111_v8 = vpop.eup %4945  ;;  %v2962_v37 = vmul.f32 %v2930_v53, %v2482_v7  ;;  %4963 = vpow2.f32 %v3014_v55 }
 0x997   : > { %v7109_v13 = vmul.f32 0.70710677, %v7105_v26  ;;  %v2929_v61 = vsub.f32 0.0, %v2481_v46  ;;  %v2613_v62 = vmul.f32 1.0614054, %v6801_v24  ;;  %v7116_v12 = vpop.eup %4947  ;;  %4965 = vrcp.f32 %v2543_v11 }
 0x998   : > { %v2513_v25 = vmul.f32 0.3275911, %v2481_v46  ;;  %v2615_v9 = vmul.f32 1.0614054, %v6814_v16  ;;  %7771 = vst [vmem:[#allocation102_spill] sm:$0xff] %v7116_v12  ;;  %v2544_v44 = vadd.f32 1.0, %v2512_v0  ;;  %4967 = vpow2.f32 %v3018_v4 }
 0x999   : > { %7770 = vst [vmem:[#allocation101_spill] sm:$0xff] %v7109_v13  ;;  %v2483_v57 = vand.u32 2147483647, %v7109_v13  ;;  %v2645_v31 = vadd.f32 -1.4531521, %v2613_v62  ;;  %v7119_v40 = vpop.eup %4949  ;;  %v2546_v27 = vadd.f32 1.0, %v2514_v45  ;;  %v2961_v7 = vmul.f32 %v2929_v61, %v2481_v46 }
 0x99a   : > { %v2617_v26 = vmul.f32 1.0614054, %v6875_v39  ;;  %v2647_v53 = vadd.f32 -1.4531521, %v2615_v9  ;;  %v7121_v10 = vpop.eup %4951  ;;  %v7123_v55 = vmul.f32 1.442695, %v2960_v17  ;;  %4969 = vrcp.f32 %v2544_v44 }
 0x99b   : > { %v2931_v50 = vsub.f32 0.0, %v2483_v57  ;;  %7772 = vst [vmem:[#allocation103_spill] sm:$0xff] %v7121_v10  ;;  %v7125_v13 = vmul.f32 1.442695, %v2962_v37  ;;  %v2677_v15 = vmul.f32 %v6801_v24, %v2645_v31  ;;  %v7128_v11 = vpop.eup %4953  ;;  %v7130_v62 = vadd.f32 1.0, %v2513_v25  ;;  %v7784_v12 = vld [vmem:[#allocation41_spill] sm:$0xff] }
 0x99c   : > { %7773 = vst [vmem:[#allocation104_spill] sm:$0xff] %v7123_v55  ;;  %v2649_v6 = vadd.f32 -1.4531521, %v2617_v26  ;;  %7775 = vst [vmem:[#allocation106_spill] sm:$0xff] %v7128_v11  ;;  %v2679_v18 = vmul.f32 %v6814_v16, %v2647_v53  ;;  %v2619_v46 = vmul.f32 1.0614054, %v6890_v38  ;;  %v7134_v45 = vpop.eup %4955  ;;  %4971 = vrcp.f32 %v2546_v27 }
 0x99d   : > { %7774 = vst [vmem:[#allocation105_spill] sm:$0xff] %v7125_v13  ;;  %v2963_v0 = vmul.f32 %v2931_v50, %v2483_v57  ;;  %7776 = vst [vmem:[#allocation107_spill] sm:$0xff] %v7134_v45  ;;  %v7136_v61 = vmul.f32 0.3275911, %v2483_v57  ;;  %v2709_v17 = vadd.f32 1.4214138, %v2677_v15  ;;  %v7140_v31 = vpop.eup %4957  ;;  %4973 = vrcp.f32 %v7130_v62 }
 0x99e   : > { %v2681_v37 = vmul.f32 %v6875_v39, %v2649_v6  ;;  %v2616_v9 = vmul.f32 1.0614054, %v6835_v47  ;;  %7777 = vst [vmem:[#allocation108_spill] sm:$0xff] %v7140_v31  ;;  %v7142_v26 = vmul.f32 1.442695, %v2961_v7  ;;  %v7144_v13 = vpop.eup %4959  ;;  %vm3099_vm11 = vcmp.lt.f32.partialorder %v7784_v12, 0.0 }
 0x99f   : > { %v2711_v25 = vadd.f32 1.4214138, %v2679_v18  ;;  %v2651_v50 = vadd.f32 -1.4531521, %v2619_v46  ;;  %7778 = vst [vmem:[#allocation109_spill] sm:$0xff] %v7144_v13  ;;  %v2741_v53 = vmul.f32 %v6801_v24, %v2709_v17  ;;  %v7148_v15 = vpop.eup %4961 }
 0x9a0   : > { %v2713_v55 = vadd.f32 1.4214138, %v2681_v37  ;;  %v2648_v45 = vadd.f32 -1.4531521, %v2616_v9  ;;  %v2618_v57 = vmul.f32 1.0614054, %v6838_v51  ;;  %v7157_v37 = vpop.eup %4963  ;;  %4975 = vpow2.f32 %v7142_v26 }
 0x9a1   : > { %v7150_v6 = vmul.f32 1.442695, %v2963_v0  ;;  %v2743_v11 = vmul.f32 %v6814_v16, %v2711_v25  ;;  %v2683_v4 = vmul.f32 %v6890_v38, %v2651_v50  ;;  %v2621_v7 = vmul.f32 1.0614054, %v6938_v49  ;;  %7780 = vst [vmem:[#allocation111_spill] sm:$0xff] %v7157_v37  ;;  %v7159_v0 = vpop.eup %4965 }
 0x9a2   : > { %v2773_v18 = vadd.f32 -0.28449672, %v2741_v53  ;;  %v2745_v46 = vmul.f32 %v6875_v39, %v2713_v55  ;;  %v2680_v13 = vmul.f32 %v6835_v47, %v2648_v45  ;;  %v2650_v17 = vadd.f32 -1.4531521, %v2618_v57 }
 0x9a3   : > { %7779 = vst [vmem:[#allocation110_spill] sm:$0xff] %v7150_v6  ;;  %v2775_v9 = vadd.f32 -0.28449672, %v2743_v11  ;;  %v2715_v31 = vadd.f32 1.4214138, %v2683_v4 }
 0x9a4   : > { %v2653_v48 = vadd.f32 -1.4531521, %v2621_v7  ;;  %v2805_v25 = vmul.f32 %v6801_v24, %v2773_v18  ;;  %v2777_v6 = vadd.f32 -0.28449672, %v2745_v46  ;;  %v2712_v50 = vadd.f32 1.4214138, %v2680_v13 }
 0x9a5   : > { %v2682_v10 = vmul.f32 %v6838_v51, %v2650_v17  ;;  %v2807_v53 = vmul.f32 %v6814_v16, %v2775_v9  ;;  %v2747_v55 = vmul.f32 %v6890_v38, %v2715_v31  ;;  %v2623_v57 = vmul.f32 1.0614054, %v6949_v56  ;;  %v7781_v17 = vld [vmem:[#allocation35_spill] sm:$0xff] }
 0x9a6   : > { %v2685_v45 = vmul.f32 %v6938_v49, %v2653_v48  ;;  %v2837_v44 = vadd.f32 0.2548296, %v2805_v25  ;;  %v2809_v11 = vmul.f32 %v6875_v39, %v2777_v6  ;;  %v2744_v4 = vmul.f32 %v6835_v47, %v2712_v50  ;;  %v7173_v25 = vpop.eup %4967  ;;  %v7783_v6 = vld [vmem:[#allocation40_spill] sm:$0xff] }
 0x9a7   : > { %v2714_v7 = vadd.f32 1.4214138, %v2682_v10  ;;  %v2839_v13 = vadd.f32 0.2548296, %v2807_v53  ;;  %v2779_v18 = vadd.f32 -0.28449672, %v2747_v55 }
 0x9a8   : > { %v2717_v46 = vadd.f32 1.4214138, %v2685_v45  ;;  %vm3095_vm9 = vcmp.lt.f32.partialorder %v7781_v17, 0.0  ;;  %v2869_v31 = vmul.f32 %v6801_v24, %v2837_v44  ;;  %v2841_v9 = vadd.f32 0.2548296, %v2809_v11  ;;  %7782 = vst [vmem:[#allocation35_spill] sm:$0xff] %v7173_v25 }
 0x9a9   : > { %v2776_v48 = vadd.f32 -0.28449672, %v2744_v4  ;;  %v2746_v37 = vmul.f32 %v6838_v51, %v2714_v7  ;;  %vm3097_vm10 = vcmp.lt.f32.partialorder %v7783_v6, 0.0  ;;  %v2871_v10 = vmul.f32 %v6814_v16, %v2839_v13 }
 0x9aa   : > { %v2811_v50 = vmul.f32 %v6890_v38, %v2779_v18  ;;  %v2749_v27 = vmul.f32 %v6938_v49, %v2717_v46  ;;  %v2655_v53 = vadd.f32 -1.4531521, %v2623_v57  ;;  %v3029_v55 = vmul.f32 %v6807_v43, %v2869_v31  ;;  %v7187_v43 = vpop.eup %4969 }
 0x9ab   : > { %v2873_v45 = vmul.f32 %v6875_v39, %v2841_v9  ;;  %v2808_v24 = vmul.f32 %v6835_v47, %v2776_v48  ;;  %v2778_v44 = vadd.f32 -0.28449672, %v2746_v37  ;;  %v3031_v11 = vmul.f32 %v6827_v23, %v2871_v10  ;;  %v7785_v39 = vld [vmem:[#allocation36_spill] sm:$0xff] }
 0x9ac   : > { %v2843_v4 = vadd.f32 0.2548296, %v2811_v50  ;;  %v2781_v7 = vadd.f32 -0.28449672, %v2749_v27  ;;  %v2687_v25 = vmul.f32 %v6949_v56, %v2655_v53  ;;  %v3061_v16 = vsub.f32 1.0, %v3029_v55  ;;  %v7786_v27 = vld [vmem:[#allocation38_spill] sm:$0xff] }
 0x9ad   : > { %v3033_v13 = vmul.f32 %v6885_v19, %v2873_v45  ;;  %v2840_v18 = vadd.f32 0.2548296, %v2808_v24  ;;  %v2810_v57 = vmul.f32 %v6838_v51, %v2778_v44  ;;  %vm3096_vm12 = vcmp.lt.f32.partialorder %v7785_v39, 0.0  ;;  %v7787_v24 = vld [vmem:[#allocation45_spill] sm:$0xff] }
 0x9ae   : > { %v3063_v46 = vsub.f32 1.0, %v3031_v11  ;;  %v2875_v37 = vmul.f32 %v6890_v38, %v2843_v4  ;;  %v2813_v23 = vmul.f32 %v6938_v49, %v2781_v7  ;;  %v2719_v31 = vadd.f32 1.4214138, %v2687_v25  ;;  %v7788_v25 = vld [vmem:[#allocation54_spill] sm:$0xff] }
 0x9af   : > { %v3125_v9 = vsub.f32 0.0, %v3061_v16  ;;  %v3065_v48 = vsub.f32 1.0, %v3033_v13  ;;  %v2872_v10 = vmul.f32 %v6835_v47, %v2840_v18  ;;  %v2842_v50 = vadd.f32 0.2548296, %v2810_v57  ;;  %v7201_v47 = vpop.eup %4971 }
 0x9b0   : > { %vm3098_vm13 = vcmp.lt.f32.partialorder %v7786_v27, 0.0  ;;  %v3127_v19 = vsub.f32 0.0, %v3063_v46  ;;  %v3035_v53 = vmul.f32 %v6898_v2, %v2875_v37  ;;  %v2845_v55 = vadd.f32 0.2548296, %v2813_v23  ;;  %7789 = vst [vmem:[#allocation40_spill] sm:$0xff] %v7201_v47 }
 0x9b1   : > { %v2751_v45 = vmul.f32 %v6949_v56, %v2719_v31  ;;  %vm3101_vm14 = vcmp.lt.f32.partialorder %v7787_v24, 0.0  ;;  %v3157_v38 = vsel %vm3093_vm8, %v3125_v9, %v3061_v16  ;;  %v3129_v44 = vsub.f32 0.0, %v3065_v48  ;;  %v7790_v16 = vld [vmem:[#allocation56_spill] sm:$0xff]  ;;  %v7791_v31 = vld [vmem:[#allocation37_spill] sm:$0xff] }
 0x9b2   : > { %v3032_v11 = vmul.f32 %v7788_v25, %v2872_v10  ;;  %v2874_v4 = vmul.f32 %v6838_v51, %v2842_v50  ;;  %v3189_v7 = vadd.f32 1.0, %v3157_v38  ;;  %v3159_v13 = vsel %vm3095_vm9, %v3127_v19, %v3063_v46  ;;  %v7792_v50 = vld [vmem:[#allocation70_spill] sm:$0xff]  ;;  %v7793_v38 = vld [vmem:[#allocation39_spill] sm:$0xff] }
 0x9b3   : > { %v3067_v2 = vsub.f32 1.0, %v3035_v53  ;;  %v2877_v18 = vmul.f32 %v6938_v49, %v2845_v55  ;;  %v3191_v57 = vadd.f32 1.0, %v3159_v13  ;;  %v3161_v37 = vsel %vm3097_vm10, %v3129_v44, %v3065_v48  ;;  %v7794_v49 = vld [vmem:[#allocation47_spill] sm:$0xff]  ;;  %v7795_v55 = vld [vmem:[#allocation62_spill] sm:$0xff] }
 0x9b4   : > { %v3064_v54 = vsub.f32 1.0, %v3032_v11  ;;  %v3034_v23 = vmul.f32 %v7790_v16, %v2874_v4  ;;  %v3221_v9 = vmul.f32 %v3189_v7, %v7791_v31  ;;  %v3193_v10 = vadd.f32 1.0, %v3161_v37  ;;  %v7797_v37 = vld [vmem:[#allocation49_spill] sm:$0xff] }
 0x9b5   : > { %v3131_v51 = vsub.f32 0.0, %v3067_v2  ;;  %v3037_v25 = vmul.f32 %v7792_v50, %v2877_v18  ;;  %v3223_v47 = vmul.f32 %v3191_v57, %v7793_v38  ;;  %v2783_v19 = vadd.f32 -0.28449672, %v2751_v45  ;;  %v7800_v38 = vld [vmem:[#allocation46_spill] sm:$0xff] }
 0x9b6   : > { %v3128_v17 = vsub.f32 0.0, %v3064_v54  ;;  %v3066_v46 = vsub.f32 1.0, %v3034_v23  ;;  %3387 = vmatprep.mubr.f32.mxu0 %v3221_v9  ;;  %v3225_v53 = vmul.f32 %v3193_v10, %v7794_v49  ;;  %v2620_v44 = vmul.f32 1.0614054, %v7795_v55  ;;  %v7799_v23 = vld [vmem:[#allocation44_spill] sm:$0xff] }
 0x9b7   : > { %v3163_v6 = vsel %vm3099_vm11, %v3131_v51, %v3067_v2  ;;  %v3069_v48 = vsub.f32 1.0, %v3037_v25  ;;  %3492 = vmatprep.mubr.f32.mxu1 %v3223_v47  ;;  %3388 = vmatmul.mubr.f32.vlgmr.msra.gmra.mrb[16].mxu0 %v6952_v42  ;;  %v2815_v13 = vmul.f32 %v6949_v56, %v2783_v19  ;;  %v7796_v2 = vld [vmem:[#allocation66_spill] sm:$0xff]  ;;  %v2625_v39 = vmul.f32 1.0614054, %v6997_v60 }
 0x9b8   : > { %v3195_v11 = vadd.f32 1.0, %v3163_v6  ;;  %v3160_v4 = vsel %vm3096_vm12, %v3128_v17, %v3064_v54  ;;  %v3130_v7 = vsub.f32 0.0, %v3066_v46  ;;  %3493 = vmatmul.mubr.f32.vlgmr.msra.gmra.mrb[16].mxu1 %v6965_v41  ;;  %3392 = vmatprep.mubr.f32.mxu0 %v3225_v53  ;;  %v2652_v12 = vadd.f32 -1.4531521, %v2620_v44  ;;  %v7798_v54 = vld [vmem:[#allocation48_spill] sm:$0xff]  ;;  %v7801_v53 = vld [vmem:[#allocation55_spill] sm:$0xff] }
 0x9b9   : > { %v3192_v45 = vadd.f32 1.0, %v3160_v4  ;;  %v3133_v18 = vsub.f32 0.0, %v3069_v48  ;;  %v2622_v57 = vmul.f32 1.0614054, %v7796_v2  ;;  %v2847_v47 = vadd.f32 0.2548296, %v2815_v13 }
 0x9ba   : > { %v3227_v16 = vmul.f32 %v3195_v11, %v7797_v37  ;;  %v3162_v42 = vsel %vm3098_vm13, %v3130_v7, %v3066_v46  ;;  %vm3103_vm15 = vcmp.lt.f32.partialorder %v7798_v54, 0.0  ;;  %v2684_v10 = vmul.f32 %v7795_v55, %v2652_v12  ;;  %v7803_v54 = vld [vmem:[#allocation58_spill] sm:$0xff] }
 0x9bb   : > { %v3224_v31 = vmul.f32 %v3192_v45, %v7799_v23  ;;  %v3194_v9 = vadd.f32 1.0, %v3162_v42  ;;  %v3165_v41 = vsel %vm3101_vm14, %v3133_v18, %v3069_v48  ;;  %v2879_v50 = vmul.f32 %v6949_v56, %v2847_v47 }
 0x9bc   : > { %3497 = vmatprep.mubr.f32.mxu1 %v3227_v16  ;;  %v3197_v51 = vadd.f32 1.0, %v3165_v41  ;;  %v2654_v25 = vadd.f32 -1.4531521, %v2622_v57  ;;  %v2657_v27 = vadd.f32 -1.4531521, %v2625_v39 }
 0x9bd   : > { %3393 = vmatmul.mubr.f32.gmra.mrb[18].mxu0 %v3224_v31  ;;  %v3226_v17 = vmul.f32 %v3194_v9, %v7800_v38  ;;  %v2716_v46 = vadd.f32 1.4214138, %v2684_v10  ;;  %v2627_v19 = vmul.f32 1.0614054, %v7012_v35  ;;  %v2624_v49 = vmul.f32 1.0614054, %v6968_v20 }
 0x9be   : > { %v3229_v6 = vmul.f32 %v3197_v51, %v7801_v53  ;;  %v3039_v24 = vmul.f32 %v6962_v52, %v2879_v50  ;;  %v2686_v48 = vmul.f32 %v7796_v2, %v2654_v25  ;;  %v2689_v44 = vmul.f32 %v6997_v60, %v2657_v27 }
 0x9bf   : > { %3498 = vmatmul.mubr.f32.gmra.mrb[18].mxu1 %v3226_v17  ;;  %v2748_v56 = vmul.f32 %v7795_v55, %v2716_v46  ;;  %v2659_v11 = vadd.f32 -1.4531521, %v2627_v19  ;;  %v2656_v4 = vadd.f32 -1.4531521, %v2624_v49  ;;  %v2626_v7 = vmul.f32 1.0614054, %v6985_v58 }
 0x9c0   : > { %3397 = vmatprep.mubr.f32.mxu0 %v3229_v6  ;;  %v3071_v13 = vsub.f32 1.0, %v3039_v24  ;;  %v2718_v45 = vadd.f32 1.4214138, %v2686_v48  ;;  %v2721_v18 = vadd.f32 1.4214138, %v2689_v44  ;;  %v7802_v46 = vld [vmem:[#allocation42_spill] sm:$0xff] }
 0x9c1   : > { %v2780_v12 = vadd.f32 -0.28449672, %v2748_v56  ;;  %v2691_v52 = vmul.f32 %v7012_v35, %v2659_v11  ;;  %v2688_v57 = vmul.f32 %v6968_v20, %v2656_v4  ;;  %v2658_v37 = vadd.f32 -1.4531521, %v2626_v7 }
 0x9c2   : > { %v3135_v16 = vsub.f32 0.0, %v3071_v13  ;;  %v2750_v42 = vmul.f32 %v7796_v2, %v2718_v45  ;;  %v2753_v47 = vmul.f32 %v6997_v60, %v2721_v18  ;;  %v2629_v39 = vmul.f32 1.0614054, %v7056_v33  ;;  %v7804_v45 = vld [vmem:[#allocation43_spill] sm:$0xff]  ;;  %v7805_v18 = vld [vmem:[#allocation57_spill] sm:$0xff] }
 0x9c3   : > { %v2812_v23 = vmul.f32 %v7795_v55, %v2780_v12  ;;  %v2723_v62 = vadd.f32 1.4214138, %v2691_v52  ;;  %v2720_v31 = vadd.f32 1.4214138, %v2688_v57  ;;  %v2690_v9 = vmul.f32 %v6985_v58, %v2658_v37  ;;  %v7806_v12 = vld [vmem:[#allocation64_spill] sm:$0xff] }
 0x9c4   : > { %v3167_v41 = vsel %vm3103_vm15, %v3135_v16, %v3071_v13  ;;  %v2782_v10 = vadd.f32 -0.28449672, %v2750_v42  ;;  %v2785_v51 = vadd.f32 -0.28449672, %v2753_v47  ;;  %v2661_v50 = vadd.f32 -1.4531521, %v2629_v39  ;;  %v7266_v16 = vpop.eup %4973 }
 0x9c5   : > { %v3199_v25 = vadd.f32 1.0, %v3167_v41  ;;  %v2844_v27 = vadd.f32 0.2548296, %v2812_v23  ;;  %v2755_v38 = vmul.f32 %v7012_v35, %v2723_v62  ;;  %v2752_v17 = vmul.f32 %v6968_v20, %v2720_v31 }
 0x9c6   : > { %vm3100_vm0 = vcmp.lt.f32.partialorder %v7802_v46, 0.0  ;;  %v2814_v19 = vmul.f32 %v7796_v2, %v2782_v10  ;;  %v2817_v49 = vmul.f32 %v6997_v60, %v2785_v51  ;;  %v2722_v53 = vadd.f32 1.4214138, %v2690_v9  ;;  %v7807_v10 = vld [vmem:[#allocation51_spill] sm:$0xff] }
 0x9c7   : > { %v2693_v6 = vmul.f32 %v7056_v33, %v2661_v50  ;;  %v3231_v24 = vmul.f32 %v3199_v25, %v7803_v54  ;;  %v2876_v48 = vmul.f32 %v7795_v55, %v2844_v27  ;;  %v2787_v44 = vadd.f32 -0.28449672, %v2755_v38  ;;  %v7808_v51 = vld [vmem:[#allocation59_spill] sm:$0xff] }
 0x9c8   : > { %v2784_v56 = vadd.f32 -0.28449672, %v2752_v17  ;;  %v2846_v11 = vadd.f32 0.2548296, %v2814_v19  ;;  %v2849_v4 = vadd.f32 0.2548296, %v2817_v49  ;;  %v2754_v7 = vmul.f32 %v6985_v58, %v2722_v53 }
 0x9c9   : > { %v2725_v13 = vadd.f32 1.4214138, %v2693_v6  ;;  %vm3102_vm1 = vcmp.lt.f32.partialorder %v7804_v45, 0.0  ;;  %vm3105_vm2 = vcmp.lt.f32.partialorder %v7805_v18, 0.0  ;;  %3502 = vmatprep.mubr.f32.mxu1 %v3231_v24  ;;  %v3036_v52 = vmul.f32 %v7806_v12, %v2876_v48  ;;  %v7809_v50 = vld [vmem:[#allocation67_spill] sm:$0xff]  ;;  %v7810_v24 = vld [vmem:[#allocation53_spill] sm:$0xff] }
 0x9ca   : > { %v2819_v57 = vmul.f32 %v7012_v35, %v2787_v44  ;;  %v2816_v37 = vmul.f32 %v6968_v20, %v2784_v56  ;;  %v2631_v55 = vmul.f32 1.0614054, %v7069_v29  ;;  %v2878_v42 = vmul.f32 %v7796_v2, %v2846_v11 }
 0x9cb   : > { %v2881_v47 = vmul.f32 %v6997_v60, %v2849_v4  ;;  %v2786_v39 = vadd.f32 -0.28449672, %v2754_v7  ;;  %v2757_v23 = vmul.f32 %v7056_v33, %v2725_v13  ;;  %v7272_v62 = vadd.f32 1.0, %v7136_v61 }
 0x9cc   : > { %v3068_v31 = vsub.f32 1.0, %v3036_v52  ;;  %v2851_v9 = vadd.f32 0.2548296, %v2819_v57  ;;  %v2848_v41 = vadd.f32 0.2548296, %v2816_v37  ;;  %vm3104_vm3 = vcmp.lt.f32.partialorder %v7807_v10, 0.0 }
 0x9cd   : > { %vm3107_vm4 = vcmp.lt.f32.partialorder %v7808_v51, 0.0  ;;  %v3038_v25 = vmul.f32 %v7809_v50, %v2878_v42  ;;  %v3041_v27 = vmul.f32 %v7003_v28, %v2881_v47  ;;  %v2818_v2 = vmul.f32 %v6985_v58, %v2786_v39  ;;  %v7811_v57 = vld [vmem:[#allocation50_spill] sm:$0xff]  ;;  %v7814_v51 = vld [vmem:[#allocation61_spill] sm:$0xff] }
 0x9ce   : > { %v2789_v60 = vadd.f32 -0.28449672, %v2757_v23  ;;  %v3132_v38 = vsub.f32 0.0, %v3068_v31  ;;  %v2883_v17 = vmul.f32 %v7012_v35, %v2851_v9  ;;  %v2880_v61 = vmul.f32 %v6968_v20, %v2848_v41  ;;  %v7813_v41 = vld [vmem:[#allocation52_spill] sm:$0xff] }
 0x9cf   : > { %v2663_v19 = vadd.f32 -1.4531521, %v2631_v55  ;;  %v3070_v49 = vsub.f32 1.0, %v3038_v25  ;;  %v3073_v53 = vsub.f32 1.0, %v3041_v27  ;;  %v2850_v6 = vadd.f32 0.2548296, %v2818_v2 }
 0x9d0   : > { %v2821_v54 = vmul.f32 %v7056_v33, %v2789_v60  ;;  %vm3106_vm5 = vcmp.lt.f32.partialorder %v7810_v24, 0.0  ;;  %v3164_v48 = vsel %vm3100_vm0, %v3132_v38, %v3068_v31  ;;  %v3043_v28 = vmul.f32 %v7020_v3, %v2883_v17  ;;  %v7812_v55 = vld [vmem:[#allocation65_spill] sm:$0xff] }
 0x9d1   : > { %v3040_v44 = vmul.f32 %v6980_v63, %v2880_v61  ;;  %v2695_v56 = vmul.f32 %v7069_v29, %v2663_v19  ;;  %v3196_v35 = vadd.f32 1.0, %v3164_v48  ;;  %v3134_v11 = vsub.f32 0.0, %v3070_v49 }
 0x9d2   : > { %v3137_v20 = vsub.f32 0.0, %v3073_v53  ;;  %v2882_v4 = vmul.f32 %v6985_v58, %v2850_v6  ;;  %v3075_v7 = vsub.f32 1.0, %v3043_v28  ;;  %v2853_v12 = vadd.f32 0.2548296, %v2821_v54  ;;  %v7815_v28 = vld [vmem:[#allocation72_spill] sm:$0xff] }
 0x9d3   : > { %v3072_v13 = vsub.f32 1.0, %v3040_v44  ;;  %v2727_v52 = vadd.f32 1.4214138, %v2695_v56  ;;  %v3228_v37 = vmul.f32 %v3196_v35, %v7811_v57  ;;  %v3166_v46 = vsel %vm3102_vm1, %v3134_v11, %v3070_v49  ;;  %v7816_v11 = vld [vmem:[#allocation68_spill] sm:$0xff] }
 0x9d4   : > { %v3169_v3 = vsel %vm3105_vm2, %v3137_v20, %v3073_v53  ;;  %v3042_v63 = vmul.f32 %v6990_v1, %v2882_v4  ;;  %vm3109_vm6 = vcmp.lt.f32.partialorder %v7812_v55, 0.0  ;;  %v3198_v42 = vadd.f32 1.0, %v3166_v46 }
 0x9d5   : > { %v3201_v47 = vadd.f32 1.0, %v3169_v3  ;;  %v3139_v39 = vsub.f32 0.0, %v3075_v7  ;;  %v3136_v58 = vsub.f32 0.0, %v3072_v13  ;;  %3398 = vmatmul.mubr.f32.gmra.mrb[20].mxu0 %v3228_v37  ;;  %v2885_v31 = vmul.f32 %v7056_v33, %v2853_v12 }
 0x9d6   : > { %v3074_v23 = vsub.f32 1.0, %v3042_v63  ;;  %v2759_v9 = vmul.f32 %v7069_v29, %v2727_v52  ;;  %v2628_v45 = vmul.f32 1.0614054, %v7026_v30  ;;  %v3230_v50 = vmul.f32 %v3198_v42, %v7813_v41 }
 0x9d7   : > { %v3233_v18 = vmul.f32 %v3201_v47, %v6971_v36  ;;  %v3171_v1 = vsel %vm3107_vm4, %v3139_v39, %v3075_v7  ;;  %v3168_v25 = vsel %vm3104_vm3, %v3136_v58, %v3072_v13  ;;  %v3045_v38 = vmul.f32 %v7062_v34, %v2885_v31 }
 0x9d8   : > { %v3203_v27 = vadd.f32 1.0, %v3171_v1  ;;  %v3200_v2 = vadd.f32 1.0, %v3168_v25  ;;  %v3138_v60 = vsub.f32 0.0, %v3074_v23  ;;  %3503 = vmatmul.mubr.f32.gmra.mrb[20].mxu1 %v3230_v50  ;;  %v2791_v33 = vadd.f32 -0.28449672, %v2759_v9  ;;  %v7332_v9 = vpop.eup %4975 }
 0x9d9   : > { %3402 = vmatprep.mubr.f32.mxu0 %v3233_v18  ;;  %v2660_v17 = vadd.f32 -1.4531521, %v2628_v45  ;;  %v2630_v61 = vmul.f32 1.0614054, %v7041_v5  ;;  %v3077_v49 = vsub.f32 1.0, %v3045_v38  ;;  %4977 = vrcp.f32 %v7272_v62 }
 0x9da   : > { %v3235_v36 = vmul.f32 %v3203_v27, %v6983_v14  ;;  %v3232_v19 = vmul.f32 %v3200_v2, %v7814_v51  ;;  %v3170_v10 = vsel %vm3106_vm5, %v3138_v60, %v3074_v23  ;;  %v2823_v6 = vmul.f32 %v7069_v29, %v2791_v33 }
 0x9db   : > { %v3202_v53 = vadd.f32 1.0, %v3170_v10  ;;  %v2692_v34 = vmul.f32 %v7026_v30, %v2660_v17  ;;  %v2662_v26 = vadd.f32 -1.4531521, %v2630_v61  ;;  %v3141_v54 = vsub.f32 0.0, %v3077_v49  ;;  %v7817_v17 = vld [vmem:[#allocation60_spill] sm:$0xff] }
 0x9dc   : > { %3507 = vmatprep.mubr.f32.mxu1 %v3235_v36  ;;  %3403 = vmatmul.mubr.f32.gmra.mrb[22].mxu0 %v3232_v19  ;;  %v2633_v48 = vmul.f32 1.0614054, %v7111_v8  ;;  %v2635_v14 = vmul.f32 1.0614054, %v7119_v40  ;;  %v2855_v24 = vadd.f32 0.2548296, %v2823_v6 }
 0x9dd   : > { %v3234_v44 = vmul.f32 %v3202_v53, %v7815_v28  ;;  %v2724_v56 = vadd.f32 1.4214138, %v2692_v34  ;;  %v2694_v35 = vmul.f32 %v7041_v5, %v2662_v26  ;;  %vm3111_vm7 = vcmp.lt.f32.partialorder %v7816_v11, 0.0  ;;  %v7818_v34 = vld [vmem:[#allocation63_spill] sm:$0xff]  ;;  %v7820_v11 = vld [vmem:[#allocation81_spill] sm:$0xff] }
 0x9de   : > { %v3173_v20 = vsel %vm3109_vm6, %v3141_v54, %v3077_v49  ;;  %v2665_v4 = vadd.f32 -1.4531521, %v2633_v48  ;;  %v2667_v62 = vadd.f32 -1.4531521, %v2635_v14  ;;  %v2632_v7 = vmul.f32 1.0614054, %v7083_v59 }
 0x9df   : > { %3508 = vmatmul.mubr.f32.gmra.mrb[22].mxu1 %v3234_v44  ;;  %v3205_v13 = vadd.f32 1.0, %v3173_v20  ;;  %v2887_v12 = vmul.f32 %v7069_v29, %v2855_v24  ;;  %v2756_v52 = vmul.f32 %v7026_v30, %v2724_v56  ;;  %v2726_v57 = vadd.f32 1.4214138, %v2694_v35  ;;  %v7819_v28 = vld [vmem:[#allocation83_spill] sm:$0xff] }
 0x9e0   : > { %v2697_v37 = vmul.f32 %v7111_v8, %v2665_v4  ;;  %v2699_v46 = vmul.f32 %v7119_v40, %v2667_v62  ;;  %v2664_v3 = vadd.f32 -1.4531521, %v2632_v7  ;;  %v2634_v63 = vmul.f32 1.0614054, %v7086_v21  ;;  %v7821_v7 = vld [vmem:[#allocation73_spill] sm:$0xff] }
 0x9e1   : > { %v3237_v55 = vmul.f32 %v3205_v13, %v7023_v22  ;;  %v3047_v42 = vmul.f32 %v7074_v32, %v2887_v12  ;;  %v2788_v47 = vadd.f32 -0.28449672, %v2756_v52  ;;  %v2758_v39 = vmul.f32 %v7041_v5, %v2726_v57  ;;  %v7822_v13 = vld [vmem:[#allocation74_spill] sm:$0xff] }
 0x9e2   : > { %v2729_v58 = vadd.f32 1.4214138, %v2697_v37  ;;  %v2731_v23 = vadd.f32 1.4214138, %v2699_v46  ;;  %v2696_v29 = vmul.f32 %v7083_v59, %v2664_v3  ;;  %v2666_v31 = vadd.f32 -1.4531521, %v2634_v63 }
 0x9e3   : > { %3407 = vmatprep.mubr.f32.mxu0 %v3237_v55  ;;  %v3079_v45 = vsub.f32 1.0, %v3047_v42  ;;  %v2820_v41 = vmul.f32 %v7026_v30, %v2788_v47  ;;  %v2790_v50 = vadd.f32 -0.28449672, %v2758_v39  ;;  %v2637_v18 = vmul.f32 1.0614054, %v7148_v15  ;;  %v7340_v33 = vpop.eup %4977  ;;  %v7823_v52 = vld [vmem:[#allocation86_spill] sm:$0xff] }
 0x9e4   : > { %v2761_v22 = vmul.f32 %v7111_v8, %v2729_v58  ;;  %v2763_v32 = vmul.f32 %v7119_v40, %v2731_v23  ;;  %v2728_v1 = vadd.f32 1.4214138, %v2696_v29  ;;  %v2698_v25 = vmul.f32 %v7086_v21, %v2666_v31  ;;  %v7824_v23 = vld [vmem:[#allocation69_spill] sm:$0xff]  ;;  %v7825_v29 = vld [vmem:[#allocation102_spill] sm:$0xff] }
 0x9e5   : > { %v3143_v27 = vsub.f32 0.0, %v3079_v45  ;;  %v2852_v2 = vadd.f32 0.2548296, %v2820_v41  ;;  %v2822_v60 = vmul.f32 %v7041_v5, %v2790_v50  ;;  %v2669_v38 = vadd.f32 -1.4531521, %v2637_v18 }
 0x9e6   : > { %vm3108_vm8 = vcmp.lt.f32.partialorder %v7817_v17, 0.0  ;;  %v2793_v61 = vadd.f32 -0.28449672, %v2761_v22  ;;  %v2795_v36 = vadd.f32 -0.28449672, %v2763_v32  ;;  %v2760_v51 = vmul.f32 %v7083_v59, %v2728_v1  ;;  %v7827_v1 = vld [vmem:[#allocation71_spill] sm:$0xff] }
 0x9e7   : > { %v2730_v19 = vadd.f32 1.4214138, %v2698_v25  ;;  %v3175_v10 = vsel %vm3111_vm7, %v3143_v27, %v3079_v45  ;;  %v2884_v49 = vmul.f32 %v7026_v30, %v2852_v2  ;;  %v2854_v53 = vadd.f32 0.2548296, %v2822_v60  ;;  %v7826_v45 = vld [vmem:[#allocation103_spill] sm:$0xff] }
 0x9e8   : > { %v2701_v6 = vmul.f32 %v7148_v15, %v2669_v38  ;;  %vm3110_vm9 = vcmp.lt.f32.partialorder %v7818_v34, 0.0  ;;  %v3207_v26 = vadd.f32 1.0, %v3175_v10  ;;  %v2825_v54 = vmul.f32 %v7111_v8, %v2793_v61  ;;  %v7828_v60 = vld [vmem:[#allocation95_spill] sm:$0xff]  ;;  %v7832_v34 = vld [vmem:[#allocation80_spill] sm:$0xff] }
 0x9e9   : > { %v2827_v48 = vmul.f32 %v7119_v40, %v2795_v36  ;;  %v2792_v14 = vadd.f32 -0.28449672, %v2760_v51  ;;  %v3044_v44 = vmul.f32 %v7819_v28, %v2884_v49  ;;  %v2886_v24 = vmul.f32 %v7041_v5, %v2854_v53  ;;  %v7829_v51 = vld [vmem:[#allocation77_spill] sm:$0xff] }
 0x9ea   : > { %v2762_v56 = vmul.f32 %v7086_v21, %v2730_v19  ;;  %v2733_v35 = vadd.f32 1.4214138, %v2701_v6  ;;  %v3239_v30 = vmul.f32 %v3207_v26, %v7820_v11  ;;  %v2857_v20 = vadd.f32 0.2548296, %v2825_v54  ;;  %v7830_v6 = vld [vmem:[#allocation84_spill] sm:$0xff]  ;;  %v7831_v54 = vld [vmem:[#allocation98_spill] sm:$0xff] }
 0x9eb   : > { %v2859_v4 = vadd.f32 0.2548296, %v2827_v48  ;;  %v2824_v62 = vmul.f32 %v7083_v59, %v2792_v14  ;;  %vm3113_vm10 = vcmp.lt.f32.partialorder %v7821_v7, 0.0  ;;  %vm3115_vm11 = vcmp.lt.f32.partialorder %v7822_v13, 0.0 }
 0x9ec   : > { %v3076_v12 = vsub.f32 1.0, %v3044_v44  ;;  %v3046_v57 = vmul.f32 %v7823_v52, %v2886_v24  ;;  %v2794_v37 = vadd.f32 -0.28449672, %v2762_v56  ;;  %v2765_v46 = vmul.f32 %v7148_v15, %v2733_v35  ;;  %3512 = vmatprep.mubr.f32.mxu1 %v3239_v30  ;;  %v7833_v56 = vld [vmem:[#allocation106_spill] sm:$0xff] }
 0x9ed   : > { %v2889_v5 = vmul.f32 %v7111_v8, %v2857_v20  ;;  %v2891_v3 = vmul.f32 %v7119_v40, %v2859_v4  ;;  %v2856_v63 = vadd.f32 0.2548296, %v2824_v62  ;;  %v2639_v55 = vmul.f32 1.0614054, %v7159_v0  ;;  %v7834_v62 = vld [vmem:[#allocation111_spill] sm:$0xff] }
 0x9ee   : > { %v3140_v42 = vsub.f32 0.0, %v3076_v12  ;;  %v3078_v47 = vsub.f32 1.0, %v3046_v57  ;;  %v2826_v39 = vmul.f32 %v7086_v21, %v2794_v37  ;;  %v2797_v58 = vadd.f32 -0.28449672, %v2765_v46  ;;  %v7835_v57 = vld [vmem:[#allocation107_spill] sm:$0xff] }
 0x9ef   : > { %vm3112_vm12 = vcmp.lt.f32.partialorder %v7824_v23, 0.0  ;;  %v3049_v31 = vmul.f32 %v7825_v29, %v2889_v5  ;;  %v3051_v41 = vmul.f32 %v7826_v45, %v2891_v3  ;;  %v2888_v50 = vmul.f32 %v7083_v59, %v2856_v63  ;;  %v7836_v46 = vld [vmem:[#allocation87_spill] sm:$0xff]  ;;  %v7837_v5 = vld [vmem:[#allocation93_spill] sm:$0xff] }
 0x9f0   : > { %v2671_v18 = vadd.f32 -1.4531521, %v2639_v55  ;;  %v3172_v40 = vsel %vm3108_vm8, %v3140_v42, %v3076_v12  ;;  %v3142_v8 = vsub.f32 0.0, %v3078_v47  ;;  %v2858_v22 = vadd.f32 0.2548296, %v2826_v39 }
 0x9f1   : > { %v2829_v32 = vmul.f32 %v7148_v15, %v2797_v58  ;;  %vm3114_vm13 = vcmp.lt.f32.partialorder %v7827_v1, 0.0  ;;  %v3204_v25 = vadd.f32 1.0, %v3172_v40  ;;  %v3081_v27 = vsub.f32 1.0, %v3049_v31 }
 0x9f2   : > { %v3083_v2 = vsub.f32 1.0, %v3051_v41  ;;  %v3048_v38 = vmul.f32 %v7828_v60, %v2888_v50  ;;  %v3174_v61 = vsel %vm3110_vm9, %v3142_v8, %v3078_v47  ;;  %v2890_v59 = vmul.f32 %v7086_v21, %v2858_v22  ;;  %v7838_v41 = vld [vmem:[#allocation82_spill] sm:$0xff] }
 0x9f3   : > { %v2861_v36 = vadd.f32 0.2548296, %v2829_v32  ;;  %v2703_v17 = vmul.f32 %v7159_v0, %v2671_v18  ;;  %v3236_v19 = vmul.f32 %v3204_v25, %v7829_v51  ;;  %v3206_v10 = vadd.f32 1.0, %v3174_v61  ;;  %v7840_v61 = vld [vmem:[#allocation88_spill] sm:$0xff] }
 0x9f4   : > { %v3145_v49 = vsub.f32 0.0, %v3081_v27  ;;  %v3147_v53 = vsub.f32 0.0, %v3083_v2  ;;  %vm3117_vm14 = vcmp.lt.f32.partialorder %v7830_v6, 0.0  ;;  %v3080_v26 = vsub.f32 1.0, %v3048_v38 }
 0x9f5   : > { %v3050_v48 = vmul.f32 %v7831_v54, %v2890_v59  ;;  %v2893_v14 = vmul.f32 %v7148_v15, %v2861_v36  ;;  %v2735_v28 = vadd.f32 1.4214138, %v2703_v17  ;;  %3408 = vmatmul.mubr.f32.gmra.mrb[24].mxu0 %v3236_v19  ;;  %v3238_v44 = vmul.f32 %v3206_v10, %v7832_v34  ;;  %v7843_v34 = vld [vmem:[#allocation35_spill] sm:$0xff] }
 0x9f6   : > { %v3177_v21 = vsel %vm3113_vm10, %v3145_v49, %v3081_v27  ;;  %v3179_v24 = vsel %vm3115_vm11, %v3147_v53, %v3083_v2  ;;  %v2636_v35 = vmul.f32 1.0614054, %v7833_v56  ;;  %v3144_v20 = vsub.f32 0.0, %v3080_v26  ;;  %v7839_v27 = vld [vmem:[#allocation85_spill] sm:$0xff]  ;;  %v7841_v53 = vld [vmem:[#allocation40_spill] sm:$0xff] }
 0x9f7   : > { %v3209_v11 = vadd.f32 1.0, %v3177_v21  ;;  %v3211_v30 = vadd.f32 1.0, %v3179_v24  ;;  %v3082_v4 = vsub.f32 1.0, %v3050_v48  ;;  %3513 = vmatmul.mubr.f32.gmra.mrb[24].mxu1 %v3238_v44  ;;  %v3053_v12 = vmul.f32 %v7834_v62, %v2893_v14 }
 0x9f8   : > { %v2767_v15 = vmul.f32 %v7159_v0, %v2735_v28  ;;  %v2668_v52 = vadd.f32 -1.4531521, %v2636_v35  ;;  %v2638_v37 = vmul.f32 1.0614054, %v7835_v57  ;;  %v3176_v13 = vsel %vm3112_vm12, %v3144_v20, %v3080_v26  ;;  %v7842_v26 = vld [vmem:[#allocation96_spill] sm:$0xff] }
 0x9f9   : > { %v3241_v7 = vmul.f32 %v3209_v11, %v7836_v46  ;;  %v3243_v3 = vmul.f32 %v3211_v30, %v7837_v5  ;;  %v3146_v63 = vsub.f32 0.0, %v3082_v4  ;;  %v3208_v55 = vadd.f32 1.0, %v3176_v13  ;;  %v7844_v11 = vld [vmem:[#allocation110_spill] sm:$0xff] }
 0x9fa   : > { %v3085_v42 = vsub.f32 1.0, %v3053_v12  ;;  %v2799_v47 = vadd.f32 -0.28449672, %v2767_v15  ;;  %v2700_v39 = vmul.f32 %v7833_v56, %v2668_v52  ;;  %v2670_v29 = vadd.f32 -1.4531521, %v2638_v37  ;;  %v7845_v52 = vld [vmem:[#allocation104_spill] sm:$0xff] }
 0x9fb   : > { %3412 = vmatprep.mubr.f32.mxu0 %v3241_v7  ;;  %3517 = vmatprep.mubr.f32.mxu1 %v3243_v3  ;;  %v3178_v58 = vsel %vm3114_vm13, %v3146_v63, %v3082_v4  ;;  %v2641_v31 = vmul.f32 1.0614054, %v7266_v16  ;;  %v2643_v45 = vmul.f32 1.0614054, %v7340_v33  ;;  %v3240_v50 = vmul.f32 %v3208_v55, %v7838_v41  ;;  %v7846_v55 = vld [vmem:[#allocation105_spill] sm:$0xff] }
 0x9fc   : > { %v3210_v23 = vadd.f32 1.0, %v3178_v58  ;;  %v3149_v18 = vsub.f32 0.0, %v3085_v42  ;;  %v2831_v40 = vmul.f32 %v7159_v0, %v2799_v47  ;;  %v2732_v8 = vadd.f32 1.4214138, %v2700_v39 }
 0x9fd   : > { %v2702_v22 = vmul.f32 %v7835_v57, %v2670_v29  ;;  %v2673_v32 = vadd.f32 -1.4531521, %v2641_v31  ;;  %v2675_v25 = vadd.f32 -1.4531521, %v2643_v45  ;;  %3413 = vmatmul.mubr.f32.gmra.mrb[26].mxu0 %v3240_v50  ;;  %v2640_v38 = vmul.f32 1.0614054, %v7187_v43 }
 0x9fe   : > { %v3242_v1 = vmul.f32 %v3210_v23, %v7839_v27  ;;  %v3181_v2 = vsel %vm3117_vm14, %v3149_v18, %v3085_v42  ;;  %v2863_v60 = vadd.f32 0.2548296, %v2831_v40  ;;  %vm3119_vm15 = vcmp.lt.f32.partialorder %v7840_v61, 0.0  ;;  %v7847_v50 = vld [vmem:[#allocation108_spill] sm:$0xff] }
 0x9ff   : > { %v3213_v59 = vadd.f32 1.0, %v3181_v2  ;;  %v2764_v36 = vmul.f32 %v7833_v56, %v2732_v8  ;;  %v2734_v17 = vadd.f32 1.4214138, %v2702_v22  ;;  %v2705_v51 = vmul.f32 %v7266_v16, %v2673_v32  ;;  %v7848_v32 = vld [vmem:[#allocation99_spill] sm:$0xff] }
 0xa00   : > { %3518 = vmatmul.mubr.f32.gmra.mrb[26].mxu1 %v3242_v1  ;;  %v2895_v19 = vmul.f32 %v7159_v0, %v2863_v60  ;;  %v2707_v10 = vmul.f32 %v7340_v33, %v2675_v25  ;;  %v2672_v49 = vadd.f32 -1.4531521, %v2640_v38  ;;  %v2642_v6 = vmul.f32 1.0614054, %v7841_v53  ;;  %v7849_v1 = vld [vmem:[#allocation109_spill] sm:$0xff] }
 0xa01   : > { %v3245_v54 = vmul.f32 %v3213_v59, %v7842_v26  ;;  %v2796_v48 = vadd.f32 -0.28449672, %v2764_v36  ;;  %v2766_v14 = vmul.f32 %v7835_v57, %v2734_v17  ;;  %v2737_v28 = vadd.f32 1.4214138, %v2705_v51  ;;  %v7850_v17 = vld [vmem:[#allocation75_spill] sm:$0xff] }
 0xa02   : > { %v3055_v44 = vmul.f32 %v7843_v34, %v2895_v19  ;;  %v2739_v21 = vadd.f32 1.4214138, %v2707_v10  ;;  %v2704_v24 = vmul.f32 %v7187_v43, %v2672_v49  ;;  %v2674_v35 = vadd.f32 -1.4531521, %v2642_v6  ;;  %v7851_v49 = vld [vmem:[#allocation78_spill] sm:$0xff] }
 0xa03   : > { %4979 = vpow2.f32 %v7844_v11  ;;  %3417 = vmatprep.mubr.f32.mxu0 %v3245_v54  ;;  %v2828_v0 = vmul.f32 %v7833_v56, %v2796_v48  ;;  %v2798_v30 = vadd.f32 -0.28449672, %v2766_v14  ;;  %v2769_v20 = vmul.f32 %v7266_v16, %v2737_v28  ;;  %v7852_v48 = vld [vmem:[#allocation79_spill] sm:$0xff]  ;;  %v7853_v11 = vld [vmem:[#allocation76_spill] sm:$0xff] }
 0xa04   : > { %v3087_v4 = vsub.f32 1.0, %v3055_v44  ;;  %v2771_v62 = vmul.f32 %v7340_v33, %v2739_v21  ;;  %v2736_v12 = vadd.f32 1.4214138, %v2704_v24  ;;  %v2706_v15 = vmul.f32 %v7841_v53, %v2674_v35 }
 0xa05   : > { %4981 = vpow2.f32 %v7845_v52  ;;  %v2860_v37 = vadd.f32 0.2548296, %v2828_v0  ;;  %v2830_v46 = vmul.f32 %v7835_v57, %v2798_v30  ;;  %v2801_v7 = vadd.f32 -0.28449672, %v2769_v20  ;;  %v7854_v0 = vld [vmem:[#allocation97_spill] sm:$0xff] }
 0xa06   : > { %v3151_v5 = vsub.f32 0.0, %v3087_v4  ;;  %v2803_v3 = vadd.f32 -0.28449672, %v2771_v62  ;;  %v2768_v13 = vmul.f32 %v7187_v43, %v2736_v12  ;;  %v2738_v63 = vadd.f32 1.4214138, %v2706_v15  ;;  %v7855_v15 = vld [vmem:[#allocation94_spill] sm:$0xff] }
 0xa07   : > { %4983 = vpow2.f32 %v7846_v55  ;;  %v2892_v42 = vmul.f32 %v7833_v56, %v2860_v37  ;;  %v2862_v47 = vadd.f32 0.2548296, %v2830_v46  ;;  %v2833_v39 = vmul.f32 %v7266_v16, %v2801_v7  ;;  %v7856_v37 = vld [vmem:[#allocation101_spill] sm:$0xff]  ;;  %v7858_v55 = vld [vmem:[#allocation100_spill] sm:$0xff] }
 0xa08   : > { %v3183_v58 = vsel %vm3119_vm15, %v3151_v5, %v3087_v4  ;;  %v2835_v29 = vmul.f32 %v7340_v33, %v2803_v3  ;;  %v2800_v31 = vadd.f32 -0.28449672, %v2768_v13  ;;  %v2770_v45 = vmul.f32 %v7841_v53, %v2738_v63  ;;  %v7857_v63 = vld [vmem:[#allocation91_spill] sm:$0xff] }
 0xa09   : > { %v3215_v41 = vadd.f32 1.0, %v3183_v58  ;;  %v3052_v23 = vmul.f32 %v7847_v50, %v2892_v42  ;;  %v2894_v18 = vmul.f32 %v7835_v57, %v2862_v47  ;;  %v2865_v40 = vadd.f32 0.2548296, %v2833_v39 }
 0xa0a   : > { %v2867_v8 = vadd.f32 0.2548296, %v2835_v29  ;;  %v2832_v56 = vmul.f32 %v7187_v43, %v2800_v31  ;;  %v2802_v22 = vadd.f32 -0.28449672, %v2770_v45  ;;  %v2412_v57 = vmul.f32 0.5, %v7850_v17  ;;  %v7859_v31 = vld [vmem:[#allocation89_spill] sm:$0xff] }
 0xa0b   : > { %v3247_v25 = vmul.f32 %v3215_v41, %v7848_v32  ;;  %v3084_v27 = vsub.f32 1.0, %v3052_v23  ;;  %v3054_v2 = vmul.f32 %v7849_v1, %v2894_v18  ;;  %v2897_v60 = vmul.f32 %v7266_v16, %v2865_v40  ;;  %v7860_v18 = vld [vmem:[#allocation92_spill] sm:$0xff] }
 0xa0c   : > { %v2899_v38 = vmul.f32 %v7340_v33, %v2867_v8  ;;  %v2864_v61 = vadd.f32 0.2548296, %v2832_v56  ;;  %v2834_v59 = vmul.f32 %v7841_v53, %v2802_v22  ;;  %vm3116_vm0 = vcmp.lt.f32.partialorder %v7851_v49, 0.0  ;;  %v7861_v56 = vld [vmem:[#allocation90_spill] sm:$0xff]  ;;  %v7863_v49 = vld [vmem:[#allocation27_spill] sm:$0xff] }
 0xa0d   : > { %v4980_v36 = vpop.eup %4979  ;;  %3522 = vmatprep.mubr.f32.mxu1 %v3247_v25  ;;  %v3148_v51 = vsub.f32 0.0, %v3084_v27  ;;  %v3086_v19 = vsub.f32 1.0, %v3054_v2  ;;  %v3057_v10 = vmul.f32 %v7332_v9, %v2897_v60  ;;  %vm3118_vm1 = vcmp.lt.f32.partialorder %v7852_v48, 0.0  ;;  %v7457_v2 = vld [vmem:[%s7862_s25] ss:$0 sm:$0xff] }
 0xa0e   : > { %v3059_v6 = vmul.f32 %v4980_v36, %v2899_v38  ;;  %v2896_v26 = vmul.f32 %v7187_v43, %v2864_v61  ;;  %v2866_v54 = vadd.f32 0.2548296, %v2834_v59  ;;  %v2414_v9 = vmul.f32 0.5, %v7853_v11 }
 0xa0f   : > { %v4982_v16 = vpop.eup %4981  ;;  %v3180_v33 = vsel %vm3116_vm0, %v3148_v51, %v3084_v27  ;;  %v3150_v14 = vsub.f32 0.0, %v3086_v19  ;;  %v3089_v28 = vsub.f32 1.0, %v3057_v10  ;;  %vm3121_vm2 = vcmp.lt.f32.partialorder %v7854_v0, 0.0 }
 0xa10   : > { %v3212_v34 = vadd.f32 1.0, %v3180_v33  ;;  %v3091_v44 = vsub.f32 1.0, %v3059_v6  ;;  %v3056_v21 = vmul.f32 %v4982_v16, %v2896_v26  ;;  %v2898_v24 = vmul.f32 %v7841_v53, %v2866_v54  ;;  %v7864_v33 = vld [vmem:[#allocation28_spill] sm:$0xff] }
 0xa11   : > { %v4984_v35 = vpop.eup %4983  ;;  %v3182_v30 = vsel %vm3118_vm1, %v3150_v14, %v3086_v19  ;;  %v3153_v20 = vsub.f32 0.0, %v3089_v28  ;;  %v2417_v52 = vmul.f32 0.5, %v7855_v15  ;;  %vm3123_vm3 = vcmp.lt.f32.partialorder %v7856_v37, 0.0 }
 0xa12   : > { %v3244_v43 = vmul.f32 %v3212_v34, %v2412_v57  ;;  %v3214_v4 = vadd.f32 1.0, %v3182_v30  ;;  %v3155_v62 = vsub.f32 0.0, %v3091_v44  ;;  %v3088_v12 = vsub.f32 1.0, %v3056_v21 }
 0xa13   : > { %v3185_v46 = vsel %vm3121_vm2, %v3153_v20, %v3089_v28  ;;  %v3058_v7 = vmul.f32 %v4984_v35, %v2898_v24  ;;  %vm3120_vm4 = vcmp.lt.f32.partialorder %v7857_v63, 0.0  ;;  %v2419_v42 = vmul.f32 0.5, %v7858_v55 }
 0xa14   : > { %3418 = vmatmul.mubr.f32.gmra.mrb[28].mxu0 %v3244_v43  ;;  %v3246_v5 = vmul.f32 %v3214_v4, %v2414_v9  ;;  %v3217_v53 = vadd.f32 1.0, %v3185_v46  ;;  %v3187_v3 = vsel %vm3123_vm3, %v3155_v62, %v3091_v44  ;;  %v3152_v13 = vsub.f32 0.0, %v3088_v12  ;;  %v7865_v43 = vld [vmem:[#allocation29_spill] sm:$0xff]  ;;  %v7866_v46 = vld [vmem:[#allocation30_spill] sm:$0xff] }
 0xa15   : > { %v3219_v47 = vadd.f32 1.0, %v3187_v3  ;;  %v3090_v39 = vsub.f32 1.0, %v3058_v7  ;;  %v2416_v45 = vmul.f32 0.5, %v7859_v31  ;;  %vm3122_vm5 = vcmp.lt.f32.partialorder %v7860_v18, 0.0 }
 0xa16   : > { %3523 = vmatmul.mubr.f32.gmra.mrb[28].mxu1 %v3246_v5  ;;  %v3249_v58 = vmul.f32 %v3217_v53, %v2417_v52  ;;  %v3184_v29 = vsel %vm3120_vm4, %v3152_v13, %v3088_v12  ;;  %v2418_v22 = vmul.f32 0.5, %v7861_v56 }
 0xa17   : > { %v3251_v41 = vmul.f32 %v3219_v47, %v2419_v42  ;;  %v3216_v50 = vadd.f32 1.0, %v3184_v29  ;;  %v3154_v23 = vsub.f32 0.0, %v3090_v39 }
 0xa18   : > { %3422 = vmatprep.mubr.f32.mxu0 %v3249_v58 }
 0xa19   : > { %3527 = vmatprep.mubr.f32.mxu1 %v3251_v41  ;;  %v3248_v40 = vmul.f32 %v3216_v50, %v2416_v45  ;;  %v3186_v8 = vsel %vm3122_vm5, %v3154_v23, %v3090_v39  ;;  %v7867_v39 = vld [vmem:[#allocation31_spill] sm:$0xff] }
 0xa1a   : > { %v3218_v32 = vadd.f32 1.0, %v3186_v8  ;;  %v7868_v8 = vld [vmem:[#allocation32_spill] sm:$0xff] }
 0xa1b   : > { %3423 = vmatmul.mubr.f32.gmra.mrb[30].mxu0 %v3248_v40 }
 0xa1c   : > { %v3250_v25 = vmul.f32 %v3218_v32, %v2418_v22 }
 0xa1e   : > { %3528 = vmatmul.mubr.f32.gmra.mrb[30].mxu1 %v3250_v25 }
 0xa8a   : > { %v3972_v27 = vpop.f32.mrb[16].mxu0 }
 0xa8b   : > { %v4028_v1 = vpop.f32.mrb[16].mxu1  ;;  %v3973_v60 = vpop.f32.mrb[17].mxu0 }
 0xa8c   : > { %v3974_v38 = vadd.f32 %v3973_v60, %v3972_v27  ;;  %v4029_v61 = vpop.f32.mrb[17].mxu1 }
 0xa8d   : > { %v4030_v59 = vadd.f32 %v4029_v61, %v4028_v1 }
 0xa8e   : > { %v3390_v36 = vadd.f32 %v3974_v38, %v7457_v2 }
 0xa90   : > { %v3975_v17 = vpop.f32.mrb[18].mxu0  ;;  %v3495_v57 = vadd.f32 %v4030_v59, %v3390_v36  ;;  %v7869_v36 = vld [vmem:[#allocation33_spill] sm:$0xff] }
 0xa91   : > { %v3976_v51 = vpop.f32.mrb[19].mxu0 }
 0xa92   : > { %v4031_v19 = vpop.f32.mrb[18].mxu1  ;;  %v3977_v10 = vadd.f32 %v3976_v51, %v3975_v17  ;;  %v3533_v6 = vadd.f32 %v3495_v57, %v7863_v49 }
 0xa93   : > { %v4032_v26 = vpop.f32.mrb[19].mxu1 }
 0xa94   : > { %v3395_v54 = vadd.f32 %v3977_v10, %v7457_v2  ;;  %v4033_v16 = vadd.f32 %v4032_v26, %v4031_v19  ;;  %3541 = vst [vmem:[%s5541_s22] sm:$0xff] %v3533_v6 }
 0xa96   : > { %v3500_v48 = vadd.f32 %v4033_v16, %v3395_v54  ;;  %v7870_v54 = vld [vmem:[#allocation34_spill] sm:$0xff] }
 0xa98   : > { %v3534_v14 = vadd.f32 %v3500_v48, %v7864_v33 }
 0xa9a   : > { %3542 = vst [vmem:[%s5541_s22 + $0x8] sm:$0xff] %v3534_v14 }
 0xaa8   : > { %v3978_v28 = vpop.f32.mrb[20].mxu0 }
 0xaa9   : > { %v3979_v34 = vpop.f32.mrb[21].mxu0 }
 0xaaa   : > { %v3980_v44 = vadd.f32 %v3979_v34, %v3978_v28 }
 0xaab   : > { %v4034_v21 = vpop.f32.mrb[20].mxu1 }
 0xaac   : > { %v3400_v24 = vadd.f32 %v3980_v44, %v7457_v2  ;;  %v4035_v35 = vpop.f32.mrb[21].mxu1 }
 0xaad   : > { %v4036_v11 = vadd.f32 %v4035_v35, %v4034_v21 }
 0xaaf   : > { %v3981_v9 = vpop.f32.mrb[22].mxu0  ;;  %v3505_v0 = vadd.f32 %v4036_v11, %v3400_v24 }
 0xab0   : > { %v3982_v30 = vpop.f32.mrb[23].mxu0 }
 0xab1   : > { %v3983_v20 = vadd.f32 %v3982_v30, %v3981_v9  ;;  %v3535_v4 = vadd.f32 %v3505_v0, %v7865_v43 }
 0xab2   : > { %v4037_v62 = vpop.f32.mrb[22].mxu1 }
 0xab3   : > { %v3405_v12 = vadd.f32 %v3983_v20, %v7457_v2  ;;  %v4038_v15 = vpop.f32.mrb[23].mxu1  ;;  %3543 = vst [vmem:[%s5541_s22 + $0x10] sm:$0xff] %v3535_v4 }
 0xab4   : > { %v4039_v52 = vadd.f32 %v4038_v15, %v4037_v62 }
 0xab6   : > { %v3510_v37 = vadd.f32 %v4039_v52, %v3405_v12 }
 0xab8   : > { %v3536_v7 = vadd.f32 %v3510_v37, %v7866_v46 }
 0xaba   : > { %3544 = vst [vmem:[%s5541_s22 + $0x18] sm:$0xff] %v3536_v7 }
 0xac8   : > { %v3984_v5 = vpop.f32.mrb[24].mxu0 }
 0xac9   : > { %v3985_v53 = vpop.f32.mrb[25].mxu0 }
 0xaca   : > { %v4040_v3 = vpop.f32.mrb[24].mxu1  ;;  %v3986_v13 = vadd.f32 %v3985_v53, %v3984_v5 }
 0xacb   : > { %v4041_v63 = vpop.f32.mrb[25].mxu1 }
 0xacc   : > { %v3410_v55 = vadd.f32 %v3986_v13, %v7457_v2  ;;  %v4042_v42 = vadd.f32 %v4041_v63, %v4040_v3 }
 0xace   : > { %v3515_v47 = vadd.f32 %v4042_v42, %v3410_v55 }
 0xad0   : > { %v3537_v58 = vadd.f32 %v3515_v47, %v7867_v39  ;;  %v3987_v29 = vpop.f32.mrb[26].mxu0 }
 0xad1   : > { %v3988_v31 = vpop.f32.mrb[27].mxu0 }
 0xad2   : > { %3545 = vst [vmem:[%s5541_s22 + $0x20] sm:$0xff] %v3537_v58  ;;  %v3989_v41 = vadd.f32 %v3988_v31, %v3987_v29 }
 0xad3   : > { %v4043_v45 = vpop.f32.mrb[26].mxu1 }
 0xad4   : > { %v4044_v50 = vpop.f32.mrb[27].mxu1  ;;  %v3415_v23 = vadd.f32 %v3989_v41, %v7457_v2 }
 0xad5   : > { %v4045_v18 = vadd.f32 %v4044_v50, %v4043_v45 }
 0xad7   : > { %v3520_v40 = vadd.f32 %v4045_v18, %v3415_v23 }
 0xad9   : > { %v3538_v56 = vadd.f32 %v3520_v40, %v7868_v8 }
 0xadb   : > { %3546 = vst [vmem:[%s5541_s22 + $0x28] sm:$0xff] %v3538_v56 }
 0xae7   : > { %v3990_v22 = vpop.f32.mrb[28].mxu0 }
 0xae8   : > { %v3991_v32 = vpop.f32.mrb[29].mxu0 }
 0xae9   : > { %v4046_v25 = vpop.f32.mrb[28].mxu1  ;;  %v3992_v27 = vadd.f32 %v3991_v32, %v3990_v22 }
 0xaea   : > { %v4047_v1 = vpop.f32.mrb[29].mxu1 }
 0xaeb   : > { %v3420_v60 = vadd.f32 %v3992_v27, %v7457_v2  ;;  %v4048_v38 = vadd.f32 %v4047_v1, %v4046_v25 }
 0xaed   : > { %v3525_v61 = vadd.f32 %v4048_v38, %v3420_v60 }
 0xaee   : > { %v3993_v59 = vpop.f32.mrb[30].mxu0 }
 0xaef   : > { %v3539_v17 = vadd.f32 %v3525_v61, %v7869_v36  ;;  %v3994_v57 = vpop.f32.mrb[31].mxu0 }
 0xaf0   : > { %v3995_v51 = vadd.f32 %v3994_v57, %v3993_v59 }
 0xaf1   : > { %3547 = vst [vmem:[%s5541_s22 + $0x30] sm:$0xff] %v3539_v17  ;;  %v4049_v19 = vpop.f32.mrb[30].mxu1 }
 0xaf2   : > { %v3425_v10 = vadd.f32 %v3995_v51, %v7457_v2  ;;  %v4050_v49 = vpop.f32.mrb[31].mxu1 }
 0xaf3   : > { %v4051_v6 = vadd.f32 %v4050_v49, %v4049_v19 }
 0xaf5   : > { %v3530_v26 = vadd.f32 %v4051_v6, %v3425_v10 }
 0xaf7   : > { %v3540_v16 = vadd.f32 %v3530_v26, %v7870_v54 }
 0xaf9   : > { %3548 = vst [vmem:[%s5541_s22 + $0x38] sm:$0xff] %v3540_v16 }
 0xafa PF: > { %s7871_s17 = sld [smem:[#allocation22_spill]]  ;;  %s3820_s20 = sshll.u32 %s5187_s18, 4 }
 0xafb   : > { %s3562_s28 = sadd.s32 %s3820_s20, %s5490_s10  ;;  %s3565_s16 = sshll.u32 %s5541_s22, 4  ;;  %s7486_s16 = int_to_ptr.vmem [resolvable:$true] %s3565_s16 }
 0xafc   : > { %s3821_s14 = sshll.u32 %s3562_s28, 7  ;;  %s7872_s15 = sld [smem:[#allocation116_spill]] }
 0xafd   : > { %s7495_s23 = scalar_lea.sflag [#allocation8], %s546_s29  ;;  %s5041_s11 = scalar_lea.vmem %s7486_s16, 1024 }
 0xafe   : > { %p5042_p9 = scmp.ne.s32.totalorder %s7486_s16, %s5041_s11  ;;  %s5258_s18 = smov [#allocation11]  }
 0xaff   : > { %s5045_s10 = sshll.u32 %s5258_s18, 4  ;;  %s5046_s10 = int_to_ptr.vmem [resolvable:$false] %s5045_s10 }
 0xb00   : > { %p7874_p10 = scmp.ne.s32.totalorder %s7871_s17, 0  ;;  %s5047_s22 = scalar_lea.vmem %s5046_s10, 2048 }
 0xb01   : > { %p5048_p6 = scmp.lt.s32.totalorder %s7486_s16, %s5046_s10  ;;  %p5049_p8 = scmp.lt.s32.totalorder %s5047_s22, %s5041_s11 }
 0xb02   : > { %s7873_s13 = smov %s7872_s15  ;;  %s7491_s24 = scalar_lea.hbm %s7872_s15, %s3821_s14 }
 0xb03   : > { %p5043_p13 = pnand %p5042_p9, %p7874_p10  ;;  %p5050_p1 = por %p5049_p8, %p5048_p6 }
 0xb05   : > { %p5044_p0 = pneg %p5043_p13 }
 0xb07   : > { %p5051_p3 = pnand %p5050_p1, %p5044_p0 }
 0xb09   : > { %5054 = shalt.err (!%p5051_p3)
}
 0xb0a   : > { %s5055_s29 = scalar_lea.hbm %s7491_s24, 1024  ;;  %s5059_s20 = scalar_lea.hbm %s7873_s13, 4096 }
 0xb0b   : > { %p5056_p11 = scmp.ne.s32.totalorder %s7491_s24, %s5055_s29  ;;  %p5060_p4 = scmp.lt.u32.totalorder %s7491_s24, %s7873_s13 }
 0xb0c   : > { %p5061_p5 = scmp.lt.u32.totalorder %s5059_s20, %s5055_s29  ;;  %p5063_p9 = scmp.lt.u32.totalorder %s5055_s29, %s7491_s24 }
 0xb0d   : > { %p5057_p12 = pnand %p5056_p11, %p7874_p10 }
 0xb0e   : > { %p5062_p7 = por %p5061_p5, %p5060_p4 }
 0xb0f   : > { %p5058_p2 = pneg %p5057_p12 }
 0xb10   : > { %p5064_p13 = por %p5063_p9, %p5062_p7 }
 0xb12   : > { %p5065_p0 = pnand %p5064_p13, %p5058_p2 }
 0xb14   : > { %5068 = shalt.err (!%p5065_p0)
}
 0xb15   : > { %s5259_s19 = smov 128   ;;  %s5260_s26 = smov 8  }
 0xb16   : > { %4560 = dma.vmem_to_hbm [thread:$0]  (%p7874_p10), %s7486_s16, 1024, %s7491_s24, %s7495_s23, %s5259_s19, %s5259_s19, %s5260_s26  }
 0xb17 PF: > { %s7875_s15 = sld [smem:[#allocation20_spill]]  ;;  %s7876_s11 = sld [smem:[#allocation15_spill]] }
 0xb18   : > { %s7877_s18 = sld [smem:[#allocation24_spill]] }
 0xb1d   : > { %p4577_p6 = scmp.ge.s32.totalorder %s7875_s15, 2  ;;  %s3580_s10 = sand.u32 1, %s7876_s11  }
 0xb1e   : > { %p7878_p8 = scmp.ne.s32.totalorder %s7877_s18, 0  ;;  %s3581_s22 = scalar_lea.sflag [#allocation8], %s3580_s10 }
 0xb20   : > { %p4570_p1 = pnand %p4577_p6, %p7878_p8 }
 0xb22   : > { %5162 = dma.done.wait (!%p4570_p1), %s3581_s22, 1024  }
 0xb23   : > { %5164 = vsyncadd (!%p4570_p1), %s3581_s22, 4294966272  ;;  %s29_s22 = sadd.s32 1, %s7875_s15   ;;  %s7879_s21 = sld [smem:[#allocation16_spill]] }
 0xb24   : > { %p26_p3 = scmp.ge.s32.totalorder %s29_s22, 10   ;;  %s7880_s15 = sld [smem:[#allocation26_spill]] }
 0xb25   : > { %s7881_s16 = sld [smem:[#allocation17_spill]]  ;;  %s7882_s17 = sld [smem:[#allocation18_spill]] }
 0xb26   : > { %s7883_s18 = sld [smem:[#allocation19_spill]]  ;;  %s7884_s19 = sld [smem:[#allocation21_spill]] }
 0xb27   : > { %s7885_s20 = sld [smem:[#allocation23_spill]]  ;;  %s7886_s24 = sld [smem:[#allocation25_spill]] }
 0xb28   : > { %s7887_s29 = smov %s5171_s30  ;;  %28 = sbr.rel (!%p26_p3) target bundleno = 14 (0xe), region = 199 }
 0xb29   : > { %s7888_s30 = smov %s7879_s21 }
 0xb2d   : > { %s7889_s21 = smov %s7886_s24 }
 0xb2f   :  { %3586 = vsyncpa [#allocation7], 1 }
 0xb30   :  { %3588 = vsyncpa [#allocation7 + $0x1], 1 }
 0xb31   :  { %3589 = vsyncpa [#allocation10], 1 }
 0xb32   :  { %3590 = vsyncpa [#allocation8], 1 }
 0xb33   :  { %3592 = vsyncpa [#allocation8 + $0x1], 1 }

</bundles_post_ra>
